<compile_context>
chip_gen: v7x
topology: tpu7x:2x2x1
jax: 0.10.0
libtpu: 0.0.40
codegen_flags: <defaults>
</compile_context>

<pallas_src>
import functools

import jax
import jax.numpy as jnp
from jax.experimental import pallas as pl
from jax.experimental.pallas import tpu as pltpu

_EPS = 1e-5
_WPAD = 16   # interior W offset inside the halo scratch; multiple of 16 so the bf16
             # interior fill store stays tile-aligned (bf16 packs 16 sublanes per vreg).


def _conv3x3_bn(src_scr, w_ref, gamma, beta, *, N, H, W, C):
    """3x3 conv (stride 1, halo already sitting in the bf16 scratch) as 9 accumulated
    K=C MXU dots, followed by training-mode batch-norm with single-pass statistics.
    Returns an (N*H*W, Cout) float32 value."""
    M = N * H * W
    acc = None
    for dy in range(3):
        for dx in range(3):
            tap = (src_scr[:, dy:dy + H, _WPAD - 1 + dx:_WPAD - 1 + dx + W, :]
                   .reshape(M, C))                                      # bf16, no cast
            d = jnp.dot(tap, w_ref[3 * dy + dx],
                        preferred_element_type=jnp.float32)             # (M, Cout) f32
            acc = d if acc is None else acc + d

    # BatchNorm (training mode): batch mean + biased variance over all N*H*W rows,
    # computed in one pass (sum & sum-of-squares) in f32.  Single-pass E[x^2]-E[x]^2 is
    # cancellation-prone when |mean| >> std; clamped at 0 and acceptable at the test
    # tolerance (switch to a shifted / two-pass form if tolerances tighten).
    inv_m = 1.0 / M
    s1 = jnp.sum(acc, axis=0, keepdims=True)
    s2 = jnp.sum(acc * acc, axis=0, keepdims=True)
    mean = s1 * inv_m
    var = jnp.maximum(s2 * inv_m - mean * mean, 0.0)
    scale = gamma * jax.lax.rsqrt(var + _EPS)
    shift = beta - mean * scale
    return acc * scale + shift


def _basic_block_kernel(x_ref, w1_ref, w2_ref, bn_ref, o_ref, p_scr, *, N, H, W, C):
    M = N * H * W
    bn = bn_ref[...]                      # (4, C) f32, packed rows [g1, b1, g2, b2]
    g1, b1, g2, b2 = bn[0:1], bn[1:2], bn[2:3], bn[3:4]

    # ---- halo ring only (interior is fully overwritten below; no full-scratch zero) ----
    # Column pairs [WPAD-2, WPAD) and [WPAD+W, WPAD+W+2) cover the left/right halo columns
    # at packed-bf16-pair alignment; rows 0 and H+1 cover the top/bottom halo.
    zcol = jnp.zeros((N, H + 2, 2, C), p_scr.dtype)
    p_scr[:, :, _WPAD - 2:_WPAD, :] = zcol
    p_scr[:, :, _WPAD + W:_WPAD + W + 2, :] = zcol
    zrow = jnp.zeros((N, 1, W, C), p_scr.dtype)
    p_scr[:, 0:1, _WPAD:_WPAD + W, :] = zrow
    p_scr[:, H + 1:H + 2, _WPAD:_WPAD + W, :] = zrow

    # ---- stage 1: y1 = relu(bn1(conv3x3(x))) -------------------------------------------
    # Fill the interior straight from the input ref; single f32->bf16 cast at the store.
    p_scr[:, 1:H + 1, _WPAD:_WPAD + W, :] = x_ref[...].astype(p_scr.dtype)
    y1 = jnp.maximum(_conv3x3_bn(p_scr, w1_ref, g1, b1, N=N, H=H, W=W, C=C), 0.0)

    # ---- stage 2: out = relu(bn2(conv3x3(y1)) + x) --------------------------------------
    # Reuse the SAME scratch (halo ring already zero, Cin == Cout): the intermediate
    # activation never leaves VMEM.  y1 data-depends on every stage-1 tap read, so this
    # overwrite cannot be hoisted above them.
    p_scr[:, 1:H + 1, _WPAD:_WPAD + W, :] = y1.reshape(N, H, W, C).astype(p_scr.dtype)
    y2 = _conv3x3_bn(p_scr, w2_ref, g2, b2, N=N, H=H, W=W, C=C)

    # Residual add: re-read x from its resident VMEM block.  Lane-dense (M, 128) store.
    o_ref[...] = jnp.maximum(y2 + x_ref[...].reshape(M, C), 0.0)


def _whole(shape):
    nd = len(shape)
    return pl.BlockSpec(shape, lambda i, _nd=nd: (0,) * _nd)


@jax.jit
def basic_block_forward_nhwc(x_nhwc, params):
    """Fused BasicBlock forward in NHWC layout. x_nhwc: (N, H, W, C) float32."""
    w1, g1, b1, w2, g2, b2 = params            # w*: (3, 3, Cin, Cout); g*/b*: (C,)
    N, H, W, C = x_nhwc.shape
    P = w1.shape[3]
    assert P == C, "stride=1 / downsample=None path requires inplanes == planes"
    assert C % 128 == 0, "lane-dense layout requires channels to be a multiple of 128"
    assert W % 8 == 0, "aligned interior fill assumes W is a multiple of 8"
    assert _WPAD % 16 == 0, "bf16 scratch interior offset must be a 16-sublane multiple"

    # Per-tap weight layout: (9, Cin, Cout), tap index t = 3*dy + dx; bf16 MXU operands.
    w1f = w1.reshape(9, C, P).astype(jnp.bfloat16)
    w2f = w2.reshape(9, P, P).astype(jnp.bfloat16)
    bn = jnp.stack([g1, b1, g2, b2]).astype(jnp.float32)       # (4, P): one tiny operand

    Wp = W + 2 * _WPAD
    kernel = functools.partial(_basic_block_kernel, N=N, H=H, W=W, C=C)
    out2d = pl.pallas_call(
        kernel,
        out_shape=jax.ShapeDtypeStruct((N * H * W, P), jnp.float32),
        grid=(1,),
        in_specs=[_whole(x_nhwc.shape), _whole(w1f.shape),
                  _whole(w2f.shape), _whole(bn.shape)],
        out_specs=_whole((N * H * W, P)),
        scratch_shapes=[pltpu.VMEM((N, H + 2, Wp, C), jnp.bfloat16)],
        compiler_params=pltpu.CompilerParams(
            dimension_semantics=("arbitrary",),
            vmem_limit_bytes=32 * 1024 * 1024),
    )(x_nhwc, w1f, w2f, bn)
    return out2d.reshape(N, H, W, P)


@jax.jit
def basic_block_forward(x_nchw, params):
    """PyTorch-layout entry point: (N, C, H, W) in, (N, C, H, W) out."""
    x = jnp.transpose(x_nchw, (0, 2, 3, 1))                    # NCHW -> NHWC (boundary only)
    out = basic_block_forward_nhwc(x, params)
    return jnp.transpose(out, (0, 3, 1, 2))                    # NHWC -> NCHW


def reference_forward(x_nchw, params):
    """Pure-JAX f32 reference with identical semantics (for the correctness check)."""
    w1, g1, b1, w2, g2, b2 = params

    def conv(x, w):
        w_oihw = jnp.transpose(w, (3, 2, 0, 1))
        return jax.lax.conv_general_dilated(
            x, w_oihw, window_strides=(1, 1), padding=((1, 1), (1, 1)),
            dimension_numbers=('NCHW', 'OIHW', 'NCHW'),
            precision=jax.lax.Precision.HIGHEST)

    def bn(x, g, b):
        mean = jnp.mean(x, axis=(0, 2, 3), keepdims=True)
        var = jnp.mean((x - mean) ** 2, axis=(0, 2, 3), keepdims=True)
        return (x - mean) * jax.lax.rsqrt(var + _EPS) * g.reshape(1, -1, 1, 1) \
            + b.reshape(1, -1, 1, 1)

    out = jax.nn.relu(bn(conv(x_nchw, w1), g1, b1))
    out = bn(conv(out, w2), g2, b2) + x_nchw
    return jax.nn.relu(out)


if __name__ == "__main__":
    key = jax.random.PRNGKey(0)
    k1, k2, k3, k4, k5, k6, kx = jax.random.split(key, 7)

    # BasicBlock with inplanes == planes (stride=1, downsample=None). C = 128 = one full
    # lane width so every load/store and all BN/ReLU elementwise work is lane-dense.
    N, C, H, W = 2, 128, 16, 16
    P = C

    w1 = 0.1 * jax.random.normal(k1, (3, 3, C, P), jnp.float32)   # conv1 (KH, KW, Cin, Cout)
    w2 = 0.1 * jax.random.normal(k2, (3, 3, P, P), jnp.float32)   # conv2
    g1 = 1.0 + 0.1 * jax.random.normal(k3, (P,), jnp.float32)     # bn1 gamma
    b1 = 0.1 * jax.random.normal(k4, (P,), jnp.float32)           # bn1 beta
    g2 = 1.0 + 0.1 * jax.random.normal(k5, (P,), jnp.float32)     # bn2 gamma
    b2 = 0.1 * jax.random.normal(k6, (P,), jnp.float32)           # bn2 beta
    params = (w1, g1, b1, w2, g2, b2)

    x = jax.random.normal(kx, (N, C, H, W), jnp.float32)

    out = jax.block_until_ready(basic_block_forward(x, params))
    ref = jax.block_until_ready(reference_forward(x, params))

    assert out.shape == (N, P, H, W)
    max_err = float(jnp.max(jnp.abs(out - ref)))
    # bf16 MXU operands / bf16 intermediate activation (f32 accumulate, BN, ReLU) vs. a
    # pure-f32 reference -> loosened tolerance.
    assert jnp.allclose(out, ref, atol=5e-2, rtol=5e-2), f"max abs err {max_err}"

    # TODO(synk): stride>1 / downsample branch not exercised (module defaults:
    #             stride=1, downsample=None).
    print("KERNEL_OK")
</pallas_src>

<mosaic_0001>
module attributes {stable_mosaic.version = 11 : i64} {
  func.func @_basic_block_kernel(%arg0: i32, %arg1: memref<2x16x16x128xf32, #tpu.memory_space<vmem>>, %arg2: memref<9x128x128xbf16, #tpu.memory_space<vmem>>, %arg3: memref<9x128x128xbf16, #tpu.memory_space<vmem>>, %arg4: memref<4x128xf32, #tpu.memory_space<vmem>>, %arg5: memref<512x128xf32, #tpu.memory_space<vmem>>, %arg6: memref<2x18x48x128xbf16, #tpu.memory_space<vmem>>) attributes {dimension_semantics = [#tpu.dimension_semantics<arbitrary>], iteration_bounds = array<i64: 1>, scalar_prefetch = 0 : i64, scratch_operands = 1 : i64, tpu.core_type = #tpu.core_type<tc>, window_params = [{pipeline_mode = #tpu.pipeline_mode<synchronous>, transform_indices = @transform_0, window_bounds = array<i64: 2, 16, 16, 128>}, {pipeline_mode = #tpu.pipeline_mode<synchronous>, transform_indices = @transform_1, window_bounds = array<i64: 9, 128, 128>}, {pipeline_mode = #tpu.pipeline_mode<synchronous>, transform_indices = @transform_2, window_bounds = array<i64: 9, 128, 128>}, {pipeline_mode = #tpu.pipeline_mode<synchronous>, transform_indices = @transform_3, window_bounds = array<i64: 4, 128>}, {pipeline_mode = #tpu.pipeline_mode<synchronous>, transform_indices = @transform_4, window_bounds = array<i64: 512, 128>}]} {
    %c0 = arith.constant 0 : index
    %c0_0 = arith.constant 0 : index
    %0 = vector.load %arg4[%c0, %c0_0] : memref<4x128xf32, #tpu.memory_space<vmem>>, vector<4x128xf32>
    %1 = vector.extract_strided_slice %0 {offsets = [0, 0], sizes = [1, 128], strides = [1, 1]} : vector<4x128xf32> to vector<1x128xf32>
    %2 = vector.extract_strided_slice %0 {offsets = [1, 0], sizes = [1, 128], strides = [1, 1]} : vector<4x128xf32> to vector<1x128xf32>
    %3 = vector.extract_strided_slice %0 {offsets = [2, 0], sizes = [1, 128], strides = [1, 1]} : vector<4x128xf32> to vector<1x128xf32>
    %4 = vector.extract_strided_slice %0 {offsets = [3, 0], sizes = [1, 128], strides = [1, 1]} : vector<4x128xf32> to vector<1x128xf32>
    %cst = arith.constant 0.000000e+00 : bf16
    %5 = vector.broadcast %cst : bf16 to vector<2x18x2x128xbf16>
    %c0_1 = arith.constant 0 : index
    %c0_2 = arith.constant 0 : index
    %c14 = arith.constant 14 : index
    %c0_3 = arith.constant 0 : index
    %6 = vector.load %arg6[%c0_1, %c0_2, %c14, %c0_3] : memref<2x18x48x128xbf16, #tpu.memory_space<vmem>>, vector<2x18x2x128xbf16>
    tpu.vector_store %arg6[%c0_1, %c0_2, %c14, %c0_3], %5 {strides = array<i32>} : memref<2x18x48x128xbf16, #tpu.memory_space<vmem>>, vector<2x18x2x128xbf16>,
    %c0_4 = arith.constant 0 : index
    %c0_5 = arith.constant 0 : index
    %c32 = arith.constant 32 : index
    %c0_6 = arith.constant 0 : index
    %7 = vector.load %arg6[%c0_4, %c0_5, %c32, %c0_6] : memref<2x18x48x128xbf16, #tpu.memory_space<vmem>>, vector<2x18x2x128xbf16>
    tpu.vector_store %arg6[%c0_4, %c0_5, %c32, %c0_6], %5 {strides = array<i32>} : memref<2x18x48x128xbf16, #tpu.memory_space<vmem>>, vector<2x18x2x128xbf16>,
    %cst_7 = arith.constant 0.000000e+00 : bf16
    %8 = vector.broadcast %cst_7 : bf16 to vector<2x1x16x128xbf16>
    %c0_8 = arith.constant 0 : index
    %c0_9 = arith.constant 0 : index
    %c16 = arith.constant 16 : index
    %c0_10 = arith.constant 0 : index
    %9 = vector.load %arg6[%c0_8, %c0_9, %c16, %c0_10] : memref<2x18x48x128xbf16, #tpu.memory_space<vmem>>, vector<2x1x16x128xbf16>
    tpu.vector_store %arg6[%c0_8, %c0_9, %c16, %c0_10], %8 {strides = array<i32>} : memref<2x18x48x128xbf16, #tpu.memory_space<vmem>>, vector<2x1x16x128xbf16>,
    %c0_11 = arith.constant 0 : index
    %c17 = arith.constant 17 : index
    %c16_12 = arith.constant 16 : index
    %c0_13 = arith.constant 0 : index
    %10 = vector.load %arg6[%c0_11, %c17, %c16_12, %c0_13] : memref<2x18x48x128xbf16, #tpu.memory_space<vmem>>, vector<2x1x16x128xbf16>
    tpu.vector_store %arg6[%c0_11, %c17, %c16_12, %c0_13], %8 {strides = array<i32>} : memref<2x18x48x128xbf16, #tpu.memory_space<vmem>>, vector<2x1x16x128xbf16>,
    %c0_14 = arith.constant 0 : index
    %c0_15 = arith.constant 0 : index
    %c0_16 = arith.constant 0 : index
    %c0_17 = arith.constant 0 : index
    %11 = vector.load %arg1[%c0_14, %c0_15, %c0_16, %c0_17] : memref<2x16x16x128xf32, #tpu.memory_space<vmem>>, vector<2x16x16x128xf32>
    %12 = arith.truncf %11 : vector<2x16x16x128xf32> to vector<2x16x16x128xbf16>
    %c0_18 = arith.constant 0 : index
    %c1 = arith.constant 1 : index
    %c16_19 = arith.constant 16 : index
    %c0_20 = arith.constant 0 : index
    %13 = vector.load %arg6[%c0_18, %c1, %c16_19, %c0_20] : memref<2x18x48x128xbf16, #tpu.memory_space<vmem>>, vector<2x16x16x128xbf16>
    tpu.vector_store %arg6[%c0_18, %c1, %c16_19, %c0_20], %12 {strides = array<i32>} : memref<2x18x48x128xbf16, #tpu.memory_space<vmem>>, vector<2x16x16x128xbf16>,
    %c0_21 = arith.constant 0 : index
    %c0_22 = arith.constant 0 : index
    %c15 = arith.constant 15 : index
    %c0_23 = arith.constant 0 : index
    %14 = vector.load %arg6[%c0_21, %c0_22, %c15, %c0_23] : memref<2x18x48x128xbf16, #tpu.memory_space<vmem>>, vector<2x16x16x128xbf16>
    %15 = vector.shape_cast %14 : vector<2x16x16x128xbf16> to vector<512x128xbf16>
    %c0_24 = arith.constant 0 : index
    %c0_25 = arith.constant 0 : index
    %c0_26 = arith.constant 0 : index
    %16 = vector.load %arg2[%c0_24, %c0_25, %c0_26] : memref<9x128x128xbf16, #tpu.memory_space<vmem>>, vector<1x128x128xbf16>
    %17 = vector.shape_cast %16 : vector<1x128x128xbf16> to vector<128x128xbf16>
    %cst_27 = arith.constant dense<0.000000e+00> : vector<512x128xf32>
    %18 = tpu.matmul %15, %17, %cst_27 {dimension_numbers = #tpu.dot_dimension_numbers<[1], [0], [0], [1], [0, 0, 1, 1], [], []>} : vector<512x128xbf16>, vector<128x128xbf16>, vector<512x128xf32> -> vector<512x128xf32>
    %c0_28 = arith.constant 0 : index
    %c0_29 = arith.constant 0 : index
    %c16_30 = arith.constant 16 : index
    %c0_31 = arith.constant 0 : index
    %19 = vector.load %arg6[%c0_28, %c0_29, %c16_30, %c0_31] : memref<2x18x48x128xbf16, #tpu.memory_space<vmem>>, vector<2x16x16x128xbf16>
    %20 = vector.shape_cast %19 : vector<2x16x16x128xbf16> to vector<512x128xbf16>
    %c1_32 = arith.constant 1 : index
    %c0_33 = arith.constant 0 : index
    %c0_34 = arith.constant 0 : index
    %21 = vector.load %arg2[%c1_32, %c0_33, %c0_34] : memref<9x128x128xbf16, #tpu.memory_space<vmem>>, vector<1x128x128xbf16>
    %22 = vector.shape_cast %21 : vector<1x128x128xbf16> to vector<128x128xbf16>
    %cst_35 = arith.constant dense<0.000000e+00> : vector<512x128xf32>
    %23 = tpu.matmul %20, %22, %cst_35 {dimension_numbers = #tpu.dot_dimension_numbers<[1], [0], [0], [1], [0, 0, 1, 1], [], []>} : vector<512x128xbf16>, vector<128x128xbf16>, vector<512x128xf32> -> vector<512x128xf32>
    %24 = arith.addf %18, %23 : vector<512x128xf32>
    %c0_36 = arith.constant 0 : index
    %c0_37 = arith.constant 0 : index
    %c17_38 = arith.constant 17 : index
    %c0_39 = arith.constant 0 : index
    %25 = vector.load %arg6[%c0_36, %c0_37, %c17_38, %c0_39] : memref<2x18x48x128xbf16, #tpu.memory_space<vmem>>, vector<2x16x16x128xbf16>
    %26 = vector.shape_cast %25 : vector<2x16x16x128xbf16> to vector<512x128xbf16>
    %c2 = arith.constant 2 : index
    %c0_40 = arith.constant 0 : index
    %c0_41 = arith.constant 0 : index
    %27 = vector.load %arg2[%c2, %c0_40, %c0_41] : memref<9x128x128xbf16, #tpu.memory_space<vmem>>, vector<1x128x128xbf16>
    %28 = vector.shape_cast %27 : vector<1x128x128xbf16> to vector<128x128xbf16>
    %cst_42 = arith.constant dense<0.000000e+00> : vector<512x128xf32>
    %29 = tpu.matmul %26, %28, %cst_42 {dimension_numbers = #tpu.dot_dimension_numbers<[1], [0], [0], [1], [0, 0, 1, 1], [], []>} : vector<512x128xbf16>, vector<128x128xbf16>, vector<512x128xf32> -> vector<512x128xf32>
    %30 = arith.addf %24, %29 : vector<512x128xf32>
    %c0_43 = arith.constant 0 : index
    %c1_44 = arith.constant 1 : index
    %c15_45 = arith.constant 15 : index
    %c0_46 = arith.constant 0 : index
    %31 = vector.load %arg6[%c0_43, %c1_44, %c15_45, %c0_46] : memref<2x18x48x128xbf16, #tpu.memory_space<vmem>>, vector<2x16x16x128xbf16>
    %32 = vector.shape_cast %31 : vector<2x16x16x128xbf16> to vector<512x128xbf16>
    %c3 = arith.constant 3 : index
    %c0_47 = arith.constant 0 : index
    %c0_48 = arith.constant 0 : index
    %33 = vector.load %arg2[%c3, %c0_47, %c0_48] : memref<9x128x128xbf16, #tpu.memory_space<vmem>>, vector<1x128x128xbf16>
    %34 = vector.shape_cast %33 : vector<1x128x128xbf16> to vector<128x128xbf16>
    %cst_49 = arith.constant dense<0.000000e+00> : vector<512x128xf32>
    %35 = tpu.matmul %32, %34, %cst_49 {dimension_numbers = #tpu.dot_dimension_numbers<[1], [0], [0], [1], [0, 0, 1, 1], [], []>} : vector<512x128xbf16>, vector<128x128xbf16>, vector<512x128xf32> -> vector<512x128xf32>
    %36 = arith.addf %30, %35 : vector<512x128xf32>
    %c0_50 = arith.constant 0 : index
    %c1_51 = arith.constant 1 : index
    %c16_52 = arith.constant 16 : index
    %c0_53 = arith.constant 0 : index
    %37 = vector.load %arg6[%c0_50, %c1_51, %c16_52, %c0_53] : memref<2x18x48x128xbf16, #tpu.memory_space<vmem>>, vector<2x16x16x128xbf16>
    %38 = vector.shape_cast %37 : vector<2x16x16x128xbf16> to vector<512x128xbf16>
    %c4 = arith.constant 4 : index
    %c0_54 = arith.constant 0 : index
    %c0_55 = arith.constant 0 : index
    %39 = vector.load %arg2[%c4, %c0_54, %c0_55] : memref<9x128x128xbf16, #tpu.memory_space<vmem>>, vector<1x128x128xbf16>
    %40 = vector.shape_cast %39 : vector<1x128x128xbf16> to vector<128x128xbf16>
    %cst_56 = arith.constant dense<0.000000e+00> : vector<512x128xf32>
    %41 = tpu.matmul %38, %40, %cst_56 {dimension_numbers = #tpu.dot_dimension_numbers<[1], [0], [0], [1], [0, 0, 1, 1], [], []>} : vector<512x128xbf16>, vector<128x128xbf16>, vector<512x128xf32> -> vector<512x128xf32>
    %42 = arith.addf %36, %41 : vector<512x128xf32>
    %c0_57 = arith.constant 0 : index
    %c1_58 = arith.constant 1 : index
    %c17_59 = arith.constant 17 : index
    %c0_60 = arith.constant 0 : index
    %43 = vector.load %arg6[%c0_57, %c1_58, %c17_59, %c0_60] : memref<2x18x48x128xbf16, #tpu.memory_space<vmem>>, vector<2x16x16x128xbf16>
    %44 = vector.shape_cast %43 : vector<2x16x16x128xbf16> to vector<512x128xbf16>
    %c5 = arith.constant 5 : index
    %c0_61 = arith.constant 0 : index
    %c0_62 = arith.constant 0 : index
    %45 = vector.load %arg2[%c5, %c0_61, %c0_62] : memref<9x128x128xbf16, #tpu.memory_space<vmem>>, vector<1x128x128xbf16>
    %46 = vector.shape_cast %45 : vector<1x128x128xbf16> to vector<128x128xbf16>
    %cst_63 = arith.constant dense<0.000000e+00> : vector<512x128xf32>
    %47 = tpu.matmul %44, %46, %cst_63 {dimension_numbers = #tpu.dot_dimension_numbers<[1], [0], [0], [1], [0, 0, 1, 1], [], []>} : vector<512x128xbf16>, vector<128x128xbf16>, vector<512x128xf32> -> vector<512x128xf32>
    %48 = arith.addf %42, %47 : vector<512x128xf32>
    %c0_64 = arith.constant 0 : index
    %c2_65 = arith.constant 2 : index
    %c15_66 = arith.constant 15 : index
    %c0_67 = arith.constant 0 : index
    %49 = vector.load %arg6[%c0_64, %c2_65, %c15_66, %c0_67] : memref<2x18x48x128xbf16, #tpu.memory_space<vmem>>, vector<2x16x16x128xbf16>
    %50 = vector.shape_cast %49 : vector<2x16x16x128xbf16> to vector<512x128xbf16>
    %c6 = arith.constant 6 : index
    %c0_68 = arith.constant 0 : index
    %c0_69 = arith.constant 0 : index
    %51 = vector.load %arg2[%c6, %c0_68, %c0_69] : memref<9x128x128xbf16, #tpu.memory_space<vmem>>, vector<1x128x128xbf16>
    %52 = vector.shape_cast %51 : vector<1x128x128xbf16> to vector<128x128xbf16>
    %cst_70 = arith.constant dense<0.000000e+00> : vector<512x128xf32>
    %53 = tpu.matmul %50, %52, %cst_70 {dimension_numbers = #tpu.dot_dimension_numbers<[1], [0], [0], [1], [0, 0, 1, 1], [], []>} : vector<512x128xbf16>, vector<128x128xbf16>, vector<512x128xf32> -> vector<512x128xf32>
    %54 = arith.addf %48, %53 : vector<512x128xf32>
    %c0_71 = arith.constant 0 : index
    %c2_72 = arith.constant 2 : index
    %c16_73 = arith.constant 16 : index
    %c0_74 = arith.constant 0 : index
    %55 = vector.load %arg6[%c0_71, %c2_72, %c16_73, %c0_74] : memref<2x18x48x128xbf16, #tpu.memory_space<vmem>>, vector<2x16x16x128xbf16>
    %56 = vector.shape_cast %55 : vector<2x16x16x128xbf16> to vector<512x128xbf16>
    %c7 = arith.constant 7 : index
    %c0_75 = arith.constant 0 : index
    %c0_76 = arith.constant 0 : index
    %57 = vector.load %arg2[%c7, %c0_75, %c0_76] : memref<9x128x128xbf16, #tpu.memory_space<vmem>>, vector<1x128x128xbf16>
    %58 = vector.shape_cast %57 : vector<1x128x128xbf16> to vector<128x128xbf16>
    %cst_77 = arith.constant dense<0.000000e+00> : vector<512x128xf32>
    %59 = tpu.matmul %56, %58, %cst_77 {dimension_numbers = #tpu.dot_dimension_numbers<[1], [0], [0], [1], [0, 0, 1, 1], [], []>} : vector<512x128xbf16>, vector<128x128xbf16>, vector<512x128xf32> -> vector<512x128xf32>
    %60 = arith.addf %54, %59 : vector<512x128xf32>
    %c0_78 = arith.constant 0 : index
    %c2_79 = arith.constant 2 : index
    %c17_80 = arith.constant 17 : index
    %c0_81 = arith.constant 0 : index
    %61 = vector.load %arg6[%c0_78, %c2_79, %c17_80, %c0_81] : memref<2x18x48x128xbf16, #tpu.memory_space<vmem>>, vector<2x16x16x128xbf16>
    %62 = vector.shape_cast %61 : vector<2x16x16x128xbf16> to vector<512x128xbf16>
    %c8 = arith.constant 8 : index
    %c0_82 = arith.constant 0 : index
    %c0_83 = arith.constant 0 : index
    %63 = vector.load %arg2[%c8, %c0_82, %c0_83] : memref<9x128x128xbf16, #tpu.memory_space<vmem>>, vector<1x128x128xbf16>
    %64 = vector.shape_cast %63 : vector<1x128x128xbf16> to vector<128x128xbf16>
    %cst_84 = arith.constant dense<0.000000e+00> : vector<512x128xf32>
    %65 = tpu.matmul %62, %64, %cst_84 {dimension_numbers = #tpu.dot_dimension_numbers<[1], [0], [0], [1], [0, 0, 1, 1], [], []>} : vector<512x128xbf16>, vector<128x128xbf16>, vector<512x128xf32> -> vector<512x128xf32>
    %66 = arith.addf %60, %65 : vector<512x128xf32>
    %cst_85 = arith.constant dense<0.000000e+00> : vector<128xf32>
    %67 = vector.multi_reduction <add>, %66, %cst_85 [0] : vector<512x128xf32> to vector<128xf32>
    %68 = vector.shape_cast %67 : vector<128xf32> to vector<1x128xf32>
    %69 = arith.mulf %66, %66 : vector<512x128xf32>
    %cst_86 = arith.constant dense<0.000000e+00> : vector<128xf32>
    %70 = vector.multi_reduction <add>, %69, %cst_86 [0] : vector<512x128xf32> to vector<128xf32>
    %71 = vector.shape_cast %70 : vector<128xf32> to vector<1x128xf32>
    %cst_87 = arith.constant 0.001953125 : f32
    %72 = vector.broadcast %cst_87 : f32 to vector<1x128xf32>
    %73 = arith.mulf %68, %72 : vector<1x128xf32>
    %cst_88 = arith.constant 0.001953125 : f32
    %74 = vector.broadcast %cst_88 : f32 to vector<1x128xf32>
    %75 = arith.mulf %71, %74 : vector<1x128xf32>
    %76 = arith.mulf %73, %73 : vector<1x128xf32>
    %77 = arith.subf %75, %76 : vector<1x128xf32>
    %cst_89 = arith.constant 0.000000e+00 : f32
    %78 = vector.broadcast %cst_89 : f32 to vector<1x128xf32>
    %79 = arith.maximumf %77, %78 : vector<1x128xf32>
    %cst_90 = arith.constant 9.99999974E-6 : f32
    %80 = vector.broadcast %cst_90 : f32 to vector<1x128xf32>
    %81 = arith.addf %79, %80 : vector<1x128xf32>
    %82 = math.rsqrt %81 : vector<1x128xf32>
    %83 = arith.mulf %1, %82 : vector<1x128xf32>
    %84 = arith.mulf %73, %83 : vector<1x128xf32>
    %85 = arith.subf %2, %84 : vector<1x128xf32>
    %86 = vector.broadcast %83 : vector<1x128xf32> to vector<512x128xf32>
    %87 = arith.mulf %66, %86 : vector<512x128xf32>
    %88 = vector.broadcast %85 : vector<1x128xf32> to vector<512x128xf32>
    %89 = arith.addf %87, %88 : vector<512x128xf32>
    %cst_91 = arith.constant 0.000000e+00 : f32
    %90 = vector.broadcast %cst_91 : f32 to vector<512x128xf32>
    %91 = arith.maximumf %89, %90 : vector<512x128xf32>
    %92 = vector.shape_cast %91 : vector<512x128xf32> to vector<2x16x16x128xf32>
    %93 = arith.truncf %92 : vector<2x16x16x128xf32> to vector<2x16x16x128xbf16>
    %c0_92 = arith.constant 0 : index
    %c1_93 = arith.constant 1 : index
    %c16_94 = arith.constant 16 : index
    %c0_95 = arith.constant 0 : index
    %94 = vector.load %arg6[%c0_92, %c1_93, %c16_94, %c0_95] : memref<2x18x48x128xbf16, #tpu.memory_space<vmem>>, vector<2x16x16x128xbf16>
    tpu.vector_store %arg6[%c0_92, %c1_93, %c16_94, %c0_95], %93 {strides = array<i32>} : memref<2x18x48x128xbf16, #tpu.memory_space<vmem>>, vector<2x16x16x128xbf16>,
    %c0_96 = arith.constant 0 : index
    %c0_97 = arith.constant 0 : index
    %c15_98 = arith.constant 15 : index
    %c0_99 = arith.constant 0 : index
    %95 = vector.load %arg6[%c0_96, %c0_97, %c15_98, %c0_99] : memref<2x18x48x128xbf16, #tpu.memory_space<vmem>>, vector<2x16x16x128xbf16>
    %96 = vector.shape_cast %95 : vector<2x16x16x128xbf16> to vector<512x128xbf16>
    %c0_100 = arith.constant 0 : index
    %c0_101 = arith.constant 0 : index
    %c0_102 = arith.constant 0 : index
    %97 = vector.load %arg3[%c0_100, %c0_101, %c0_102] : memref<9x128x128xbf16, #tpu.memory_space<vmem>>, vector<1x128x128xbf16>
    %98 = vector.shape_cast %97 : vector<1x128x128xbf16> to vector<128x128xbf16>
    %cst_103 = arith.constant dense<0.000000e+00> : vector<512x128xf32>
    %99 = tpu.matmul %96, %98, %cst_103 {dimension_numbers = #tpu.dot_dimension_numbers<[1], [0], [0], [1], [0, 0, 1, 1], [], []>} : vector<512x128xbf16>, vector<128x128xbf16>, vector<512x128xf32> -> vector<512x128xf32>
    %c0_104 = arith.constant 0 : index
    %c0_105 = arith.constant 0 : index
    %c16_106 = arith.constant 16 : index
    %c0_107 = arith.constant 0 : index
    %100 = vector.load %arg6[%c0_104, %c0_105, %c16_106, %c0_107] : memref<2x18x48x128xbf16, #tpu.memory_space<vmem>>, vector<2x16x16x128xbf16>
    %101 = vector.shape_cast %100 : vector<2x16x16x128xbf16> to vector<512x128xbf16>
    %c1_108 = arith.constant 1 : index
    %c0_109 = arith.constant 0 : index
    %c0_110 = arith.constant 0 : index
    %102 = vector.load %arg3[%c1_108, %c0_109, %c0_110] : memref<9x128x128xbf16, #tpu.memory_space<vmem>>, vector<1x128x128xbf16>
    %103 = vector.shape_cast %102 : vector<1x128x128xbf16> to vector<128x128xbf16>
    %cst_111 = arith.constant dense<0.000000e+00> : vector<512x128xf32>
    %104 = tpu.matmul %101, %103, %cst_111 {dimension_numbers = #tpu.dot_dimension_numbers<[1], [0], [0], [1], [0, 0, 1, 1], [], []>} : vector<512x128xbf16>, vector<128x128xbf16>, vector<512x128xf32> -> vector<512x128xf32>
    %105 = arith.addf %99, %104 : vector<512x128xf32>
    %c0_112 = arith.constant 0 : index
    %c0_113 = arith.constant 0 : index
    %c17_114 = arith.constant 17 : index
    %c0_115 = arith.constant 0 : index
    %106 = vector.load %arg6[%c0_112, %c0_113, %c17_114, %c0_115] : memref<2x18x48x128xbf16, #tpu.memory_space<vmem>>, vector<2x16x16x128xbf16>
    %107 = vector.shape_cast %106 : vector<2x16x16x128xbf16> to vector<512x128xbf16>
    %c2_116 = arith.constant 2 : index
    %c0_117 = arith.constant 0 : index
    %c0_118 = arith.constant 0 : index
    %108 = vector.load %arg3[%c2_116, %c0_117, %c0_118] : memref<9x128x128xbf16, #tpu.memory_space<vmem>>, vector<1x128x128xbf16>
    %109 = vector.shape_cast %108 : vector<1x128x128xbf16> to vector<128x128xbf16>
    %cst_119 = arith.constant dense<0.000000e+00> : vector<512x128xf32>
    %110 = tpu.matmul %107, %109, %cst_119 {dimension_numbers = #tpu.dot_dimension_numbers<[1], [0], [0], [1], [0, 0, 1, 1], [], []>} : vector<512x128xbf16>, vector<128x128xbf16>, vector<512x128xf32> -> vector<512x128xf32>
    %111 = arith.addf %105, %110 : vector<512x128xf32>
    %c0_120 = arith.constant 0 : index
    %c1_121 = arith.constant 1 : index
    %c15_122 = arith.constant 15 : index
    %c0_123 = arith.constant 0 : index
    %112 = vector.load %arg6[%c0_120, %c1_121, %c15_122, %c0_123] : memref<2x18x48x128xbf16, #tpu.memory_space<vmem>>, vector<2x16x16x128xbf16>
    %113 = vector.shape_cast %112 : vector<2x16x16x128xbf16> to vector<512x128xbf16>
    %c3_124 = arith.constant 3 : index
    %c0_125 = arith.constant 0 : index
    %c0_126 = arith.constant 0 : index
    %114 = vector.load %arg3[%c3_124, %c0_125, %c0_126] : memref<9x128x128xbf16, #tpu.memory_space<vmem>>, vector<1x128x128xbf16>
    %115 = vector.shape_cast %114 : vector<1x128x128xbf16> to vector<128x128xbf16>
    %cst_127 = arith.constant dense<0.000000e+00> : vector<512x128xf32>
    %116 = tpu.matmul %113, %115, %cst_127 {dimension_numbers = #tpu.dot_dimension_numbers<[1], [0], [0], [1], [0, 0, 1, 1], [], []>} : vector<512x128xbf16>, vector<128x128xbf16>, vector<512x128xf32> -> vector<512x128xf32>
    %117 = arith.addf %111, %116 : vector<512x128xf32>
    %c0_128 = arith.constant 0 : index
    %c1_129 = arith.constant 1 : index
    %c16_130 = arith.constant 16 : index
    %c0_131 = arith.constant 0 : index
    %118 = vector.load %arg6[%c0_128, %c1_129, %c16_130, %c0_131] : memref<2x18x48x128xbf16, #tpu.memory_space<vmem>>, vector<2x16x16x128xbf16>
    %119 = vector.shape_cast %118 : vector<2x16x16x128xbf16> to vector<512x128xbf16>
    %c4_132 = arith.constant 4 : index
    %c0_133 = arith.constant 0 : index
    %c0_134 = arith.constant 0 : index
    %120 = vector.load %arg3[%c4_132, %c0_133, %c0_134] : memref<9x128x128xbf16, #tpu.memory_space<vmem>>, vector<1x128x128xbf16>
    %121 = vector.shape_cast %120 : vector<1x128x128xbf16> to vector<128x128xbf16>
    %cst_135 = arith.constant dense<0.000000e+00> : vector<512x128xf32>
    %122 = tpu.matmul %119, %121, %cst_135 {dimension_numbers = #tpu.dot_dimension_numbers<[1], [0], [0], [1], [0, 0, 1, 1], [], []>} : vector<512x128xbf16>, vector<128x128xbf16>, vector<512x128xf32> -> vector<512x128xf32>
    %123 = arith.addf %117, %122 : vector<512x128xf32>
    %c0_136 = arith.constant 0 : index
    %c1_137 = arith.constant 1 : index
    %c17_138 = arith.constant 17 : index
    %c0_139 = arith.constant 0 : index
    %124 = vector.load %arg6[%c0_136, %c1_137, %c17_138, %c0_139] : memref<2x18x48x128xbf16, #tpu.memory_space<vmem>>, vector<2x16x16x128xbf16>
    %125 = vector.shape_cast %124 : vector<2x16x16x128xbf16> to vector<512x128xbf16>
    %c5_140 = arith.constant 5 : index
    %c0_141 = arith.constant 0 : index
    %c0_142 = arith.constant 0 : index
    %126 = vector.load %arg3[%c5_140, %c0_141, %c0_142] : memref<9x128x128xbf16, #tpu.memory_space<vmem>>, vector<1x128x128xbf16>
    %127 = vector.shape_cast %126 : vector<1x128x128xbf16> to vector<128x128xbf16>
    %cst_143 = arith.constant dense<0.000000e+00> : vector<512x128xf32>
    %128 = tpu.matmul %125, %127, %cst_143 {dimension_numbers = #tpu.dot_dimension_numbers<[1], [0], [0], [1], [0, 0, 1, 1], [], []>} : vector<512x128xbf16>, vector<128x128xbf16>, vector<512x128xf32> -> vector<512x128xf32>
    %129 = arith.addf %123, %128 : vector<512x128xf32>
    %c0_144 = arith.constant 0 : index
    %c2_145 = arith.constant 2 : index
    %c15_146 = arith.constant 15 : index
    %c0_147 = arith.constant 0 : index
    %130 = vector.load %arg6[%c0_144, %c2_145, %c15_146, %c0_147] : memref<2x18x48x128xbf16, #tpu.memory_space<vmem>>, vector<2x16x16x128xbf16>
    %131 = vector.shape_cast %130 : vector<2x16x16x128xbf16> to vector<512x128xbf16>
    %c6_148 = arith.constant 6 : index
    %c0_149 = arith.constant 0 : index
    %c0_150 = arith.constant 0 : index
    %132 = vector.load %arg3[%c6_148, %c0_149, %c0_150] : memref<9x128x128xbf16, #tpu.memory_space<vmem>>, vector<1x128x128xbf16>
    %133 = vector.shape_cast %132 : vector<1x128x128xbf16> to vector<128x128xbf16>
    %cst_151 = arith.constant dense<0.000000e+00> : vector<512x128xf32>
    %134 = tpu.matmul %131, %133, %cst_151 {dimension_numbers = #tpu.dot_dimension_numbers<[1], [0], [0], [1], [0, 0, 1, 1], [], []>} : vector<512x128xbf16>, vector<128x128xbf16>, vector<512x128xf32> -> vector<512x128xf32>
    %135 = arith.addf %129, %134 : vector<512x128xf32>
    %c0_152 = arith.constant 0 : index
    %c2_153 = arith.constant 2 : index
    %c16_154 = arith.constant 16 : index
    %c0_155 = arith.constant 0 : index
    %136 = vector.load %arg6[%c0_152, %c2_153, %c16_154, %c0_155] : memref<2x18x48x128xbf16, #tpu.memory_space<vmem>>, vector<2x16x16x128xbf16>
    %137 = vector.shape_cast %136 : vector<2x16x16x128xbf16> to vector<512x128xbf16>
    %c7_156 = arith.constant 7 : index
    %c0_157 = arith.constant 0 : index
    %c0_158 = arith.constant 0 : index
    %138 = vector.load %arg3[%c7_156, %c0_157, %c0_158] : memref<9x128x128xbf16, #tpu.memory_space<vmem>>, vector<1x128x128xbf16>
    %139 = vector.shape_cast %138 : vector<1x128x128xbf16> to vector<128x128xbf16>
    %cst_159 = arith.constant dense<0.000000e+00> : vector<512x128xf32>
    %140 = tpu.matmul %137, %139, %cst_159 {dimension_numbers = #tpu.dot_dimension_numbers<[1], [0], [0], [1], [0, 0, 1, 1], [], []>} : vector<512x128xbf16>, vector<128x128xbf16>, vector<512x128xf32> -> vector<512x128xf32>
    %141 = arith.addf %135, %140 : vector<512x128xf32>
    %c0_160 = arith.constant 0 : index
    %c2_161 = arith.constant 2 : index
    %c17_162 = arith.constant 17 : index
    %c0_163 = arith.constant 0 : index
    %142 = vector.load %arg6[%c0_160, %c2_161, %c17_162, %c0_163] : memref<2x18x48x128xbf16, #tpu.memory_space<vmem>>, vector<2x16x16x128xbf16>
    %143 = vector.shape_cast %142 : vector<2x16x16x128xbf16> to vector<512x128xbf16>
    %c8_164 = arith.constant 8 : index
    %c0_165 = arith.constant 0 : index
    %c0_166 = arith.constant 0 : index
    %144 = vector.load %arg3[%c8_164, %c0_165, %c0_166] : memref<9x128x128xbf16, #tpu.memory_space<vmem>>, vector<1x128x128xbf16>
    %145 = vector.shape_cast %144 : vector<1x128x128xbf16> to vector<128x128xbf16>
    %cst_167 = arith.constant dense<0.000000e+00> : vector<512x128xf32>
    %146 = tpu.matmul %143, %145, %cst_167 {dimension_numbers = #tpu.dot_dimension_numbers<[1], [0], [0], [1], [0, 0, 1, 1], [], []>} : vector<512x128xbf16>, vector<128x128xbf16>, vector<512x128xf32> -> vector<512x128xf32>
    %147 = arith.addf %141, %146 : vector<512x128xf32>
    %cst_168 = arith.constant dense<0.000000e+00> : vector<128xf32>
    %148 = vector.multi_reduction <add>, %147, %cst_168 [0] : vector<512x128xf32> to vector<128xf32>
    %149 = vector.shape_cast %148 : vector<128xf32> to vector<1x128xf32>
    %150 = arith.mulf %147, %147 : vector<512x128xf32>
    %cst_169 = arith.constant dense<0.000000e+00> : vector<128xf32>
    %151 = vector.multi_reduction <add>, %150, %cst_169 [0] : vector<512x128xf32> to vector<128xf32>
    %152 = vector.shape_cast %151 : vector<128xf32> to vector<1x128xf32>
    %cst_170 = arith.constant 0.001953125 : f32
    %153 = vector.broadcast %cst_170 : f32 to vector<1x128xf32>
    %154 = arith.mulf %149, %153 : vector<1x128xf32>
    %cst_171 = arith.constant 0.001953125 : f32
    %155 = vector.broadcast %cst_171 : f32 to vector<1x128xf32>
    %156 = arith.mulf %152, %155 : vector<1x128xf32>
    %157 = arith.mulf %154, %154 : vector<1x128xf32>
    %158 = arith.subf %156, %157 : vector<1x128xf32>
    %cst_172 = arith.constant 0.000000e+00 : f32
    %159 = vector.broadcast %cst_172 : f32 to vector<1x128xf32>
    %160 = arith.maximumf %158, %159 : vector<1x128xf32>
    %cst_173 = arith.constant 9.99999974E-6 : f32
    %161 = vector.broadcast %cst_173 : f32 to vector<1x128xf32>
    %162 = arith.addf %160, %161 : vector<1x128xf32>
    %163 = math.rsqrt %162 : vector<1x128xf32>
    %164 = arith.mulf %3, %163 : vector<1x128xf32>
    %165 = arith.mulf %154, %164 : vector<1x128xf32>
    %166 = arith.subf %4, %165 : vector<1x128xf32>
    %167 = vector.broadcast %164 : vector<1x128xf32> to vector<512x128xf32>
    %168 = arith.mulf %147, %167 : vector<512x128xf32>
    %169 = vector.broadcast %166 : vector<1x128xf32> to vector<512x128xf32>
    %170 = arith.addf %168, %169 : vector<512x128xf32>
    %c0_174 = arith.constant 0 : index
    %c0_175 = arith.constant 0 : index
    %c0_176 = arith.constant 0 : index
    %c0_177 = arith.constant 0 : index
    %171 = vector.load %arg1[%c0_174, %c0_175, %c0_176, %c0_177] : memref<2x16x16x128xf32, #tpu.memory_space<vmem>>, vector<2x16x16x128xf32>
    %172 = vector.shape_cast %171 : vector<2x16x16x128xf32> to vector<512x128xf32>
    %173 = arith.addf %170, %172 : vector<512x128xf32>
    %cst_178 = arith.constant 0.000000e+00 : f32
    %174 = vector.broadcast %cst_178 : f32 to vector<512x128xf32>
    %175 = arith.maximumf %173, %174 : vector<512x128xf32>
    %c0_179 = arith.constant 0 : index
    %c0_180 = arith.constant 0 : index
    %176 = vector.load %arg5[%c0_179, %c0_180] : memref<512x128xf32, #tpu.memory_space<vmem>>, vector<512x128xf32>
    tpu.vector_store %arg5[%c0_179, %c0_180], %175 {strides = array<i32>} : memref<512x128xf32, #tpu.memory_space<vmem>>, vector<512x128xf32>,
    return
  }
  func.func @transform_0(%arg0: i32) -> (i32, i32, i32, i32) {
    %c0_i32 = arith.constant 0 : i32
    %c0_i32_0 = arith.constant 0 : i32
    %c0_i32_1 = arith.constant 0 : i32
    %c0_i32_2 = arith.constant 0 : i32
    %c0_i32_3 = arith.constant 0 : i32
    return %c0_i32, %c0_i32_0, %c0_i32_1, %c0_i32_2 : i32, i32, i32, i32
  }
  func.func @transform_1(%arg0: i32) -> (i32, i32, i32) {
    %c0_i32 = arith.constant 0 : i32
    %c0_i32_0 = arith.constant 0 : i32
    %c0_i32_1 = arith.constant 0 : i32
    %c0_i32_2 = arith.constant 0 : i32
    return %c0_i32, %c0_i32_0, %c0_i32_1 : i32, i32, i32
  }
  func.func @transform_2(%arg0: i32) -> (i32, i32, i32) {
    %c0_i32 = arith.constant 0 : i32
    %c0_i32_0 = arith.constant 0 : i32
    %c0_i32_1 = arith.constant 0 : i32
    %c0_i32_2 = arith.constant 0 : i32
    return %c0_i32, %c0_i32_0, %c0_i32_1 : i32, i32, i32
  }
  func.func @transform_3(%arg0: i32) -> (i32, i32) {
    %c0_i32 = arith.constant 0 : i32
    %c0_i32_0 = arith.constant 0 : i32
    %c0_i32_1 = arith.constant 0 : i32
    return %c0_i32, %c0_i32_0 : i32, i32
  }
  func.func @transform_4(%arg0: i32) -> (i32, i32) {
    %c0_i32 = arith.constant 0 : i32
    %c0_i32_0 = arith.constant 0 : i32
    %c0_i32_1 = arith.constant 0 : i32
    return %c0_i32, %c0_i32_0 : i32, i32
  }
}

</mosaic_0001>

<bundles_post_ra>
// kernel: basic_block_forward_nhwc.1
= control target key start
LH: loop header
LB: loop body
LE: loop exit
PB: predicated region body
PF: predicated region fallthrough
CT: control target
= control target key end

     0   :  { %v18237_v2 = vmov 0   ;;  %vm290_vm0 = vsmask.f32 256  ;;  %s23639_s0 = inlined_call_operand.vmem [shape: f32[2,16,16,128], index: 0, kind: input, shape index: {}]   ;;  %s23640_s1 = inlined_call_operand.vmem [shape: bf16[9,128,128], index: 1, kind: input, shape index: {}]   ;;  %s23641_s2 = inlined_call_operand.vmem [shape: bf16[9,128,128], index: 2, kind: input, shape index: {}]   ;;  %s23642_s3 = inlined_call_operand.vmem [shape: f32[4,128], index: 3, kind: input, shape index: {}]   ;;  %s23643_s4 = inlined_call_operand.hbm [shape: f32[512,128], index: 4, kind: output, shape index: {}]  }
   0x1   :  { %v18269_v0 = vld [vmem:[%s23640_s1 + $0x40] sm:$0xff]   ;;  %v18274_v1 = vld [vmem:[%s23640_s1 + $0x48] sm:$0xff]   ;;  %92 = vst [vmem:[#allocation2 + $0x8] sm:$0xff] %v18237_v2  ;;  %15493 = vmatprep.mubr.bf16.mxu0 %v18237_v2  ;;  %20 = vst [vmem:[#allocation2] sm:$0x80] %v18237_v2  ;;  %16213 = vmatprep.mubr.bf16.mxu1 %v18237_v2 }
   0x2   :  { %21 = vst [vmem:[#allocation2 + $0x18] sm:$0x80] %v18237_v2  ;;  %22 = vst [vmem:[#allocation2 + $0x30] sm:$0x80] %v18237_v2  ;;  %15477 = vmatprep.subr.bf16.mxu0 %v18269_v0  ;;  %v17947_v3 = vld [vmem:[%s23640_s1 + $0x50] sm:$0xff]   ;;  %v17948_v4 = vld [vmem:[%s23640_s1 + $0x58] sm:$0xff]  }
   0x3   :  { %23 = vst [vmem:[#allocation2 + $0x48] sm:$0x80] %v18237_v2  ;;  %24 = vst [vmem:[#allocation2 + $0x60] sm:$0x80] %v18237_v2  ;;  %15478 = vmatpush3.bf16.msra.mxu0 %v18269_v0  ;;  %v97_v5 = vld [vmem:[%s23639_s0] sm:$0xff]  ;;  %v98_v6 = vld [vmem:[%s23639_s0 + $0x8] sm:$0xff] }
   0x4   :  { %25 = vst [vmem:[#allocation2 + $0x78] sm:$0x80] %v18237_v2  ;;  %26 = vst [vmem:[#allocation2 + $0x90] sm:$0x80] %v18237_v2  ;;  %15479 = vmatprep.subr.bf16.mxu0 %v18274_v1  ;;  %v18367_v7 = vpack.c.bf16 %v98_v6, %v97_v5  ;;  %v99_v8 = vld [vmem:[%s23639_s0 + $0x10] sm:$0xff]  ;;  %v17949_v9 = vld [vmem:[%s23640_s1 + $0x60] sm:$0xff]  }
   0x5   :  { %27 = vst [vmem:[#allocation2 + $0xa8] sm:$0x80] %v18237_v2  ;;  %28 = vst [vmem:[#allocation2 + $0xc0] sm:$0x80] %v18237_v2  ;;  %v100_v10 = vld [vmem:[%s23639_s0 + $0x18] sm:$0xff]  ;;  %v101_v11 = vld [vmem:[%s23639_s0 + $0x20] sm:$0xff] }
   0x6   :  { %29 = vst [vmem:[#allocation2 + $0xd8] sm:$0x80] %v18237_v2  ;;  %30 = vst [vmem:[#allocation2 + $0xf0] sm:$0x80] %v18237_v2  ;;  %v102_v12 = vld [vmem:[%s23639_s0 + $0x28] sm:$0xff]  ;;  %v18385_v13 = vpack.c.bf16 %v100_v10, %v99_v8  ;;  %v103_v15 = vld [vmem:[%s23639_s0 + $0x30] sm:$0xff] }
   0x7   :  { %31 = vst [vmem:[#allocation2 + $0x108] sm:$0x80] %v18237_v2  ;;  %32 = vst [vmem:[#allocation2 + $0x120] sm:$0x80] %v18237_v2  ;;  %15480 = vmatpush3.bf16.msra.mxu0 %v18274_v1  ;;  %v18387_v14 = vpack.c.bf16 %v102_v12, %v101_v11  ;;  %v104_v16 = vld [vmem:[%s23639_s0 + $0x38] sm:$0xff]  ;;  %v105_v17 = vld [vmem:[%s23639_s0 + $0x40] sm:$0xff] }
   0x8   :  { %33 = vst [vmem:[#allocation2 + $0x138] sm:$0x80] %v18237_v2  ;;  %34 = vst [vmem:[#allocation2 + $0x150] sm:$0x80] %v18237_v2  ;;  %15481 = vmatprep.subr.bf16.mxu0 %v17947_v3  ;;  %v18398_v18 = vpack.c.bf16 %v104_v16, %v103_v15  ;;  %v106_v19 = vld [vmem:[%s23639_s0 + $0x48] sm:$0xff]  ;;  %v107_v20 = vld [vmem:[%s23639_s0 + $0x50] sm:$0xff] }
   0x9   :  { %35 = vst [vmem:[#allocation2 + $0x168] sm:$0x80] %v18237_v2  ;;  %36 = vst [vmem:[#allocation2 + $0x180] sm:$0x80] %v18237_v2  ;;  %v18409_v21 = vpack.c.bf16 %v106_v19, %v105_v17  ;;  %v108_v22 = vld [vmem:[%s23639_s0 + $0x58] sm:$0xff]  ;;  %v109_v23 = vld [vmem:[%s23639_s0 + $0x60] sm:$0xff] }
   0xa   :  { %37 = vst [vmem:[#allocation2 + $0x198] sm:$0x80] %v18237_v2  ;;  %38 = vst [vmem:[#allocation2 + $0x1b0] sm:$0x80] %v18237_v2  ;;  %v110_v24 = vld [vmem:[%s23639_s0 + $0x68] sm:$0xff]  ;;  %v18420_v25 = vpack.c.bf16 %v108_v22, %v107_v20  ;;  %v111_v26 = vld [vmem:[%s23639_s0 + $0x70] sm:$0xff] }
   0xb   :  { %39 = vst [vmem:[#allocation2 + $0x1c8] sm:$0x80] %v18237_v2  ;;  %40 = vst [vmem:[#allocation2 + $0x1e0] sm:$0x80] %v18237_v2  ;;  %15482 = vmatpush3.bf16.msra.mxu0 %v17947_v3  ;;  %v112_v27 = vld [vmem:[%s23639_s0 + $0x78] sm:$0xff]  ;;  %v113_v28 = vld [vmem:[%s23639_s0 + $0x80] sm:$0xff]  ;;  %v18435_v30 = vpack.c.bf16 %v110_v24, %v109_v23 }
   0xc   :  { %41 = vst [vmem:[#allocation2 + $0x1f8] sm:$0x80] %v18237_v2  ;;  %42 = vst [vmem:[#allocation2 + $0x210] sm:$0x80] %v18237_v2  ;;  %15483 = vmatprep.subr.bf16.mxu0 %v17948_v4  ;;  %v17950_v29 = vld [vmem:[%s23640_s1 + $0x68] sm:$0xff]   ;;  %v18441_v32 = vpack.c.bf16 %v112_v27, %v111_v26  ;;  %v115_v34 = vld [vmem:[%s23639_s0 + $0x90] sm:$0xff] }
   0xd   :  { %43 = vst [vmem:[#allocation2 + $0x228] sm:$0x80] %v18237_v2  ;;  %44 = vst [vmem:[#allocation2 + $0x240] sm:$0x80] %v18237_v2  ;;  %v114_v31 = vld [vmem:[%s23639_s0 + $0x88] sm:$0xff]  ;;  %v116_v35 = vld [vmem:[%s23639_s0 + $0x98] sm:$0xff] }
   0xe   :  { %45 = vst [vmem:[#allocation2 + $0x258] sm:$0x80] %v18237_v2  ;;  %46 = vst [vmem:[#allocation2 + $0x270] sm:$0x80] %v18237_v2  ;;  %v18443_v33 = vpack.c.bf16 %v114_v31, %v113_v28  ;;  %v117_v36 = vld [vmem:[%s23639_s0 + $0xa0] sm:$0xff]  ;;  %v118_v37 = vld [vmem:[%s23639_s0 + $0xa8] sm:$0xff]  ;;  %v18469_v41 = vpack.c.bf16 %v116_v35, %v115_v34 }
   0xf   :  { %47 = vst [vmem:[#allocation2 + $0x288] sm:$0x80] %v18237_v2  ;;  %48 = vst [vmem:[#allocation2 + $0x2a0] sm:$0x80] %v18237_v2  ;;  %15484 = vmatpush3.bf16.msra.mxu0 %v17948_v4  ;;  %v17951_v38 = vld [vmem:[%s23640_s1 + $0x70] sm:$0xff]   ;;  %v120_v40 = vld [vmem:[%s23639_s0 + $0xb8] sm:$0xff]  ;;  %v18471_v42 = vpack.c.bf16 %v118_v37, %v117_v36 }
  0x10   :  { %49 = vst [vmem:[#allocation2 + $0x2b8] sm:$0x80] %v18237_v2  ;;  %50 = vst [vmem:[#allocation2 + $0x2d0] sm:$0x80] %v18237_v2  ;;  %15485 = vmatprep.subr.bf16.mxu0 %v17949_v9  ;;  %v119_v39 = vld [vmem:[%s23639_s0 + $0xb0] sm:$0xff]  ;;  %v121_v43 = vld [vmem:[%s23639_s0 + $0xc0] sm:$0xff] }
  0x11   :  { %51 = vst [vmem:[#allocation2 + $0x2e8] sm:$0x80] %v18237_v2  ;;  %52 = vst [vmem:[#allocation2 + $0x300] sm:$0x80] %v18237_v2  ;;  %v122_v44 = vld [vmem:[%s23639_s0 + $0xc8] sm:$0xff]  ;;  %v18479_v45 = vpack.c.bf16 %v120_v40, %v119_v39  ;;  %v123_v47 = vld [vmem:[%s23639_s0 + $0xd0] sm:$0xff] }
  0x12   :  { %53 = vst [vmem:[#allocation2 + $0x318] sm:$0x80] %v18237_v2  ;;  %54 = vst [vmem:[#allocation2 + $0x330] sm:$0x80] %v18237_v2  ;;  %v18481_v46 = vpack.c.bf16 %v122_v44, %v121_v43  ;;  %v124_v48 = vld [vmem:[%s23639_s0 + $0xd8] sm:$0xff]  ;;  %v125_v49 = vld [vmem:[%s23639_s0 + $0xe0] sm:$0xff] }
  0x13   :  { %55 = vst [vmem:[#allocation2 + $0x348] sm:$0x80] %v18237_v2  ;;  %56 = vst [vmem:[#allocation2 + $0x10] sm:$0x1] %v18237_v2  ;;  %15486 = vmatpush3.bf16.msra.mxu0 %v17949_v9  ;;  %v126_v50 = vld [vmem:[%s23639_s0 + $0xe8] sm:$0xff]  ;;  %v129_v51 = vld [vmem:[%s23639_s0 + $0x100] sm:$0xff]  ;;  %v18505_v53 = vpack.c.bf16 %v124_v48, %v123_v47 }
  0x14   :  { %57 = vst [vmem:[#allocation2 + $0x28] sm:$0x1] %v18237_v2  ;;  %58 = vst [vmem:[#allocation2 + $0x40] sm:$0x1] %v18237_v2  ;;  %15487 = vmatprep.subr.bf16.mxu0 %v17950_v29  ;;  %v17952_v52 = vld [vmem:[%s23640_s1 + $0x78] sm:$0xff]   ;;  %v18507_v54 = vpack.c.bf16 %v126_v50, %v125_v49  ;;  %v130_v55 = vld [vmem:[%s23639_s0 + $0x108] sm:$0xff] }
  0x15   :  { %59 = vst [vmem:[#allocation2 + $0x58] sm:$0x1] %v18237_v2  ;;  %60 = vst [vmem:[#allocation2 + $0x70] sm:$0x1] %v18237_v2  ;;  %v18512_v56 = vpack.c.bf16 %v130_v55, %v129_v51  ;;  %v131_v57 = vld [vmem:[%s23639_s0 + $0x110] sm:$0xff]  ;;  %v132_v58 = vld [vmem:[%s23639_s0 + $0x118] sm:$0xff] }
  0x16   :  { %61 = vst [vmem:[#allocation2 + $0x88] sm:$0x1] %v18237_v2  ;;  %62 = vst [vmem:[#allocation2 + $0xa0] sm:$0x1] %v18237_v2  ;;  %v133_v59 = vld [vmem:[%s23639_s0 + $0x120] sm:$0xff]  ;;  %v134_v60 = vld [vmem:[%s23639_s0 + $0x128] sm:$0xff]  ;;  %v18529_v61 = vpack.c.bf16 %v132_v58, %v131_v57 }
  0x17   :  { %63 = vst [vmem:[#allocation2 + $0xb8] sm:$0x1] %v18237_v2  ;;  %64 = vst [vmem:[#allocation2 + $0xd0] sm:$0x1] %v18237_v2  ;;  %15488 = vmatpush3.bf16.msra.mxu0 %v17950_v29  ;;  %v18531_v62 = vpack.c.bf16 %v134_v60, %v133_v59  ;;  %v135_v63 = vld [vmem:[%s23639_s0 + $0x130] sm:$0xff]  ;;  %v136_v0 = vld [vmem:[%s23639_s0 + $0x138] sm:$0xff] }
  0x18   :  { %65 = vst [vmem:[#allocation2 + $0xe8] sm:$0x1] %v18237_v2  ;;  %66 = vst [vmem:[#allocation2 + $0x100] sm:$0x1] %v18237_v2  ;;  %15489 = vmatprep.subr.bf16.mxu0 %v17951_v38  ;;  %v137_v1 = vld [vmem:[%s23639_s0 + $0x140] sm:$0xff]  ;;  %v18545_v4 = vpack.c.bf16 %v136_v0, %v135_v63  ;;  %v138_v5 = vld [vmem:[%s23639_s0 + $0x148] sm:$0xff] }
  0x19   :  { %67 = vst [vmem:[#allocation2 + $0x118] sm:$0x1] %v18237_v2  ;;  %68 = vst [vmem:[#allocation2 + $0x130] sm:$0x1] %v18237_v2  ;;  %v17953_v3 = vld [vmem:[%s23640_s1] sm:$0xff]   ;;  %v18553_v6 = vpack.c.bf16 %v138_v5, %v137_v1  ;;  %v139_v8 = vld [vmem:[%s23639_s0 + $0x150] sm:$0xff] }
  0x1a   :  { %69 = vst [vmem:[#allocation2 + $0x148] sm:$0x1] %v18237_v2  ;;  %70 = vst [vmem:[#allocation2 + $0x160] sm:$0x1] %v18237_v2  ;;  %v140_v9 = vld [vmem:[%s23639_s0 + $0x158] sm:$0xff]  ;;  %v141_v10 = vld [vmem:[%s23639_s0 + $0x160] sm:$0xff] }
  0x1b   :  { %71 = vst [vmem:[#allocation2 + $0x178] sm:$0x1] %v18237_v2  ;;  %72 = vst [vmem:[#allocation2 + $0x190] sm:$0x1] %v18237_v2  ;;  %15490 = vmatpush3.bf16.msra.mxu0 %v17951_v38  ;;  %v18564_v11 = vpack.c.bf16 %v140_v9, %v139_v8  ;;  %v142_v12 = vld [vmem:[%s23639_s0 + $0x168] sm:$0xff]  ;;  %v143_v15 = vld [vmem:[%s23639_s0 + $0x170] sm:$0xff] }
  0x1c   :  { %73 = vst [vmem:[#allocation2 + $0x1a8] sm:$0x1] %v18237_v2  ;;  %74 = vst [vmem:[#allocation2 + $0x1c0] sm:$0x1] %v18237_v2  ;;  %15491 = vmatprep.subr.bf16.mxu0 %v17952_v52  ;;  %v144_v16 = vld [vmem:[%s23639_s0 + $0x178] sm:$0xff]  ;;  %v17954_v17 = vld [vmem:[%s23640_s1 + $0x8] sm:$0xff]   ;;  %v18579_v19 = vpack.c.bf16 %v142_v12, %v141_v10 }
  0x1d   :  { %75 = vst [vmem:[#allocation2 + $0x1d8] sm:$0x1] %v18237_v2  ;;  %76 = vst [vmem:[#allocation2 + $0x1f0] sm:$0x1] %v18237_v2  ;;  %v145_v20 = vld [vmem:[%s23639_s0 + $0x180] sm:$0xff]  ;;  %v146_v22 = vld [vmem:[%s23639_s0 + $0x188] sm:$0xff]  ;;  %v18588_v23 = vpack.c.bf16 %v144_v16, %v143_v15 }
  0x1e   :  { %77 = vst [vmem:[#allocation2 + $0x208] sm:$0x1] %v18237_v2  ;;  %78 = vst [vmem:[#allocation2 + $0x220] sm:$0x1] %v18237_v2  ;;  %v18590_v24 = vpack.c.bf16 %v146_v22, %v145_v20  ;;  %v147_v26 = vld [vmem:[%s23639_s0 + $0x190] sm:$0xff]  ;;  %v148_v27 = vld [vmem:[%s23639_s0 + $0x198] sm:$0xff] }
  0x1f   :  { %79 = vst [vmem:[#allocation2 + $0x238] sm:$0x1] %v18237_v2  ;;  %80 = vst [vmem:[#allocation2 + $0x250] sm:$0x1] %v18237_v2  ;;  %15492 = vmatpush3.bf16.msra.mxu0 %v17952_v52  ;;  %v149_v28 = vld [vmem:[%s23639_s0 + $0x1a0] sm:$0xff]  ;;  %v17955_v29 = vld [vmem:[%s23640_s1 + $0x10] sm:$0xff]   ;;  %v186_v35 = vpack.c.bf16 %v148_v27, %v147_v26 }
  0x20   :  { %81 = vst [vmem:[#allocation2 + $0x268] sm:$0x1] %v18237_v2  ;;  %82 = vst [vmem:[#allocation2 + $0x280] sm:$0x1] %v18237_v2  ;;  %15557 = vmatprep.subr.bf16.mxu0 %v17953_v3  ;;  %v150_v31 = vld [vmem:[%s23639_s0 + $0x1a8] sm:$0xff]  ;;  %v151_v34 = vld [vmem:[%s23639_s0 + $0x1b0] sm:$0xff] }
  0x21   :  { %83 = vst [vmem:[#allocation2 + $0x298] sm:$0x1] %v18237_v2  ;;  %84 = vst [vmem:[#allocation2 + $0x2b0] sm:$0x1] %v18237_v2  ;;  %v187_v36 = vpack.c.bf16 %v150_v31, %v149_v28  ;;  %v152_v37 = vld [vmem:[%s23639_s0 + $0x1b8] sm:$0xff]  ;;  %v153_v38 = vld [vmem:[%s23639_s0 + $0x1c0] sm:$0xff] }
  0x22   :  { %85 = vst [vmem:[#allocation2 + $0x2c8] sm:$0x1] %v18237_v2  ;;  %86 = vst [vmem:[#allocation2 + $0x2e0] sm:$0x1] %v18237_v2  ;;  %15494 = vmatmul.mubr.bf16.vlgmr.msra.gmra.mrb[0].mxu0 %v18367_v7  ;;  %v154_v39 = vld [vmem:[%s23639_s0 + $0x1c8] sm:$0xff]  ;;  %v188_v40 = vpack.c.bf16 %v152_v37, %v151_v34  ;;  %v155_v44 = vld [vmem:[%s23639_s0 + $0x1d0] sm:$0xff] }
  0x23   :  { %87 = vst [vmem:[#allocation2 + $0x2f8] sm:$0x1] %v18237_v2  ;;  %88 = vst [vmem:[#allocation2 + $0x310] sm:$0x1] %v18237_v2  ;;  %15558 = vmatpush3.bf16.msra.mxu0 %v17953_v3  ;;  %15497 = vmatprep.mubr.bf16.mxu0 %v18385_v13  ;;  %v18624_v43 = vpack.c.bf16 %v154_v39, %v153_v38  ;;  %v156_v47 = vld [vmem:[%s23639_s0 + $0x1d8] sm:$0xff]  ;;  %v157_v48 = vld [vmem:[%s23639_s0 + $0x1e0] sm:$0xff] }
  0x24   :  { %89 = vst [vmem:[#allocation2 + $0x328] sm:$0x1] %v18237_v2  ;;  %90 = vst [vmem:[#allocation2 + $0x340] sm:$0x1] %v18237_v2  ;;  %15559 = vmatprep.subr.bf16.mxu0 %v17954_v17  ;;  %v17956_v49 = vld [vmem:[%s23640_s1 + $0x18] sm:$0xff]   ;;  %v190_v50 = vpack.c.bf16 %v156_v47, %v155_v44  ;;  %v158_v51 = vld [vmem:[%s23639_s0 + $0x1e8] sm:$0xff] }
  0x25   :  { %91 = vst [vmem:[#allocation2 + $0x358] sm:$0x1] %v18237_v2  ;;  %194 = vst [vmem:[#allocation2 + $0x20] sm:$0xff] %v18367_v7  ;;  %v18642_v52 = vpack.c.bf16 %v158_v51, %v157_v48  ;;  %v17957_v55 = vld [vmem:[%s23640_s1 + $0x20] sm:$0xff]   ;;  %v17958_v57 = vld [vmem:[%s23640_s1 + $0x28] sm:$0xff]   ;;  %v323_v0 = vshll.u32 %v18385_v13, 16 }
  0x26   :  { %195 = vst [vmem:[#allocation2 + $0x38] sm:$0xff] %v18385_v13  ;;  %196 = vst [vmem:[#allocation2 + $0x50] sm:$0xff] %v18387_v14  ;;  %v17959_v58 = vld [vmem:[%s23640_s1 + $0x30] sm:$0xff]   ;;  %v17960_v59 = vld [vmem:[%s23640_s1 + $0x38] sm:$0xff]   ;;  %v332_v1 = vshrl.u32 %v18387_v14, 16  ;;  %v344_v3 = vshrl.u32 %v18398_v18, 16 }
  0x27   :  { %197 = vst [vmem:[#allocation2 + $0x68] sm:$0xff] %v18398_v18  ;;  %198 = vst [vmem:[#allocation2 + $0x80] sm:$0xff] %v18409_v21  ;;  %15560 = vmatpush3.bf16.msra.mxu0 %v17954_v17  ;;  %v17961_v60 = vld [vmem:[%s23640_s1 + $0x80] sm:$0xff]   ;;  %v347_v17 = vshll.u32 %v18398_v18, 16  ;;  %v17962_v26 = vld [vmem:[%s23640_s1 + $0x88] sm:$0xff]  }
  0x28   :  { %199 = vst [vmem:[#allocation2 + $0x98] sm:$0xff] %v18420_v25  ;;  %200 = vst [vmem:[#allocation2 + $0xb0] sm:$0xff] %v18435_v30  ;;  %15561 = vmatprep.subr.bf16.mxu0 %v17955_v29  ;;  %v234_v15 = vld [vmem:[#allocation2 + $0x60] sm:$0x80]  ;;  %v334_v16 = vrot.slane %v332_v1, 7  ;;  %v346_v22 = vrot.slane %v344_v3, 7 }
  0x29   :  { %201 = vst [vmem:[#allocation2 + $0xc8] sm:$0xff] %v18441_v32  ;;  %202 = vst [vmem:[#allocation2 + $0xe0] sm:$0xff] %v18443_v33  ;;  %v236_v34 = vld [vmem:[#allocation2 + $0x78] sm:$0x80]  ;;  %v238_v37 = vld [vmem:[#allocation2 + $0x90] sm:$0x80] }
  0x2a   :  { %203 = vst [vmem:[#allocation2 + $0xf8] sm:$0xff] %v18469_v41  ;;  %204 = vst [vmem:[#allocation2 + $0x110] sm:$0xff] %v18471_v42  ;;  %15498 = vmatmul.mubr.bf16.gmra.mrb[4].mxu0 %v18387_v14  ;;  %v17963_v38 = vld [vmem:[%s23640_s1 + $0x90] sm:$0xff]  }
  0x2b   :  { %205 = vst [vmem:[#allocation2 + $0x128] sm:$0xff] %v18479_v45  ;;  %206 = vst [vmem:[#allocation2 + $0x140] sm:$0xff] %v18481_v46  ;;  %15501 = vmatprep.mubr.bf16.mxu0 %v18398_v18  ;;  %15562 = vmatpush3.bf16.msra.mxu0 %v17955_v29  ;;  %v368_v29 = vshrl.u32 %v18420_v25, 16 }
  0x2c   :  { %207 = vst [vmem:[#allocation2 + $0x158] sm:$0xff] %v18505_v53  ;;  %208 = vst [vmem:[#allocation2 + $0x170] sm:$0xff] %v18507_v54  ;;  %15563 = vmatprep.subr.bf16.mxu0 %v17956_v49 }
  0x2d   :  { %210 = vst [vmem:[#allocation2 + $0x1d0] sm:$0xff] %v18512_v56  ;;  %211 = vst [vmem:[#allocation2 + $0x1e8] sm:$0xff] %v18529_v61 }
  0x2e   :  { %212 = vst [vmem:[#allocation2 + $0x200] sm:$0xff] %v18531_v62  ;;  %213 = vst [vmem:[#allocation2 + $0x218] sm:$0xff] %v18545_v4 }
  0x2f   :  { %214 = vst [vmem:[#allocation2 + $0x230] sm:$0xff] %v18553_v6  ;;  %215 = vst [vmem:[#allocation2 + $0x248] sm:$0xff] %v18564_v11  ;;  %15564 = vmatpush3.bf16.msra.mxu0 %v17956_v49 }
  0x30   :  { %216 = vst [vmem:[#allocation2 + $0x260] sm:$0xff] %v18579_v19  ;;  %217 = vst [vmem:[#allocation2 + $0x278] sm:$0xff] %v18588_v23  ;;  %15565 = vmatprep.subr.bf16.mxu0 %v17957_v55 }
  0x31   :  { %218 = vst [vmem:[#allocation2 + $0x290] sm:$0xff] %v18590_v24  ;;  %219 = vst [vmem:[#allocation2 + $0x2a8] sm:$0xff] %v186_v35 }
  0x32   :  { %220 = vst [vmem:[#allocation2 + $0x2c0] sm:$0xff] %v187_v36  ;;  %221 = vst [vmem:[#allocation2 + $0x2d8] sm:$0xff] %v188_v40  ;;  %15502 = vmatmul.mubr.bf16.gmra.mrb[8].mxu0 %v18409_v21 }
  0x33   :  { %222 = vst [vmem:[#allocation2 + $0x2f0] sm:$0xff] %v18624_v43  ;;  %223 = vst [vmem:[#allocation2 + $0x308] sm:$0xff] %v190_v50  ;;  %15505 = vmatprep.mubr.bf16.mxu0 %v18420_v25  ;;  %15566 = vmatpush3.bf16.msra.mxu0 %v17957_v55 }
  0x34   :  { %224 = vst [vmem:[#allocation2 + $0x320] sm:$0xff] %v18642_v52  ;;  %15567 = vmatprep.subr.bf16.mxu0 %v17958_v57 }
  0x37   :  { %15568 = vmatpush3.bf16.msra.mxu0 %v17958_v57 }
  0x38   :  { %15569 = vmatprep.subr.bf16.mxu0 %v17959_v58 }
  0x3a   :  { %15506 = vmatmul.mubr.bf16.gmra.mrb[12].mxu0 %v18435_v30 }
  0x3b   :  { %15509 = vmatprep.mubr.bf16.mxu0 %v18441_v32  ;;  %15570 = vmatpush3.bf16.msra.mxu0 %v17959_v58 }
  0x3c   :  { %15571 = vmatprep.subr.bf16.mxu0 %v17960_v59 }
  0x3f   :  { %15572 = vmatpush3.bf16.msra.mxu0 %v17960_v59 }
  0x40   :  { %15637 = vmatprep.subr.bf16.mxu0 %v17961_v60 }
  0x42   :  { %15510 = vmatmul.mubr.bf16.gmra.mrb[16].mxu0 %v18443_v33 }
  0x43   :  { %15513 = vmatprep.mubr.bf16.mxu0 %v18469_v41 }
  0x4a   :  { %15514 = vmatmul.mubr.bf16.gmra.mrb[20].mxu0 %v18471_v42 }
  0x4b   :  { %15517 = vmatprep.mubr.bf16.mxu0 %v18479_v45 }
  0x52   :  { %15518 = vmatmul.mubr.bf16.gmra.mrb[24].mxu0 %v18481_v46  ;;  %v226_v46 = vld [vmem:[#allocation2] sm:$0x80] }
  0x53   :  { %15521 = vmatprep.mubr.bf16.mxu0 %v18505_v53  ;;  %v18684_v53 = vrot.slane %v18237_v2, 7 }
  0x5a   :  { %15522 = vmatmul.mubr.bf16.gmra.mrb[28].mxu0 %v18507_v54  ;;  %v308_v54 = vshrl.u32 %v18367_v7, 16 }
  0x5b   :  { %15525 = vmatprep.mubr.bf16.mxu0 %v18237_v2  ;;  %v230_v2 = vld [vmem:[#allocation2 + $0x30] sm:$0x80] }
  0x5c   :  { %v310_v63 = vrot.slane %v308_v54, 7 }
  0x62   :  { %15526 = vmatmul.mubr.bf16.gmra.mrb[32].mxu0 %v18512_v56  ;;  %v311_v56 = vshll.u32 %v18367_v7, 16  ;;  %v316_v7 = vshrl.u32 %v230_v2, 16 }
  0x63   :  { %15529 = vmatprep.mubr.bf16.mxu0 %v18529_v61  ;;  %v320_v61 = vshrl.u32 %v18385_v13, 16  ;;  %v232_v13 = vld [vmem:[#allocation2 + $0x48] sm:$0x80] }
  0x64   :  { %v313_v10 = vor.u32 %v311_v56, %v310_v63 }
  0x65   :  { %v322_v5 = vrot.slane %v320_v61, 7 }
  0x67   :  { %v325_v20 = vor.u32 %v323_v0, %v322_v5 }
  0x6a   :  { %15530 = vmatmul.mubr.bf16.gmra.mrb[36].mxu0 %v18531_v62  ;;  %v292_v62 = vshrl.u32 %v226_v46, 16 }
  0x6b   :  { %15533 = vmatprep.mubr.bf16.mxu0 %v18545_v4  ;;  %v228_v4 = vld [vmem:[#allocation2 + $0x18] sm:$0x80] }
  0x6c   :  { %v304_v8 = vshrl.u32 %v228_v4, 16 }
  0x6e   :  { %v306_v12 = vrot.slane %v304_v8, 7 }
  0x70   :  { %v314_v27 = vsel %vm290_vm0, %v306_v12, %v313_v10 }
  0x72   :  { %15534 = vmatmul.mubr.bf16.gmra.mrb[40].mxu0 %v18553_v6  ;;  %v294_v6 = vrot.slane %v292_v62, 7 }
  0x73   :  { %15537 = vmatprep.mubr.bf16.mxu0 %v18564_v11  ;;  %v335_v11 = vshll.u32 %v18387_v14, 16  ;;  %v356_v14 = vshrl.u32 %v18409_v21, 16 }
  0x74   :  { %v302_v9 = vsel %vm290_vm0, %v294_v6, %v18684_v53 }
  0x75   :  { %v337_v31 = vor.u32 %v335_v11, %v334_v16 }
  0x7a   :  { %15538 = vmatmul.mubr.bf16.gmra.mrb[44].mxu0 %v18579_v19  ;;  %v318_v19 = vrot.slane %v316_v7, 7 }
  0x7b   :  { %15541 = vmatprep.mubr.bf16.mxu0 %v18588_v23  ;;  %v328_v23 = vshrl.u32 %v232_v13, 16 }
  0x7c   :  { %v326_v28 = vsel %vm290_vm0, %v318_v19, %v325_v20 }
  0x7d   :  { %v330_v18 = vrot.slane %v328_v23, 7 }
  0x82   :  { %15542 = vmatmul.mubr.bf16.gmra.mrb[48].mxu0 %v18590_v24  ;;  %v340_v24 = vshrl.u32 %v234_v15, 16 }
  0x83   :  { %15545 = vmatprep.mubr.bf16.mxu0 %v186_v35 }
  0x84   :  { %v342_v35 = vrot.slane %v340_v24, 7 }
  0x8a   :  { %15546 = vmatmul.mubr.bf16.gmra.mrb[52].mxu0 %v187_v36  ;;  %v349_v36 = vor.u32 %v347_v17, %v346_v22 }
  0x8b   :  { %15549 = vmatprep.mubr.bf16.mxu0 %v188_v40 }
  0x92   :  { %15550 = vmatmul.mubr.bf16.gmra.mrb[56].mxu0 %v18624_v43 }
  0x93   :  { %15553 = vmatprep.mubr.bf16.mxu0 %v190_v50 }
  0x9a   :  { %15554 = vmatmul.mubr.bf16.gmra.mrb[60].mxu0 %v18642_v52 }
  0x9b   :  { %15573 = vmatprep.mubr.bf16.mxu0 %v302_v9 }
  0xa2   :  { %15574 = vmatmul.mubr.bf16.vlgmr.msra.gmra.mrb[0].mxu0 %v314_v27 }
  0xa3   :  { %15638 = vmatpush3.bf16.msra.mxu0 %v17961_v60  ;;  %15577 = vmatprep.mubr.bf16.mxu0 %v326_v28 }
  0xa4   :  { %15639 = vmatprep.subr.bf16.mxu0 %v17962_v26 }
  0xa5   :  { %9 = vsyncpa [#allocation4], 0  ;;  %v358_v39 = vrot.slane %v356_v14, 7  ;;  %v359_v40 = vshll.u32 %v18409_v21, 16  ;;  %v338_v43 = vsel %vm290_vm0, %v330_v18, %v337_v31  ;;  %v352_v44 = vshrl.u32 %v236_v34, 16  ;;  %v17964_v51 = vld [vmem:[%s23640_s1 + $0x98] sm:$0xff]  }
  0xa6   :  { %v370_v47 = vrot.slane %v368_v29, 7  ;;  %v371_v48 = vshll.u32 %v18420_v25, 16  ;;  %v350_v49 = vsel %vm290_vm0, %v342_v35, %v349_v36  ;;  %v364_v50 = vshrl.u32 %v238_v37, 16  ;;  %v240_v25 = vld [vmem:[#allocation2 + $0xa8] sm:$0x80]  ;;  %v17965_v60 = vld [vmem:[%s23640_s1 + $0xa0] sm:$0xff]  }
  0xa7   :  { %15640 = vmatpush3.bf16.msra.mxu0 %v17962_v26  ;;  %v380_v52 = vshrl.u32 %v18435_v30, 16  ;;  %v354_v21 = vrot.slane %v352_v44, 7  ;;  %v361_v55 = vor.u32 %v359_v40, %v358_v39  ;;  %v392_v57 = vshrl.u32 %v18441_v32, 16  ;;  %v242_v46 = vld [vmem:[#allocation2 + $0xc0] sm:$0x80]  ;;  %v17966_v4 = vld [vmem:[%s23640_s1 + $0xa8] sm:$0xff]  }
  0xa8   :  { %15641 = vmatprep.subr.bf16.mxu0 %v17963_v38  ;;  %v366_v58 = vrot.slane %v364_v50, 7  ;;  %v373_v59 = vor.u32 %v371_v48, %v370_v47  ;;  %v383_v56 = vshll.u32 %v18435_v30, 16  ;;  %v376_v62 = vshrl.u32 %v240_v25, 16  ;;  %v17967_v9 = vld [vmem:[%s23640_s1 + $0xb0] sm:$0xff]   ;;  %v17968_v22 = vld [vmem:[%s23640_s1 + $0xb8] sm:$0xff]   ;;  %v18744_v14 = vld [vmem:[%s23640_s1 + $0xc0] sm:$0xff]  }
  0xa9   :  { %v382_v54 = vrot.slane %v380_v52, 7  ;;  %v362_v61 = vsel %vm290_vm0, %v354_v21, %v361_v55  ;;  %v394_v63 = vrot.slane %v392_v57, 7  ;;  %v395_v0 = vshll.u32 %v18441_v32, 16  ;;  %v244_v32 = vld [vmem:[#allocation2 + $0xd8] sm:$0x80]  ;;  %v18093_v31 = vld [vmem:[#allocation2 + $0x110] sm:$0xff] }
  0xaa   :  { %15578 = vmatmul.mubr.bf16.gmra.mrb[4].mxu0 %v338_v43  ;;  %v374_v1 = vsel %vm290_vm0, %v366_v58, %v373_v59  ;;  %v388_v3 = vshrl.u32 %v242_v46, 16  ;;  %v404_v2 = vshrl.u32 %v18443_v33, 16  ;;  %v378_v30 = vrot.slane %v376_v62, 7  ;;  %v246_v13 = vld [vmem:[#allocation2 + $0xf0] sm:$0x80]  ;;  %v18094_v37 = vld [vmem:[#allocation2 + $0x128] sm:$0xff] }
  0xab   :  { %15581 = vmatprep.mubr.bf16.mxu0 %v350_v49  ;;  %15642 = vmatpush3.bf16.msra.mxu0 %v17963_v38  ;;  %v385_v5 = vor.u32 %v383_v56, %v382_v54  ;;  %v416_v6 = vshrl.u32 %v18469_v41, 16  ;;  %v397_v7 = vor.u32 %v395_v0, %v394_v63  ;;  %v407_v11 = vshll.u32 %v18443_v33, 16  ;;  %v250_v29 = vld [vmem:[#allocation2 + $0x120] sm:$0x80]  ;;  %v18096_v48 = vld [vmem:[#allocation2 + $0x158] sm:$0xff]  ;;  %v18097_v56 = vld [vmem:[#allocation2 + $0x170] sm:$0xff] }
  0xac   :  { %15643 = vmatprep.subr.bf16.mxu0 %v17964_v51  ;;  %v390_v8 = vrot.slane %v388_v3, 7  ;;  %v406_v10 = vrot.slane %v404_v2, 7  ;;  %v400_v15 = vshrl.u32 %v244_v32, 16  ;;  %v419_v17 = vshll.u32 %v18469_v41, 16  ;;  %v248_v41 = vld [vmem:[#allocation2 + $0x108] sm:$0x80] }
  0xad   :  { %v386_v12 = vsel %vm290_vm0, %v378_v30, %v385_v5  ;;  %v418_v16 = vrot.slane %v416_v6, 7  ;;  %v412_v20 = vshrl.u32 %v246_v13, 16  ;;  %v428_v23 = vshrl.u32 %v18471_v42, 16  ;;  %v18095_v40 = vld [vmem:[#allocation2 + $0x140] sm:$0xff]  ;;  %v252_v52 = vld [vmem:[#allocation2 + $0x138] sm:$0x80] }
  0xae   :  { %v398_v19 = vsel %vm290_vm0, %v390_v8, %v397_v7  ;;  %v402_v33 = vrot.slane %v400_v15, 7  ;;  %v409_v24 = vor.u32 %v407_v11, %v406_v10  ;;  %v440_v26 = vshrl.u32 %v18479_v45, 16  ;;  %v254_v21 = vld [vmem:[#allocation2 + $0x150] sm:$0x80]  ;;  %v256_v3 = vld [vmem:[#allocation2 + $0x168] sm:$0x80] }
  0xaf   :  { %15644 = vmatpush3.bf16.msra.mxu0 %v17964_v51  ;;  %v414_v27 = vrot.slane %v412_v20, 7  ;;  %v421_v28 = vor.u32 %v419_v17, %v418_v16  ;;  %v430_v18 = vrot.slane %v428_v23, 7  ;;  %v431_v34 = vshll.u32 %v18093_v31, 16  ;;  %v18098_v32 = vld [vmem:[#allocation2 + $0x1d0] sm:$0xff]  ;;  %v18099_v11 = vld [vmem:[#allocation2 + $0x1e8] sm:$0xff]  ;;  %v18101_v31 = vld [vmem:[#allocation2 + $0x218] sm:$0xff] }
  0xb0   :  { %15645 = vmatprep.subr.bf16.mxu0 %v17965_v60  ;;  %v410_v42 = vsel %vm290_vm0, %v402_v33, %v409_v24  ;;  %v424_v35 = vshrl.u32 %v248_v41, 16  ;;  %v442_v36 = vrot.slane %v440_v26, 7  ;;  %v443_v45 = vshll.u32 %v18094_v37, 16  ;;  %v260_v16 = vld [vmem:[#allocation2 + $0x1c8] sm:$0x80] }
  0xb1   :  { %v422_v38 = vsel %vm290_vm0, %v414_v27, %v421_v28  ;;  %v436_v39 = vshrl.u32 %v250_v29, 16  ;;  %v452_v43 = vshrl.u32 %v18095_v40, 16  ;;  %v433_v47 = vor.u32 %v431_v34, %v430_v18  ;;  %v262_v17 = vld [vmem:[#allocation2 + $0x1e0] sm:$0x80]  ;;  %v266_v37 = vld [vmem:[#allocation2 + $0x210] sm:$0x80] }
  0xb2   :  { %15582 = vmatmul.mubr.bf16.gmra.mrb[8].mxu0 %v362_v61  ;;  %v426_v44 = vrot.slane %v424_v35, 7  ;;  %v464_v49 = vshrl.u32 %v18096_v48, 16  ;;  %v445_v51 = vor.u32 %v443_v45, %v442_v36  ;;  %v455_v57 = vshll.u32 %v18095_v40, 16  ;;  %v18100_v28 = vld [vmem:[#allocation2 + $0x200] sm:$0xff]  ;;  %v264_v36 = vld [vmem:[#allocation2 + $0x1f8] sm:$0x80] }
  0xb3   :  { %15585 = vmatprep.mubr.bf16.mxu0 %v374_v1  ;;  %15646 = vmatpush3.bf16.msra.mxu0 %v17965_v60  ;;  %v438_v50 = vrot.slane %v436_v39, 7  ;;  %v454_v55 = vrot.slane %v452_v43, 7  ;;  %v448_v59 = vshrl.u32 %v252_v52, 16  ;;  %v467_v60 = vshll.u32 %v18096_v48, 16  ;;  %v18102_v48 = vld [vmem:[#allocation2 + $0x230] sm:$0xff]  ;;  %v18103_v52 = vld [vmem:[#allocation2 + $0x248] sm:$0xff] }
  0xb4   :  { %15647 = vmatprep.subr.bf16.mxu0 %v17966_v4  ;;  %v434_v58 = vsel %vm290_vm0, %v426_v44, %v433_v47  ;;  %v466_v25 = vrot.slane %v464_v49, 7  ;;  %v460_v54 = vshrl.u32 %v254_v21, 16  ;;  %v476_v61 = vshrl.u32 %v18097_v56, 16 }
  0xb5   :  { %v446_v46 = vsel %vm290_vm0, %v438_v50, %v445_v51  ;;  %v450_v62 = vrot.slane %v448_v59, 7  ;;  %v457_v63 = vor.u32 %v455_v57, %v454_v55  ;;  %v479_v30 = vshll.u32 %v18097_v56, 16  ;;  %v270_v59 = vld [vmem:[#allocation2 + $0x240] sm:$0x80] }
  0xb6   :  { %v462_v0 = vrot.slane %v460_v54, 7  ;;  %v469_v1 = vor.u32 %v467_v60, %v466_v25  ;;  %v478_v2 = vrot.slane %v476_v61, 7  ;;  %v472_v6 = vshrl.u32 %v256_v3, 16 }
  0xb7   :  { %15648 = vmatpush3.bf16.msra.mxu0 %v17966_v4  ;;  %v258_v4 = vld [vmem:[#allocation2 + $0x1b0] sm:$0x80]  ;;  %v458_v5 = vsel %vm290_vm0, %v450_v62, %v457_v63  ;;  %v503_v20 = vshll.u32 %v18098_v32, 16  ;;  %v496_v23 = vshrl.u32 %v260_v16, 16  ;;  %v515_v24 = vshll.u32 %v18099_v11, 16 }
  0xb8   :  { %15649 = vmatprep.subr.bf16.mxu0 %v17967_v9  ;;  %v470_v8 = vsel %vm290_vm0, %v462_v0, %v469_v1  ;;  %v484_v7 = vshrl.u32 %v258_v4, 16  ;;  %v474_v13 = vrot.slane %v472_v6, 7  ;;  %v481_v10 = vor.u32 %v479_v30, %v478_v2  ;;  %v18104_v0 = vld [vmem:[#allocation2 + $0x260] sm:$0xff]  ;;  %v18105_v2 = vld [vmem:[#allocation2 + $0x278] sm:$0xff] }
  0xb9   :  { %v508_v27 = vshrl.u32 %v262_v17, 16  ;;  %v524_v41 = vshrl.u32 %v18100_v28, 16  ;;  %v498_v29 = vrot.slane %v496_v23, 7  ;;  %v536_v34 = vshrl.u32 %v18101_v31, 16  ;;  %v18106_v17 = vld [vmem:[#allocation2 + $0x290] sm:$0xff]  ;;  %v18107_v23 = vld [vmem:[#allocation2 + $0x2a8] sm:$0xff] }
  0xba   :  { %15586 = vmatmul.mubr.bf16.gmra.mrb[12].mxu0 %v386_v12  ;;  %v512_v12 = vshrl.u32 %v18099_v11, 16  ;;  %v486_v15 = vrot.slane %v484_v7, 7  ;;  %v520_v40 = vshrl.u32 %v264_v36, 16  ;;  %v532_v47 = vshrl.u32 %v266_v37, 16  ;;  %v274_v7 = vld [vmem:[#allocation2 + $0x270] sm:$0x80] }
  0xbb   :  { %15589 = vmatprep.mubr.bf16.mxu0 %v398_v19  ;;  %15650 = vmatpush3.bf16.msra.mxu0 %v17967_v9  ;;  %v500_v9 = vshrl.u32 %v18098_v32, 16  ;;  %v526_v45 = vrot.slane %v524_v41, 7  ;;  %v538_v43 = vrot.slane %v536_v34, 7  ;;  %v548_v49 = vshrl.u32 %v18102_v48, 16  ;;  %v18108_v37 = vld [vmem:[#allocation2 + $0x2c0] sm:$0xff] }
  0xbc   :  { %15651 = vmatprep.subr.bf16.mxu0 %v17968_v22  ;;  %v514_v33 = vrot.slane %v512_v12, 7  ;;  %v494_v26 = vsel %vm290_vm0, %v486_v15, %v18684_v53  ;;  %v539_v53 = vshll.u32 %v18101_v31, 16  ;;  %v522_v50 = vrot.slane %v520_v40, 7  ;;  %v18109_v40 = vld [vmem:[#allocation2 + $0x2d8] sm:$0xff] }
  0xbd   :  { %v502_v19 = vrot.slane %v500_v9, 7  ;;  %v560_v21 = vshrl.u32 %v18103_v52, 16  ;;  %v534_v55 = vrot.slane %v532_v47, 7  ;;  %v550_v25 = vrot.slane %v548_v49, 7  ;;  %v280_v47 = vld [vmem:[#allocation2 + $0x2b8] sm:$0x80] }
  0xbe   :  { %v517_v35 = vor.u32 %v515_v24, %v514_v33  ;;  %v541_v57 = vor.u32 %v539_v53, %v538_v43  ;;  %v551_v60 = vshll.u32 %v18102_v48, 16  ;;  %v563_v61 = vshll.u32 %v18103_v52, 16  ;;  %v282_v48 = vld [vmem:[#allocation2 + $0x2d0] sm:$0x80] }
  0xbf   :  { %15652 = vmatpush3.bf16.msra.mxu0 %v17968_v22  ;;  %v482_v22 = vsel %vm290_vm0, %v474_v13, %v481_v10  ;;  %v505_v18 = vor.u32 %v503_v20, %v502_v19  ;;  %v562_v56 = vrot.slane %v560_v21, 7  ;;  %v556_v63 = vshrl.u32 %v270_v59, 16  ;;  %v18110_v59 = vld [vmem:[#allocation2 + $0x2f0] sm:$0xff] }
  0xc0   :  { %15717 = vmatprep.subr.bf16.mxu0 %v18744_v14  ;;  %v542_v62 = vsel %vm290_vm0, %v534_v55, %v541_v57  ;;  %v572_v1 = vshrl.u32 %v18104_v0, 16  ;;  %v553_v4 = vor.u32 %v551_v60, %v550_v25  ;;  %v584_v30 = vshrl.u32 %v18105_v2, 16 }
  0xc1   :  { %v506_v39 = vsel %vm290_vm0, %v498_v29, %v505_v18  ;;  %v565_v6 = vor.u32 %v563_v61, %v562_v56  ;;  %v575_v9 = vshll.u32 %v18104_v0, 16  ;;  %v587_v12 = vshll.u32 %v18105_v2, 16  ;;  %v286_v0 = vld [vmem:[#allocation2 + $0x300] sm:$0x80] }
  0xc2   :  { %15590 = vmatmul.mubr.bf16.gmra.mrb[16].mxu0 %v410_v42  ;;  %v510_v42 = vrot.slane %v508_v27, 7  ;;  %v574_v32 = vrot.slane %v572_v1, 7  ;;  %v586_v11 = vrot.slane %v584_v30, 7  ;;  %v580_v16 = vshrl.u32 %v274_v7, 16  ;;  %v276_v27 = vld [vmem:[#allocation2 + $0x288] sm:$0x80] }
  0xc3   :  { %15593 = vmatprep.mubr.bf16.mxu0 %v422_v38  ;;  %v527_v38 = vshll.u32 %v18100_v28, 16  ;;  %v596_v19 = vshrl.u32 %v18106_v17, 16  ;;  %v608_v33 = vshrl.u32 %v18107_v23, 16  ;;  %v278_v28 = vld [vmem:[#allocation2 + $0x2a0] sm:$0x80]  ;;  %v599_v29 = vshll.u32 %v18106_v17, 16 }
  0xc4   :  { %v518_v44 = vsel %vm290_vm0, %v510_v42, %v517_v35  ;;  %v582_v24 = vrot.slane %v580_v16, 7  ;;  %v592_v31 = vshrl.u32 %v276_v27, 16  ;;  %v611_v42 = vshll.u32 %v18107_v23, 16  ;;  %v18112_v7 = vld [vmem:[#allocation2 + $0x320] sm:$0xff]  ;;  %v1415_v17 = vld [vmem:[#allocation2 + $0x10] sm:$0x1] }
  0xc5   :  { %v529_v51 = vor.u32 %v527_v38, %v526_v45  ;;  %v598_v41 = vrot.slane %v596_v19, 7  ;;  %v610_v34 = vrot.slane %v608_v33, 7  ;;  %v604_v36 = vshrl.u32 %v278_v28, 16  ;;  %v18770_v28 = vld [vmem:[#allocation2 + $0x20] sm:$0xff] }
  0xc6   :  { %v620_v45 = vshrl.u32 %v18108_v37, 16  ;;  %v594_v38 = vrot.slane %v592_v31, 7  ;;  %v632_v43 = vshrl.u32 %v18109_v40, 16  ;;  %v616_v52 = vshrl.u32 %v280_v47, 16 }
  0xc7   :  { %v606_v53 = vrot.slane %v604_v36, 7  ;;  %v635_v55 = vshll.u32 %v18109_v40, 16  ;;  %v644_v25 = vshrl.u32 %v18110_v59, 16  ;;  %v1487_v27 = vshll.u32 %v1415_v17, 16 }
  0xc8   :  { %v622_v49 = vrot.slane %v620_v45, 7  ;;  %v634_v21 = vrot.slane %v632_v43, 7  ;;  %v618_v60 = vrot.slane %v616_v52, 7  ;;  %v1494_v31 = vshll.u32 %v18770_v28, 16 }
  0xc9   :  { %v646_v1 = vrot.slane %v644_v25, 7  ;;  %vm1478_vm1 = vsmask.f32 7424 }
  0xca   :  { %15594 = vmatmul.mubr.bf16.gmra.mrb[20].mxu0 %v434_v58  ;;  %v268_v58 = vld [vmem:[#allocation2 + $0x228] sm:$0x80] }
  0xcb   :  { %15597 = vmatprep.mubr.bf16.mxu0 %v446_v46  ;;  %v530_v46 = vsel %vm290_vm0, %v522_v50, %v529_v51  ;;  %v544_v54 = vshrl.u32 %v268_v58, 16  ;;  %v623_v50 = vshll.u32 %v18108_v37, 16  ;;  %v628_v58 = vshrl.u32 %v282_v48, 16  ;;  %v1419_v37 = vld [vmem:[#allocation2 + $0x40] sm:$0x1]  ;;  %v18787_v48 = vld [vmem:[#allocation2 + $0x50] sm:$0xff] }
  0xcc   :  { %v1511_v47 = vshll.u32 %v1419_v37, 16  ;;  %v1518_v52 = vshll.u32 %v18787_v48, 16 }
  0xcd   :  { %v546_v3 = vrot.slane %v544_v54, 7  ;;  %v18111_v54 = vld [vmem:[#allocation2 + $0x308] sm:$0xff]  ;;  %v630_v61 = vrot.slane %v628_v58, 7 }
  0xce   :  { %v656_v56 = vshrl.u32 %v18111_v54, 16 }
  0xcf   :  { %v554_v13 = vsel %vm290_vm0, %v546_v3, %v553_v4  ;;  %v647_v3 = vshll.u32 %v18110_v59, 16  ;;  %v1423_v59 = vld [vmem:[#allocation2 + $0x70] sm:$0x1] }
  0xd0   :  { %v658_v30 = vrot.slane %v656_v56, 7 }
  0xd2   :  { %15598 = vmatmul.mubr.bf16.gmra.mrb[24].mxu0 %v458_v5  ;;  %v558_v5 = vrot.slane %v556_v63, 7  ;;  %v284_v63 = vld [vmem:[#allocation2 + $0x2e8] sm:$0x80] }
  0xd3   :  { %15601 = vmatprep.mubr.bf16.mxu0 %v470_v8  ;;  %v272_v8 = vld [vmem:[#allocation2 + $0x258] sm:$0x80]  ;;  %v640_v2 = vshrl.u32 %v284_v63, 16  ;;  %v1535_v63 = vshll.u32 %v1423_v59, 16 }
  0xd4   :  { %v568_v10 = vshrl.u32 %v272_v8, 16  ;;  %v566_v15 = vsel %vm290_vm0, %v558_v5, %v565_v6  ;;  %v659_v5 = vshll.u32 %v18111_v54, 16  ;;  %v652_v8 = vshrl.u32 %v286_v0, 16  ;;  %v18805_v0 = vld [vmem:[#allocation2 + $0x80] sm:$0xff] }
  0xd6   :  { %v570_v20 = vrot.slane %v568_v10, 7  ;;  %v654_v10 = vrot.slane %v652_v8, 7  ;;  %v1425_v8 = vld [vmem:[#allocation2 + $0x88] sm:$0x1] }
  0xda   :  { %15602 = vmatmul.mubr.bf16.gmra.mrb[28].mxu0 %v482_v22  ;;  %v577_v22 = vor.u32 %v575_v9, %v574_v32  ;;  %v668_v32 = vshrl.u32 %v18112_v7, 16  ;;  %v642_v9 = vrot.slane %v640_v2, 7 }
  0xdb   :  { %15605 = vmatprep.mubr.bf16.mxu0 %v494_v26  ;;  %v589_v26 = vor.u32 %v587_v12, %v586_v11  ;;  %v661_v11 = vor.u32 %v659_v5, %v658_v30  ;;  %v288_v12 = vld [vmem:[#allocation2 + $0x318] sm:$0x80]  ;;  %v1542_v30 = vshll.u32 %v18805_v0, 16 }
  0xdc   :  { %v578_v18 = vsel %vm290_vm0, %v570_v20, %v577_v22  ;;  %v670_v19 = vrot.slane %v668_v32, 7  ;;  %v671_v20 = vshll.u32 %v18112_v7, 16  ;;  %v664_v23 = vshrl.u32 %v288_v12, 16  ;;  %v17971_v32 = vld [vmem:[%s23640_s1 + $0xd0] sm:$0xff]  }
  0xdd   :  { %v590_v35 = vsel %vm290_vm0, %v582_v24, %v589_v26  ;;  %v662_v33 = vsel %vm290_vm0, %v654_v10, %v661_v11  ;;  %v1544_v10 = vrot.slane %v1542_v30, 1  ;;  %v1547_v11 = vshll.u32 %v1425_v8, 16 }
  0xe2   :  { %15606 = vmatmul.mubr.bf16.gmra.mrb[32].mxu0 %v506_v39  ;;  %v601_v39 = vor.u32 %v599_v29, %v598_v41  ;;  %v18772_v41 = vld [vmem:[#allocation2 + $0x38] sm:$0xff]  ;;  %v666_v29 = vrot.slane %v664_v23, 7 }
  0xe3   :  { %15609 = vmatprep.mubr.bf16.mxu0 %v518_v44  ;;  %v613_v44 = vor.u32 %v611_v42, %v610_v34  ;;  %v1489_v42 = vrot.slane %v1487_v27, 1  ;;  %v1506_v36 = vshll.u32 %v18772_v41, 16 }
  0xe4   :  { %v602_v51 = vsel %vm290_vm0, %v594_v38, %v601_v39  ;;  %v1492_v38 = vshrl.u32 %v18770_v28, 16  ;;  %v1496_v39 = vrot.slane %v1494_v31, 1 }
  0xe5   :  { %v614_v57 = vsel %vm290_vm0, %v606_v53, %v613_v44  ;;  %v1504_v53 = vshrl.u32 %v18772_v41, 16  ;;  %v1508_v44 = vrot.slane %v1506_v36, 1  ;;  %v17978_v41 = vld [vmem:[%s23640_s1 + $0x108] sm:$0xff]  }
  0xea   :  { %15610 = vmatmul.mubr.bf16.gmra.mrb[36].mxu0 %v530_v46  ;;  %v625_v46 = vor.u32 %v623_v50, %v622_v49  ;;  %v18789_v49 = vld [vmem:[#allocation2 + $0x68] sm:$0xff]  ;;  %v1497_v50 = vor.u32 %v1496_v39, %v1492_v38 }
  0xeb   :  { %15613 = vmatprep.mubr.bf16.mxu0 %v542_v62  ;;  %v637_v62 = vor.u32 %v635_v55, %v634_v21  ;;  %v1509_v21 = vor.u32 %v1508_v44, %v1504_v53  ;;  %v1513_v55 = vrot.slane %v1511_v47, 1  ;;  %v1530_v58 = vshll.u32 %v18789_v49, 16 }
  0xec   :  { %v626_v4 = vsel %vm290_vm0, %v618_v60, %v625_v46  ;;  %v1516_v60 = vshrl.u32 %v18787_v48, 16  ;;  %v1520_v46 = vrot.slane %v1518_v52, 1 }
  0xed   :  { %v638_v6 = vsel %vm290_vm0, %v630_v61, %v637_v62  ;;  %v1514_v56 = vsel %vm1478_vm1, %v1509_v21, %v1513_v55  ;;  %v1528_v61 = vshrl.u32 %v18789_v49, 16  ;;  %v1532_v62 = vrot.slane %v1530_v58, 1  ;;  %v17974_v21 = vld [vmem:[%s23640_s1 + $0xe8] sm:$0xff]   ;;  %v18859_v55 = vld [vmem:[#allocation2 + $0xf8] sm:$0xff] }
  0xef   :  { %v1533_v5 = vor.u32 %v1532_v62, %v1528_v61  ;;  %v23667_v62 = vshll.u32 %v18859_v55, 16 }
  0xf2   :  { %15614 = vmatmul.mubr.bf16.gmra.mrb[40].mxu0 %v554_v13  ;;  %v649_v13 = vor.u32 %v647_v3, %v646_v1  ;;  %v17970_v1 = vld [vmem:[%s23640_s1 + $0xc8] sm:$0xff]   ;;  %v18810_v3 = vld [vmem:[#allocation2 + $0x98] sm:$0xff] }
  0xf3   :  { %15617 = vmatprep.mubr.bf16.mxu0 %v566_v15  ;;  %v18113_v15 = vld [vmem:[#allocation2 + $0x8] sm:$0xff]  ;;  %v1554_v7 = vshll.u32 %v18810_v3, 16 }
  0xf4   :  { %v1482_v16 = vshll.u32 %v18113_v15, 16  ;;  %v650_v22 = vsel %vm290_vm0, %v642_v9, %v649_v13  ;;  %v1480_v24 = vshrl.u32 %v18113_v15, 16  ;;  %v1540_v13 = vshrl.u32 %v18805_v0, 16 }
  0xf5   :  { %v1552_v15 = vshrl.u32 %v18810_v3, 16 }
  0xf6   :  { %v1484_v26 = vrot.slane %v1482_v16, 1  ;;  %v1556_v16 = vrot.slane %v1554_v7, 1  ;;  %v1545_v23 = vor.u32 %v1544_v10, %v1540_v13  ;;  %v18878_v10 = vld [vmem:[#allocation2 + $0x110] sm:$0xff] }
  0xf8   :  { %v18775_v34 = vor.u32 %v1484_v26, %v1480_v24  ;;  %v1557_v26 = vor.u32 %v1556_v16, %v1552_v15 }
  0xfa   :  { %15618 = vmatmul.mubr.bf16.gmra.mrb[44].mxu0 %v578_v18  ;;  %v673_v18 = vor.u32 %v671_v20, %v670_v19  ;;  %v1490_v43 = vsel %vm1478_vm1, %v18775_v34, %v1489_v42  ;;  %v18830_v19 = vld [vmem:[#allocation2 + $0xb0] sm:$0xff]  ;;  %v17972_v20 = vld [vmem:[%s23640_s1 + $0xd8] sm:$0xff]   ;;  %v17973_v42 = vld [vmem:[%s23640_s1 + $0xe0] sm:$0xff]  }
  0xfb   :  { %15621 = vmatprep.mubr.bf16.mxu0 %v590_v35  ;;  %v1417_v35 = vld [vmem:[#allocation2 + $0x28] sm:$0x1]  ;;  %v1566_v24 = vshll.u32 %v18830_v19, 16 }
  0xfc   :  { %v674_v45 = vsel %vm290_vm0, %v666_v29, %v673_v18  ;;  %v1499_v40 = vshll.u32 %v1417_v35, 16  ;;  %v1429_v29 = vld [vmem:[#allocation2 + $0xb8] sm:$0x1]  ;;  %v1431_v35 = vld [vmem:[#allocation2 + $0xd0] sm:$0x1] }
  0xfd   :  { %v1568_v39 = vrot.slane %v1566_v24, 1 }
 0x102   :  { %15622 = vmatmul.mubr.bf16.gmra.mrb[48].mxu0 %v602_v51  ;;  %v1501_v51 = vrot.slane %v1499_v40, 1  ;;  %v1571_v40 = vshll.u32 %v1429_v29, 16  ;;  %v18894_v29 = vld [vmem:[%s23640_s1 + $0x100] sm:$0xff]  }
 0x103   :  { %15625 = vmatprep.mubr.bf16.mxu0 %v614_v57  ;;  %v1421_v57 = vld [vmem:[#allocation2 + $0x58] sm:$0x1] }
 0x104   :  { %v1502_v25 = vsel %vm1478_vm1, %v1497_v50, %v1501_v51  ;;  %v1523_v54 = vshll.u32 %v1421_v57, 16  ;;  %v1583_v50 = vshll.u32 %v1431_v35, 16  ;;  %v18854_v51 = vld [vmem:[#allocation2 + $0xe0] sm:$0xff]  ;;  %v1573_v59 = vrot.slane %v1571_v40, 1 }
 0x106   :  { %v1525_v2 = vrot.slane %v1523_v54, 1  ;;  %v1585_v54 = vrot.slane %v1583_v50, 1 }
 0x10a   :  { %15626 = vmatmul.mubr.bf16.gmra.mrb[52].mxu0 %v626_v4  ;;  %v1521_v4 = vor.u32 %v1520_v46, %v1516_v60 }
 0x10b   :  { %15629 = vmatprep.mubr.bf16.mxu0 %v638_v6  ;;  %v1537_v6 = vrot.slane %v1535_v63, 1  ;;  %v17975_v63 = vld [vmem:[%s23640_s1 + $0xf0] sm:$0xff]  }
 0x10c   :  { %v1526_v9 = vsel %vm1478_vm1, %v1521_v4, %v1525_v2  ;;  %v23680_v2 = vshrl.u32 %v18854_v51, 16 }
 0x10d   :  { %v1538_v12 = vsel %vm1478_vm1, %v1533_v5, %v1537_v6 }
 0x112   :  { %15630 = vmatmul.mubr.bf16.gmra.mrb[56].mxu0 %v650_v22  ;;  %v18835_v22 = vld [vmem:[#allocation2 + $0xc8] sm:$0xff] }
 0x113   :  { %15633 = vmatprep.mubr.bf16.mxu0 %v662_v33  ;;  %v1549_v33 = vrot.slane %v1547_v11, 1  ;;  %v23679_v18 = vshll.u32 %v18835_v22, 16  ;;  %v23684_v44 = vshrl.u32 %v18835_v22, 16  ;;  %v17976_v11 = vld [vmem:[%s23640_s1 + $0xf8] sm:$0xff]  }
 0x115   :  { %v1550_v37 = vsel %vm1478_vm1, %v1545_v23, %v1549_v33  ;;  %v1580_v47 = vrot.slane %v23679_v18, 1 }
 0x117   :  { %v1581_v46 = vor.u32 %v1580_v47, %v23684_v44 }
 0x119   :  { %v1586_v8 = vsel %vm1478_vm1, %v1581_v46, %v1585_v54 }
 0x11a   :  { %15634 = vmatmul.mubr.bf16.gmra.mrb[60].mxu0 %v674_v45  ;;  %v1564_v45 = vshrl.u32 %v18830_v19, 16  ;;  %v23872_v19 = vshrl.u32 %v18854_v51, 16 }
 0x11b   :  { %15653 = vmatprep.mubr.bf16.mxu0 %v1490_v43 }
 0x11c   :  { %v1569_v57 = vor.u32 %v1568_v39, %v1564_v45  ;;  %v2456_v0 = vrot.slane %v1564_v45, 7  ;;  %v17981_v45 = vld [vmem:[%s23640_s1 + $0x120] sm:$0xff]  }
 0x11e   :  { %v1574_v4 = vsel %vm1478_vm1, %v1569_v57, %v1573_v59  ;;  %v18904_v57 = vld [vmem:[#allocation2 + $0x140] sm:$0xff]  ;;  %v18907_v59 = vld [vmem:[#allocation2 + $0x158] sm:$0xff] }
 0x122   :  { %15654 = vmatmul.mubr.bf16.vlgmr.msra.gmra.mrb[0].mxu0 %v1502_v25  ;;  %v23674_v25 = vshll.u32 %v18854_v51, 16 }
 0x123   :  { %15718 = vmatpush3.bf16.msra.mxu0 %v18744_v14  ;;  %15657 = vmatprep.mubr.bf16.mxu0 %v1514_v56  ;;  %v1427_v14 = vld [vmem:[#allocation2 + $0xa0] sm:$0x1]  ;;  %v1433_v56 = vld [vmem:[#allocation2 + $0xe8] sm:$0x1] }
 0x124   :  { %15719 = vmatprep.subr.bf16.mxu0 %v17970_v1  ;;  %v1559_v17 = vshll.u32 %v1427_v14, 16  ;;  %v1592_v5 = vrot.slane %v23674_v25, 1  ;;  %v1595_v6 = vshll.u32 %v1433_v56, 16  ;;  %v1604_v14 = vrot.slane %v23667_v62, 1 }
 0x125   :  { %v23650_v56 = vshll.u32 %v18904_v57, 16 }
 0x126   :  { %v1561_v27 = vrot.slane %v1559_v17, 1  ;;  %v1593_v16 = vor.u32 %v1592_v5, %v23680_v2  ;;  %v1597_v17 = vrot.slane %v1595_v6, 1  ;;  %v23645_v5 = vshll.u32 %v18907_v59, 16  ;;  %v1443_v6 = vld [vmem:[#allocation2 + $0x160] sm:$0x1] }
 0x127   :  { %15720 = vmatpush3.bf16.msra.mxu0 %v17970_v1  ;;  %v1435_v1 = vld [vmem:[#allocation2 + $0x100] sm:$0x1] }
 0x128   :  { %15721 = vmatprep.subr.bf16.mxu0 %v17971_v32  ;;  %v1562_v43 = vsel %vm1478_vm1, %v1557_v26, %v1561_v27  ;;  %v1437_v26 = vld [vmem:[#allocation2 + $0x118] sm:$0x1]  ;;  %v1598_v35 = vsel %vm1478_vm1, %v1593_v16, %v1597_v17  ;;  %v23649_v17 = vshrl.u32 %v18907_v59, 16 }
 0x129   :  { %v1619_v40 = vshll.u32 %v1437_v26, 16  ;;  %v18923_v26 = vld [vmem:[#allocation2 + $0x170] sm:$0xff] }
 0x12a   :  { %15658 = vmatmul.mubr.bf16.gmra.mrb[4].mxu0 %v1526_v9  ;;  %v1607_v9 = vshll.u32 %v1435_v1, 16 }
 0x12b   :  { %15661 = vmatprep.mubr.bf16.mxu0 %v1538_v12  ;;  %15722 = vmatpush3.bf16.msra.mxu0 %v17971_v32  ;;  %v23673_v32 = vshrl.u32 %v18859_v55, 16  ;;  %v18883_v12 = vld [vmem:[#allocation2 + $0x128] sm:$0xff]  ;;  %v1621_v54 = vrot.slane %v1619_v40, 1 }
 0x12c   :  { %15723 = vmatprep.subr.bf16.mxu0 %v17972_v20  ;;  %v1609_v33 = vrot.slane %v1607_v9, 1  ;;  %v23655_v27 = vshll.u32 %v18883_v12, 16  ;;  %v23661_v47 = vshrl.u32 %v18883_v12, 16  ;;  %v1640_v9 = vrot.slane %v23650_v56, 1 }
 0x12d   :  { %v1605_v23 = vor.u32 %v1604_v14, %v23673_v32  ;;  %v23656_v14 = vshrl.u32 %v18904_v57, 16 }
 0x12e   :  { %v1628_v50 = vrot.slane %v23655_v27, 1 }
 0x12f   :  { %15724 = vmatpush3.bf16.msra.mxu0 %v17972_v20  ;;  %v23662_v20 = vshll.u32 %v18878_v10, 16 }
 0x130   :  { %15725 = vmatprep.subr.bf16.mxu0 %v17973_v42 }
 0x131   :  { %v1616_v39 = vrot.slane %v23662_v20, 1 }
 0x132   :  { %15662 = vmatmul.mubr.bf16.gmra.mrb[8].mxu0 %v1550_v37  ;;  %v23668_v37 = vshrl.u32 %v18878_v10, 16 }
 0x133   :  { %15665 = vmatprep.mubr.bf16.mxu0 %v1562_v43  ;;  %15726 = vmatpush3.bf16.msra.mxu0 %v17973_v42  ;;  %v1439_v42 = vld [vmem:[#allocation2 + $0x130] sm:$0x1]  ;;  %v1610_v43 = vsel %vm1478_vm1, %v1605_v23, %v1609_v33  ;;  %v1652_v23 = vrot.slane %v23645_v5, 1  ;;  %v1655_v33 = vshll.u32 %v1443_v6, 16  ;;  %v18961_v5 = vld [vmem:[#allocation2 + $0x200] sm:$0xff] }
 0x134   :  { %15727 = vmatprep.subr.bf16.mxu0 %v17974_v21  ;;  %v1617_v46 = vor.u32 %v1616_v39, %v23668_v37  ;;  %v23644_v39 = vshll.u32 %v18923_v26, 16  ;;  %v23658_v56 = vshrl.u32 %v18961_v5, 16 }
 0x135   :  { %v1653_v40 = vor.u32 %v1652_v23, %v23649_v17 }
 0x137   :  { %15728 = vmatpush3.bf16.msra.mxu0 %v17974_v21  ;;  %v1631_v21 = vshll.u32 %v1439_v42, 16  ;;  %v1641_v42 = vor.u32 %v1640_v9, %v23656_v14  ;;  %v127_v9 = vld [vmem:[%s23639_s0 + $0xf0] sm:$0xff] }
 0x138   :  { %15729 = vmatprep.subr.bf16.mxu0 %v17975_v63 }
 0x139   :  { %v1633_v1 = vrot.slane %v1631_v21, 1  ;;  %v1447_v21 = vld [vmem:[#allocation2 + $0x1c0] sm:$0x1] }
 0x13a   :  { %15666 = vmatmul.mubr.bf16.gmra.mrb[12].mxu0 %v1574_v4  ;;  %v1441_v4 = vld [vmem:[#allocation2 + $0x148] sm:$0x1]  ;;  %v1679_v6 = vshll.u32 %v1447_v21, 16  ;;  %v1451_v21 = vld [vmem:[#allocation2 + $0x1f0] sm:$0x1] }
 0x13b   :  { %15669 = vmatprep.mubr.bf16.mxu0 %v1586_v8  ;;  %15730 = vmatpush3.bf16.msra.mxu0 %v17975_v63  ;;  %v1629_v63 = vor.u32 %v1628_v50, %v23661_v47  ;;  %v1622_v8 = vsel %vm1478_vm1, %v1617_v46, %v1621_v54  ;;  %v1445_v50 = vld [vmem:[#allocation2 + $0x178] sm:$0x1]  ;;  %v23646_v54 = vshrl.u32 %v18923_v26, 16 }
 0x13c   :  { %15731 = vmatprep.subr.bf16.mxu0 %v17976_v11 }
 0x13d   :  { %v1634_v16 = vsel %vm1478_vm1, %v1629_v63, %v1633_v1  ;;  %v1664_v63 = vrot.slane %v23644_v39, 1  ;;  %v1667_v1 = vshll.u32 %v1445_v50, 16 }
 0x13f   :  { %15732 = vmatpush3.bf16.msra.mxu0 %v17976_v11  ;;  %v1643_v11 = vshll.u32 %v1441_v4, 16 }
 0x140   :  { %15797 = vmatprep.subr.bf16.mxu0 %v18894_v29 }
 0x142   :  { %15670 = vmatmul.mubr.bf16.gmra.mrb[16].mxu0 %v1598_v35  ;;  %v1645_v35 = vrot.slane %v1643_v11, 1  ;;  %v128_v11 = vld [vmem:[%s23639_s0 + $0xf8] sm:$0xff] }
 0x143   :  { %15673 = vmatprep.mubr.bf16.mxu0 %v1610_v43  ;;  %v1657_v43 = vrot.slane %v1655_v33, 1  ;;  %v18945_v23 = vpack.c.bf16 %v128_v11, %v127_v9  ;;  %v1665_v33 = vor.u32 %v1664_v63, %v23646_v54  ;;  %v1703_v11 = vshll.u32 %v1451_v21, 16  ;;  %v18963_v54 = vld [vmem:[#allocation2 + $0x218] sm:$0xff]  ;;  %v1455_v21 = vld [vmem:[#allocation2 + $0x220] sm:$0x1] }
 0x144   :  { %v1646_v46 = vsel %vm1478_vm1, %v1641_v42, %v1645_v35  ;;  %v1669_v42 = vrot.slane %v1667_v1, 1 }
 0x145   :  { %v1658_v4 = vsel %vm1478_vm1, %v1653_v40, %v1657_v43  ;;  %209 = vst [vmem:[#allocation2 + $0x188] sm:$0xff] %v18945_v23  ;;  %v1681_v40 = vrot.slane %v1679_v6, 1  ;;  %v1449_v43 = vld [vmem:[#allocation2 + $0x1d8] sm:$0x1] }
 0x146   :  { %v1670_v39 = vsel %vm1478_vm1, %v1665_v33, %v1669_v42 }
 0x147   :  { %v1682_v63 = vsel %vm1478_vm1, %v18775_v34, %v1681_v40  ;;  %v1705_v40 = vrot.slane %v1703_v11, 1  ;;  %v1727_v11 = vshll.u32 %v1455_v21, 16  ;;  %v1459_v21 = vld [vmem:[#allocation2 + $0x250] sm:$0x1] }
 0x14a   :  { %15674 = vmatmul.mubr.bf16.gmra.mrb[20].mxu0 %v1622_v8  ;;  %v18935_v8 = vld [vmem:[#allocation2 + $0x1d0] sm:$0xff] }
 0x14b   :  { %15677 = vmatprep.mubr.bf16.mxu0 %v1634_v16  ;;  %v18943_v16 = vld [vmem:[#allocation2 + $0x1e8] sm:$0xff]  ;;  %v23647_v35 = vshll.u32 %v18935_v8, 16  ;;  %v23652_v9 = vshrl.u32 %v18935_v8, 16 }
 0x14c   :  { %v23648_v50 = vshll.u32 %v18943_v16, 16  ;;  %v23651_v1 = vshrl.u32 %v18943_v16, 16 }
 0x14e   :  { %v1700_v6 = vrot.slane %v23648_v50, 1  ;;  %v23654_v50 = vshll.u32 %v18963_v54, 16 }
 0x150   :  { %v1701_v34 = vor.u32 %v1700_v6, %v23651_v1  ;;  %v1724_v6 = vrot.slane %v23654_v50, 1  ;;  %v18979_v1 = vld [vmem:[#allocation2 + $0x230] sm:$0xff] }
 0x151   :  { %v23664_v14 = vshrl.u32 %v18979_v1, 16 }
 0x152   :  { %15678 = vmatmul.mubr.bf16.gmra.mrb[24].mxu0 %v1646_v46  ;;  %v1688_v46 = vrot.slane %v23647_v35, 1  ;;  %v1453_v35 = vld [vmem:[#allocation2 + $0x208] sm:$0x1] }
 0x153   :  { %15681 = vmatprep.mubr.bf16.mxu0 %v1658_v4  ;;  %v1691_v4 = vshll.u32 %v1449_v43, 16  ;;  %v23653_v43 = vshll.u32 %v18961_v5, 16 }
 0x154   :  { %v1689_v33 = vor.u32 %v1688_v46, %v23652_v9  ;;  %v1706_v46 = vsel %vm1478_vm1, %v1701_v34, %v1705_v40  ;;  %v18981_v9 = vld [vmem:[#allocation2 + $0x248] sm:$0xff]  ;;  %v1729_v40 = vrot.slane %v1727_v11, 1  ;;  %v1751_v11 = vshll.u32 %v1459_v21, 16  ;;  %v1463_v21 = vld [vmem:[#allocation2 + $0x280] sm:$0x1] }
 0x155   :  { %v1693_v42 = vrot.slane %v1691_v4, 1  ;;  %v23657_v4 = vshrl.u32 %v18963_v54, 16  ;;  %v23660_v50 = vshll.u32 %v18981_v9, 16 }
 0x157   :  { %v1694_v17 = vsel %vm1478_vm1, %v1689_v33, %v1693_v42  ;;  %v1725_v34 = vor.u32 %v1724_v6, %v23657_v4  ;;  %v1748_v6 = vrot.slane %v23660_v50, 1  ;;  %v18997_v4 = vld [vmem:[#allocation2 + $0x260] sm:$0xff] }
 0x158   :  { %v23670_v20 = vshrl.u32 %v18997_v4, 16 }
 0x15a   :  { %15682 = vmatmul.mubr.bf16.gmra.mrb[28].mxu0 %v1670_v39  ;;  %v1712_v39 = vrot.slane %v23653_v43, 1  ;;  %v1457_v43 = vld [vmem:[#allocation2 + $0x238] sm:$0x1] }
 0x15b   :  { %15685 = vmatprep.mubr.bf16.mxu0 %v1682_v63  ;;  %v1715_v63 = vshll.u32 %v1453_v35, 16  ;;  %v23659_v35 = vshll.u32 %v18979_v1, 16 }
 0x15c   :  { %v1713_v33 = vor.u32 %v1712_v39, %v23658_v56  ;;  %v1730_v39 = vsel %vm1478_vm1, %v1725_v34, %v1729_v40  ;;  %v18999_v56 = vld [vmem:[#allocation2 + $0x278] sm:$0xff]  ;;  %v1753_v40 = vrot.slane %v1751_v11, 1  ;;  %v1775_v11 = vshll.u32 %v1463_v21, 16  ;;  %v1467_v21 = vld [vmem:[#allocation2 + $0x2b0] sm:$0x1] }
 0x15d   :  { %v1717_v42 = vrot.slane %v1715_v63, 1  ;;  %v23663_v63 = vshrl.u32 %v18981_v9, 16  ;;  %v23666_v50 = vshll.u32 %v18999_v56, 16 }
 0x15f   :  { %v1718_v27 = vsel %vm1478_vm1, %v1713_v33, %v1717_v42  ;;  %v1749_v34 = vor.u32 %v1748_v6, %v23663_v63  ;;  %v1772_v6 = vrot.slane %v23666_v50, 1  ;;  %v19015_v63 = vld [vmem:[#allocation2 + $0x290] sm:$0xff] }
 0x160   :  { %v23676_v37 = vshrl.u32 %v19015_v63, 16 }
 0x162   :  { %15686 = vmatmul.mubr.bf16.gmra.mrb[32].mxu0 %v1694_v17  ;;  %v1736_v17 = vrot.slane %v23659_v35, 1  ;;  %v1461_v35 = vld [vmem:[#allocation2 + $0x268] sm:$0x1] }
 0x163   :  { %15689 = vmatprep.mubr.bf16.mxu0 %v1706_v46  ;;  %v1739_v46 = vshll.u32 %v1457_v43, 16  ;;  %v23665_v43 = vshll.u32 %v18997_v4, 16 }
 0x164   :  { %v1737_v33 = vor.u32 %v1736_v17, %v23664_v14  ;;  %v1754_v17 = vsel %vm1478_vm1, %v1749_v34, %v1753_v40  ;;  %v19017_v14 = vld [vmem:[#allocation2 + $0x2a8] sm:$0xff]  ;;  %v1777_v40 = vrot.slane %v1775_v11, 1  ;;  %v1799_v11 = vshll.u32 %v1467_v21, 16  ;;  %v1471_v21 = vld [vmem:[#allocation2 + $0x2e0] sm:$0x1] }
 0x165   :  { %v1741_v42 = vrot.slane %v1739_v46, 1  ;;  %v23669_v46 = vshrl.u32 %v18999_v56, 16  ;;  %v23672_v50 = vshll.u32 %v19017_v14, 16 }
 0x167   :  { %v1742_v47 = vsel %vm1478_vm1, %v1737_v33, %v1741_v42  ;;  %v1773_v34 = vor.u32 %v1772_v6, %v23669_v46  ;;  %v1796_v6 = vrot.slane %v23672_v50, 1  ;;  %v19033_v46 = vld [vmem:[#allocation2 + $0x2c0] sm:$0xff] }
 0x168   :  { %v23682_v25 = vshrl.u32 %v19033_v46, 16 }
 0x16a   :  { %15690 = vmatmul.mubr.bf16.gmra.mrb[36].mxu0 %v1718_v27  ;;  %v1760_v27 = vrot.slane %v23665_v43, 1  ;;  %v1465_v43 = vld [vmem:[#allocation2 + $0x298] sm:$0x1] }
 0x16b   :  { %15693 = vmatprep.mubr.bf16.mxu0 %v1730_v39  ;;  %v1763_v39 = vshll.u32 %v1461_v35, 16  ;;  %v23671_v35 = vshll.u32 %v19015_v63, 16 }
 0x16c   :  { %v1761_v33 = vor.u32 %v1760_v27, %v23670_v20  ;;  %v1778_v27 = vsel %vm1478_vm1, %v1773_v34, %v1777_v40  ;;  %v19035_v20 = vld [vmem:[#allocation2 + $0x2d8] sm:$0xff]  ;;  %v1801_v40 = vrot.slane %v1799_v11, 1  ;;  %v1823_v11 = vshll.u32 %v1471_v21, 16  ;;  %v1475_v21 = vld [vmem:[#allocation2 + $0x310] sm:$0x1] }
 0x16d   :  { %v1765_v42 = vrot.slane %v1763_v39, 1  ;;  %v23675_v39 = vshrl.u32 %v19017_v14, 16  ;;  %v23678_v50 = vshll.u32 %v19035_v20, 16 }
 0x16f   :  { %v1766_v62 = vsel %vm1478_vm1, %v1761_v33, %v1765_v42  ;;  %v1797_v34 = vor.u32 %v1796_v6, %v23675_v39  ;;  %v1820_v6 = vrot.slane %v23678_v50, 1  ;;  %v19051_v39 = vld [vmem:[#allocation2 + $0x2f0] sm:$0xff] }
 0x170   :  { %v1828_v2 = vshrl.u32 %v19051_v39, 16 }
 0x172   :  { %15694 = vmatmul.mubr.bf16.gmra.mrb[40].mxu0 %v1742_v47  ;;  %v1784_v47 = vrot.slane %v23671_v35, 1  ;;  %v1469_v35 = vld [vmem:[#allocation2 + $0x2c8] sm:$0x1] }
 0x173   :  { %15697 = vmatprep.mubr.bf16.mxu0 %v1754_v17  ;;  %v1787_v17 = vshll.u32 %v1465_v43, 16  ;;  %v23677_v43 = vshll.u32 %v19033_v46, 16 }
 0x174   :  { %v1785_v33 = vor.u32 %v1784_v47, %v23676_v37  ;;  %v1802_v47 = vsel %vm1478_vm1, %v1797_v34, %v1801_v40  ;;  %v19053_v37 = vld [vmem:[#allocation2 + $0x308] sm:$0xff]  ;;  %v1825_v40 = vrot.slane %v1823_v11, 1  ;;  %v1847_v11 = vshll.u32 %v1475_v21, 16 }
 0x175   :  { %v1789_v42 = vrot.slane %v1787_v17, 1  ;;  %v23681_v17 = vshrl.u32 %v19035_v20, 16  ;;  %v23685_v50 = vshll.u32 %v19053_v37, 16 }
 0x177   :  { %v1790_v32 = vsel %vm1478_vm1, %v1785_v33, %v1789_v42  ;;  %v1821_v34 = vor.u32 %v1820_v6, %v23681_v17  ;;  %v1844_v6 = vrot.slane %v23685_v50, 1  ;;  %v19069_v17 = vld [vmem:[#allocation2 + $0x320] sm:$0xff] }
 0x178   :  { %v1852_v21 = vshrl.u32 %v19069_v17, 16 }
 0x17a   :  { %15698 = vmatmul.mubr.bf16.gmra.mrb[44].mxu0 %v1766_v62  ;;  %v1808_v62 = vrot.slane %v23677_v43, 1  ;;  %v1473_v43 = vld [vmem:[#allocation2 + $0x2f8] sm:$0x1] }
 0x17b   :  { %15701 = vmatprep.mubr.bf16.mxu0 %v1778_v27  ;;  %v1811_v27 = vshll.u32 %v1469_v35, 16  ;;  %v23683_v35 = vshll.u32 %v19051_v39, 16 }
 0x17c   :  { %v1809_v33 = vor.u32 %v1808_v62, %v23682_v25  ;;  %v1826_v62 = vsel %vm1478_vm1, %v1821_v34, %v1825_v40  ;;  %v23686_v25 = vshll.u32 %v19069_v17, 16  ;;  %v1849_v34 = vrot.slane %v1847_v11, 1  ;;  %v1477_v40 = vld [vmem:[#allocation2 + $0x328] sm:$0x1]  ;;  %v160_v11 = vld [vmem:[%s23639_s0 + $0x1f8] sm:$0xff] }
 0x17d   :  { %v1813_v42 = vrot.slane %v1811_v27, 1  ;;  %v23687_v27 = vshrl.u32 %v19053_v37, 16 }
 0x17f   :  { %v1814_v18 = vsel %vm1478_vm1, %v1809_v33, %v1813_v42 }
 0x182   :  { %15702 = vmatmul.mubr.bf16.gmra.mrb[48].mxu0 %v1790_v32  ;;  %v1832_v32 = vrot.slane %v23683_v35, 1  ;;  %v2313_v35 = vld [vmem:[#allocation2 + $0x18] sm:$0x80] }
 0x183   :  { %15705 = vmatprep.mubr.bf16.mxu0 %v1802_v47  ;;  %v1835_v47 = vshll.u32 %v1473_v43, 16  ;;  %v1845_v43 = vor.u32 %v1844_v6, %v23687_v27  ;;  %v159_v6 = vld [vmem:[%s23639_s0 + $0x1f0] sm:$0xff] }
 0x184   :  { %v1833_v33 = vor.u32 %v1832_v32, %v1828_v2  ;;  %v2378_v32 = vshrl.u32 %v2313_v35, 16 }
 0x185   :  { %v1837_v42 = vrot.slane %v1835_v47, 1  ;;  %v1850_v50 = vsel %vm1478_vm1, %v1845_v43, %v1849_v34  ;;  %v2384_v47 = vrot.slane %v1492_v38, 7  ;;  %v2315_v34 = vld [vmem:[#allocation2 + $0x30] sm:$0x80] }
 0x186   :  { %v2380_v35 = vrot.slane %v2378_v32, 7  ;;  %v2390_v27 = vshrl.u32 %v2315_v34, 16 }
 0x187   :  { %v1838_v44 = vsel %vm1478_vm1, %v1833_v33, %v1837_v42  ;;  %v19089_v33 = vpack.c.bf16 %v160_v11, %v159_v6  ;;  %v2387_v38 = vor.u32 %v2384_v47, %v1494_v31  ;;  %v2396_v6 = vrot.slane %v1504_v53, 7  ;;  %v2319_v47 = vld [vmem:[#allocation2 + $0x60] sm:$0x80]  ;;  %v2321_v11 = vld [vmem:[#allocation2 + $0x78] sm:$0x80] }
 0x189   :  { %225 = vst [vmem:[#allocation2 + $0x338] sm:$0xff] %v19089_v33  ;;  %v2399_v28 = vor.u32 %v2396_v6, %v1506_v36 }
 0x18a   :  { %15706 = vmatmul.mubr.bf16.gmra.mrb[52].mxu0 %v1814_v18  ;;  %v1856_v18 = vrot.slane %v23686_v25, 1 }
 0x18b   :  { %15709 = vmatprep.mubr.bf16.mxu0 %v1826_v62  ;;  %v1859_v62 = vshll.u32 %v1477_v40, 16  ;;  %v2317_v40 = vld [vmem:[#allocation2 + $0x48] sm:$0x80] }
 0x18c   :  { %v1857_v42 = vor.u32 %v1856_v18, %v1852_v21  ;;  %v2408_v18 = vrot.slane %v1516_v60, 7 }
 0x18d   :  { %v1861_v43 = vrot.slane %v1859_v62, 1  ;;  %v2392_v62 = vrot.slane %v2390_v27, 7  ;;  %v2432_v27 = vrot.slane %v1540_v13, 7  ;;  %v17979_v13 = vld [vmem:[%s23640_s1 + $0x110] sm:$0xff]  }
 0x18e   :  { %v2411_v32 = vor.u32 %v2408_v18, %v1518_v52  ;;  %v2327_v18 = vld [vmem:[#allocation2 + $0xc0] sm:$0x80] }
 0x18f   :  { %v1862_v25 = vsel %vm1478_vm1, %v1857_v42, %v1861_v43  ;;  %v2400_v53 = vsel %vm290_vm0, %v2392_v62, %v2399_v28  ;;  %v2414_v42 = vshrl.u32 %v2319_v47, 16  ;;  %v2420_v43 = vrot.slane %v1528_v61, 7  ;;  %v2329_v62 = vld [vmem:[#allocation2 + $0xd8] sm:$0x80] }
 0x190   :  { %v2435_v61 = vor.u32 %v2432_v27, %v1542_v30  ;;  %v17980_v30 = vld [vmem:[%s23640_s1 + $0x118] sm:$0xff]  }
 0x191   :  { %v2416_v36 = vrot.slane %v2414_v42, 7  ;;  %v2423_v48 = vor.u32 %v2420_v43, %v1530_v58  ;;  %v23873_v42 = vshll.u32 %v18835_v22, 16 }
 0x192   :  { %15710 = vmatmul.mubr.bf16.gmra.mrb[56].mxu0 %v1838_v44  ;;  %v2388_v44 = vsel %vm290_vm0, %v2380_v35, %v2387_v38  ;;  %v2323_v35 = vld [vmem:[#allocation2 + $0x90] sm:$0x80]  ;;  %v2325_v38 = vld [vmem:[#allocation2 + $0xa8] sm:$0x80] }
 0x193   :  { %15713 = vmatprep.mubr.bf16.mxu0 %v1850_v50  ;;  %v2402_v50 = vshrl.u32 %v2317_v40, 16  ;;  %v2424_v34 = vsel %vm290_vm0, %v2416_v36, %v2423_v48  ;;  %v2438_v40 = vshrl.u32 %v2323_v35, 16  ;;  %v2450_v58 = vshrl.u32 %v2325_v38, 16  ;;  %v17983_v36 = vld [vmem:[%s23640_s1 + $0x130] sm:$0xff]   ;;  %v2333_v48 = vld [vmem:[#allocation2 + $0x108] sm:$0x80] }
 0x194   :  { %v23875_v35 = vshrl.u32 %v18859_v55, 16  ;;  %v2498_v38 = vshrl.u32 %v2333_v48, 16  ;;  %v23884_v48 = vshrl.u32 %v18923_v26, 16 }
 0x195   :  { %v2404_v31 = vrot.slane %v2402_v50, 7  ;;  %v2440_v6 = vrot.slane %v2438_v40, 7  ;;  %v2459_v50 = vor.u32 %v2456_v0, %v1566_v24  ;;  %v2480_v24 = vrot.slane %v23872_v19, 7  ;;  %v17984_v40 = vld [vmem:[%s23640_s1 + $0x138] sm:$0xff]  }
 0x196   :  { %v2500_v0 = vrot.slane %v2498_v38, 7  ;;  %v23886_v38 = vshll.u32 %v18923_v26, 16 }
 0x197   :  { %v2412_v60 = vsel %vm290_vm0, %v2404_v31, %v2411_v32  ;;  %v2462_v31 = vshrl.u32 %v2327_v18, 16  ;;  %v23871_v32 = vshrl.u32 %v18835_v22, 16 }
 0x199   :  { %v2468_v47 = vrot.slane %v23871_v32, 7 }
 0x19a   :  { %15714 = vmatmul.mubr.bf16.gmra.mrb[60].mxu0 %v1862_v25  ;;  %v2426_v25 = vshrl.u32 %v2321_v11, 16  ;;  %v17982_v11 = vld [vmem:[%s23640_s1 + $0x128] sm:$0xff]  }
 0x19b   :  { %15733 = vmatprep.mubr.bf16.mxu0 %v2388_v44  ;;  %v2471_v43 = vor.u32 %v2468_v47, %v23873_v42  ;;  %v2341_v42 = vld [vmem:[#allocation2 + $0x168] sm:$0x80] }
 0x19c   :  { %v2428_v52 = vrot.slane %v2426_v25, 7  ;;  %v23874_v25 = vshll.u32 %v18854_v51, 16  ;;  %v23876_v51 = vshrl.u32 %v18878_v10, 16 }
 0x19e   :  { %v2436_v49 = vsel %vm290_vm0, %v2428_v52, %v2435_v61  ;;  %v2483_v27 = vor.u32 %v2480_v24, %v23874_v25  ;;  %v23882_v24 = vshll.u32 %v18904_v57, 16  ;;  %v23883_v25 = vshrl.u32 %v18907_v59, 16 }
 0x1a2   :  { %15734 = vmatmul.mubr.bf16.vlgmr.msra.gmra.mrb[0].mxu0 %v2400_v53  ;;  %v2464_v53 = vrot.slane %v2462_v31, 7 }
 0x1a3   :  { %15798 = vmatpush3.bf16.msra.mxu0 %v18894_v29  ;;  %15737 = vmatprep.mubr.bf16.mxu0 %v2412_v60  ;;  %v2444_v29 = vrot.slane %v1552_v15, 7  ;;  %v2452_v15 = vrot.slane %v2450_v58, 7 }
 0x1a4   :  { %15799 = vmatprep.subr.bf16.mxu0 %v17978_v41  ;;  %v2472_v52 = vsel %vm290_vm0, %v2464_v53, %v2471_v43  ;;  %v2339_v53 = vld [vmem:[#allocation2 + $0x150] sm:$0x80] }
 0x1a5   :  { %v2447_v44 = vor.u32 %v2444_v29, %v1554_v7  ;;  %v2460_v3 = vsel %vm290_vm0, %v2452_v15, %v2459_v50  ;;  %v2474_v7 = vshrl.u32 %v2329_v62, 16  ;;  %v19171_v15 = vld [vmem:[%s23640_s1 + $0x140] sm:$0xff]   ;;  %v2337_v50 = vld [vmem:[#allocation2 + $0x138] sm:$0x80]  ;;  %v23879_v62 = vshrl.u32 %v18883_v12, 16 }
 0x1a6   :  { %v2522_v31 = vshrl.u32 %v2337_v50, 16 }
 0x1a7   :  { %15800 = vmatpush3.bf16.msra.mxu0 %v17978_v41  ;;  %v2448_v28 = vsel %vm290_vm0, %v2440_v6, %v2447_v44  ;;  %v2476_v60 = vrot.slane %v2474_v7, 7  ;;  %v2331_v41 = vld [vmem:[#allocation2 + $0xf0] sm:$0x80]  ;;  %v2335_v44 = vld [vmem:[#allocation2 + $0x120] sm:$0x80] }
 0x1a8   :  { %15801 = vmatprep.subr.bf16.mxu0 %v17979_v13  ;;  %v2486_v61 = vshrl.u32 %v2331_v41, 16  ;;  %v2524_v19 = vrot.slane %v2522_v31, 7  ;;  %v2347_v31 = vld [vmem:[#allocation2 + $0x1e0] sm:$0x80] }
 0x1a9   :  { %v2484_v22 = vsel %vm290_vm0, %v2476_v60, %v2483_v27  ;;  %v2534_v60 = vshrl.u32 %v2339_v53, 16  ;;  %v2540_v27 = vrot.slane %v23883_v25, 7 }
 0x1aa   :  { %15738 = vmatmul.mubr.bf16.gmra.mrb[4].mxu0 %v2424_v34  ;;  %v2504_v34 = vrot.slane %v23876_v51, 7  ;;  %v2488_v29 = vrot.slane %v2486_v61, 7  ;;  %v23885_v61 = vshll.u32 %v18907_v59, 16 }
 0x1ab   :  { %15741 = vmatprep.mubr.bf16.mxu0 %v2436_v49  ;;  %15802 = vmatpush3.bf16.msra.mxu0 %v17979_v13  ;;  %v2492_v13 = vrot.slane %v23875_v35, 7  ;;  %v23877_v49 = vshll.u32 %v18859_v55, 16  ;;  %v2516_v55 = vrot.slane %v23879_v62, 7 }
 0x1ac   :  { %15803 = vmatprep.subr.bf16.mxu0 %v17980_v30  ;;  %v2543_v35 = vor.u32 %v2540_v27, %v23885_v61  ;;  %v23892_v27 = vshll.u32 %v18961_v5, 16  ;;  %v23893_v61 = vshrl.u32 %v18963_v54, 16 }
 0x1ad   :  { %v2495_v58 = vor.u32 %v2492_v13, %v23877_v49  ;;  %v2562_v13 = vshrl.u32 %v18945_v23, 16 }
 0x1af   :  { %15804 = vmatpush3.bf16.msra.mxu0 %v17980_v30  ;;  %v23878_v30 = vshll.u32 %v18878_v10, 16  ;;  %v2496_v18 = vsel %vm290_vm0, %v2488_v29, %v2495_v58  ;;  %v23880_v10 = vshrl.u32 %v18904_v57, 16  ;;  %v2564_v58 = vrot.slane %v2562_v13, 7 }
 0x1b0   :  { %15805 = vmatprep.subr.bf16.mxu0 %v17981_v45 }
 0x1b1   :  { %v2507_v6 = vor.u32 %v2504_v34, %v23878_v30  ;;  %v2528_v32 = vrot.slane %v23880_v10, 7  ;;  %v2343_v34 = vld [vmem:[#allocation2 + $0x180] sm:$0x80]  ;;  %v2349_v10 = vld [vmem:[#allocation2 + $0x1f8] sm:$0x80] }
 0x1b2   :  { %15742 = vmatmul.mubr.bf16.gmra.mrb[8].mxu0 %v2448_v28  ;;  %v2558_v49 = vshrl.u32 %v2343_v34, 16 }
 0x1b3   :  { %15745 = vmatprep.mubr.bf16.mxu0 %v2460_v3  ;;  %15806 = vmatpush3.bf16.msra.mxu0 %v17981_v45  ;;  %v2510_v45 = vshrl.u32 %v2335_v44, 16  ;;  %v2508_v28 = vsel %vm290_vm0, %v2500_v0, %v2507_v6  ;;  %v23881_v3 = vshll.u32 %v18883_v12, 16  ;;  %v2536_v12 = vrot.slane %v2534_v60, 7 }
 0x1b4   :  { %15807 = vmatprep.subr.bf16.mxu0 %v17982_v11  ;;  %v2565_v0 = vshll.u32 %v18945_v23, 16  ;;  %v23887_v44 = vshrl.u32 %v18935_v8, 16 }
 0x1b5   :  { %v2512_v47 = vrot.slane %v2510_v45, 7  ;;  %v2519_v7 = vor.u32 %v2516_v55, %v23881_v3  ;;  %v2544_v29 = vsel %vm290_vm0, %v2536_v12, %v2543_v35  ;;  %v23888_v55 = vshll.u32 %v18935_v8, 16 }
 0x1b6   :  { %v2576_v50 = vrot.slane %v23887_v44, 7  ;;  %v2567_v45 = vor.u32 %v2565_v0, %v2564_v58  ;;  %v23889_v3 = vshrl.u32 %v18943_v16, 16  ;;  %v2612_v35 = vrot.slane %v23893_v61, 7  ;;  %v2355_v44 = vld [vmem:[#allocation2 + $0x240] sm:$0x80] }
 0x1b7   :  { %15808 = vmatpush3.bf16.msra.mxu0 %v17982_v11  ;;  %v2531_v11 = vor.u32 %v2528_v32, %v23882_v24  ;;  %v2520_v43 = vsel %vm290_vm0, %v2512_v47, %v2519_v7  ;;  %v2582_v47 = vshrl.u32 %v2347_v31, 16  ;;  %v2594_v24 = vshrl.u32 %v2349_v10, 16 }
 0x1b8   :  { %15809 = vmatprep.subr.bf16.mxu0 %v17983_v36  ;;  %v2588_v7 = vrot.slane %v23889_v3, 7  ;;  %v23898_v10 = vshrl.u32 %v18997_v4, 16  ;;  %v23899_v3 = vshll.u32 %v18981_v9, 16  ;;  %v23903_v61 = vshll.u32 %v18999_v56, 16 }
 0x1b9   :  { %v2532_v41 = vsel %vm290_vm0, %v2524_v19, %v2531_v11  ;;  %v23890_v11 = vshrl.u32 %v18961_v5, 16  ;;  %v2596_v25 = vrot.slane %v2594_v24, 7  ;;  %v23900_v24 = vshll.u32 %v18997_v4, 16 }
 0x1ba   :  { %15746 = vmatmul.mubr.bf16.gmra.mrb[12].mxu0 %v2472_v52  ;;  %v2552_v52 = vrot.slane %v23884_v48, 7  ;;  %v2353_v48 = vld [vmem:[#allocation2 + $0x228] sm:$0x80] }
 0x1bb   :  { %15749 = vmatprep.mubr.bf16.mxu0 %v2484_v22  ;;  %15810 = vmatpush3.bf16.msra.mxu0 %v17983_v36  ;;  %v2546_v36 = vshrl.u32 %v2341_v42, 16  ;;  %v2600_v53 = vrot.slane %v23890_v11, 7  ;;  %v2584_v42 = vrot.slane %v2582_v47, 7 }
 0x1bc   :  { %15811 = vmatprep.subr.bf16.mxu0 %v17984_v40  ;;  %v2555_v51 = vor.u32 %v2552_v52, %v23886_v38  ;;  %v2618_v38 = vshrl.u32 %v2353_v48, 16  ;;  %v23902_v48 = vshrl.u32 %v19015_v63, 16 }
 0x1bd   :  { %v2548_v22 = vrot.slane %v2546_v36, 7  ;;  %v2351_v36 = vld [vmem:[#allocation2 + $0x210] sm:$0x80] }
 0x1be   :  { %v2606_v12 = vshrl.u32 %v2351_v36, 16  ;;  %v2620_v58 = vrot.slane %v2618_v38, 7  ;;  %v23904_v38 = vshll.u32 %v19015_v63, 16 }
 0x1bf   :  { %15812 = vmatpush3.bf16.msra.mxu0 %v17984_v40  ;;  %v2345_v40 = vld [vmem:[#allocation2 + $0x1c8] sm:$0x80]  ;;  %v2556_v30 = vsel %vm290_vm0, %v2548_v22, %v2555_v51  ;;  %v23894_v51 = vshrl.u32 %v18979_v1, 16 }
 0x1c0   :  { %15877 = vmatprep.subr.bf16.mxu0 %v19171_v15  ;;  %v2570_v6 = vshrl.u32 %v2345_v40, 16  ;;  %v2608_v40 = vrot.slane %v2606_v12, 7 }
 0x1c1   :  { %v2624_v34 = vrot.slane %v23894_v51, 7 }
 0x1c2   :  { %15750 = vmatmul.mubr.bf16.gmra.mrb[16].mxu0 %v2496_v18  ;;  %v2560_v18 = vrot.slane %v2558_v49, 7  ;;  %v2572_v62 = vrot.slane %v2570_v6, 7 }
 0x1c3   :  { %15753 = vmatprep.mubr.bf16.mxu0 %v2508_v28  ;;  %v2579_v28 = vor.u32 %v2576_v50, %v23888_v55  ;;  %v2357_v50 = vld [vmem:[#allocation2 + $0x258] sm:$0x80] }
 0x1c4   :  { %v2568_v32 = vsel %vm290_vm0, %v2560_v18, %v2567_v45  ;;  %v2630_v45 = vshrl.u32 %v2355_v44, 16  ;;  %v2642_v31 = vshrl.u32 %v2357_v50, 16  ;;  %v23906_v50 = vshrl.u32 %v19033_v46, 16 }
 0x1c5   :  { %v2580_v19 = vsel %vm290_vm0, %v2572_v62, %v2579_v28  ;;  %v23897_v62 = vshrl.u32 %v18981_v9, 16 }
 0x1c6   :  { %v2632_v47 = vrot.slane %v2630_v45, 7 }
 0x1c7   :  { %v2636_v55 = vrot.slane %v23897_v62, 7  ;;  %v23907_v62 = vshll.u32 %v19017_v14, 16 }
 0x1ca   :  { %15754 = vmatmul.mubr.bf16.gmra.mrb[20].mxu0 %v2520_v43  ;;  %v23891_v43 = vshll.u32 %v18943_v16, 16 }
 0x1cb   :  { %15757 = vmatprep.mubr.bf16.mxu0 %v2532_v41  ;;  %v2603_v41 = vor.u32 %v2600_v53, %v23892_v27  ;;  %v2359_v53 = vld [vmem:[#allocation2 + $0x270] sm:$0x80] }
 0x1cc   :  { %v2591_v60 = vor.u32 %v2588_v7, %v23891_v43  ;;  %v2639_v7 = vor.u32 %v2636_v55, %v23899_v3 }
 0x1cd   :  { %v2604_v22 = vsel %vm290_vm0, %v2596_v25, %v2603_v41  ;;  %v23901_v25 = vshrl.u32 %v18999_v56, 16 }
 0x1ce   :  { %v2592_v52 = vsel %vm290_vm0, %v2584_v42, %v2591_v60  ;;  %v2361_v42 = vld [vmem:[#allocation2 + $0x288] sm:$0x80]  ;;  %v2640_v43 = vsel %vm290_vm0, %v2632_v47, %v2639_v7  ;;  %v2654_v60 = vshrl.u32 %v2359_v53, 16 }
 0x1cf   :  { %v2660_v27 = vrot.slane %v23901_v25, 7  ;;  %v2666_v36 = vshrl.u32 %v2361_v42, 16  ;;  %v2369_v47 = vld [vmem:[#allocation2 + $0x2e8] sm:$0x80]  ;;  %v2720_v42 = vrot.slane %v1828_v2, 7 }
 0x1d0   :  { %v2656_v12 = vrot.slane %v2654_v60, 7  ;;  %v2714_v53 = vshrl.u32 %v2369_v47, 16  ;;  %v23910_v60 = vshll.u32 %v19035_v20, 16  ;;  %v18115_v47 = vld [vmem:[#allocation2 + $0x38] sm:$0xff] }
 0x1d2   :  { %15758 = vmatmul.mubr.bf16.gmra.mrb[24].mxu0 %v2544_v29  ;;  %v23895_v29 = vshll.u32 %v18963_v54, 16 }
 0x1d3   :  { %15761 = vmatprep.mubr.bf16.mxu0 %v2556_v30  ;;  %v23896_v30 = vshll.u32 %v18979_v1, 16 }
 0x1d4   :  { %v2615_v49 = vor.u32 %v2612_v35, %v23895_v29  ;;  %v2663_v35 = vor.u32 %v2660_v27, %v23903_v61  ;;  %v2716_v27 = vrot.slane %v2714_v53, 7  ;;  %v17990_v53 = vld [vmem:[%s23640_s1 + $0x168] sm:$0xff]  }
 0x1d5   :  { %v2627_v6 = vor.u32 %v2624_v34, %v23896_v30  ;;  %v2363_v34 = vld [vmem:[#allocation2 + $0x2a0] sm:$0x80] }
 0x1d6   :  { %v2616_v18 = vsel %vm290_vm0, %v2608_v40, %v2615_v49  ;;  %v2365_v40 = vld [vmem:[#allocation2 + $0x2b8] sm:$0x80]  ;;  %v2664_v29 = vsel %vm290_vm0, %v2656_v12, %v2663_v35  ;;  %v2678_v49 = vshrl.u32 %v2363_v34, 16  ;;  %v23912_v35 = vshrl.u32 %v19053_v37, 16 }
 0x1d7   :  { %v2628_v28 = vsel %vm290_vm0, %v2620_v58, %v2627_v6  ;;  %v23905_v58 = vshrl.u32 %v19017_v14, 16  ;;  %v2690_v44 = vshrl.u32 %v2365_v40, 16  ;;  %v23913_v40 = vshll.u32 %v19053_v37, 16 }
 0x1d8   :  { %v2680_v45 = vrot.slane %v2678_v49, 7  ;;  %v2754_v49 = vshrl.u32 %v19089_v33, 16 }
 0x1d9   :  { %v2684_v30 = vrot.slane %v23905_v58, 7 }
 0x1da   :  { %15762 = vmatmul.mubr.bf16.gmra.mrb[28].mxu0 %v2568_v32  ;;  %v2648_v32 = vrot.slane %v23898_v10, 7 }
 0x1db   :  { %15765 = vmatprep.mubr.bf16.mxu0 %v2580_v19  ;;  %v2644_v19 = vrot.slane %v2642_v31, 7  ;;  %v2687_v55 = vor.u32 %v2684_v30, %v23907_v62  ;;  %v23908_v31 = vshll.u32 %v19033_v46, 16  ;;  %v23914_v30 = vshll.u32 %v19069_v17, 16 }
 0x1dc   :  { %v2651_v11 = vor.u32 %v2648_v32, %v23900_v24  ;;  %v2367_v32 = vld [vmem:[#allocation2 + $0x2d0] sm:$0x80] }
 0x1dd   :  { %v2688_v3 = vsel %vm290_vm0, %v2680_v45, %v2687_v55  ;;  %v2702_v7 = vshrl.u32 %v2367_v32, 16  ;;  %v2756_v45 = vrot.slane %v2754_v49, 7  ;;  %v17986_v32 = vld [vmem:[%s23640_s1 + $0x148] sm:$0xff]  }
 0x1de   :  { %v2652_v41 = vsel %vm290_vm0, %v2644_v19, %v2651_v11  ;;  %v23909_v19 = vshrl.u32 %v19035_v20, 16 }
 0x1e0   :  { %v2708_v24 = vrot.slane %v23909_v19, 7  ;;  %v17988_v19 = vld [vmem:[%s23640_s1 + $0x158] sm:$0xff]  }
 0x1e2   :  { %15766 = vmatmul.mubr.bf16.gmra.mrb[32].mxu0 %v2592_v52  ;;  %v2672_v52 = vrot.slane %v23902_v48, 7  ;;  %v2711_v25 = vor.u32 %v2708_v24, %v23910_v60  ;;  %v2371_v48 = vld [vmem:[#allocation2 + $0x300] sm:$0x80]  ;;  %v18117_v24 = vld [vmem:[#allocation2 + $0x68] sm:$0xff]  ;;  %v17991_v60 = vld [vmem:[%s23640_s1 + $0x170] sm:$0xff]  }
 0x1e3   :  { %15769 = vmatprep.mubr.bf16.mxu0 %v2604_v22  ;;  %v2668_v22 = vrot.slane %v2666_v36, 7  ;;  %v2726_v61 = vshrl.u32 %v2371_v48, 16  ;;  %v18123_v48 = vld [vmem:[#allocation2 + $0xf8] sm:$0xff] }
 0x1e4   :  { %v2675_v51 = vor.u32 %v2672_v52, %v23904_v38  ;;  %v2373_v52 = vld [vmem:[#allocation2 + $0x318] sm:$0x80] }
 0x1e5   :  { %v2738_v38 = vshrl.u32 %v2373_v52, 16  ;;  %v2728_v34 = vrot.slane %v2726_v61, 7  ;;  %v18124_v52 = vld [vmem:[#allocation2 + $0x110] sm:$0xff] }
 0x1e6   :  { %v2676_v6 = vsel %vm290_vm0, %v2668_v22, %v2675_v51  ;;  %v2732_v22 = vrot.slane %v23912_v35, 7  ;;  %v2744_v51 = vrot.slane %v1852_v21, 7  ;;  %v2757_v21 = vshll.u32 %v19089_v33, 16 }
 0x1e7   :  { %v2740_v58 = vrot.slane %v2738_v38, 7  ;;  %v19347_v38 = vld [vmem:[#allocation2 + $0x80] sm:$0xff] }
 0x1ea   :  { %15770 = vmatmul.mubr.bf16.gmra.mrb[36].mxu0 %v2616_v18  ;;  %v2696_v18 = vrot.slane %v23906_v50, 7 }
 0x1eb   :  { %15773 = vmatprep.mubr.bf16.mxu0 %v2628_v28  ;;  %v2692_v28 = vrot.slane %v2690_v44, 7  ;;  %v2375_v44 = vld [vmem:[#allocation2 + $0x330] sm:$0x80] }
 0x1ec   :  { %v2699_v10 = vor.u32 %v2696_v18, %v23908_v31  ;;  %v2750_v18 = vshrl.u32 %v2375_v44, 16  ;;  %v3638_v44 = vld [vmem:[#allocation2 + $0x88] sm:$0x1] }
 0x1ee   :  { %v2700_v11 = vsel %vm290_vm0, %v2692_v28, %v2699_v10  ;;  %v2752_v55 = vrot.slane %v2750_v18, 7  ;;  %v2759_v28 = vor.u32 %v2757_v21, %v2756_v45  ;;  %v18114_v10 = vld [vmem:[#allocation2 + $0x20] sm:$0xff] }
 0x1f0   :  { %v2760_v31 = vsel %vm290_vm0, %v2752_v55, %v2759_v28  ;;  %v3742_v28 = vshrl.u32 %v19347_v38, 16 }
 0x1f2   :  { %15774 = vmatmul.mubr.bf16.gmra.mrb[40].mxu0 %v2640_v43  ;;  %v2704_v43 = vrot.slane %v2702_v7, 7  ;;  %v17987_v7 = vld [vmem:[%s23640_s1 + $0x150] sm:$0xff]  }
 0x1f3   :  { %15777 = vmatprep.mubr.bf16.mxu0 %v2652_v41  ;;  %v23911_v41 = vshll.u32 %v19051_v39, 16 }
 0x1f4   :  { %v2712_v12 = vsel %vm290_vm0, %v2704_v43, %v2711_v25  ;;  %v18120_v43 = vld [vmem:[#allocation2 + $0xb0] sm:$0xff]  ;;  %v17992_v25 = vld [vmem:[%s23640_s1 + $0x178] sm:$0xff]  }
 0x1f5   :  { %v2723_v36 = vor.u32 %v2720_v42, %v23911_v41  ;;  %v18119_v42 = vld [vmem:[#allocation2 + $0x98] sm:$0xff]  ;;  %v18122_v41 = vld [vmem:[#allocation2 + $0xe0] sm:$0xff] }
 0x1f7   :  { %v2724_v2 = vsel %vm290_vm0, %v2716_v27, %v2723_v36  ;;  %v18121_v27 = vld [vmem:[#allocation2 + $0xc8] sm:$0xff]  ;;  %v19310_v36 = vld [vmem:[%s23640_s1 + $0x180] sm:$0xff]  }
 0x1fa   :  { %15778 = vmatmul.mubr.bf16.gmra.mrb[44].mxu0 %v2664_v29  ;;  %v2735_v29 = vor.u32 %v2732_v22, %v23913_v40 }
 0x1fb   :  { %15781 = vmatprep.mubr.bf16.mxu0 %v2676_v6  ;;  %v2747_v6 = vor.u32 %v2744_v51, %v23914_v30  ;;  %v3636_v30 = vld [vmem:[#allocation2 + $0x70] sm:$0x1] }
 0x1fc   :  { %v2736_v50 = vsel %vm290_vm0, %v2728_v34, %v2735_v29 }
 0x1fd   :  { %v2748_v62 = vsel %vm290_vm0, %v2740_v58, %v2747_v6  ;;  %v3744_v6 = vshll.u32 %v19347_v38, 16 }
 0x202   :  { %15782 = vmatmul.mubr.bf16.gmra.mrb[48].mxu0 %v2688_v3  ;;  %v18116_v3 = vld [vmem:[#allocation2 + $0x50] sm:$0xff] }
 0x203   :  { %15785 = vmatprep.mubr.bf16.mxu0 %v2700_v11  ;;  %v18118_v11 = vld [vmem:[#allocation2 + $0x80] sm:$0xff] }
 0x20a   :  { %15786 = vmatmul.mubr.bf16.gmra.mrb[52].mxu0 %v2712_v12  ;;  %v18125_v12 = vld [vmem:[#allocation2 + $0x128] sm:$0xff] }
 0x20b   :  { %15789 = vmatprep.mubr.bf16.mxu0 %v2724_v2  ;;  %v19345_v2 = vld [vmem:[#allocation2 + $0x68] sm:$0xff] }
 0x20c   :  { %v3732_v40 = vshll.u32 %v19345_v2, 16  ;;  %v3730_v18 = vshrl.u32 %v19345_v2, 16 }
 0x20e   :  { %v3734_v45 = vrot.slane %v3732_v40, 1 }
 0x212   :  { %15790 = vmatmul.mubr.bf16.gmra.mrb[56].mxu0 %v2736_v50 }
 0x213   :  { %15793 = vmatprep.mubr.bf16.mxu0 %v2748_v62  ;;  %v3737_v62 = vshll.u32 %v3636_v30, 16 }
 0x21a   :  { %15794 = vmatmul.mubr.bf16.gmra.mrb[60].mxu0 %v2760_v31  ;;  %v3746_v31 = vrot.slane %v3744_v6, 1 }
 0x21b   :  { %15813 = vmatprep.mubr.bf16.mxu0 %v18114_v10  ;;  %v3749_v10 = vshll.u32 %v3638_v44, 16 }
 0x222   :  { %15814 = vmatmul.mubr.bf16.vlgmr.msra.gmra.mrb[0].mxu0 %v18115_v47  ;;  %v17994_v47 = vld [vmem:[%s23640_s1 + $0x188] sm:$0xff]  }
 0x223   :  { %15878 = vmatpush3.bf16.msra.mxu0 %v19171_v15  ;;  %15817 = vmatprep.mubr.bf16.mxu0 %v18116_v3  ;;  %v17989_v15 = vld [vmem:[%s23640_s1 + $0x160] sm:$0xff]   ;;  %v19369_v3 = vld [vmem:[#allocation2 + $0xb0] sm:$0xff] }
 0x224   :  { %15879 = vmatprep.subr.bf16.mxu0 %v17986_v32 }
 0x227   :  { %15880 = vmatpush3.bf16.msra.mxu0 %v17986_v32  ;;  %v19364_v32 = vld [vmem:[#allocation2 + $0x98] sm:$0xff] }
 0x228   :  { %15881 = vmatprep.subr.bf16.mxu0 %v17987_v7 }
 0x22a   :  { %15818 = vmatmul.mubr.bf16.gmra.mrb[4].mxu0 %v18117_v24  ;;  %v3756_v24 = vshll.u32 %v19364_v32, 16 }
 0x22b   :  { %15821 = vmatprep.mubr.bf16.mxu0 %v18118_v11  ;;  %15882 = vmatpush3.bf16.msra.mxu0 %v17987_v7  ;;  %v3735_v7 = vor.u32 %v3734_v45, %v3730_v18  ;;  %v3747_v11 = vor.u32 %v3746_v31, %v3742_v28  ;;  %v17998_v45 = vld [vmem:[%s23640_s1 + $0x1a8] sm:$0xff]  }
 0x22c   :  { %15883 = vmatprep.subr.bf16.mxu0 %v17988_v19 }
 0x22f   :  { %15884 = vmatpush3.bf16.msra.mxu0 %v17988_v19  ;;  %v3739_v19 = vrot.slane %v3737_v62, 1  ;;  %v19418_v62 = vld [vmem:[#allocation2 + $0x110] sm:$0xff] }
 0x230   :  { %15885 = vmatprep.subr.bf16.mxu0 %v17989_v15 }
 0x232   :  { %15822 = vmatmul.mubr.bf16.gmra.mrb[8].mxu0 %v18119_v42  ;;  %v3768_v42 = vshll.u32 %v19369_v3, 16 }
 0x233   :  { %15825 = vmatprep.mubr.bf16.mxu0 %v18120_v43  ;;  %15886 = vmatpush3.bf16.msra.mxu0 %v17989_v15  ;;  %v3751_v15 = vrot.slane %v3749_v10, 1  ;;  %v17995_v43 = vld [vmem:[%s23640_s1 + $0x190] sm:$0xff]  }
 0x234   :  { %15887 = vmatprep.subr.bf16.mxu0 %v17990_v53 }
 0x237   :  { %15888 = vmatpush3.bf16.msra.mxu0 %v17990_v53  ;;  %v3640_v53 = vld [vmem:[#allocation2 + $0xa0] sm:$0x1] }
 0x238   :  { %15889 = vmatprep.subr.bf16.mxu0 %v17991_v60 }
 0x23a   :  { %15826 = vmatmul.mubr.bf16.gmra.mrb[12].mxu0 %v18121_v27  ;;  %v3754_v27 = vshrl.u32 %v19364_v32, 16 }
 0x23b   :  { %15829 = vmatprep.mubr.bf16.mxu0 %v18122_v41  ;;  %15890 = vmatpush3.bf16.msra.mxu0 %v17991_v60  ;;  %v3642_v60 = vld [vmem:[#allocation2 + $0xb8] sm:$0x1]  ;;  %v3758_v41 = vrot.slane %v3756_v24, 1 }
 0x23c   :  { %15891 = vmatprep.subr.bf16.mxu0 %v17992_v25 }
 0x23f   :  { %15892 = vmatpush3.bf16.msra.mxu0 %v17992_v25  ;;  %v3740_v25 = vsel %vm1478_vm1, %v3735_v7, %v3739_v19  ;;  %v3648_v19 = vld [vmem:[#allocation2 + $0x100] sm:$0x1] }
 0x240   :  { %15957 = vmatprep.subr.bf16.mxu0 %v19310_v36 }
 0x242   :  { %15830 = vmatmul.mubr.bf16.gmra.mrb[16].mxu0 %v18123_v48  ;;  %v3752_v48 = vsel %vm1478_vm1, %v3747_v11, %v3751_v15  ;;  %v23705_v11 = vshll.u32 %v19418_v62, 16  ;;  %v17999_v15 = vld [vmem:[%s23640_s1 + $0x1b0] sm:$0xff]  }
 0x243   :  { %15833 = vmatprep.mubr.bf16.mxu0 %v18124_v52  ;;  %v3766_v52 = vshrl.u32 %v19369_v3, 16 }
 0x24a   :  { %15834 = vmatmul.mubr.bf16.gmra.mrb[20].mxu0 %v18125_v12  ;;  %v3770_v12 = vrot.slane %v3768_v42, 1 }
 0x24b   :  { %15837 = vmatprep.mubr.bf16.mxu0 %v18904_v57  ;;  %v3629_v57 = vld [vmem:[#allocation2 + $0x20] sm:$0xff] }
 0x252   :  { %15838 = vmatmul.mubr.bf16.gmra.mrb[24].mxu0 %v18907_v59  ;;  %v3696_v59 = vshll.u32 %v3629_v57, 16 }
 0x253   :  { %15841 = vmatprep.mubr.bf16.mxu0 %v18923_v26  ;;  %v3694_v26 = vshrl.u32 %v3629_v57, 16  ;;  %v3773_v57 = vshll.u32 %v3642_v60, 16 }
 0x25a   :  { %15842 = vmatmul.mubr.bf16.gmra.mrb[28].mxu0 %v18945_v23 }
 0x25b   :  { %15845 = vmatprep.mubr.bf16.mxu0 %v18935_v8 }
 0x262   :  { %15846 = vmatmul.mubr.bf16.gmra.mrb[32].mxu0 %v18943_v16  ;;  %v19330_v16 = vld [vmem:[#allocation2 + $0x38] sm:$0xff] }
 0x263   :  { %15849 = vmatprep.mubr.bf16.mxu0 %v18961_v5  ;;  %v3630_v5 = vld [vmem:[#allocation2 + $0x28] sm:$0x1] }
 0x264   :  { %v3701_v8 = vshll.u32 %v3630_v5, 16  ;;  %v17996_v5 = vld [vmem:[%s23640_s1 + $0x198] sm:$0xff]  }
 0x26a   :  { %15850 = vmatmul.mubr.bf16.gmra.mrb[36].mxu0 %v18963_v54  ;;  %v3698_v54 = vrot.slane %v3696_v59, 1  ;;  %v19389_v59 = vld [vmem:[#allocation2 + $0xc8] sm:$0xff] }
 0x26b   :  { %15853 = vmatprep.mubr.bf16.mxu0 %v18979_v1  ;;  %v3703_v1 = vrot.slane %v3701_v8, 1 }
 0x272   :  { %15854 = vmatmul.mubr.bf16.gmra.mrb[40].mxu0 %v18981_v9  ;;  %v19332_v9 = vld [vmem:[#allocation2 + $0x50] sm:$0xff] }
 0x273   :  { %15857 = vmatprep.mubr.bf16.mxu0 %v18997_v4  ;;  %v3720_v4 = vshll.u32 %v19332_v9, 16 }
 0x27a   :  { %15858 = vmatmul.mubr.bf16.gmra.mrb[44].mxu0 %v18999_v56  ;;  %v3708_v56 = vshll.u32 %v19330_v16, 16 }
 0x27b   :  { %15861 = vmatprep.mubr.bf16.mxu0 %v19015_v63  ;;  %v3634_v63 = vld [vmem:[#allocation2 + $0x58] sm:$0x1] }
 0x27c   :  { %v3725_v22 = vshll.u32 %v3634_v63, 16  ;;  %v3644_v63 = vld [vmem:[#allocation2 + $0xd0] sm:$0x1] }
 0x27e   :  { %v3727_v58 = vrot.slane %v3725_v22, 1  ;;  %v3778_v22 = vshrl.u32 %v19389_v59, 16 }
 0x280   :  { %v4671_v32 = vrot.slane %v3778_v22, 7 }
 0x282   :  { %15862 = vmatmul.mubr.bf16.gmra.mrb[48].mxu0 %v19017_v14  ;;  %v3699_v14 = vor.u32 %v3698_v54, %v3694_v26  ;;  %v19394_v26 = vld [vmem:[#allocation2 + $0xe0] sm:$0xff]  ;;  %v3759_v54 = vor.u32 %v3758_v41, %v3754_v27  ;;  %v3809_v41 = vshll.u32 %v3648_v19, 16 }
 0x283   :  { %15865 = vmatprep.mubr.bf16.mxu0 %v19033_v46  ;;  %v3706_v46 = vshrl.u32 %v19330_v16, 16 }
 0x284   :  { %v3704_v35 = vsel %vm1478_vm1, %v3699_v14, %v3703_v1  ;;  %v23727_v14 = vshll.u32 %v19389_v59, 16  ;;  %v3771_v1 = vor.u32 %v3770_v12, %v3766_v52  ;;  %v3818_v12 = vrot.slane %v23705_v11, 1 }
 0x28a   :  { %15866 = vmatmul.mubr.bf16.gmra.mrb[52].mxu0 %v19035_v20  ;;  %v3632_v20 = vld [vmem:[#allocation2 + $0x40] sm:$0x1] }
 0x28b   :  { %15869 = vmatprep.mubr.bf16.mxu0 %v19051_v39  ;;  %v3710_v39 = vrot.slane %v3708_v56, 1  ;;  %v3713_v61 = vshll.u32 %v3632_v20, 16  ;;  %v3775_v20 = vrot.slane %v3773_v57, 1 }
 0x28d   :  { %v3711_v51 = vor.u32 %v3710_v39, %v3706_v46  ;;  %v3715_v34 = vrot.slane %v3713_v61, 1  ;;  %v23717_v39 = vshll.u32 %v19394_v26, 16  ;;  %v17997_v61 = vld [vmem:[%s23640_s1 + $0x1a0] sm:$0xff]  }
 0x28f   :  { %v3716_v50 = vsel %vm1478_vm1, %v3711_v51, %v3715_v34  ;;  %v3782_v51 = vrot.slane %v23727_v14, 1  ;;  %v3785_v34 = vshll.u32 %v3644_v63, 16  ;;  %v3794_v30 = vrot.slane %v23717_v39, 1 }
 0x291   :  { %v3787_v31 = vrot.slane %v3785_v34, 1  ;;  %v19453_v34 = vld [vmem:[%s23640_s1 + $0x1c0] sm:$0xff]  }
 0x292   :  { %15870 = vmatmul.mubr.bf16.gmra.mrb[56].mxu0 %v19053_v37  ;;  %v3718_v37 = vshrl.u32 %v19332_v9, 16  ;;  %v18002_v9 = vld [vmem:[%s23640_s1 + $0x1c8] sm:$0xff]  }
 0x293   :  { %15873 = vmatprep.mubr.bf16.mxu0 %v19069_v17  ;;  %v3722_v17 = vrot.slane %v3720_v4, 1 }
 0x295   :  { %v3723_v29 = vor.u32 %v3722_v17, %v3718_v37 }
 0x297   :  { %v3728_v55 = vsel %vm1478_vm1, %v3723_v29, %v3727_v58  ;;  %v3776_v29 = vsel %vm1478_vm1, %v3771_v1, %v3775_v20  ;;  %v23723_v58 = vshrl.u32 %v19394_v26, 16  ;;  %v3811_v20 = vrot.slane %v3809_v41, 1 }
 0x29a   :  { %15874 = vmatmul.mubr.bf16.gmra.mrb[60].mxu0 %v19089_v33  ;;  %v4623_v33 = vrot.slane %v3730_v18, 7 }
 0x29b   :  { %15893 = vmatprep.mubr.bf16.mxu0 %v3704_v35  ;;  %v3646_v35 = vld [vmem:[#allocation2 + $0xe8] sm:$0x1] }
 0x29c   :  { %v3797_v44 = vshll.u32 %v3646_v35, 16 }
 0x29e   :  { %v3799_v7 = vrot.slane %v3797_v44, 1 }
 0x2a2   :  { %15894 = vmatmul.mubr.bf16.vlgmr.msra.gmra.mrb[0].mxu0 %v3716_v50  ;;  %v19413_v50 = vld [vmem:[#allocation2 + $0xf8] sm:$0xff] }
 0x2a3   :  { %15958 = vmatpush3.bf16.msra.mxu0 %v19310_v36  ;;  %15897 = vmatprep.mubr.bf16.mxu0 %v3728_v55  ;;  %v3761_v36 = vshll.u32 %v3640_v53, 16  ;;  %v3783_v55 = vor.u32 %v3782_v51, %v3778_v22  ;;  %v23716_v10 = vshll.u32 %v19413_v50, 16  ;;  %v3650_v53 = vld [vmem:[#allocation2 + $0x118] sm:$0x1]  ;;  %v23722_v60 = vshrl.u32 %v19413_v50, 16  ;;  %v18005_v22 = vld [vmem:[%s23640_s1 + $0x1e0] sm:$0xff]  }
 0x2a4   :  { %15959 = vmatprep.subr.bf16.mxu0 %v17994_v47  ;;  %v3821_v57 = vshll.u32 %v3650_v53, 16  ;;  %v19466_v53 = vld [vmem:[#allocation2 + $0x170] sm:$0xff] }
 0x2a5   :  { %v3763_v8 = vrot.slane %v3761_v36, 1 }
 0x2a6   :  { %v3823_v35 = vrot.slane %v3821_v57, 1  ;;  %v3656_v57 = vld [vmem:[#allocation2 + $0x160] sm:$0x1] }
 0x2a7   :  { %15960 = vmatpush3.bf16.msra.mxu0 %v17994_v47  ;;  %v3764_v17 = vsel %vm1478_vm1, %v3759_v54, %v3763_v8  ;;  %v3795_v47 = vor.u32 %v3794_v30, %v23723_v58  ;;  %v18000_v54 = vld [vmem:[%s23640_s1 + $0x1b8] sm:$0xff]   ;;  %v19442_v8 = vld [vmem:[#allocation2 + $0x140] sm:$0xff] }
 0x2a8   :  { %15961 = vmatprep.subr.bf16.mxu0 %v17995_v43  ;;  %v23690_v51 = vshll.u32 %v19442_v8, 16 }
 0x2a9   :  { %v3800_v36 = vsel %vm1478_vm1, %v3795_v47, %v3799_v7  ;;  %v23691_v47 = vshrl.u32 %v19442_v8, 16 }
 0x2aa   :  { %15898 = vmatmul.mubr.bf16.gmra.mrb[4].mxu0 %v3740_v25  ;;  %v3806_v25 = vrot.slane %v23716_v10, 1  ;;  %v3842_v7 = vrot.slane %v23690_v51, 1 }
 0x2ab   :  { %15901 = vmatprep.mubr.bf16.mxu0 %v3752_v48  ;;  %15962 = vmatpush3.bf16.msra.mxu0 %v17995_v43  ;;  %v3788_v43 = vsel %vm1478_vm1, %v3783_v55, %v3787_v31  ;;  %v23711_v48 = vshrl.u32 %v19418_v62, 16 }
 0x2ac   :  { %15963 = vmatprep.subr.bf16.mxu0 %v17996_v5  ;;  %v3807_v1 = vor.u32 %v3806_v25, %v23722_v60 }
 0x2ae   :  { %v3812_v30 = vsel %vm1478_vm1, %v3807_v1, %v3811_v20  ;;  %v3658_v1 = vld [vmem:[#allocation2 + $0x178] sm:$0x1] }
 0x2af   :  { %15964 = vmatpush3.bf16.msra.mxu0 %v17996_v5  ;;  %v19437_v5 = vld [vmem:[#allocation2 + $0x128] sm:$0xff] }
 0x2b0   :  { %15965 = vmatprep.subr.bf16.mxu0 %v17997_v61  ;;  %v23704_v63 = vshll.u32 %v19437_v5, 16  ;;  %v23710_v44 = vshrl.u32 %v19437_v5, 16 }
 0x2b2   :  { %15902 = vmatmul.mubr.bf16.gmra.mrb[8].mxu0 %v3764_v17  ;;  %v3652_v17 = vld [vmem:[#allocation2 + $0x130] sm:$0x1] }
 0x2b3   :  { %15905 = vmatprep.mubr.bf16.mxu0 %v3776_v29  ;;  %15966 = vmatpush3.bf16.msra.mxu0 %v17997_v61  ;;  %v3819_v61 = vor.u32 %v3818_v12, %v23711_v48  ;;  %v3654_v29 = vld [vmem:[#allocation2 + $0x148] sm:$0x1]  ;;  %v3833_v55 = vshll.u32 %v3652_v17, 16  ;;  %v3857_v17 = vshll.u32 %v3656_v57, 16  ;;  %v3660_v57 = vld [vmem:[#allocation2 + $0x190] sm:$0x1] }
 0x2b4   :  { %15967 = vmatprep.subr.bf16.mxu0 %v17998_v45  ;;  %v3845_v19 = vshll.u32 %v3654_v29, 16 }
 0x2b5   :  { %v3824_v31 = vsel %vm1478_vm1, %v3819_v61, %v3823_v35  ;;  %v3835_v25 = vrot.slane %v3833_v55, 1  ;;  %v3869_v55 = vshll.u32 %v3658_v1, 16  ;;  %v3881_v1 = vshll.u32 %v3660_v57, 16  ;;  %v3664_v57 = vld [vmem:[#allocation2 + $0x1f0] sm:$0x1] }
 0x2b6   :  { %v3847_v12 = vrot.slane %v3845_v19, 1  ;;  %v3859_v19 = vrot.slane %v3857_v17, 1  ;;  %v19492_v17 = vld [vmem:[#allocation2 + $0x200] sm:$0xff] }
 0x2b7   :  { %15968 = vmatpush3.bf16.msra.mxu0 %v17998_v45  ;;  %v3830_v45 = vrot.slane %v23704_v63, 1 }
 0x2b8   :  { %15969 = vmatprep.subr.bf16.mxu0 %v17999_v15 }
 0x2ba   :  { %15906 = vmatmul.mubr.bf16.gmra.mrb[12].mxu0 %v3788_v43  ;;  %v3831_v43 = vor.u32 %v3830_v45, %v23710_v44 }
 0x2bb   :  { %15909 = vmatprep.mubr.bf16.mxu0 %v3800_v36  ;;  %15970 = vmatpush3.bf16.msra.mxu0 %v17999_v15  ;;  %v19463_v15 = vld [vmem:[#allocation2 + $0x158] sm:$0xff]  ;;  %v3843_v36 = vor.u32 %v3842_v7, %v23691_v47 }
 0x2bc   :  { %15971 = vmatprep.subr.bf16.mxu0 %v18000_v54  ;;  %v23688_v41 = vshll.u32 %v19463_v15, 16  ;;  %v3836_v20 = vsel %vm1478_vm1, %v3831_v43, %v3835_v25  ;;  %v23699_v61 = vshrl.u32 %v19463_v15, 16  ;;  %v3871_v25 = vrot.slane %v3869_v55, 1 }
 0x2bd   :  { %v3848_v29 = vsel %vm1478_vm1, %v3843_v36, %v3847_v12  ;;  %v3662_v36 = vld [vmem:[#allocation2 + $0x1d8] sm:$0x1]  ;;  %v3883_v55 = vrot.slane %v3881_v1, 1  ;;  %v19508_v1 = vld [vmem:[#allocation2 + $0x230] sm:$0xff] }
 0x2be   :  { %v3854_v35 = vrot.slane %v23688_v41, 1  ;;  %v3893_v47 = vshll.u32 %v3662_v36, 16 }
 0x2bf   :  { %15972 = vmatpush3.bf16.msra.mxu0 %v18000_v54  ;;  %v23689_v54 = vshll.u32 %v19466_v53, 16 }
 0x2c0   :  { %16037 = vmatprep.subr.bf16.mxu0 %v19453_v34  ;;  %v3855_v7 = vor.u32 %v3854_v35, %v23699_v61  ;;  %v19490_v35 = vld [vmem:[#allocation2 + $0x1e8] sm:$0xff] }
 0x2c1   :  { %v3866_v45 = vrot.slane %v23689_v54, 1  ;;  %v3878_v54 = vrot.slane %v2565_v0, 1  ;;  %v3895_v0 = vrot.slane %v3893_v47, 1 }
 0x2c2   :  { %15910 = vmatmul.mubr.bf16.gmra.mrb[16].mxu0 %v3812_v30  ;;  %v23698_v30 = vshrl.u32 %v19466_v53, 16  ;;  %v3860_v12 = vsel %vm1478_vm1, %v3855_v7, %v3859_v19  ;;  %v23693_v7 = vshll.u32 %v19490_v35, 16 }
 0x2c3   :  { %15913 = vmatprep.mubr.bf16.mxu0 %v3824_v31  ;;  %v3661_v31 = vld [vmem:[#allocation2 + $0x1d0] sm:$0xff] }
 0x2c4   :  { %v3867_v43 = vor.u32 %v3866_v45, %v23698_v30  ;;  %v3888_v41 = vshll.u32 %v3661_v31, 16  ;;  %v3879_v45 = vor.u32 %v3878_v54, %v2562_v13  ;;  %v3902_v36 = vrot.slane %v23693_v7, 1  ;;  %v19506_v54 = vld [vmem:[#allocation2 + $0x218] sm:$0xff] }
 0x2c5   :  { %v23694_v13 = vshrl.u32 %v19492_v17, 16  ;;  %v23701_v7 = vshrl.u32 %v19506_v54, 16 }
 0x2c6   :  { %v3890_v51 = vrot.slane %v3888_v41, 1  ;;  %v3884_v41 = vsel %vm1478_vm1, %v3879_v45, %v3883_v55  ;;  %v23696_v45 = vshll.u32 %v19506_v54, 16 }
 0x2ca   :  { %15914 = vmatmul.mubr.bf16.gmra.mrb[20].mxu0 %v3836_v20  ;;  %v3872_v20 = vsel %vm1478_vm1, %v3867_v43, %v3871_v25  ;;  %v23692_v43 = vshll.u32 %v19492_v17, 16  ;;  %v23695_v25 = vshrl.u32 %v19490_v35, 16 }
 0x2cb   :  { %15917 = vmatprep.mubr.bf16.mxu0 %v3848_v29  ;;  %v3886_v29 = vshrl.u32 %v3661_v31, 16  ;;  %v3666_v31 = vld [vmem:[#allocation2 + $0x208] sm:$0x1] }
 0x2cc   :  { %v3917_v47 = vshll.u32 %v3666_v31, 16  ;;  %v3670_v31 = vld [vmem:[#allocation2 + $0x238] sm:$0x1] }
 0x2cd   :  { %v3891_v19 = vor.u32 %v3890_v51, %v3886_v29  ;;  %v3914_v51 = vrot.slane %v23692_v43, 1 }
 0x2cf   :  { %v3896_v23 = vsel %vm1478_vm1, %v3891_v19, %v3895_v0  ;;  %v3915_v55 = vor.u32 %v3914_v51, %v23694_v13  ;;  %v3919_v19 = vrot.slane %v3917_v47, 1  ;;  %v3668_v0 = vld [vmem:[#allocation2 + $0x220] sm:$0x1]  ;;  %v3941_v47 = vshll.u32 %v3670_v31, 16  ;;  %v19524_v13 = vld [vmem:[#allocation2 + $0x248] sm:$0xff] }
 0x2d0   :  { %v3674_v31 = vld [vmem:[#allocation2 + $0x268] sm:$0x1]  ;;  %v23707_v61 = vshrl.u32 %v19524_v13, 16 }
 0x2d2   :  { %15918 = vmatmul.mubr.bf16.gmra.mrb[24].mxu0 %v3860_v12  ;;  %v3905_v12 = vshll.u32 %v3664_v57, 16  ;;  %v23697_v57 = vshll.u32 %v19508_v1, 16 }
 0x2d3   :  { %15921 = vmatprep.mubr.bf16.mxu0 %v3872_v20  ;;  %v3903_v20 = vor.u32 %v3902_v36, %v23695_v25  ;;  %v3920_v36 = vsel %vm1478_vm1, %v3915_v55, %v3919_v19  ;;  %v19526_v25 = vld [vmem:[#allocation2 + $0x260] sm:$0xff]  ;;  %v3943_v19 = vrot.slane %v3941_v47, 1  ;;  %v3965_v47 = vshll.u32 %v3674_v31, 16  ;;  %v3678_v31 = vld [vmem:[#allocation2 + $0x298] sm:$0x1] }
 0x2d4   :  { %v3907_v29 = vrot.slane %v3905_v12, 1  ;;  %v23700_v12 = vshrl.u32 %v19508_v1, 16  ;;  %v3938_v51 = vrot.slane %v23697_v57, 1  ;;  %v23703_v57 = vshll.u32 %v19526_v25, 16 }
 0x2d6   :  { %v3908_v43 = vsel %vm1478_vm1, %v3903_v20, %v3907_v29  ;;  %v3939_v55 = vor.u32 %v3938_v51, %v23700_v12  ;;  %v3962_v51 = vrot.slane %v23703_v57, 1  ;;  %v19542_v12 = vld [vmem:[#allocation2 + $0x278] sm:$0xff] }
 0x2d7   :  { %v23713_v11 = vshrl.u32 %v19542_v12, 16 }
 0x2da   :  { %15922 = vmatmul.mubr.bf16.gmra.mrb[28].mxu0 %v3884_v41  ;;  %v3926_v41 = vrot.slane %v23696_v45, 1  ;;  %v3672_v45 = vld [vmem:[#allocation2 + $0x250] sm:$0x1] }
 0x2db   :  { %15925 = vmatprep.mubr.bf16.mxu0 %v3896_v23  ;;  %v3929_v23 = vshll.u32 %v3668_v0, 16  ;;  %v23702_v0 = vshll.u32 %v19524_v13, 16 }
 0x2dc   :  { %v3927_v20 = vor.u32 %v3926_v41, %v23701_v7  ;;  %v3944_v41 = vsel %vm1478_vm1, %v3939_v55, %v3943_v19  ;;  %v19544_v7 = vld [vmem:[#allocation2 + $0x290] sm:$0xff]  ;;  %v3967_v19 = vrot.slane %v3965_v47, 1  ;;  %v3989_v47 = vshll.u32 %v3678_v31, 16  ;;  %v3682_v31 = vld [vmem:[#allocation2 + $0x2c8] sm:$0x1] }
 0x2dd   :  { %v3931_v29 = vrot.slane %v3929_v23, 1  ;;  %v23706_v23 = vshrl.u32 %v19526_v25, 16  ;;  %v23709_v57 = vshll.u32 %v19544_v7, 16 }
 0x2df   :  { %v3932_v30 = vsel %vm1478_vm1, %v3927_v20, %v3931_v29  ;;  %v3963_v55 = vor.u32 %v3962_v51, %v23706_v23  ;;  %v3986_v51 = vrot.slane %v23709_v57, 1  ;;  %v19560_v23 = vld [vmem:[#allocation2 + $0x2a8] sm:$0xff] }
 0x2e0   :  { %v23719_v48 = vshrl.u32 %v19560_v23, 16 }
 0x2e2   :  { %15926 = vmatmul.mubr.bf16.gmra.mrb[32].mxu0 %v3908_v43  ;;  %v3950_v43 = vrot.slane %v23702_v0, 1  ;;  %v3676_v0 = vld [vmem:[#allocation2 + $0x280] sm:$0x1] }
 0x2e3   :  { %15929 = vmatprep.mubr.bf16.mxu0 %v3920_v36  ;;  %v3953_v36 = vshll.u32 %v3672_v45, 16  ;;  %v23708_v45 = vshll.u32 %v19542_v12, 16 }
 0x2e4   :  { %v3951_v20 = vor.u32 %v3950_v43, %v23707_v61  ;;  %v3968_v43 = vsel %vm1478_vm1, %v3963_v55, %v3967_v19  ;;  %v19562_v61 = vld [vmem:[#allocation2 + $0x2c0] sm:$0xff]  ;;  %v3991_v19 = vrot.slane %v3989_v47, 1  ;;  %v4013_v47 = vshll.u32 %v3682_v31, 16  ;;  %v3686_v31 = vld [vmem:[#allocation2 + $0x2f8] sm:$0x1] }
 0x2e5   :  { %v3955_v29 = vrot.slane %v3953_v36, 1  ;;  %v23712_v36 = vshrl.u32 %v19544_v7, 16  ;;  %v23715_v57 = vshll.u32 %v19562_v61, 16 }
 0x2e7   :  { %v3956_v63 = vsel %vm1478_vm1, %v3951_v20, %v3955_v29  ;;  %v3987_v55 = vor.u32 %v3986_v51, %v23712_v36  ;;  %v4010_v51 = vrot.slane %v23715_v57, 1  ;;  %v19578_v36 = vld [vmem:[#allocation2 + $0x2d8] sm:$0xff] }
 0x2e8   :  { %v23725_v39 = vshrl.u32 %v19578_v36, 16 }
 0x2ea   :  { %15930 = vmatmul.mubr.bf16.gmra.mrb[36].mxu0 %v3932_v30  ;;  %v3974_v30 = vrot.slane %v23708_v45, 1  ;;  %v3680_v45 = vld [vmem:[#allocation2 + $0x2b0] sm:$0x1] }
 0x2eb   :  { %15933 = vmatprep.mubr.bf16.mxu0 %v3944_v41  ;;  %v3977_v41 = vshll.u32 %v3676_v0, 16  ;;  %v23714_v0 = vshll.u32 %v19560_v23, 16 }
 0x2ec   :  { %v3975_v20 = vor.u32 %v3974_v30, %v23713_v11  ;;  %v3992_v30 = vsel %vm1478_vm1, %v3987_v55, %v3991_v19  ;;  %v19580_v11 = vld [vmem:[#allocation2 + $0x2f0] sm:$0xff]  ;;  %v4015_v19 = vrot.slane %v4013_v47, 1  ;;  %v4037_v47 = vshll.u32 %v3686_v31, 16  ;;  %v3690_v31 = vld [vmem:[#allocation2 + $0x328] sm:$0x1] }
 0x2ed   :  { %v3979_v29 = vrot.slane %v3977_v41, 1  ;;  %v23718_v41 = vshrl.u32 %v19562_v61, 16  ;;  %v23721_v57 = vshll.u32 %v19580_v11, 16 }
 0x2ef   :  { %v3980_v44 = vsel %vm1478_vm1, %v3975_v20, %v3979_v29  ;;  %v4011_v55 = vor.u32 %v4010_v51, %v23718_v41  ;;  %v4034_v51 = vrot.slane %v23721_v57, 1  ;;  %v19596_v41 = vld [vmem:[#allocation2 + $0x308] sm:$0xff] }
 0x2f0   :  { %v4042_v58 = vshrl.u32 %v19596_v41, 16 }
 0x2f2   :  { %15934 = vmatmul.mubr.bf16.gmra.mrb[40].mxu0 %v3956_v63  ;;  %v3998_v63 = vrot.slane %v23714_v0, 1  ;;  %v3684_v0 = vld [vmem:[#allocation2 + $0x2e0] sm:$0x1] }
 0x2f3   :  { %15937 = vmatprep.mubr.bf16.mxu0 %v3968_v43  ;;  %v4001_v43 = vshll.u32 %v3680_v45, 16  ;;  %v23720_v45 = vshll.u32 %v19578_v36, 16 }
 0x2f4   :  { %v3999_v20 = vor.u32 %v3998_v63, %v23719_v48  ;;  %v4016_v63 = vsel %vm1478_vm1, %v4011_v55, %v4015_v19  ;;  %v19598_v48 = vld [vmem:[#allocation2 + $0x320] sm:$0xff]  ;;  %v4039_v19 = vrot.slane %v4037_v47, 1  ;;  %v4061_v47 = vshll.u32 %v3690_v31, 16 }
 0x2f5   :  { %v4003_v29 = vrot.slane %v4001_v43, 1  ;;  %v23724_v43 = vshrl.u32 %v19580_v11, 16  ;;  %v4056_v57 = vshll.u32 %v19598_v48, 16 }
 0x2f7   :  { %v4004_v10 = vsel %vm1478_vm1, %v3999_v20, %v4003_v29  ;;  %v4035_v55 = vor.u32 %v4034_v51, %v23724_v43  ;;  %v4058_v51 = vrot.slane %v4056_v57, 1 }
 0x2fa   :  { %15938 = vmatmul.mubr.bf16.gmra.mrb[44].mxu0 %v3980_v44  ;;  %v4022_v44 = vrot.slane %v23720_v45, 1  ;;  %v3688_v45 = vld [vmem:[#allocation2 + $0x310] sm:$0x1] }
 0x2fb   :  { %15941 = vmatprep.mubr.bf16.mxu0 %v3992_v30  ;;  %v4025_v30 = vshll.u32 %v3684_v0, 16  ;;  %v23726_v0 = vshll.u32 %v19596_v41, 16 }
 0x2fc   :  { %v4023_v20 = vor.u32 %v4022_v44, %v23725_v39  ;;  %v4040_v44 = vsel %vm1478_vm1, %v4035_v55, %v4039_v19  ;;  %v4063_v39 = vrot.slane %v4061_v47, 1  ;;  %v4070_v19 = vrot.slane %v2757_v21, 1  ;;  %v4530_v47 = vld [vmem:[#allocation2 + $0x48] sm:$0x80] }
 0x2fd   :  { %v4027_v29 = vrot.slane %v4025_v30, 1  ;;  %v4054_v30 = vshrl.u32 %v19598_v48, 16 }
 0x2ff   :  { %v4028_v60 = vsel %vm1478_vm1, %v4023_v20, %v4027_v29  ;;  %v4059_v29 = vor.u32 %v4058_v51, %v4054_v30 }
 0x301   :  { %v4064_v31 = vsel %vm1478_vm1, %v4059_v29, %v4063_v39  ;;  %v4611_v39 = vrot.slane %v3718_v37, 7 }
 0x302   :  { %15942 = vmatmul.mubr.bf16.gmra.mrb[48].mxu0 %v4004_v10  ;;  %v4046_v10 = vrot.slane %v23726_v0, 1  ;;  %v3692_v0 = vld [vmem:[#allocation2 + $0x340] sm:$0x1] }
 0x303   :  { %15945 = vmatprep.mubr.bf16.mxu0 %v4016_v63  ;;  %v4049_v63 = vshll.u32 %v3688_v45, 16  ;;  %v4528_v45 = vld [vmem:[#allocation2 + $0x30] sm:$0x80]  ;;  %v4073_v14 = vshll.u32 %v3692_v0, 16  ;;  %v4605_v0 = vshrl.u32 %v4530_v47, 16  ;;  %v4614_v16 = vor.u32 %v4611_v39, %v3720_v4 }
 0x304   :  { %v4047_v43 = vor.u32 %v4046_v10, %v4042_v58  ;;  %v4071_v10 = vor.u32 %v4070_v19, %v2754_v49  ;;  %v4542_v39 = vld [vmem:[#allocation2 + $0xd8] sm:$0x80] }
 0x305   :  { %v4051_v20 = vrot.slane %v4049_v63, 1  ;;  %v4075_v63 = vrot.slane %v4073_v14, 1  ;;  %v4607_v49 = vrot.slane %v4605_v0, 7  ;;  %v4626_v14 = vor.u32 %v4623_v33, %v3732_v40 }
 0x306   :  { %v4677_v33 = vshrl.u32 %v4542_v39, 16 }
 0x307   :  { %v4052_v55 = vsel %vm1478_vm1, %v4047_v43, %v4051_v20  ;;  %v4532_v20 = vld [vmem:[#allocation2 + $0x60] sm:$0x80]  ;;  %v4076_v21 = vsel %vm1478_vm1, %v4071_v10, %v4075_v63  ;;  %v4615_v37 = vsel %vm290_vm0, %v4607_v49, %v4614_v16  ;;  %v4538_v10 = vld [vmem:[#allocation2 + $0xa8] sm:$0x80]  ;;  %v23916_v49 = vshrl.u32 %v19394_v26, 16 }
 0x308   :  { %v4617_v29 = vshrl.u32 %v4532_v20, 16  ;;  %v4540_v63 = vld [vmem:[#allocation2 + $0xc0] sm:$0x80] }
 0x309   :  { %v4683_v16 = vrot.slane %v23916_v49, 7 }
 0x30a   :  { %15946 = vmatmul.mubr.bf16.gmra.mrb[52].mxu0 %v4028_v60  ;;  %v4593_v60 = vshrl.u32 %v4528_v45, 16  ;;  %v4534_v45 = vld [vmem:[#allocation2 + $0x78] sm:$0x80] }
 0x30b   :  { %15949 = vmatprep.mubr.bf16.mxu0 %v4040_v44  ;;  %v4599_v44 = vrot.slane %v3706_v46, 7  ;;  %v4629_v19 = vshrl.u32 %v4534_v45, 16  ;;  %v4679_v45 = vrot.slane %v4677_v33, 7  ;;  %v19712_v33 = vld [vmem:[#allocation2 + $0x188] sm:$0xff] }
 0x30c   :  { %v4595_v51 = vrot.slane %v4593_v60, 7 }
 0x30d   :  { %v4602_v43 = vor.u32 %v4599_v44, %v3708_v56  ;;  %v4619_v56 = vrot.slane %v4617_v29, 7  ;;  %v4647_v44 = vrot.slane %v3754_v27, 7  ;;  %v4631_v4 = vrot.slane %v4629_v19, 7  ;;  %v18003_v27 = vld [vmem:[%s23640_s1 + $0x1d0] sm:$0xff]  }
 0x30f   :  { %v4603_v46 = vsel %vm290_vm0, %v4595_v51, %v4602_v43  ;;  %v4627_v18 = vsel %vm290_vm0, %v4619_v56, %v4626_v14  ;;  %v4653_v43 = vshrl.u32 %v4538_v10, 16  ;;  %v18006_v14 = vld [vmem:[%s23640_s1 + $0x1e8] sm:$0xff]  }
 0x311   :  { %v4655_v47 = vrot.slane %v4653_v43, 7  ;;  %v23922_v43 = vshll.u32 %v19418_v62, 16 }
 0x312   :  { %15950 = vmatmul.mubr.bf16.gmra.mrb[56].mxu0 %v4052_v55  ;;  %v4536_v55 = vld [vmem:[#allocation2 + $0x90] sm:$0x80] }
 0x313   :  { %15953 = vmatprep.mubr.bf16.mxu0 %v4064_v31  ;;  %v4635_v31 = vrot.slane %v3742_v28, 7  ;;  %v4641_v60 = vshrl.u32 %v4536_v55, 16  ;;  %v4650_v28 = vor.u32 %v4647_v44, %v3756_v24  ;;  %v18004_v24 = vld [vmem:[%s23640_s1 + $0x1d8] sm:$0xff]   ;;  %v23918_v55 = vshll.u32 %v19394_v26, 16  ;;  %v18007_v44 = vld [vmem:[%s23640_s1 + $0x1f0] sm:$0xff]  }
 0x315   :  { %v4638_v2 = vor.u32 %v4635_v31, %v3744_v6  ;;  %v4643_v40 = vrot.slane %v4641_v60, 7  ;;  %v4665_v6 = vshrl.u32 %v4540_v63, 16  ;;  %v23919_v31 = vshll.u32 %v19413_v50, 16  ;;  %v4546_v60 = vld [vmem:[#allocation2 + $0x108] sm:$0x80]  ;;  %v18008_v63 = vld [vmem:[%s23640_s1 + $0x1f8] sm:$0xff]  }
 0x317   :  { %v4639_v51 = vsel %vm290_vm0, %v4631_v4, %v4638_v2  ;;  %v4651_v38 = vsel %vm290_vm0, %v4643_v40, %v4650_v28  ;;  %v4701_v2 = vshrl.u32 %v4546_v60, 16  ;;  %v23920_v40 = vshrl.u32 %v19418_v62, 16 }
 0x319   :  { %v4707_v28 = vrot.slane %v23920_v40, 7  ;;  %v23929_v40 = vshll.u32 %v19466_v53, 16 }
 0x31a   :  { %15954 = vmatmul.mubr.bf16.gmra.mrb[60].mxu0 %v4076_v21  ;;  %v23915_v21 = vshll.u32 %v19389_v59, 16  ;;  %v23917_v59 = vshrl.u32 %v19413_v50, 16  ;;  %v23921_v50 = vshrl.u32 %v19437_v5, 16 }
 0x31b   :  { %15973 = vmatprep.mubr.bf16.mxu0 %v4603_v46  ;;  %v4544_v46 = vld [vmem:[#allocation2 + $0xf0] sm:$0x80] }
 0x31c   :  { %v4674_v0 = vor.u32 %v4671_v32, %v23915_v21  ;;  %v4695_v56 = vrot.slane %v23917_v59, 7  ;;  %v23927_v59 = vshll.u32 %v19463_v15, 16 }
 0x322   :  { %15974 = vmatmul.mubr.bf16.vlgmr.msra.gmra.mrb[0].mxu0 %v4615_v37  ;;  %v4686_v37 = vor.u32 %v4683_v16, %v23918_v55  ;;  %v23926_v16 = vshll.u32 %v19442_v8, 16  ;;  %v4556_v55 = vld [vmem:[#allocation2 + $0x180] sm:$0x80] }
 0x323   :  { %16038 = vmatpush3.bf16.msra.mxu0 %v19453_v34  ;;  %15977 = vmatprep.mubr.bf16.mxu0 %v4627_v18  ;;  %v4659_v34 = vrot.slane %v3766_v52, 7  ;;  %v4667_v52 = vrot.slane %v4665_v6, 7  ;;  %v4698_v18 = vor.u32 %v4695_v56, %v23919_v31  ;;  %v23923_v6 = vshll.u32 %v19437_v5, 16 }
 0x324   :  { %16039 = vmatprep.subr.bf16.mxu0 %v18002_v9  ;;  %v4687_v4 = vsel %vm290_vm0, %v4679_v45, %v4686_v37  ;;  %v4765_v45 = vshrl.u32 %v19712_v33, 16  ;;  %v23928_v31 = vshrl.u32 %v19466_v53, 16 }
 0x325   :  { %v4662_v20 = vor.u32 %v4659_v34, %v3768_v42  ;;  %v4675_v3 = vsel %vm290_vm0, %v4667_v52, %v4674_v0  ;;  %v4689_v42 = vshrl.u32 %v4544_v46, 16  ;;  %v4710_v34 = vor.u32 %v4707_v28, %v23922_v43 }
 0x326   :  { %v23924_v0 = vshrl.u32 %v19442_v8, 16  ;;  %v23925_v46 = vshrl.u32 %v19463_v15, 16 }
 0x327   :  { %16040 = vmatpush3.bf16.msra.mxu0 %v18002_v9  ;;  %v4663_v29 = vsel %vm290_vm0, %v4655_v47, %v4662_v20  ;;  %v4691_v19 = vrot.slane %v4689_v42, 7  ;;  %v4548_v9 = vld [vmem:[#allocation2 + $0x120] sm:$0x80]  ;;  %v4552_v20 = vld [vmem:[#allocation2 + $0x150] sm:$0x80] }
 0x328   :  { %16041 = vmatprep.subr.bf16.mxu0 %v18003_v27  ;;  %v4713_v10 = vshrl.u32 %v4548_v9, 16  ;;  %v19703_v47 = vld [vmem:[%s23640_s1 + $0x200] sm:$0xff]   ;;  %v4731_v62 = vrot.slane %v23924_v0, 7  ;;  %v4767_v9 = vrot.slane %v4765_v45, 7 }
 0x329   :  { %v4699_v26 = vsel %vm290_vm0, %v4691_v19, %v4698_v18  ;;  %v4755_v18 = vrot.slane %v23928_v31, 7 }
 0x32a   :  { %15978 = vmatmul.mubr.bf16.gmra.mrb[4].mxu0 %v4639_v51  ;;  %v4703_v51 = vrot.slane %v4701_v2, 7 }
 0x32b   :  { %15981 = vmatprep.mubr.bf16.mxu0 %v4651_v38  ;;  %16042 = vmatpush3.bf16.msra.mxu0 %v18003_v27  ;;  %v4719_v27 = vrot.slane %v23921_v50, 7  ;;  %v4715_v38 = vrot.slane %v4713_v10, 7  ;;  %v4758_v28 = vor.u32 %v4755_v18, %v23929_v40 }
 0x32c   :  { %16043 = vmatprep.subr.bf16.mxu0 %v18004_v24  ;;  %v4711_v52 = vsel %vm290_vm0, %v4703_v51, %v4710_v34  ;;  %v4560_v51 = vld [vmem:[#allocation2 + $0x1e0] sm:$0x80] }
 0x32d   :  { %v4722_v32 = vor.u32 %v4719_v27, %v23923_v6 }
 0x32f   :  { %16044 = vmatpush3.bf16.msra.mxu0 %v18004_v24  ;;  %v4550_v24 = vld [vmem:[#allocation2 + $0x138] sm:$0x80]  ;;  %v4723_v39 = vsel %vm290_vm0, %v4715_v38, %v4722_v32 }
 0x330   :  { %16045 = vmatprep.subr.bf16.mxu0 %v18005_v22  ;;  %v4725_v21 = vshrl.u32 %v4550_v24, 16  ;;  %v4785_v24 = vshrl.u32 %v4560_v51, 16 }
 0x332   :  { %15982 = vmatmul.mubr.bf16.gmra.mrb[8].mxu0 %v4663_v29  ;;  %v4743_v29 = vrot.slane %v23925_v46, 7  ;;  %v4727_v49 = vrot.slane %v4725_v21, 7  ;;  %v4562_v46 = vld [vmem:[#allocation2 + $0x1f8] sm:$0x80] }
 0x333   :  { %15985 = vmatprep.mubr.bf16.mxu0 %v4675_v3  ;;  %16046 = vmatpush3.bf16.msra.mxu0 %v18005_v22  ;;  %v4737_v22 = vshrl.u32 %v4552_v20, 16  ;;  %v4734_v3 = vor.u32 %v4731_v62, %v23926_v16  ;;  %v23930_v20 = vshrl.u32 %v19490_v35, 16  ;;  %v4787_v62 = vrot.slane %v4785_v24, 7 }
 0x334   :  { %16047 = vmatprep.subr.bf16.mxu0 %v18006_v14  ;;  %v4746_v56 = vor.u32 %v4743_v29, %v23927_v59  ;;  %v4564_v29 = vld [vmem:[#allocation2 + $0x210] sm:$0x80]  ;;  %v4797_v16 = vshrl.u32 %v4562_v46, 16 }
 0x335   :  { %v4739_v42 = vrot.slane %v4737_v22, 7  ;;  %v4735_v37 = vsel %vm290_vm0, %v4727_v49, %v4734_v3  ;;  %v23932_v3 = vshrl.u32 %v19492_v17, 16 }
 0x337   :  { %16048 = vmatpush3.bf16.msra.mxu0 %v18006_v14  ;;  %v4554_v14 = vld [vmem:[#allocation2 + $0x168] sm:$0x80]  ;;  %v4747_v60 = vsel %vm290_vm0, %v4739_v42, %v4746_v56  ;;  %v4803_v42 = vrot.slane %v23932_v3, 7  ;;  %v4809_v56 = vshrl.u32 %v4564_v29, 16  ;;  %v23940_v29 = vshrl.u32 %v19526_v25, 16 }
 0x338   :  { %16049 = vmatprep.subr.bf16.mxu0 %v18007_v44  ;;  %v4749_v19 = vshrl.u32 %v4554_v14, 16  ;;  %v23933_v14 = vshrl.u32 %v19506_v54, 16 }
 0x339   :  { %v4811_v18 = vrot.slane %v4809_v56, 7 }
 0x33a   :  { %15986 = vmatmul.mubr.bf16.gmra.mrb[12].mxu0 %v4687_v4  ;;  %v4768_v4 = vshll.u32 %v19712_v33, 16  ;;  %v4751_v2 = vrot.slane %v4749_v19, 7  ;;  %v23934_v19 = vshll.u32 %v19492_v17, 16 }
 0x33b   :  { %15989 = vmatprep.mubr.bf16.mxu0 %v4699_v26  ;;  %16050 = vmatpush3.bf16.msra.mxu0 %v18007_v44  ;;  %v4761_v44 = vshrl.u32 %v4556_v55, 16  ;;  %v19728_v26 = vld [vmem:[#allocation2 + $0x8] sm:$0xff]  ;;  %v4815_v55 = vrot.slane %v23933_v14, 7  ;;  %v23942_v14 = vshll.u32 %v19526_v25, 16 }
 0x33c   :  { %16051 = vmatprep.subr.bf16.mxu0 %v18008_v63  ;;  %v4777_v10 = vshrl.u32 %v19728_v26, 16  ;;  %v4770_v27 = vor.u32 %v4768_v4, %v4767_v9  ;;  %v4759_v43 = vsel %vm290_vm0, %v4751_v2, %v4758_v28  ;;  %v4780_v6 = vshll.u32 %v19728_v26, 16  ;;  %v4566_v9 = vld [vmem:[#allocation2 + $0x228] sm:$0x80]  ;;  %v4568_v2 = vld [vmem:[#allocation2 + $0x240] sm:$0x80] }
 0x33d   :  { %v4763_v50 = vrot.slane %v4761_v44, 7  ;;  %v4806_v31 = vor.u32 %v4803_v42, %v23934_v19  ;;  %v4821_v28 = vshrl.u32 %v4566_v9, 16  ;;  %v4833_v51 = vshrl.u32 %v4568_v2, 16 }
 0x33e   :  { %v4779_v38 = vrot.slane %v4777_v10, 7  ;;  %v23941_v42 = vshrl.u32 %v19542_v12, 16  ;;  %v23943_v19 = vshll.u32 %v19542_v12, 16  ;;  %v23944_v2 = vshrl.u32 %v19544_v7, 16 }
 0x33f   :  { %16052 = vmatpush3.bf16.msra.mxu0 %v18008_v63  ;;  %v4558_v63 = vld [vmem:[#allocation2 + $0x198] sm:$0x80]  ;;  %v4771_v32 = vsel %vm290_vm0, %v4763_v50, %v4770_v27  ;;  %v23936_v50 = vshrl.u32 %v19508_v1, 16 }
 0x340   :  { %16117 = vmatprep.subr.bf16.mxu0 %v19703_v47  ;;  %v4773_v34 = vshrl.u32 %v4558_v63, 16  ;;  %v19742_v0 = vor.u32 %v4780_v6, %v4779_v38  ;;  %v4823_v38 = vrot.slane %v4821_v28, 7 }
 0x341   :  { %v4827_v27 = vrot.slane %v23936_v50, 7 }
 0x342   :  { %15990 = vmatmul.mubr.bf16.gmra.mrb[16].mxu0 %v4711_v52  ;;  %v4791_v52 = vrot.slane %v23930_v20, 7  ;;  %v4775_v21 = vrot.slane %v4773_v34, 7  ;;  %v4835_v20 = vrot.slane %v4833_v51, 7 }
 0x343   :  { %15993 = vmatprep.mubr.bf16.mxu0 %v4723_v39  ;;  %v23931_v39 = vshll.u32 %v19490_v35, 16 }
 0x344   :  { %v4783_v49 = vsel %vm290_vm0, %v4775_v21, %v19742_v0 }
 0x345   :  { %v4794_v22 = vor.u32 %v4791_v52, %v23931_v39  ;;  %v23939_v52 = vshll.u32 %v19524_v13, 16  ;;  %v4572_v39 = vld [vmem:[#allocation2 + $0x270] sm:$0x80] }
 0x346   :  { %v4857_v3 = vshrl.u32 %v4572_v39, 16  ;;  %v23948_v39 = vshrl.u32 %v19562_v61, 16 }
 0x347   :  { %v4795_v59 = vsel %vm290_vm0, %v4787_v62, %v4794_v22  ;;  %v4570_v62 = vld [vmem:[#allocation2 + $0x258] sm:$0x80] }
 0x348   :  { %v4845_v46 = vshrl.u32 %v4570_v62, 16 }
 0x34a   :  { %15994 = vmatmul.mubr.bf16.gmra.mrb[20].mxu0 %v4735_v37  ;;  %v4799_v37 = vrot.slane %v4797_v16, 7  ;;  %v4847_v56 = vrot.slane %v4845_v46, 7 }
 0x34b   :  { %15997 = vmatprep.mubr.bf16.mxu0 %v4747_v60  ;;  %v23935_v60 = vshll.u32 %v19506_v54, 16 }
 0x34c   :  { %v4807_v40 = vsel %vm290_vm0, %v4799_v37, %v4806_v31  ;;  %v4859_v37 = vrot.slane %v4857_v3, 7 }
 0x34d   :  { %v4818_v44 = vor.u32 %v4815_v55, %v23935_v60  ;;  %v4576_v60 = vld [vmem:[#allocation2 + $0x2a0] sm:$0x80] }
 0x34e   :  { %v4881_v50 = vshrl.u32 %v4576_v60, 16  ;;  %v23952_v60 = vshrl.u32 %v19580_v11, 16 }
 0x34f   :  { %v4819_v63 = vsel %vm290_vm0, %v4811_v18, %v4818_v44  ;;  %v4574_v18 = vld [vmem:[#allocation2 + $0x288] sm:$0x80] }
 0x350   :  { %v4869_v9 = vshrl.u32 %v4574_v18, 16 }
 0x352   :  { %15998 = vmatmul.mubr.bf16.gmra.mrb[24].mxu0 %v4759_v43  ;;  %v23937_v43 = vshrl.u32 %v19524_v13, 16  ;;  %v4871_v51 = vrot.slane %v4869_v9, 7 }
 0x353   :  { %16001 = vmatprep.mubr.bf16.mxu0 %v4771_v32  ;;  %v23938_v32 = vshll.u32 %v19508_v1, 16 }
 0x354   :  { %v4839_v34 = vrot.slane %v23937_v43, 7  ;;  %v23946_v43 = vshll.u32 %v19544_v7, 16 }
 0x355   :  { %v4830_v24 = vor.u32 %v4827_v27, %v23938_v32  ;;  %v23945_v27 = vshrl.u32 %v19560_v23, 16  ;;  %v23947_v32 = vshll.u32 %v19560_v23, 16 }
 0x356   :  { %v4842_v21 = vor.u32 %v4839_v34, %v23939_v52  ;;  %v4580_v52 = vld [vmem:[#allocation2 + $0x2d0] sm:$0x80] }
 0x357   :  { %v4831_v22 = vsel %vm290_vm0, %v4823_v38, %v4830_v24  ;;  %v4883_v38 = vrot.slane %v4881_v50, 7 }
 0x358   :  { %v4843_v16 = vsel %vm290_vm0, %v4835_v20, %v4842_v21  ;;  %v4578_v20 = vld [vmem:[#allocation2 + $0x2b8] sm:$0x80] }
 0x359   :  { %v4893_v62 = vshrl.u32 %v4578_v20, 16 }
 0x35a   :  { %16002 = vmatmul.mubr.bf16.gmra.mrb[28].mxu0 %v4783_v49  ;;  %v4851_v49 = vrot.slane %v23940_v29, 7  ;;  %v4905_v29 = vshrl.u32 %v4580_v52, 16 }
 0x35b   :  { %16005 = vmatprep.mubr.bf16.mxu0 %v4795_v59  ;;  %v4863_v59 = vrot.slane %v23941_v42, 7  ;;  %v4895_v3 = vrot.slane %v4893_v62, 7  ;;  %v23950_v42 = vshll.u32 %v19562_v61, 16 }
 0x35c   :  { %v4854_v55 = vor.u32 %v4851_v49, %v23942_v14  ;;  %v23949_v49 = vshrl.u32 %v19578_v36, 16  ;;  %v23951_v14 = vshll.u32 %v19578_v36, 16 }
 0x35d   :  { %v4866_v31 = vor.u32 %v4863_v59, %v23943_v19  ;;  %v4584_v19 = vld [vmem:[#allocation2 + $0x300] sm:$0x80] }
 0x35e   :  { %v4855_v44 = vsel %vm290_vm0, %v4847_v56, %v4854_v55  ;;  %v4907_v56 = vrot.slane %v4905_v29, 7 }
 0x35f   :  { %v4867_v28 = vsel %vm290_vm0, %v4859_v37, %v4866_v31  ;;  %v4582_v37 = vld [vmem:[#allocation2 + $0x2e8] sm:$0x80] }
 0x360   :  { %v4917_v18 = vshrl.u32 %v4582_v37, 16  ;;  %v18128_v37 = vld [vmem:[#allocation2 + $0x50] sm:$0xff] }
 0x362   :  { %16006 = vmatmul.mubr.bf16.gmra.mrb[32].mxu0 %v4807_v40  ;;  %v4875_v40 = vrot.slane %v23944_v2, 7  ;;  %v4929_v2 = vshrl.u32 %v4584_v19, 16  ;;  %v4919_v50 = vrot.slane %v4917_v18, 7  ;;  %v18129_v19 = vld [vmem:[#allocation2 + $0x68] sm:$0xff]  ;;  %v18130_v18 = vld [vmem:[#allocation2 + $0x80] sm:$0xff] }
 0x363   :  { %16009 = vmatprep.mubr.bf16.mxu0 %v4819_v63  ;;  %v4887_v63 = vrot.slane %v23945_v27, 7  ;;  %v23953_v27 = vshll.u32 %v19580_v11, 16 }
 0x364   :  { %v4878_v34 = vor.u32 %v4875_v40, %v23946_v43  ;;  %v4935_v40 = vrot.slane %v4042_v58, 7  ;;  %v23954_v43 = vshll.u32 %v19596_v41, 16  ;;  %v4947_v58 = vrot.slane %v4054_v30, 7 }
 0x365   :  { %v4890_v24 = vor.u32 %v4887_v63, %v23947_v32 }
 0x366   :  { %v4879_v21 = vsel %vm290_vm0, %v4871_v51, %v4878_v34  ;;  %v4931_v51 = vrot.slane %v4929_v2, 7  ;;  %v4938_v34 = vor.u32 %v4935_v40, %v23954_v43  ;;  %v4950_v29 = vor.u32 %v4947_v58, %v4056_v57  ;;  %v18010_v57 = vld [vmem:[%s23640_s1 + $0x208] sm:$0xff]   ;;  %v18015_v40 = vld [vmem:[%s23640_s1 + $0x230] sm:$0xff]  }
 0x367   :  { %v4891_v46 = vsel %vm290_vm0, %v4883_v38, %v4890_v24  ;;  %v4586_v38 = vld [vmem:[#allocation2 + $0x318] sm:$0x80]  ;;  %v4588_v24 = vld [vmem:[#allocation2 + $0x330] sm:$0x80]  ;;  %v18133_v2 = vld [vmem:[#allocation2 + $0xc8] sm:$0xff] }
 0x368   :  { %v4941_v52 = vshrl.u32 %v4586_v38, 16  ;;  %v4953_v62 = vshrl.u32 %v4588_v24, 16 }
 0x36a   :  { %16010 = vmatmul.mubr.bf16.gmra.mrb[36].mxu0 %v4831_v22  ;;  %v4899_v22 = vrot.slane %v23948_v39, 7 }
 0x36b   :  { %16013 = vmatprep.mubr.bf16.mxu0 %v4843_v16  ;;  %v4911_v16 = vrot.slane %v23949_v49, 7  ;;  %v4955_v49 = vrot.slane %v4953_v62, 7 }
 0x36c   :  { %v4902_v59 = vor.u32 %v4899_v22, %v23950_v42 }
 0x36d   :  { %v4914_v55 = vor.u32 %v4911_v16, %v23951_v14 }
 0x36e   :  { %v4903_v31 = vsel %vm290_vm0, %v4895_v3, %v4902_v59  ;;  %v4590_v3 = vld [vmem:[#allocation2 + $0x348] sm:$0x80] }
 0x36f   :  { %v4915_v9 = vsel %vm290_vm0, %v4907_v56, %v4914_v55  ;;  %v4965_v42 = vshrl.u32 %v4590_v3, 16  ;;  %v18127_v55 = vld [vmem:[#allocation2 + $0x38] sm:$0xff] }
 0x371   :  { %v4967_v56 = vrot.slane %v4965_v42, 7 }
 0x372   :  { %16014 = vmatmul.mubr.bf16.gmra.mrb[40].mxu0 %v4855_v44  ;;  %v4923_v44 = vrot.slane %v23952_v60, 7  ;;  %v18131_v60 = vld [vmem:[#allocation2 + $0x98] sm:$0xff] }
 0x373   :  { %16017 = vmatprep.mubr.bf16.mxu0 %v4867_v28  ;;  %v19803_v28 = vld [vmem:[#allocation2 + $0x338] sm:$0xff]  ;;  %v4975_v14 = vsel %vm290_vm0, %v4967_v56, %v19742_v0 }
 0x374   :  { %v4926_v63 = vor.u32 %v4923_v44, %v23953_v27  ;;  %v4957_v32 = vshrl.u32 %v19803_v28, 16  ;;  %v4960_v22 = vshll.u32 %v19803_v28, 16  ;;  %v18012_v0 = vld [vmem:[%s23640_s1 + $0x218] sm:$0xff]   ;;  %v18014_v44 = vld [vmem:[%s23640_s1 + $0x228] sm:$0xff]   ;;  %v18134_v27 = vld [vmem:[#allocation2 + $0xe0] sm:$0xff] }
 0x376   :  { %v4927_v20 = vsel %vm290_vm0, %v4919_v50, %v4926_v63  ;;  %v4959_v39 = vrot.slane %v4957_v32, 7  ;;  %v18016_v50 = vld [vmem:[%s23640_s1 + $0x238] sm:$0xff]  }
 0x377   :  { %v18135_v63 = vld [vmem:[#allocation2 + $0xf8] sm:$0xff] }
 0x378   :  { %v4962_v16 = vor.u32 %v4960_v22, %v4959_v39 }
 0x37a   :  { %16018 = vmatmul.mubr.bf16.gmra.mrb[44].mxu0 %v4879_v21  ;;  %v4939_v21 = vsel %vm290_vm0, %v4931_v51, %v4938_v34  ;;  %v4963_v59 = vsel %vm290_vm0, %v4955_v49, %v4962_v16  ;;  %v18136_v51 = vld [vmem:[#allocation2 + $0x110] sm:$0xff]  ;;  %v5853_v49 = vld [vmem:[#allocation2 + $0xa0] sm:$0x1] }
 0x37b   :  { %16021 = vmatprep.mubr.bf16.mxu0 %v4891_v46  ;;  %v4943_v46 = vrot.slane %v4941_v52, 7  ;;  %v5852_v52 = vld [vmem:[#allocation2 + $0x98] sm:$0xff] }
 0x37c   :  { %v5957_v56 = vshrl.u32 %v5852_v52, 16 }
 0x37d   :  { %v4951_v30 = vsel %vm290_vm0, %v4943_v46, %v4950_v29  ;;  %v5851_v46 = vld [vmem:[#allocation2 + $0x88] sm:$0x1]  ;;  %v5959_v29 = vshll.u32 %v5852_v52, 16 }
 0x37e   :  { %v5952_v42 = vshll.u32 %v5851_v46, 16 }
 0x382   :  { %16022 = vmatmul.mubr.bf16.gmra.mrb[48].mxu0 %v4903_v31  ;;  %v18011_v31 = vld [vmem:[%s23640_s1 + $0x210] sm:$0xff]  }
 0x383   :  { %16025 = vmatprep.mubr.bf16.mxu0 %v4915_v9  ;;  %v18132_v9 = vld [vmem:[#allocation2 + $0xb0] sm:$0xff] }
 0x38a   :  { %16026 = vmatmul.mubr.bf16.gmra.mrb[52].mxu0 %v4927_v20  ;;  %v5850_v20 = vld [vmem:[#allocation2 + $0x80] sm:$0xff] }
 0x38b   :  { %16029 = vmatprep.mubr.bf16.mxu0 %v4939_v21  ;;  %v5947_v21 = vshll.u32 %v5850_v20, 16  ;;  %v5945_v3 = vshrl.u32 %v5850_v20, 16  ;;  %v5864_v20 = vld [vmem:[#allocation2 + $0x128] sm:$0xff] }
 0x38c   :  { %v6031_v46 = vshll.u32 %v5864_v20, 16 }
 0x392   :  { %16030 = vmatmul.mubr.bf16.gmra.mrb[56].mxu0 %v4951_v30  ;;  %v5949_v30 = vrot.slane %v5947_v21, 1 }
 0x393   :  { %16033 = vmatprep.mubr.bf16.mxu0 %v4963_v59 }
 0x39a   :  { %16034 = vmatmul.mubr.bf16.gmra.mrb[60].mxu0 %v4975_v14  ;;  %v5961_v14 = vrot.slane %v5959_v29, 1  ;;  %v5865_v29 = vld [vmem:[#allocation2 + $0x130] sm:$0x1] }
 0x39b   :  { %16053 = vmatprep.mubr.bf16.mxu0 %v18127_v55  ;;  %v5964_v55 = vshll.u32 %v5853_v49, 16 }
 0x3a2   :  { %16054 = vmatmul.mubr.bf16.vlgmr.msra.gmra.mrb[0].mxu0 %v18128_v37  ;;  %v5856_v37 = vld [vmem:[#allocation2 + $0xc8] sm:$0xff] }
 0x3a3   :  { %16118 = vmatpush3.bf16.msra.mxu0 %v19703_v47  ;;  %16057 = vmatprep.mubr.bf16.mxu0 %v18129_v19  ;;  %v18013_v47 = vld [vmem:[%s23640_s1 + $0x220] sm:$0xff]   ;;  %v5950_v19 = vor.u32 %v5949_v30, %v5945_v3 }
 0x3a4   :  { %16119 = vmatprep.subr.bf16.mxu0 %v18010_v57 }
 0x3a7   :  { %16120 = vmatpush3.bf16.msra.mxu0 %v18010_v57  ;;  %v5854_v57 = vld [vmem:[#allocation2 + $0xb0] sm:$0xff] }
 0x3a8   :  { %16121 = vmatprep.subr.bf16.mxu0 %v18011_v31 }
 0x3aa   :  { %16058 = vmatmul.mubr.bf16.gmra.mrb[4].mxu0 %v18130_v18  ;;  %v5962_v18 = vor.u32 %v5961_v14, %v5957_v56  ;;  %v6033_v56 = vrot.slane %v6031_v46, 1  ;;  %v6036_v14 = vshll.u32 %v5865_v29, 16 }
 0x3ab   :  { %16061 = vmatprep.mubr.bf16.mxu0 %v18131_v60  ;;  %16122 = vmatpush3.bf16.msra.mxu0 %v18011_v31  ;;  %v5954_v31 = vrot.slane %v5952_v42, 1  ;;  %v5966_v60 = vrot.slane %v5964_v55, 1  ;;  %v5866_v55 = vld [vmem:[#allocation2 + $0x140] sm:$0xff] }
 0x3ac   :  { %16123 = vmatprep.subr.bf16.mxu0 %v18012_v0 }
 0x3af   :  { %16124 = vmatpush3.bf16.msra.mxu0 %v18012_v0  ;;  %v5971_v0 = vshll.u32 %v5854_v57, 16 }
 0x3b0   :  { %16125 = vmatprep.subr.bf16.mxu0 %v18013_v47 }
 0x3b2   :  { %16062 = vmatmul.mubr.bf16.gmra.mrb[8].mxu0 %v18132_v9  ;;  %v5857_v9 = vld [vmem:[#allocation2 + $0xd0] sm:$0x1] }
 0x3b3   :  { %16065 = vmatprep.mubr.bf16.mxu0 %v18133_v2  ;;  %16126 = vmatpush3.bf16.msra.mxu0 %v18013_v47  ;;  %v5855_v47 = vld [vmem:[#allocation2 + $0xb8] sm:$0x1]  ;;  %v5955_v2 = vsel %vm1478_vm1, %v5950_v19, %v5954_v31  ;;  %v6043_v31 = vshll.u32 %v5866_v55, 16 }
 0x3b4   :  { %16127 = vmatprep.subr.bf16.mxu0 %v18014_v44 }
 0x3b7   :  { %16128 = vmatpush3.bf16.msra.mxu0 %v18014_v44  ;;  %v5983_v44 = vshll.u32 %v5856_v37, 16 }
 0x3b8   :  { %16129 = vmatprep.subr.bf16.mxu0 %v18015_v40 }
 0x3ba   :  { %16066 = vmatmul.mubr.bf16.gmra.mrb[12].mxu0 %v18134_v27  ;;  %v5976_v27 = vshll.u32 %v5855_v47, 16 }
 0x3bb   :  { %16069 = vmatprep.mubr.bf16.mxu0 %v18135_v63  ;;  %16130 = vmatpush3.bf16.msra.mxu0 %v18015_v40  ;;  %v5969_v40 = vshrl.u32 %v5854_v57, 16  ;;  %v5967_v63 = vsel %vm1478_vm1, %v5962_v18, %v5966_v60  ;;  %v5868_v57 = vld [vmem:[#allocation2 + $0x158] sm:$0xff]  ;;  %v6038_v18 = vrot.slane %v6036_v14, 1  ;;  %v5867_v60 = vld [vmem:[#allocation2 + $0x148] sm:$0x1] }
 0x3bc   :  { %16131 = vmatprep.subr.bf16.mxu0 %v18016_v50  ;;  %v6055_v47 = vshll.u32 %v5868_v57, 16 }
 0x3bf   :  { %16132 = vmatpush3.bf16.msra.mxu0 %v18016_v50  ;;  %v5973_v50 = vrot.slane %v5971_v0, 1 }
 0x3c2   :  { %16070 = vmatmul.mubr.bf16.gmra.mrb[16].mxu0 %v18136_v51  ;;  %v5981_v51 = vshrl.u32 %v5856_v37, 16 }
 0x3c3   :  { %16073 = vmatprep.mubr.bf16.mxu0 %v19437_v5  ;;  %v5844_v5 = vld [vmem:[#allocation2 + $0x38] sm:$0xff] }
 0x3ca   :  { %16074 = vmatmul.mubr.bf16.gmra.mrb[20].mxu0 %v19442_v8  ;;  %v5911_v8 = vshll.u32 %v5844_v5, 16 }
 0x3cb   :  { %16077 = vmatprep.mubr.bf16.mxu0 %v19463_v15  ;;  %v5845_v15 = vld [vmem:[#allocation2 + $0x40] sm:$0x1] }
 0x3d2   :  { %16078 = vmatmul.mubr.bf16.gmra.mrb[24].mxu0 %v19466_v53  ;;  %v5909_v53 = vshrl.u32 %v5844_v5, 16  ;;  %v5985_v5 = vrot.slane %v5983_v44, 1  ;;  %v5869_v44 = vld [vmem:[#allocation2 + $0x160] sm:$0x1] }
 0x3d3   :  { %16081 = vmatprep.mubr.bf16.mxu0 %v19712_v33 }
 0x3da   :  { %16082 = vmatmul.mubr.bf16.gmra.mrb[28].mxu0 %v19728_v26 }
 0x3db   :  { %16085 = vmatprep.mubr.bf16.mxu0 %v19490_v35  ;;  %v5913_v35 = vrot.slane %v5911_v8, 1  ;;  %v5988_v8 = vshll.u32 %v5857_v9, 16 }
 0x3e2   :  { %16086 = vmatmul.mubr.bf16.gmra.mrb[32].mxu0 %v19492_v17  ;;  %v5916_v17 = vshll.u32 %v5845_v15, 16  ;;  %v5858_v15 = vld [vmem:[#allocation2 + $0xe0] sm:$0xff] }
 0x3e3   :  { %16089 = vmatprep.mubr.bf16.mxu0 %v19506_v54 }
 0x3e4   :  { %v5918_v54 = vrot.slane %v5916_v17, 1  ;;  %v5978_v17 = vrot.slane %v5976_v27, 1 }
 0x3ea   :  { %16090 = vmatmul.mubr.bf16.gmra.mrb[36].mxu0 %v19508_v1  ;;  %v5847_v1 = vld [vmem:[#allocation2 + $0x58] sm:$0x1] }
 0x3eb   :  { %16093 = vmatprep.mubr.bf16.mxu0 %v19524_v13  ;;  %v5848_v13 = vld [vmem:[#allocation2 + $0x68] sm:$0xff] }
 0x3ec   :  { %v5933_v34 = vshrl.u32 %v5848_v13, 16 }
 0x3f2   :  { %16094 = vmatmul.mubr.bf16.gmra.mrb[40].mxu0 %v19526_v25  ;;  %v5846_v25 = vld [vmem:[#allocation2 + $0x50] sm:$0xff] }
 0x3f3   :  { %16097 = vmatprep.mubr.bf16.mxu0 %v19542_v12  ;;  %v5935_v12 = vshll.u32 %v5848_v13, 16  ;;  %v5986_v13 = vor.u32 %v5985_v5, %v5981_v51  ;;  %v6057_v51 = vrot.slane %v6055_v47, 1  ;;  %v6060_v5 = vshll.u32 %v5869_v44, 16 }
 0x3f5   :  { %v5937_v38 = vrot.slane %v5935_v12, 1 }
 0x3f7   :  { %v5938_v62 = vor.u32 %v5937_v38, %v5933_v34 }
 0x3fa   :  { %16098 = vmatmul.mubr.bf16.gmra.mrb[44].mxu0 %v19544_v7  ;;  %v5923_v7 = vshll.u32 %v5846_v25, 16 }
 0x3fb   :  { %16101 = vmatprep.mubr.bf16.mxu0 %v19560_v23  ;;  %v5849_v23 = vld [vmem:[#allocation2 + $0x70] sm:$0x1] }
 0x3fc   :  { %v5940_v24 = vshll.u32 %v5849_v23, 16  ;;  %v5993_v23 = vshrl.u32 %v5858_v15, 16 }
 0x3fe   :  { %v5942_v39 = vrot.slane %v5940_v24, 1  ;;  %v5862_v24 = vld [vmem:[#allocation2 + $0x110] sm:$0xff] }
 0x400   :  { %v5943_v59 = vsel %vm1478_vm1, %v5938_v62, %v5942_v39  ;;  %v5863_v39 = vld [vmem:[#allocation2 + $0x118] sm:$0x1] }
 0x401   :  { %v6024_v30 = vshll.u32 %v5863_v39, 16 }
 0x402   :  { %16102 = vmatmul.mubr.bf16.gmra.mrb[48].mxu0 %v19562_v61  ;;  %v5914_v61 = vor.u32 %v5913_v35, %v5909_v53  ;;  %v5860_v53 = vld [vmem:[#allocation2 + $0xf8] sm:$0xff]  ;;  %v5974_v35 = vor.u32 %v5973_v50, %v5969_v40  ;;  %v6045_v40 = vrot.slane %v6043_v31, 1  ;;  %v6048_v50 = vshll.u32 %v5867_v60, 16 }
 0x403   :  { %16105 = vmatprep.mubr.bf16.mxu0 %v19578_v36  ;;  %v5925_v36 = vrot.slane %v5923_v7, 1  ;;  %v5990_v7 = vrot.slane %v5988_v8, 1  ;;  %v6026_v19 = vrot.slane %v6024_v30, 1  ;;  %v5870_v8 = vld [vmem:[#allocation2 + $0x170] sm:$0xff] }
 0x404   :  { %v5919_v43 = vsel %vm1478_vm1, %v5914_v61, %v5918_v54  ;;  %v5859_v61 = vld [vmem:[#allocation2 + $0xe8] sm:$0x1]  ;;  %v6007_v54 = vshll.u32 %v5860_v53, 16  ;;  %v5979_v12 = vsel %vm1478_vm1, %v5974_v35, %v5978_v17  ;;  %v6067_v35 = vshll.u32 %v5870_v8, 16 }
 0x406   :  { %v6009_v34 = vrot.slane %v6007_v54, 1  ;;  %v6065_v54 = vshrl.u32 %v5870_v8, 16 }
 0x40a   :  { %16106 = vmatmul.mubr.bf16.gmra.mrb[52].mxu0 %v19580_v11  ;;  %v5921_v11 = vshrl.u32 %v5846_v25, 16  ;;  %v5995_v25 = vshll.u32 %v5858_v15, 16 }
 0x40b   :  { %16109 = vmatprep.mubr.bf16.mxu0 %v19596_v41  ;;  %v5928_v41 = vshll.u32 %v5847_v1, 16  ;;  %v5861_v1 = vld [vmem:[#allocation2 + $0x100] sm:$0x1] }
 0x40c   :  { %v6012_v38 = vshll.u32 %v5861_v1, 16  ;;  %v6069_v1 = vrot.slane %v6067_v35, 1 }
 0x40d   :  { %v5930_v58 = vrot.slane %v5928_v41, 1  ;;  %v5991_v41 = vsel %vm1478_vm1, %v5986_v13, %v5990_v7  ;;  %v5871_v13 = vld [vmem:[#allocation2 + $0x178] sm:$0x1]  ;;  %v5873_v7 = vld [vmem:[#allocation2 + $0x190] sm:$0x1] }
 0x40e   :  { %v6014_v62 = vrot.slane %v6012_v38, 1 }
 0x412   :  { %16110 = vmatmul.mubr.bf16.gmra.mrb[56].mxu0 %v19598_v48  ;;  %v5926_v48 = vor.u32 %v5925_v36, %v5921_v11  ;;  %v5997_v11 = vrot.slane %v5995_v25, 1  ;;  %v6000_v36 = vshll.u32 %v5859_v61, 16  ;;  %v6062_v25 = vrot.slane %v6060_v5, 1 }
 0x413   :  { %16113 = vmatprep.mubr.bf16.mxu0 %v19803_v28 }
 0x414   :  { %v5931_v16 = vsel %vm1478_vm1, %v5926_v48, %v5930_v58  ;;  %v5998_v52 = vor.u32 %v5997_v11, %v5993_v23  ;;  %v6002_v48 = vrot.slane %v6000_v36, 1  ;;  %v6019_v58 = vshll.u32 %v5862_v24, 16 }
 0x415   :  { %v6081_v11 = vrot.slane %v4768_v4, 1  ;;  %v6084_v36 = vshll.u32 %v5873_v7, 16 }
 0x416   :  { %v6003_v49 = vsel %vm1478_vm1, %v5998_v52, %v6002_v48  ;;  %v6021_v3 = vrot.slane %v6019_v58, 1  ;;  %v5877_v48 = vld [vmem:[#allocation2 + $0x1f0] sm:$0x1] }
 0x417   :  { %v6082_v38 = vor.u32 %v6081_v11, %v4765_v45  ;;  %v6108_v29 = vshll.u32 %v5877_v48, 16 }
 0x41a   :  { %16114 = vmatmul.mubr.bf16.gmra.mrb[60].mxu0 %v19728_v26 }
 0x41b   :  { %16133 = vmatprep.mubr.bf16.mxu0 %v5919_v43  ;;  %v6005_v43 = vshrl.u32 %v5860_v53, 16  ;;  %v6050_v53 = vrot.slane %v6048_v50, 1 }
 0x41d   :  { %v6010_v21 = vor.u32 %v6009_v34, %v6005_v43  ;;  %v6070_v43 = vor.u32 %v6069_v1, %v6065_v54 }
 0x41f   :  { %v6015_v42 = vsel %vm1478_vm1, %v6010_v21, %v6014_v62  ;;  %v6093_v21 = vrot.slane %v4780_v6, 1 }
 0x421   :  { %v19892_v33 = vor.u32 %v6093_v21, %v4777_v10  ;;  %v5882_v10 = vld [vmem:[#allocation2 + $0x230] sm:$0xff]  ;;  %v5892_v21 = vld [vmem:[#allocation2 + $0x2a8] sm:$0xff] }
 0x422   :  { %16134 = vmatmul.mubr.bf16.vlgmr.msra.gmra.mrb[0].mxu0 %v5931_v16  ;;  %v6017_v16 = vshrl.u32 %v5862_v24, 16  ;;  %v6086_v24 = vrot.slane %v6084_v36, 1  ;;  %v6139_v44 = vshll.u32 %v5882_v10, 16  ;;  %v5889_v36 = vld [vmem:[#allocation2 + $0x280] sm:$0x1] }
 0x423   :  { %16137 = vmatprep.mubr.bf16.mxu0 %v5943_v59  ;;  %v6029_v59 = vshrl.u32 %v5864_v20, 16  ;;  %v5875_v20 = vld [vmem:[#allocation2 + $0x1a8] sm:$0x1]  ;;  %v6180_v48 = vshll.u32 %v5889_v36, 16 }
 0x424   :  { %v6022_v37 = vor.u32 %v6021_v3, %v6017_v16  ;;  %v6096_v62 = vshll.u32 %v5875_v20, 16  ;;  %v6087_v4 = vsel %vm1478_vm1, %v6082_v38, %v6086_v24  ;;  %v5880_v16 = vld [vmem:[#allocation2 + $0x218] sm:$0xff]  ;;  %v6141_v5 = vrot.slane %v6139_v44, 1 }
 0x425   :  { %v6034_v0 = vor.u32 %v6033_v56, %v6029_v59  ;;  %v5879_v59 = vld [vmem:[#allocation2 + $0x208] sm:$0x1]  ;;  %v6127_v6 = vshll.u32 %v5880_v16, 16  ;;  %v5881_v56 = vld [vmem:[#allocation2 + $0x220] sm:$0x1]  ;;  %v6125_v31 = vshrl.u32 %v5880_v16, 16 }
 0x426   :  { %v6027_v9 = vsel %vm1478_vm1, %v6022_v37, %v6026_v19  ;;  %v6098_v45 = vrot.slane %v6096_v62, 1  ;;  %v6120_v37 = vshll.u32 %v5879_v59, 16  ;;  %v6132_v26 = vshll.u32 %v5881_v56, 16 }
 0x427   :  { %v6039_v27 = vsel %vm1478_vm1, %v6034_v0, %v6038_v18  ;;  %v6129_v0 = vrot.slane %v6127_v6, 1  ;;  %v5884_v18 = vld [vmem:[#allocation2 + $0x248] sm:$0xff]  ;;  %v6199_v16 = vshll.u32 %v5892_v21, 16  ;;  %v6197_v56 = vshrl.u32 %v5892_v21, 16  ;;  %v5905_v21 = vld [vmem:[#allocation2 + $0x340] sm:$0x1] }
 0x428   :  { %v6099_v14 = vsel %vm1478_vm1, %v19892_v33, %v6098_v45  ;;  %v6122_v47 = vrot.slane %v6120_v37, 1  ;;  %v6151_v50 = vshll.u32 %v5884_v18, 16  ;;  %v5893_v45 = vld [vmem:[#allocation2 + $0x2b0] sm:$0x1]  ;;  %v5896_v37 = vld [vmem:[#allocation2 + $0x2d8] sm:$0xff] }
 0x42a   :  { %16138 = vmatmul.mubr.bf16.gmra.mrb[4].mxu0 %v5955_v2  ;;  %v6041_v2 = vshrl.u32 %v5866_v55, 16  ;;  %v6153_v35 = vrot.slane %v6151_v50, 1 }
 0x42b   :  { %16141 = vmatprep.mubr.bf16.mxu0 %v5967_v63  ;;  %v6053_v63 = vshrl.u32 %v5868_v57, 16 }
 0x42c   :  { %v6046_v15 = vor.u32 %v6045_v40, %v6041_v2  ;;  %v6134_v2 = vrot.slane %v6132_v26, 1  ;;  %v5883_v40 = vld [vmem:[#allocation2 + $0x238] sm:$0x1] }
 0x42d   :  { %v6058_v17 = vor.u32 %v6057_v51, %v6053_v63  ;;  %v6137_v51 = vshrl.u32 %v5882_v10, 16  ;;  %v6144_v8 = vshll.u32 %v5883_v40, 16 }
 0x42e   :  { %v6051_v61 = vsel %vm1478_vm1, %v6046_v15, %v6050_v53  ;;  %v6149_v53 = vshrl.u32 %v5884_v18, 16  ;;  %v5895_v18 = vld [vmem:[#allocation2 + $0x2c8] sm:$0x1] }
 0x42f   :  { %v6063_v23 = vsel %vm1478_vm1, %v6058_v17, %v6062_v25  ;;  %v5886_v25 = vld [vmem:[#allocation2 + $0x260] sm:$0xff]  ;;  %v6142_v7 = vor.u32 %v6141_v5, %v6137_v51  ;;  %v6216_v40 = vshll.u32 %v5895_v18, 16  ;;  %v5898_v5 = vld [vmem:[#allocation2 + $0x2f0] sm:$0xff] }
 0x430   :  { %v6163_v54 = vshll.u32 %v5886_v25, 16  ;;  %v6154_v1 = vor.u32 %v6153_v35, %v6149_v53  ;;  %v6235_v35 = vshll.u32 %v5898_v5, 16 }
 0x431   :  { %v6218_v53 = vrot.slane %v6216_v40, 1 }
 0x432   :  { %16142 = vmatmul.mubr.bf16.gmra.mrb[8].mxu0 %v5979_v12  ;;  %v6072_v12 = vshll.u32 %v5871_v13, 16  ;;  %v5888_v13 = vld [vmem:[#allocation2 + $0x278] sm:$0xff] }
 0x433   :  { %16145 = vmatprep.mubr.bf16.mxu0 %v5991_v41  ;;  %v5876_v41 = vld [vmem:[#allocation2 + $0x1e8] sm:$0xff]  ;;  %v6175_v11 = vshll.u32 %v5888_v13, 16  ;;  %v6173_v20 = vshrl.u32 %v5888_v13, 16  ;;  %v5899_v13 = vld [vmem:[#allocation2 + $0x2f8] sm:$0x1] }
 0x434   :  { %v6074_v34 = vrot.slane %v6072_v12, 1  ;;  %v6103_v52 = vshll.u32 %v5876_v41, 16  ;;  %v6101_v39 = vshrl.u32 %v5876_v41, 16 }
 0x436   :  { %v6075_v58 = vsel %vm1478_vm1, %v6070_v43, %v6074_v34  ;;  %v6105_v46 = vrot.slane %v6103_v52, 1  ;;  %v6161_v43 = vshrl.u32 %v5886_v25, 16  ;;  %v6165_v34 = vrot.slane %v6163_v54, 1 }
 0x437   :  { %v6177_v52 = vrot.slane %v6175_v11, 1 }
 0x438   :  { %v6106_v30 = vor.u32 %v6105_v46, %v6101_v39  ;;  %v6166_v62 = vor.u32 %v6165_v34, %v6161_v43  ;;  %v5902_v34 = vld [vmem:[#allocation2 + $0x320] sm:$0xff] }
 0x439   :  { %v6178_v46 = vor.u32 %v6177_v52, %v6173_v20  ;;  %v6259_v20 = vshll.u32 %v5902_v34, 16 }
 0x43a   :  { %16146 = vmatmul.mubr.bf16.gmra.mrb[12].mxu0 %v6003_v49  ;;  %v5878_v49 = vld [vmem:[#allocation2 + $0x200] sm:$0xff] }
 0x43b   :  { %16149 = vmatprep.mubr.bf16.mxu0 %v6015_v42  ;;  %v6115_v3 = vshll.u32 %v5878_v49, 16  ;;  %v6110_v42 = vrot.slane %v6108_v29, 1  ;;  %v6113_v55 = vshrl.u32 %v5878_v49, 16  ;;  %v6182_v29 = vrot.slane %v6180_v48, 1  ;;  %v5891_v49 = vld [vmem:[#allocation2 + $0x298] sm:$0x1] }
 0x43c   :  { %v6192_v59 = vshll.u32 %v5891_v49, 16  ;;  %v6273_v49 = vrot.slane %v4960_v22, 1 }
 0x43d   :  { %v6117_v57 = vrot.slane %v6115_v3, 1  ;;  %v6111_v19 = vsel %vm1478_vm1, %v6106_v30, %v6110_v42  ;;  %v6183_v6 = vsel %vm1478_vm1, %v6178_v46, %v6182_v29 }
 0x43f   :  { %v6118_v60 = vor.u32 %v6117_v57, %v6113_v55  ;;  %v6204_v55 = vshll.u32 %v5893_v45, 16  ;;  %v5894_v57 = vld [vmem:[#allocation2 + $0x2c0] sm:$0xff] }
 0x441   :  { %v6123_v63 = vsel %vm1478_vm1, %v6118_v60, %v6122_v47  ;;  %v6206_v10 = vrot.slane %v6204_v55, 1  ;;  %v6223_v60 = vshll.u32 %v5896_v37, 16  ;;  %v5897_v47 = vld [vmem:[#allocation2 + $0x2e0] sm:$0x1] }
 0x442   :  { %16150 = vmatmul.mubr.bf16.gmra.mrb[16].mxu0 %v6027_v9  ;;  %v6130_v9 = vor.u32 %v6129_v0, %v6125_v31  ;;  %v6194_v31 = vrot.slane %v6192_v59, 1  ;;  %v6211_v0 = vshll.u32 %v5894_v57, 16  ;;  %v6228_v51 = vshll.u32 %v5897_v47, 16  ;;  %v5907_v59 = vld [vmem:[#allocation2 + $0x358] sm:$0x1] }
 0x443   :  { %16153 = vmatprep.mubr.bf16.mxu0 %v6039_v27  ;;  %v5885_v27 = vld [vmem:[#allocation2 + $0x250] sm:$0x1] }
 0x444   :  { %v6135_v15 = vsel %vm1478_vm1, %v6130_v9, %v6134_v2  ;;  %v6156_v17 = vshll.u32 %v5885_v27, 16  ;;  %v6209_v9 = vshrl.u32 %v5894_v57, 16  ;;  %v6213_v2 = vrot.slane %v6211_v0, 1 }
 0x445   :  { %v6221_v27 = vshrl.u32 %v5896_v37, 16  ;;  %v6230_v25 = vrot.slane %v6228_v51, 1 }
 0x446   :  { %v6158_v12 = vrot.slane %v6156_v17, 1 }
 0x448   :  { %v6159_v24 = vsel %vm1478_vm1, %v6154_v1, %v6158_v12  ;;  %v6233_v1 = vshrl.u32 %v5898_v5, 16  ;;  %v6237_v12 = vrot.slane %v6235_v35, 1 }
 0x44a   :  { %16154 = vmatmul.mubr.bf16.gmra.mrb[20].mxu0 %v6051_v61  ;;  %v6146_v61 = vrot.slane %v6144_v8, 1  ;;  %v5900_v8 = vld [vmem:[#allocation2 + $0x308] sm:$0xff] }
 0x44b   :  { %16157 = vmatprep.mubr.bf16.mxu0 %v6063_v23  ;;  %v5887_v23 = vld [vmem:[#allocation2 + $0x268] sm:$0x1]  ;;  %v6245_v36 = vshrl.u32 %v5900_v8, 16 }
 0x44c   :  { %v6147_v41 = vsel %vm1478_vm1, %v6142_v7, %v6146_v61  ;;  %v6168_v38 = vshll.u32 %v5887_v23, 16  ;;  %v6247_v7 = vshll.u32 %v5900_v8, 16  ;;  %v5901_v61 = vld [vmem:[#allocation2 + $0x310] sm:$0x1]  ;;  %v6240_v23 = vshll.u32 %v5899_v13, 16 }
 0x44d   :  { %v6252_v43 = vshll.u32 %v5901_v61, 16 }
 0x44f   :  { %v6254_v48 = vrot.slane %v6252_v43, 1 }
 0x452   :  { %16158 = vmatmul.mubr.bf16.gmra.mrb[24].mxu0 %v6075_v58  ;;  %v5890_v58 = vld [vmem:[#allocation2 + $0x290] sm:$0xff] }
 0x453   :  { %16161 = vmatprep.mubr.bf16.mxu0 %v6087_v4  ;;  %v6170_v4 = vrot.slane %v6168_v38, 1  ;;  %v6187_v39 = vshll.u32 %v5890_v58, 16  ;;  %v6185_v30 = vshrl.u32 %v5890_v58, 16  ;;  %v6238_v38 = vor.u32 %v6237_v12, %v6233_v1  ;;  %v5903_v58 = vld [vmem:[#allocation2 + $0x328] sm:$0x1] }
 0x454   :  { %v6264_v46 = vshll.u32 %v5903_v58, 16 }
 0x455   :  { %v6171_v3 = vsel %vm1478_vm1, %v6166_v62, %v6170_v4  ;;  %v6189_v42 = vrot.slane %v6187_v39, 1  ;;  %v6257_v4 = vshrl.u32 %v5902_v34, 16  ;;  %v6261_v39 = vrot.slane %v6259_v20, 1 }
 0x457   :  { %v6262_v45 = vor.u32 %v6261_v39, %v6257_v4 }
 0x45a   :  { %16162 = vmatmul.mubr.bf16.gmra.mrb[28].mxu0 %v6099_v14  ;;  %v6201_v14 = vrot.slane %v6199_v16, 1  ;;  %v6276_v16 = vshll.u32 %v5905_v21, 16 }
 0x45b   :  { %16165 = vmatprep.mubr.bf16.mxu0 %v6111_v19  ;;  %v6190_v19 = vor.u32 %v6189_v42, %v6185_v30  ;;  %v6274_v30 = vor.u32 %v6273_v49, %v4957_v32 }
 0x45c   :  { %v6202_v26 = vor.u32 %v6201_v14, %v6197_v56  ;;  %v6278_v42 = vrot.slane %v6276_v16, 1  ;;  %v6288_v56 = vshll.u32 %v5907_v59, 16 }
 0x45d   :  { %v6195_v44 = vsel %vm1478_vm1, %v6190_v19, %v6194_v31 }
 0x45e   :  { %v6207_v50 = vsel %vm1478_vm1, %v6202_v26, %v6206_v10  ;;  %v6279_v14 = vsel %vm1478_vm1, %v6274_v30, %v6278_v42  ;;  %v6290_v55 = vrot.slane %v6288_v56, 1 }
 0x460   :  { %v6291_v22 = vsel %vm1478_vm1, %v19892_v33, %v6290_v55 }
 0x462   :  { %16166 = vmatmul.mubr.bf16.gmra.mrb[32].mxu0 %v6123_v63  ;;  %v6225_v63 = vrot.slane %v6223_v60, 1 }
 0x463   :  { %16169 = vmatprep.mubr.bf16.mxu0 %v6135_v15  ;;  %v6214_v15 = vor.u32 %v6213_v2, %v6209_v9 }
 0x464   :  { %v6226_v17 = vor.u32 %v6225_v63, %v6221_v27 }
 0x465   :  { %v6219_v54 = vsel %vm1478_vm1, %v6214_v15, %v6218_v53 }
 0x466   :  { %v6231_v11 = vsel %vm1478_vm1, %v6226_v17, %v6230_v25 }
 0x46a   :  { %16170 = vmatmul.mubr.bf16.gmra.mrb[36].mxu0 %v6147_v41  ;;  %v6249_v41 = vrot.slane %v6247_v7, 1 }
 0x46b   :  { %16173 = vmatprep.mubr.bf16.mxu0 %v6159_v24  ;;  %v6242_v24 = vrot.slane %v6240_v23, 1 }
 0x46c   :  { %v6250_v52 = vor.u32 %v6249_v41, %v6245_v36 }
 0x46d   :  { %v6243_v62 = vsel %vm1478_vm1, %v6238_v38, %v6242_v24 }
 0x46e   :  { %v6255_v29 = vsel %vm1478_vm1, %v6250_v52, %v6254_v48 }
 0x472   :  { %16174 = vmatmul.mubr.bf16.gmra.mrb[40].mxu0 %v6171_v3  ;;  %v6266_v3 = vrot.slane %v6264_v46, 1 }
 0x473   :  { %16177 = vmatprep.mubr.bf16.mxu0 %v6183_v6 }
 0x474   :  { %v6267_v6 = vsel %vm1478_vm1, %v6262_v45, %v6266_v3 }
 0x47a   :  { %16178 = vmatmul.mubr.bf16.gmra.mrb[44].mxu0 %v6195_v44 }
 0x47b   :  { %16181 = vmatprep.mubr.bf16.mxu0 %v6207_v50 }
 0x482   :  { %16182 = vmatmul.mubr.bf16.gmra.mrb[48].mxu0 %v6219_v54 }
 0x483   :  { %16185 = vmatprep.mubr.bf16.mxu0 %v6231_v11 }
 0x48a   :  { %16186 = vmatmul.mubr.bf16.gmra.mrb[52].mxu0 %v6243_v62 }
 0x48b   :  { %16189 = vmatprep.mubr.bf16.mxu0 %v6255_v29 }
 0x492   :  { %16190 = vmatmul.mubr.bf16.gmra.mrb[56].mxu0 %v6267_v6 }
 0x493   :  { %16193 = vmatprep.mubr.bf16.mxu0 %v6279_v14 }
 0x49a   :  { %16194 = vmatmul.mubr.bf16.gmra.mrb[60].mxu0 %v6291_v22 }
 0x4f5   :  { %v19917_v57 = vpop.f32.mrb[0].mxu0 }
 0x4f6   :  { %v19919_v37 = vpop.f32.mrb[1].mxu0  ;;  %v6813_v33 = vmul.f32 %v19917_v57, %v19917_v57 }
 0x4f7   :  { %v19921_v28 = vpop.f32.mrb[2].mxu0  ;;  %v6811_v19 = vmul.f32 %v19919_v37, %v19919_v37 }
 0x4f8   :  { %v19923_v32 = vpop.f32.mrb[3].mxu0  ;;  %v6814_v18 = vmul.f32 %v19921_v28, %v19921_v28 }
 0x4f9   :  { %v6742_v31 = vadd.f32 %v19923_v32, %v19919_v37  ;;  %v6812_v0 = vmul.f32 %v19923_v32, %v19923_v32 }
 0x4fb   :  { %v6743_v26 = vadd.f32 %v19917_v57, %v6742_v31  ;;  %v6875_v10 = vadd.f32 %v6812_v0, %v6811_v19 }
 0x4fd   :  { %v6876_v60 = vadd.f32 %v6875_v10, %v6813_v33  ;;  %v19936_v47 = vpop.f32.mrb[4].mxu0  ;;  %v6744_v44 = vadd.f32 %v19921_v28, %v6743_v26 }
 0x4fe   :  { %v19939_v9 = vpop.f32.mrb[5].mxu0  ;;  %v6817_v15 = vmul.f32 %v19936_v47, %v19936_v47 }
 0x4ff   :  { %v6745_v2 = vadd.f32 %v6744_v44, %v19939_v9  ;;  %v6815_v40 = vmul.f32 %v19939_v9, %v19939_v9  ;;  %v6877_v50 = vadd.f32 %v6876_v60, %v6814_v18  ;;  %v19944_v27 = vpop.f32.mrb[6].mxu0 }
 0x500   :  { %v19946_v63 = vpop.f32.mrb[7].mxu0  ;;  %v6818_v17 = vmul.f32 %v19944_v27, %v19944_v27 }
 0x501   :  { %v6878_v51 = vadd.f32 %v6877_v50, %v6815_v40  ;;  %v6746_v5 = vadd.f32 %v6745_v2, %v19946_v63  ;;  %v6816_v8 = vmul.f32 %v19946_v63, %v19946_v63 }
 0x503   :  { %v6747_v53 = vadd.f32 %v19936_v47, %v6746_v5  ;;  %v6879_v35 = vadd.f32 %v6878_v51, %v6816_v8 }
 0x505   :  { %v6880_v25 = vadd.f32 %v6879_v35, %v6817_v15  ;;  %v19956_v13 = vpop.f32.mrb[8].mxu0  ;;  %v6748_v7 = vadd.f32 %v19944_v27, %v6747_v53 }
 0x506   :  { %v19959_v61 = vpop.f32.mrb[9].mxu0  ;;  %v6821_v34 = vmul.f32 %v19956_v13, %v19956_v13 }
 0x507   :  { %v6749_v54 = vadd.f32 %v6748_v7, %v19959_v61  ;;  %v6819_v1 = vmul.f32 %v19959_v61, %v19959_v61  ;;  %v6881_v12 = vadd.f32 %v6880_v25, %v6818_v17  ;;  %v19964_v23 = vpop.f32.mrb[10].mxu0 }
 0x508   :  { %v19966_v11 = vpop.f32.mrb[11].mxu0  ;;  %v6822_v20 = vmul.f32 %v19964_v23, %v19964_v23 }
 0x509   :  { %v6882_v36 = vadd.f32 %v6881_v12, %v6819_v1  ;;  %v6750_v41 = vadd.f32 %v6749_v54, %v19966_v11  ;;  %v6820_v43 = vmul.f32 %v19966_v11, %v19966_v11 }
 0x50b   :  { %v6751_v38 = vadd.f32 %v19956_v13, %v6750_v41  ;;  %v6883_v24 = vadd.f32 %v6882_v36, %v6820_v43 }
 0x50d   :  { %v6884_v52 = vadd.f32 %v6883_v24, %v6821_v34  ;;  %v19976_v48 = vpop.f32.mrb[12].mxu0  ;;  %v6752_v58 = vadd.f32 %v19964_v23, %v6751_v38 }
 0x50e   :  { %v19979_v21 = vpop.f32.mrb[13].mxu0  ;;  %v6825_v3 = vmul.f32 %v19976_v48, %v19976_v48 }
 0x50f   :  { %v6753_v62 = vadd.f32 %v6752_v58, %v19979_v21  ;;  %v6823_v4 = vmul.f32 %v19979_v21, %v19979_v21  ;;  %v6885_v39 = vadd.f32 %v6884_v52, %v6822_v20  ;;  %v19984_v46 = vpop.f32.mrb[14].mxu0 }
 0x510   :  { %v19986_v29 = vpop.f32.mrb[15].mxu0  ;;  %v6826_v59 = vmul.f32 %v19984_v46, %v19984_v46 }
 0x511   :  { %v6886_v49 = vadd.f32 %v6885_v39, %v6823_v4  ;;  %v6754_v16 = vadd.f32 %v6753_v62, %v19986_v29  ;;  %v6824_v45 = vmul.f32 %v19986_v29, %v19986_v29 }
 0x513   :  { %v6755_v30 = vadd.f32 %v19976_v48, %v6754_v16  ;;  %v6887_v42 = vadd.f32 %v6886_v49, %v6824_v45 }
 0x515   :  { %v6888_v6 = vadd.f32 %v6887_v42, %v6825_v3  ;;  %v19996_v56 = vpop.f32.mrb[16].mxu0  ;;  %v6756_v14 = vadd.f32 %v19984_v46, %v6755_v30 }
 0x516   :  { %v19999_v55 = vpop.f32.mrb[17].mxu0  ;;  %v6829_v60 = vmul.f32 %v19996_v56, %v19996_v56 }
 0x517   :  { %v6757_v22 = vadd.f32 %v6756_v14, %v19999_v55  ;;  %v6827_v19 = vmul.f32 %v19999_v55, %v19999_v55  ;;  %v6889_v31 = vadd.f32 %v6888_v6, %v6826_v59  ;;  %v20004_v0 = vpop.f32.mrb[18].mxu0 }
 0x518   :  { %v20006_v33 = vpop.f32.mrb[19].mxu0  ;;  %v6830_v40 = vmul.f32 %v20004_v0, %v20004_v0 }
 0x519   :  { %v6890_v26 = vadd.f32 %v6889_v31, %v6827_v19  ;;  %v6758_v10 = vadd.f32 %v6757_v22, %v20006_v33  ;;  %v6828_v18 = vmul.f32 %v20006_v33, %v20006_v33 }
 0x51b   :  { %v6759_v44 = vadd.f32 %v19996_v56, %v6758_v10  ;;  %v6891_v2 = vadd.f32 %v6890_v26, %v6828_v18 }
 0x51d   :  { %v6892_v50 = vadd.f32 %v6891_v2, %v6829_v60  ;;  %v20016_v51 = vpop.f32.mrb[20].mxu0  ;;  %v6760_v5 = vadd.f32 %v20004_v0, %v6759_v44 }
 0x51e   :  { %v20019_v8 = vpop.f32.mrb[21].mxu0  ;;  %v6833_v12 = vmul.f32 %v20016_v51, %v20016_v51 }
 0x51f   :  { %v6761_v15 = vadd.f32 %v6760_v5, %v20019_v8  ;;  %v6831_v53 = vmul.f32 %v20019_v8, %v20019_v8  ;;  %v6893_v35 = vadd.f32 %v6892_v50, %v6830_v40  ;;  %v20024_v17 = vpop.f32.mrb[22].mxu0 }
 0x520   :  { %v20026_v25 = vpop.f32.mrb[23].mxu0  ;;  %v6834_v43 = vmul.f32 %v20024_v17, %v20024_v17 }
 0x521   :  { %v6894_v7 = vadd.f32 %v6893_v35, %v6831_v53  ;;  %v6762_v54 = vadd.f32 %v6761_v15, %v20026_v25  ;;  %v6832_v1 = vmul.f32 %v20026_v25, %v20026_v25  ;;  %v18017_v53 = vld [vmem:[%s23641_s2 + $0x40] sm:$0xff]  }
 0x522   :  { %16197 = vmatprep.subr.bf16.mxu1 %v18017_v53 }
 0x523   :  { %v6763_v36 = vadd.f32 %v20016_v51, %v6762_v54  ;;  %v6895_v41 = vadd.f32 %v6894_v7, %v6832_v1  ;;  %16198 = vmatpush3.bf16.msra.mxu1 %v18017_v53 }
 0x525   :  { %v6896_v34 = vadd.f32 %v6895_v41, %v6833_v12  ;;  %v20036_v38 = vpop.f32.mrb[24].mxu0  ;;  %v6764_v24 = vadd.f32 %v20024_v17, %v6763_v36 }
 0x526   :  { %v20039_v20 = vpop.f32.mrb[25].mxu0  ;;  %v6837_v3 = vmul.f32 %v20036_v38, %v20036_v38 }
 0x527   :  { %v6765_v52 = vadd.f32 %v6764_v24, %v20039_v20  ;;  %v6835_v58 = vmul.f32 %v20039_v20, %v20039_v20  ;;  %v6897_v62 = vadd.f32 %v6896_v34, %v6834_v43  ;;  %v20044_v4 = vpop.f32.mrb[26].mxu0 }
 0x528   :  { %v20046_v39 = vpop.f32.mrb[27].mxu0  ;;  %v6838_v59 = vmul.f32 %v20044_v4, %v20044_v4 }
 0x529   :  { %v6898_v49 = vadd.f32 %v6897_v62, %v6835_v58  ;;  %v6766_v16 = vadd.f32 %v6765_v52, %v20046_v39  ;;  %v6836_v45 = vmul.f32 %v20046_v39, %v20046_v39  ;;  %v18018_v52 = vld [vmem:[%s23641_s2 + $0x48] sm:$0xff]  }
 0x52a   :  { %16199 = vmatprep.subr.bf16.mxu1 %v18018_v52 }
 0x52b   :  { %v6767_v30 = vadd.f32 %v20036_v38, %v6766_v16  ;;  %v6899_v42 = vadd.f32 %v6898_v49, %v6836_v45  ;;  %16200 = vmatpush3.bf16.msra.mxu1 %v18018_v52 }
 0x52d   :  { %v6900_v6 = vadd.f32 %v6899_v42, %v6837_v3  ;;  %v20056_v14 = vpop.f32.mrb[28].mxu0  ;;  %v6768_v22 = vadd.f32 %v20044_v4, %v6767_v30  ;;  %v18019_v30 = vld [vmem:[%s23641_s2 + $0x50] sm:$0xff]  }
 0x52e   :  { %v20059_v19 = vpop.f32.mrb[29].mxu0  ;;  %v6841_v50 = vmul.f32 %v20056_v14, %v20056_v14  ;;  %16201 = vmatprep.subr.bf16.mxu1 %v18019_v30 }
 0x52f   :  { %v6769_v31 = vadd.f32 %v6768_v22, %v20059_v19  ;;  %v6839_v26 = vmul.f32 %v20059_v19, %v20059_v19  ;;  %v6901_v10 = vadd.f32 %v6900_v6, %v6838_v59  ;;  %v20064_v18 = vpop.f32.mrb[30].mxu0  ;;  %16202 = vmatpush3.bf16.msra.mxu1 %v18019_v30 }
 0x530   :  { %v20066_v60 = vpop.f32.mrb[31].mxu0  ;;  %v6842_v35 = vmul.f32 %v20064_v18, %v20064_v18 }
 0x531   :  { %v6902_v44 = vadd.f32 %v6901_v10, %v6839_v26  ;;  %v6770_v2 = vadd.f32 %v6769_v31, %v20066_v60  ;;  %v6840_v40 = vmul.f32 %v20066_v60, %v20066_v60 }
 0x533   :  { %v6771_v5 = vadd.f32 %v20056_v14, %v6770_v2  ;;  %v6903_v15 = vadd.f32 %v6902_v44, %v6840_v40 }
 0x535   :  { %v6904_v7 = vadd.f32 %v6903_v15, %v6841_v50  ;;  %v20079_v54 = vpop.f32.mrb[32].mxu0  ;;  %v6772_v1 = vadd.f32 %v20064_v18, %v6771_v5  ;;  %v18020_v50 = vld [vmem:[%s23641_s2 + $0x58] sm:$0xff]  }
 0x536   :  { %v20082_v12 = vpop.f32.mrb[33].mxu0  ;;  %v6845_v16 = vmul.f32 %v20079_v54, %v20079_v54  ;;  %16203 = vmatprep.subr.bf16.mxu1 %v18020_v50 }
 0x537   :  { %v6773_v36 = vadd.f32 %v6772_v1, %v20082_v12  ;;  %v6843_v41 = vmul.f32 %v20082_v12, %v20082_v12  ;;  %v6905_v43 = vadd.f32 %v6904_v7, %v6842_v35  ;;  %v20087_v34 = vpop.f32.mrb[34].mxu0  ;;  %16204 = vmatpush3.bf16.msra.mxu1 %v18020_v50 }
 0x538   :  { %v20089_v24 = vpop.f32.mrb[35].mxu0  ;;  %v6846_v42 = vmul.f32 %v20087_v34, %v20087_v34 }
 0x539   :  { %v6906_v58 = vadd.f32 %v6905_v43, %v6843_v41  ;;  %v6774_v62 = vadd.f32 %v6773_v36, %v20089_v24  ;;  %v6844_v49 = vmul.f32 %v20089_v24, %v20089_v24  ;;  %v18021_v36 = vld [vmem:[%s23641_s2 + $0x60] sm:$0xff]  }
 0x53a   :  { %16205 = vmatprep.subr.bf16.mxu1 %v18021_v36 }
 0x53b   :  { %v6775_v45 = vadd.f32 %v20079_v54, %v6774_v62  ;;  %v6907_v3 = vadd.f32 %v6906_v58, %v6844_v49  ;;  %16206 = vmatpush3.bf16.msra.mxu1 %v18021_v36 }
 0x53d   :  { %v6908_v59 = vadd.f32 %v6907_v3, %v6845_v16  ;;  %v20105_v6 = vpop.f32.mrb[36].mxu0  ;;  %v6776_v22 = vadd.f32 %v20087_v34, %v6775_v45 }
 0x53e   :  { %23955 = vst [vmem:[#allocation6_spill] sm:$0xff] %v20105_v6  ;;  %v20108_v31 = vpop.f32.mrb[37].mxu0  ;;  %v6849_v35 = vmul.f32 %v20105_v6, %v20105_v6 }
 0x53f   :  { %v6777_v26 = vadd.f32 %v6776_v22, %v20108_v31  ;;  %v6847_v10 = vmul.f32 %v20108_v31, %v20108_v31  ;;  %v6909_v44 = vadd.f32 %v6908_v59, %v6846_v42  ;;  %v20113_v2 = vpop.f32.mrb[38].mxu0  ;;  %v18022_v42 = vld [vmem:[%s23641_s2 + $0x68] sm:$0xff]  }
 0x540   :  { %23956 = vst [vmem:[#allocation7_spill] sm:$0xff] %v20113_v2  ;;  %v20115_v40 = vpop.f32.mrb[39].mxu0  ;;  %v6850_v41 = vmul.f32 %v20113_v2, %v20113_v2  ;;  %16207 = vmatprep.subr.bf16.mxu1 %v18022_v42 }
 0x541   :  { %23957 = vst [vmem:[#allocation8_spill] sm:$0xff] %v20115_v40  ;;  %v6910_v5 = vadd.f32 %v6909_v44, %v6847_v10  ;;  %v6778_v15 = vadd.f32 %v6777_v26, %v20115_v40  ;;  %v6848_v53 = vmul.f32 %v20115_v40, %v20115_v40  ;;  %16208 = vmatpush3.bf16.msra.mxu1 %v18022_v42 }
 0x543   :  { %v6779_v7 = vadd.f32 %v20105_v6, %v6778_v15  ;;  %v6911_v1 = vadd.f32 %v6910_v5, %v6848_v53  ;;  %v18023_v5 = vld [vmem:[%s23641_s2 + $0x70] sm:$0xff]  }
 0x544   :  { %16209 = vmatprep.subr.bf16.mxu1 %v18023_v5 }
 0x545   :  { %v6912_v43 = vadd.f32 %v6911_v1, %v6849_v35  ;;  %v20131_v52 = vpop.f32.mrb[40].mxu0  ;;  %v6780_v58 = vadd.f32 %v20113_v2, %v6779_v7  ;;  %16210 = vmatpush3.bf16.msra.mxu1 %v18023_v5 }
 0x546   :  { %23958 = vst [vmem:[#allocation9_spill] sm:$0xff] %v20131_v52  ;;  %v20134_v62 = vpop.f32.mrb[41].mxu0  ;;  %v6853_v10 = vmul.f32 %v20131_v52, %v20131_v52 }
 0x547   :  { %23959 = vst [vmem:[#allocation10_spill] sm:$0xff] %v20134_v62  ;;  %v6781_v49 = vadd.f32 %v6780_v58, %v20134_v62  ;;  %v6851_v16 = vmul.f32 %v20134_v62, %v20134_v62  ;;  %v6913_v45 = vadd.f32 %v6912_v43, %v6850_v41  ;;  %v20139_v3 = vpop.f32.mrb[42].mxu0 }
 0x548   :  { %23960 = vst [vmem:[#allocation11_spill] sm:$0xff] %v20139_v3  ;;  %v20141_v30 = vpop.f32.mrb[43].mxu0  ;;  %v6854_v15 = vmul.f32 %v20139_v3, %v20139_v3 }
 0x549   :  { %23961 = vst [vmem:[#allocation12_spill] sm:$0xff] %v20141_v30  ;;  %v6914_v59 = vadd.f32 %v6913_v45, %v6851_v16  ;;  %v6782_v22 = vadd.f32 %v6781_v49, %v20141_v30  ;;  %v6852_v26 = vmul.f32 %v20141_v30, %v20141_v30  ;;  %v18024_v16 = vld [vmem:[%s23641_s2 + $0x78] sm:$0xff]  }
 0x54a   :  { %16211 = vmatprep.subr.bf16.mxu1 %v18024_v16 }
 0x54b   :  { %v6783_v44 = vadd.f32 %v20131_v52, %v6782_v22  ;;  %v6915_v50 = vadd.f32 %v6914_v59, %v6852_v26  ;;  %16212 = vmatpush3.bf16.msra.mxu1 %v18024_v16  ;;  %v20195_v16 = vld [vmem:[%s23641_s2] sm:$0xff]  }
 0x54c   :  { %23970 = vst [vmem:[#allocation21_spill] sm:$0xff] %v20195_v16  ;;  %16277 = vmatprep.subr.bf16.mxu1 %v20195_v16 }
 0x54d   :  { %v6916_v53 = vadd.f32 %v6915_v50, %v6853_v10  ;;  %v20157_v35 = vpop.f32.mrb[44].mxu0  ;;  %v6784_v7 = vadd.f32 %v20139_v3, %v6783_v44 }
 0x54e   :  { %23962 = vst [vmem:[#allocation13_spill] sm:$0xff] %v20157_v35  ;;  %v20160_v1 = vpop.f32.mrb[45].mxu0  ;;  %v6857_v22 = vmul.f32 %v20157_v35, %v20157_v35 }
 0x54f   :  { %23963 = vst [vmem:[#allocation14_spill] sm:$0xff] %v20160_v1  ;;  %v6785_v36 = vadd.f32 %v6784_v7, %v20160_v1  ;;  %v6855_v41 = vmul.f32 %v20160_v1, %v20160_v1  ;;  %v6917_v43 = vadd.f32 %v6916_v53, %v6854_v15  ;;  %v20165_v58 = vpop.f32.mrb[46].mxu0 }
 0x550   :  { %23964 = vst [vmem:[#allocation15_spill] sm:$0xff] %v20165_v58  ;;  %v20167_v49 = vpop.f32.mrb[47].mxu0  ;;  %v6858_v44 = vmul.f32 %v20165_v58, %v20165_v58 }
 0x551   :  { %23965 = vst [vmem:[#allocation16_spill] sm:$0xff] %v20167_v49  ;;  %v6918_v45 = vadd.f32 %v6917_v43, %v6855_v41  ;;  %v6786_v42 = vadd.f32 %v6785_v36, %v20167_v49  ;;  %v6856_v59 = vmul.f32 %v20167_v49, %v20167_v49 }
 0x553   :  { %v6787_v26 = vadd.f32 %v20157_v35, %v6786_v42  ;;  %v6919_v10 = vadd.f32 %v6918_v45, %v6856_v59 }
 0x555   :  { %v6920_v50 = vadd.f32 %v6919_v10, %v6857_v22  ;;  %v20180_v5 = vpop.f32.mrb[48].mxu0  ;;  %v6788_v15 = vadd.f32 %v20165_v58, %v6787_v26 }
 0x556   :  { %23966 = vst [vmem:[#allocation17_spill] sm:$0xff] %v20180_v5  ;;  %v20183_v53 = vpop.f32.mrb[49].mxu0  ;;  %v6861_v26 = vmul.f32 %v20180_v5, %v20180_v5 }
 0x557   :  { %23967 = vst [vmem:[#allocation18_spill] sm:$0xff] %v20183_v53  ;;  %v6789_v7 = vadd.f32 %v6788_v15, %v20183_v53  ;;  %v6859_v36 = vmul.f32 %v20183_v53, %v20183_v53  ;;  %v6921_v41 = vadd.f32 %v6920_v50, %v6858_v44  ;;  %v20188_v43 = vpop.f32.mrb[50].mxu0 }
 0x558   :  { %23968 = vst [vmem:[#allocation19_spill] sm:$0xff] %v20188_v43  ;;  %v20190_v45 = vpop.f32.mrb[51].mxu0  ;;  %v6862_v50 = vmul.f32 %v20188_v43, %v20188_v43 }
 0x559   :  { %23969 = vst [vmem:[#allocation20_spill] sm:$0xff] %v20190_v45  ;;  %v6922_v42 = vadd.f32 %v6921_v41, %v6859_v36  ;;  %v6790_v59 = vadd.f32 %v6789_v7, %v20190_v45  ;;  %v6860_v22 = vmul.f32 %v20190_v45, %v20190_v45 }
 0x55b   :  { %v6791_v10 = vadd.f32 %v20180_v5, %v6790_v59  ;;  %v6923_v44 = vadd.f32 %v6922_v42, %v6860_v22 }
 0x55d   :  { %v6924_v15 = vadd.f32 %v6923_v44, %v6861_v26  ;;  %v20206_v53 = vpop.f32.mrb[52].mxu0  ;;  %v6792_v36 = vadd.f32 %v20188_v43, %v6791_v10 }
 0x55e   :  { %23971 = vst [vmem:[#allocation22_spill] sm:$0xff] %v20206_v53  ;;  %v20209_v7 = vpop.f32.mrb[53].mxu0  ;;  %v6865_v10 = vmul.f32 %v20206_v53, %v20206_v53 }
 0x55f   :  { %23972 = vst [vmem:[#allocation23_spill] sm:$0xff] %v20209_v7  ;;  %v6793_v41 = vadd.f32 %v6792_v36, %v20209_v7  ;;  %v6863_v16 = vmul.f32 %v20209_v7, %v20209_v7  ;;  %v6925_v45 = vadd.f32 %v6924_v15, %v6862_v50  ;;  %v20214_v58 = vpop.f32.mrb[54].mxu0 }
 0x560   :  { %23973 = vst [vmem:[#allocation24_spill] sm:$0xff] %v20214_v58  ;;  %v20216_v59 = vpop.f32.mrb[55].mxu0  ;;  %v6866_v7 = vmul.f32 %v20214_v58, %v20214_v58 }
 0x561   :  { %23974 = vst [vmem:[#allocation25_spill] sm:$0xff] %v20216_v59  ;;  %v6926_v42 = vadd.f32 %v6925_v45, %v6863_v16  ;;  %v6794_v22 = vadd.f32 %v6793_v41, %v20216_v59  ;;  %v6864_v26 = vmul.f32 %v20216_v59, %v20216_v59 }
 0x563   :  { %v6795_v44 = vadd.f32 %v20206_v53, %v6794_v22  ;;  %v6927_v36 = vadd.f32 %v6926_v42, %v6864_v26 }
 0x565   :  { %v6928_v50 = vadd.f32 %v6927_v36, %v6865_v10  ;;  %v20226_v15 = vpop.f32.mrb[56].mxu0  ;;  %v6796_v43 = vadd.f32 %v20214_v58, %v6795_v44 }
 0x566   :  { %23975 = vst [vmem:[#allocation26_spill] sm:$0xff] %v20226_v15  ;;  %v20229_v45 = vpop.f32.mrb[57].mxu0  ;;  %v6869_v44 = vmul.f32 %v20226_v15, %v20226_v15 }
 0x567   :  { %23976 = vst [vmem:[#allocation27_spill] sm:$0xff] %v20229_v45  ;;  %v6797_v16 = vadd.f32 %v6796_v43, %v20229_v45  ;;  %v6867_v41 = vmul.f32 %v20229_v45, %v20229_v45  ;;  %v6929_v59 = vadd.f32 %v6928_v50, %v6866_v7  ;;  %v20234_v5 = vpop.f32.mrb[58].mxu0 }
 0x568   :  { %23977 = vst [vmem:[#allocation28_spill] sm:$0xff] %v20234_v5  ;;  %v20236_v22 = vpop.f32.mrb[59].mxu0  ;;  %v6870_v45 = vmul.f32 %v20234_v5, %v20234_v5 }
 0x569   :  { %23978 = vst [vmem:[#allocation29_spill] sm:$0xff] %v20236_v22  ;;  %v6930_v42 = vadd.f32 %v6929_v59, %v6867_v41  ;;  %v6798_v26 = vadd.f32 %v6797_v16, %v20236_v22  ;;  %v6868_v10 = vmul.f32 %v20236_v22, %v20236_v22 }
 0x56b   :  { %v6799_v36 = vadd.f32 %v20226_v15, %v6798_v26  ;;  %v6931_v43 = vadd.f32 %v6930_v42, %v6868_v10 }
 0x56d   :  { %v6932_v7 = vadd.f32 %v6931_v43, %v6869_v44  ;;  %v20246_v50 = vpop.f32.mrb[60].mxu0  ;;  %v6800_v58 = vadd.f32 %v20234_v5, %v6799_v36 }
 0x56e   :  { %23979 = vst [vmem:[#allocation30_spill] sm:$0xff] %v20246_v50  ;;  %v6663_v59 = vpop.f32.mrb[61].mxu0  ;;  %v6873_v42 = vmul.f32 %v20246_v50, %v20246_v50 }
 0x56f   :  { %v6801_v41 = vadd.f32 %v6800_v58, %v6663_v59  ;;  %v6871_v16 = vmul.f32 %v6663_v59, %v6663_v59  ;;  %v6933_v53 = vadd.f32 %v6932_v7, %v6870_v45  ;;  %v20249_v35 = vpop.f32.mrb[62].mxu0 }
 0x570   :  { %v6666_v22 = vpop.f32.mrb[63].mxu0  ;;  %v6874_v44 = vmul.f32 %v20249_v35, %v20249_v35 }
 0x571   :  { %v6934_v49 = vadd.f32 %v6933_v53, %v6871_v16  ;;  %v6802_v1 = vadd.f32 %v6801_v41, %v6666_v22  ;;  %v6872_v3 = vmul.f32 %v6666_v22, %v6666_v22 }
 0x573   :  { %v6803_v26 = vadd.f32 %v20246_v50, %v6802_v1  ;;  %v6935_v10 = vadd.f32 %v6934_v49, %v6872_v3 }
 0x575   :  { %v6804_v36 = vadd.f32 %v20249_v35, %v6803_v26  ;;  %v6936_v58 = vadd.f32 %v6935_v10, %v6873_v42  ;;  %v6957_v42 = vlaneseq }
 0x577   :  { %v6805_v43 = vrot.slane %v6804_v36, 4  ;;  %v6937_v45 = vadd.f32 %v6936_v58, %v6874_v44  ;;  %v20257_v10 = vshrl.u32 %v6957_v42, 7  ;;  %v23988_v42 = vld [vmem:[#allocation7_spill] sm:$0xff] }
 0x579   :  { %v6806_v7 = vadd.f32 %v6805_v43, %v6804_v36  ;;  %v6938_v5 = vrot.slane %v6937_v45, 4  ;;  %23980 = vst [vmem:[#allocation31_spill] sm:$0xff] %v20257_v10 }
 0x57b   :  { %v6807_v15 = vrot.slane %v6806_v7, 2  ;;  %v6939_v53 = vadd.f32 %v6938_v5, %v6937_v45  ;;  %v19_v5 = vld [vmem:[%s23642_s3] sm:$0xf] }
 0x57d   :  { %v6808_v41 = vadd.f32 %v6807_v15, %v6806_v7  ;;  %v6940_v16 = vrot.slane %v6939_v53, 2  ;;  %v6959_v15 = vsub.s32 0, %v20257_v10 }
 0x57f   :  { %v6809_v52 = vrot.slane %v6808_v41, 1  ;;  %v6941_v30 = vadd.f32 %v6940_v16, %v6939_v53 }
 0x581   :  { %v6810_v62 = vadd.f32 %v6809_v52, %v6808_v41  ;;  %v6942_v2 = vrot.slane %v6941_v30, 1 }
 0x583   :  { %v6943_v1 = vadd.f32 %v6942_v2, %v6941_v30  ;;  %v6944_v3 = vmul.f32 0.001953125, %v6810_v62  ;;  %v7027_v62 = vsub.s32 1, %v20257_v10  ;;  %v24004_v10 = vld [vmem:[#allocation23_spill] sm:$0xff] }
 0x585   :  { %v6945_v49 = vmul.f32 0.001953125, %v6943_v1  ;;  %v6946_v50 = vmul.f32 %v6944_v3, %v6944_v3 }
 0x587   :  { %v6947_v6 = vsub.f32 %v6945_v49, %v6946_v50  ;;  %v23984_v49 = vld [vmem:[#allocation8_spill] sm:$0xff] }
 0x589   :  { %v6948_v40 = vmax.f32 %v6947_v6, 0.0 }
 0x58b   :  { %v6949_v26 = vadd.f32 1e-05, %v6948_v40 }
 0x58d   :  { %18089 = vrsqrt.f32 %v6949_v26  ;;  %v23986_v26 = vld [vmem:[#allocation6_spill] sm:$0xff] }
 0x597   :  { %v18090_v44 = vpop.eup %18089 }
 0x598   :  { %v6951_v52 = vmul.f32 %v18090_v44, %v19_v5  ;;  %v23994_v44 = vld [vmem:[#allocation9_spill] sm:$0xff] }
 0x59a   :  { %v6952_v36 = vmul.f32 %v6951_v52, %v6944_v3  ;;  %v20263_v2 = vrot.slane %v6951_v52, %v6959_v15  ;;  %v23992_v15 = vld [vmem:[#allocation12_spill] sm:$0xff] }
 0x59c   :  { %v6954_v30 = vrot.slane %v6952_v36, 7  ;;  %v7021_v6 = vmul.f32 %v20263_v2, %v6663_v59  ;;  %v7022_v40 = vmul.f32 %v20263_v2, %v6666_v22  ;;  %v20270_v50 = vmul.f32 %v20263_v2, %v19919_v37  ;;  %v23995_v36 = vld [vmem:[#allocation11_spill] sm:$0xff] }
 0x59d   :  { %v20274_v58 = vmul.f32 %v20263_v2, %v19923_v32  ;;  %v20278_v43 = vmul.f32 %v19917_v57, %v20263_v2  ;;  %v20282_v45 = vmul.f32 %v19921_v28, %v20263_v2  ;;  %v20286_v59 = vmul.f32 %v20263_v2, %v19939_v9 }
 0x59e   :  { %v6956_v22 = vsub.f32 %v19_v5, %v6954_v30  ;;  %v20290_v37 = vmul.f32 %v20263_v2, %v19946_v63  ;;  %v20294_v32 = vmul.f32 %v19936_v47, %v20263_v2  ;;  %v20298_v57 = vmul.f32 %v19944_v27, %v20263_v2  ;;  %v23990_v5 = vld [vmem:[#allocation10_spill] sm:$0xff] }
 0x59f   :  { %v20302_v28 = vmul.f32 %v20263_v2, %v19959_v61  ;;  %v20306_v9 = vmul.f32 %v20263_v2, %v19966_v11  ;;  %v20310_v63 = vmul.f32 %v19956_v13, %v20263_v2  ;;  %v20314_v47 = vmul.f32 %v19964_v23, %v20263_v2  ;;  %v23996_v30 = vld [vmem:[#allocation14_spill] sm:$0xff] }
 0x5a0   :  { %v20316_v7 = vrot.slane %v6956_v22, %v7027_v62  ;;  %v20320_v27 = vmul.f32 %v20263_v2, %v19979_v21  ;;  %v20324_v61 = vmul.f32 %v20263_v2, %v19986_v29  ;;  %v20328_v11 = vmul.f32 %v19976_v48, %v20263_v2 }
 0x5a1   :  { %v20332_v13 = vmul.f32 %v19984_v46, %v20263_v2  ;;  %v20336_v23 = vmul.f32 %v20263_v2, %v19999_v55  ;;  %v20340_v21 = vmul.f32 %v20263_v2, %v20006_v33  ;;  %v20344_v29 = vmul.f32 %v19996_v56, %v20263_v2 }
 0x5a2   :  { %v7089_v53 = vadd.f32 %v20316_v7, %v7021_v6  ;;  %v7090_v48 = vadd.f32 %v20316_v7, %v7022_v40  ;;  %v20350_v46 = vmul.f32 %v20004_v0, %v20263_v2  ;;  %v20354_v55 = vmul.f32 %v20263_v2, %v20019_v8  ;;  %v23997_v40 = vld [vmem:[#allocation16_spill] sm:$0xff] }
 0x5a3   :  { %v20358_v33 = vmul.f32 %v20263_v2, %v20026_v25  ;;  %v20362_v56 = vmul.f32 %v20016_v51, %v20263_v2  ;;  %v20366_v41 = vmul.f32 %v20024_v17, %v20263_v2  ;;  %v20370_v0 = vmul.f32 %v20263_v2, %v20039_v20 }
 0x5a4   :  { %v7153_v16 = vmax.f32 %v7089_v53, 0.0  ;;  %v7154_v1 = vmax.f32 %v7090_v48, 0.0  ;;  %v20374_v8 = vmul.f32 %v20263_v2, %v20046_v39  ;;  %v20378_v25 = vmul.f32 %v20036_v38, %v20263_v2  ;;  %v23998_v53 = vld [vmem:[#allocation13_spill] sm:$0xff] }
 0x5a5   :  { %v20382_v51 = vmul.f32 %v20044_v4, %v20263_v2  ;;  %v20386_v17 = vmul.f32 %v20263_v2, %v20059_v19  ;;  %v20390_v20 = vmul.f32 %v20263_v2, %v20066_v60  ;;  %v20394_v39 = vmul.f32 %v20056_v14, %v20263_v2 }
 0x5a6   :  { %v20396_v3 = vpack.c.bf16 %v7154_v1, %v7153_v16  ;;  %v20400_v38 = vmul.f32 %v20064_v18, %v20263_v2  ;;  %v20404_v4 = vmul.f32 %v20263_v2, %v20082_v12  ;;  %v20408_v19 = vmul.f32 %v20263_v2, %v20089_v24  ;;  %v23999_v16 = vld [vmem:[#allocation15_spill] sm:$0xff] }
 0x5a7   :  { %v20412_v60 = vmul.f32 %v20079_v54, %v20263_v2  ;;  %v20416_v14 = vmul.f32 %v20087_v34, %v20263_v2  ;;  %v20420_v18 = vmul.f32 %v20263_v2, %v20108_v31  ;;  %v20424_v12 = vmul.f32 %v20263_v2, %v23984_v49  ;;  %v24000_v49 = vld [vmem:[#allocation18_spill] sm:$0xff] }
 0x5a8   :  { %23981 = vst [vmem:[#allocation32_spill] sm:$0xff] %v20396_v3  ;;  %v20428_v24 = vmul.f32 %v23986_v26, %v20263_v2  ;;  %v20432_v54 = vmul.f32 %v23988_v42, %v20263_v2  ;;  %v20436_v34 = vmul.f32 %v20263_v2, %v23990_v5  ;;  %v20440_v31 = vmul.f32 %v20263_v2, %v23992_v15  ;;  %v24001_v42 = vld [vmem:[#allocation20_spill] sm:$0xff]  ;;  %v24002_v15 = vld [vmem:[#allocation17_spill] sm:$0xff] }
 0x5a9   :  { %23982 = vst [vmem:[#allocation33_spill] sm:$0xff] %v20416_v14  ;;  %23983 = vst [vmem:[#allocation34_spill] sm:$0xff] %v20420_v18  ;;  %v7003_v52 = vmul.f32 %v23994_v44, %v20263_v2  ;;  %v7004_v62 = vmul.f32 %v23995_v36, %v20263_v2  ;;  %v7005_v6 = vmul.f32 %v20263_v2, %v23996_v30  ;;  %v24003_v36 = vld [vmem:[#allocation19_spill] sm:$0xff] }
 0x5aa   :  { %23985 = vst [vmem:[#allocation8_spill] sm:$0xff] %v20424_v12  ;;  %23987 = vst [vmem:[#allocation6_spill] sm:$0xff] %v20428_v24  ;;  %v7006_v22 = vmul.f32 %v20263_v2, %v23997_v40  ;;  %v7007_v48 = vmul.f32 %v23998_v53, %v20263_v2  ;;  %v7008_v1 = vmul.f32 %v23999_v16, %v20263_v2  ;;  %v24006_v16 = vld [vmem:[#allocation22_spill] sm:$0xff]  ;;  %v24009_v24 = vld [vmem:[#allocation29_spill] sm:$0xff] }
 0x5ab   :  { %23989 = vst [vmem:[#allocation7_spill] sm:$0xff] %v20432_v54  ;;  %23991 = vst [vmem:[#allocation10_spill] sm:$0xff] %v20436_v34  ;;  %v7009_v26 = vmul.f32 %v20263_v2, %v24000_v49  ;;  %v7010_v5 = vmul.f32 %v20263_v2, %v24001_v42  ;;  %v7011_v44 = vmul.f32 %v24002_v15, %v20263_v2  ;;  %v24007_v49 = vld [vmem:[#allocation24_spill] sm:$0xff]  ;;  %v24008_v54 = vld [vmem:[#allocation27_spill] sm:$0xff] }
 0x5ac   :  { %23993 = vst [vmem:[#allocation12_spill] sm:$0xff] %v20440_v31  ;;  %7219 = vst [vmem:[#allocation2 + $0x320] sm:$0xff] %v20396_v3  ;;  %v7012_v30 = vmul.f32 %v24003_v36, %v20263_v2  ;;  %v7013_v40 = vmul.f32 %v20263_v2, %v24004_v10  ;;  %v24005_v3 = vld [vmem:[#allocation25_spill] sm:$0xff]  ;;  %v7015_v31 = vmul.f32 %v24006_v16, %v20263_v2  ;;  %v24010_v36 = vld [vmem:[#allocation26_spill] sm:$0xff] }
 0x5ad   :  { %v7014_v53 = vmul.f32 %v20263_v2, %v24005_v3  ;;  %v7016_v34 = vmul.f32 %v24007_v49, %v20263_v2  ;;  %v7017_v42 = vmul.f32 %v20263_v2, %v24008_v54  ;;  %v7018_v15 = vmul.f32 %v20263_v2, %v24009_v24  ;;  %v24011_v10 = vld [vmem:[#allocation28_spill] sm:$0xff]  ;;  %v24012_v3 = vld [vmem:[#allocation30_spill] sm:$0xff] }
 0x5ae   :  { %v7019_v12 = vmul.f32 %v24010_v36, %v20263_v2  ;;  %v7020_v18 = vmul.f32 %v24011_v10, %v20263_v2  ;;  %v7023_v14 = vmul.f32 %v24012_v3, %v20263_v2  ;;  %v7024_v16 = vmul.f32 %v20249_v35, %v20263_v2 }
 0x5af   :  { %v20485_v49 = vadd.f32 %v20316_v7, %v20270_v50  ;;  %v20489_v54 = vadd.f32 %v20316_v7, %v20274_v58  ;;  %v20493_v24 = vadd.f32 %v20316_v7, %v20278_v43  ;;  %v20497_v36 = vadd.f32 %v20316_v7, %v20282_v45 }
 0x5b0   :  { %v20501_v10 = vadd.f32 %v20316_v7, %v20286_v59  ;;  %v20505_v35 = vadd.f32 %v20316_v7, %v20290_v37  ;;  %v20509_v2 = vadd.f32 %v20316_v7, %v20294_v32  ;;  %v20513_v50 = vadd.f32 %v20316_v7, %v20298_v57 }
 0x5b1   :  { %v20517_v58 = vadd.f32 %v20316_v7, %v20302_v28  ;;  %v20521_v43 = vadd.f32 %v20316_v7, %v20306_v9  ;;  %v20525_v45 = vadd.f32 %v20316_v7, %v20310_v63  ;;  %v20529_v59 = vadd.f32 %v20316_v7, %v20314_v47  ;;  %v24020_v3 = vld [vmem:[#allocation8_spill] sm:$0xff] }
 0x5b2   :  { %v20533_v37 = vadd.f32 %v20316_v7, %v20320_v27  ;;  %v20537_v32 = vadd.f32 %v20316_v7, %v20324_v61  ;;  %v20541_v57 = vadd.f32 %v20316_v7, %v20328_v11  ;;  %v20545_v28 = vadd.f32 %v20316_v7, %v20332_v13 }
 0x5b3   :  { %v20549_v9 = vadd.f32 %v20316_v7, %v20336_v23  ;;  %v20553_v63 = vadd.f32 %v20316_v7, %v20340_v21  ;;  %v20557_v47 = vadd.f32 %v20316_v7, %v20344_v29  ;;  %v20561_v27 = vadd.f32 %v20316_v7, %v20350_v46 }
 0x5b4   :  { %v20565_v61 = vadd.f32 %v20316_v7, %v20354_v55  ;;  %v20569_v11 = vadd.f32 %v20316_v7, %v20358_v33  ;;  %v20573_v13 = vadd.f32 %v20316_v7, %v20362_v56  ;;  %v20577_v23 = vadd.f32 %v20316_v7, %v20366_v41 }
 0x5b5   :  { %v20581_v21 = vadd.f32 %v20316_v7, %v20370_v0  ;;  %v20585_v29 = vadd.f32 %v20316_v7, %v20374_v8  ;;  %v20589_v46 = vadd.f32 %v20316_v7, %v20378_v25  ;;  %v20593_v55 = vadd.f32 %v20316_v7, %v20382_v51 }
 0x5b6   :  { %v20597_v33 = vadd.f32 %v20316_v7, %v20386_v17  ;;  %v20601_v56 = vadd.f32 %v20316_v7, %v20390_v20  ;;  %v20605_v41 = vadd.f32 %v20316_v7, %v20394_v39  ;;  %v20609_v0 = vadd.f32 %v20316_v7, %v20400_v38  ;;  %v24016_v17 = vld [vmem:[#allocation33_spill] sm:$0xff]  ;;  %v24018_v39 = vld [vmem:[#allocation34_spill] sm:$0xff] }
 0x5b7   :  { %v20613_v8 = vadd.f32 %v20316_v7, %v20404_v4  ;;  %v20617_v25 = vadd.f32 %v20316_v7, %v20408_v19  ;;  %v20621_v51 = vadd.f32 %v20316_v7, %v20412_v60  ;;  %v20625_v20 = vadd.f32 %v20316_v7, %v24016_v17 }
 0x5b8   :  { %v20629_v38 = vadd.f32 %v20316_v7, %v24018_v39  ;;  %v20633_v4 = vadd.f32 %v20316_v7, %v24020_v3  ;;  %v20655_v3 = vadd.f32 %v20316_v7, %v7004_v62  ;;  %v20676_v62 = vadd.f32 %v20316_v7, %v7011_v44 }
 0x5b9   :  { %24013 = vst [vmem:[#allocation9_spill] sm:$0xff] %v20613_v8  ;;  %24014 = vst [vmem:[#allocation11_spill] sm:$0xff] %v20617_v25  ;;  %v24021_v8 = vld [vmem:[#allocation6_spill] sm:$0xff]  ;;  %v24022_v25 = vld [vmem:[#allocation7_spill] sm:$0xff]  ;;  %v20697_v44 = vadd.f32 %v20316_v7, %v7018_v15  ;;  %v7096_v15 = vmax.f32 %v20497_v36, 0.0  ;;  %v7107_v36 = vmax.f32 %v20541_v57, 0.0 }
 0x5ba   :  { %24015 = vst [vmem:[#allocation14_spill] sm:$0xff] %v20621_v51  ;;  %24017 = vst [vmem:[#allocation16_spill] sm:$0xff] %v20625_v20  ;;  %v20637_v19 = vadd.f32 %v20316_v7, %v24021_v8  ;;  %v20641_v60 = vadd.f32 %v20316_v7, %v24022_v25  ;;  %v24024_v51 = vld [vmem:[#allocation10_spill] sm:$0xff]  ;;  %v24025_v20 = vld [vmem:[#allocation12_spill] sm:$0xff]  ;;  %v20658_v8 = vadd.f32 %v20316_v7, %v7005_v6  ;;  %v7118_v57 = vmax.f32 %v20585_v29, 0.0 }
 0x5bb   :  { %24019 = vst [vmem:[#allocation13_spill] sm:$0xff] %v20629_v38  ;;  %v20645_v17 = vadd.f32 %v20316_v7, %v24024_v51  ;;  %v20649_v39 = vadd.f32 %v20316_v7, %v24025_v20  ;;  %v20652_v38 = vadd.f32 %v20316_v7, %v7003_v52  ;;  %v20661_v25 = vadd.f32 %v20316_v7, %v7006_v22 }
 0x5bc   :  { %24023 = vst [vmem:[#allocation15_spill] sm:$0xff] %v20641_v60  ;;  %v20664_v60 = vadd.f32 %v20316_v7, %v7007_v48  ;;  %v20667_v51 = vadd.f32 %v20316_v7, %v7008_v1  ;;  %v20670_v20 = vadd.f32 %v20316_v7, %v7009_v26  ;;  %v20673_v52 = vadd.f32 %v20316_v7, %v7010_v5 }
 0x5bd   :  { %v20679_v6 = vadd.f32 %v20316_v7, %v7012_v30  ;;  %v20682_v22 = vadd.f32 %v20316_v7, %v7013_v40  ;;  %v20685_v48 = vadd.f32 %v20316_v7, %v7014_v53  ;;  %v20688_v1 = vadd.f32 %v20316_v7, %v7015_v31  ;;  %24029 = vst [vmem:[#allocation19_spill] sm:$0xff] %v20697_v44 }
 0x5be   :  { %v20691_v26 = vadd.f32 %v20316_v7, %v7016_v34  ;;  %v20694_v5 = vadd.f32 %v20316_v7, %v7017_v42  ;;  %v20700_v30 = vadd.f32 %v20316_v7, %v7019_v12  ;;  %v20703_v40 = vadd.f32 %v20316_v7, %v7020_v18 }
 0x5bf   :  { %24026 = vst [vmem:[#allocation18_spill] sm:$0xff] %v20688_v1  ;;  %v20706_v53 = vadd.f32 %v20316_v7, %v7023_v14  ;;  %v20709_v31 = vadd.f32 %v20316_v7, %v7024_v16  ;;  %v7093_v34 = vmax.f32 %v20485_v49, 0.0  ;;  %v7094_v42 = vmax.f32 %v20489_v54, 0.0 }
 0x5c0   :  { %24027 = vst [vmem:[#allocation20_spill] sm:$0xff] %v20691_v26  ;;  %24028 = vst [vmem:[#allocation17_spill] sm:$0xff] %v20694_v5  ;;  %v7095_v5 = vmax.f32 %v20493_v24, 0.0  ;;  %v7097_v12 = vmax.f32 %v20501_v10, 0.0  ;;  %v7099_v18 = vmax.f32 %v20509_v2, 0.0  ;;  %v7100_v14 = vmax.f32 %v20513_v50, 0.0 }
 0x5c1   :  { %24030 = vst [vmem:[#allocation23_spill] sm:$0xff] %v20700_v30  ;;  %24031 = vst [vmem:[#allocation25_spill] sm:$0xff] %v20703_v40  ;;  %v7098_v30 = vmax.f32 %v20505_v35, 0.0  ;;  %v7102_v7 = vmax.f32 %v20521_v43, 0.0  ;;  %v7103_v16 = vmax.f32 %v20525_v45, 0.0  ;;  %v7104_v49 = vmax.f32 %v20529_v59, 0.0 }
 0x5c2   :  { %24032 = vst [vmem:[#allocation22_spill] sm:$0xff] %v20706_v53  ;;  %24033 = vst [vmem:[#allocation24_spill] sm:$0xff] %v20709_v31  ;;  %v7101_v53 = vmax.f32 %v20517_v58, 0.0  ;;  %v7105_v54 = vmax.f32 %v20533_v37, 0.0  ;;  %v7106_v24 = vmax.f32 %v20537_v32, 0.0  ;;  %v7108_v10 = vmax.f32 %v20545_v28, 0.0 }
 0x5c3   :  { %v7109_v35 = vmax.f32 %v20549_v9, 0.0  ;;  %v7110_v2 = vmax.f32 %v20553_v63, 0.0  ;;  %v7111_v50 = vmax.f32 %v20557_v47, 0.0  ;;  %v7112_v58 = vmax.f32 %v20561_v27, 0.0  ;;  %v24035_v31 = vld [vmem:[#allocation11_spill] sm:$0xff]  ;;  %v24036_v40 = vld [vmem:[#allocation14_spill] sm:$0xff] }
 0x5c4   :  { %v7113_v43 = vmax.f32 %v20565_v61, 0.0  ;;  %v7114_v45 = vmax.f32 %v20569_v11, 0.0  ;;  %v7115_v59 = vmax.f32 %v20573_v13, 0.0  ;;  %v7116_v37 = vmax.f32 %v20577_v23, 0.0  ;;  %v24034_v11 = vld [vmem:[#allocation9_spill] sm:$0xff]  ;;  %v24037_v44 = vld [vmem:[#allocation16_spill] sm:$0xff] }
 0x5c5   :  { %v7117_v32 = vmax.f32 %v20581_v21, 0.0  ;;  %v7119_v28 = vmax.f32 %v20589_v46, 0.0  ;;  %v7120_v9 = vmax.f32 %v20593_v55, 0.0  ;;  %v7121_v63 = vmax.f32 %v20597_v33, 0.0  ;;  %v24038_v26 = vld [vmem:[#allocation13_spill] sm:$0xff]  ;;  %v24039_v1 = vld [vmem:[#allocation15_spill] sm:$0xff] }
 0x5c6   :  { %v7122_v47 = vmax.f32 %v20601_v56, 0.0  ;;  %v7123_v27 = vmax.f32 %v20605_v41, 0.0  ;;  %v7124_v61 = vmax.f32 %v20609_v0, 0.0  ;;  %v7125_v13 = vmax.f32 %v24034_v11, 0.0 }
 0x5c7   :  { %v7126_v23 = vmax.f32 %v24035_v31, 0.0  ;;  %v7127_v21 = vmax.f32 %v24036_v40, 0.0  ;;  %v7128_v29 = vmax.f32 %v24037_v44, 0.0  ;;  %v7129_v46 = vmax.f32 %v24038_v26, 0.0 }
 0x5c8   :  { %v7130_v55 = vmax.f32 %v20633_v4, 0.0  ;;  %v7131_v33 = vmax.f32 %v20637_v19, 0.0  ;;  %v7132_v56 = vmax.f32 %v24039_v1, 0.0  ;;  %v7133_v41 = vmax.f32 %v20645_v17, 0.0 }
 0x5c9   :  { %v7134_v0 = vmax.f32 %v20649_v39, 0.0  ;;  %v7135_v11 = vmax.f32 %v20652_v38, 0.0  ;;  %v7136_v31 = vmax.f32 %v20655_v3, 0.0  ;;  %v7137_v40 = vmax.f32 %v20658_v8, 0.0  ;;  %v24040_v8 = vld [vmem:[#allocation18_spill] sm:$0xff] }
 0x5ca   :  { %v7138_v44 = vmax.f32 %v20661_v25, 0.0  ;;  %v7139_v26 = vmax.f32 %v20664_v60, 0.0  ;;  %v7140_v4 = vmax.f32 %v20667_v51, 0.0  ;;  %v7141_v19 = vmax.f32 %v20670_v20, 0.0  ;;  %v24041_v60 = vld [vmem:[#allocation20_spill] sm:$0xff]  ;;  %v24042_v20 = vld [vmem:[#allocation17_spill] sm:$0xff] }
 0x5cb   :  { %v7142_v1 = vmax.f32 %v20673_v52, 0.0  ;;  %v7143_v17 = vmax.f32 %v20676_v62, 0.0  ;;  %v7144_v39 = vmax.f32 %v20679_v6, 0.0  ;;  %v7145_v38 = vmax.f32 %v20682_v22, 0.0  ;;  %v24043_v62 = vld [vmem:[#allocation19_spill] sm:$0xff] }
 0x5cc   :  { %v7146_v3 = vmax.f32 %v20685_v48, 0.0  ;;  %v7147_v25 = vmax.f32 %v24040_v8, 0.0  ;;  %v7148_v51 = vmax.f32 %v24041_v60, 0.0  ;;  %v7149_v52 = vmax.f32 %v24042_v20, 0.0  ;;  %v24044_v22 = vld [vmem:[#allocation23_spill] sm:$0xff]  ;;  %v24045_v8 = vld [vmem:[#allocation25_spill] sm:$0xff] }
 0x5cd   :  { %v7150_v6 = vmax.f32 %v24043_v62, 0.0  ;;  %v7151_v48 = vmax.f32 %v24044_v22, 0.0  ;;  %v7152_v60 = vmax.f32 %v24045_v8, 0.0  ;;  %v24046_v20 = vld [vmem:[#allocation22_spill] sm:$0xff]  ;;  %v24047_v22 = vld [vmem:[#allocation24_spill] sm:$0xff] }
 0x5ce   :  { %v7155_v62 = vmax.f32 %v24046_v20, 0.0  ;;  %v7156_v8 = vmax.f32 %v24047_v22, 0.0  ;;  %v20773_v20 = vpack.c.bf16 %v7094_v42, %v7093_v34  ;;  %v20775_v22 = vpack.c.bf16 %v7096_v15, %v7095_v5 }
 0x5cf   :  { %v20777_v34 = vpack.c.bf16 %v7098_v30, %v7097_v12  ;;  %v20779_v42 = vpack.c.bf16 %v7100_v14, %v7099_v18  ;;  %v20783_v5 = vpack.c.bf16 %v7104_v49, %v7103_v16  ;;  %v20785_v15 = vpack.c.bf16 %v7106_v24, %v7105_v54  ;;  %v18026_v12 = vld [vmem:[%s23641_s2 + $0x8] sm:$0xff]  }
 0x5d0   :  { %24048 = vst [vmem:[#allocation27_spill] sm:$0xff] %v20773_v20  ;;  %24049 = vst [vmem:[#allocation29_spill] sm:$0xff] %v20775_v22  ;;  %v20781_v20 = vpack.c.bf16 %v7102_v7, %v7101_v53  ;;  %v20787_v22 = vpack.c.bf16 %v7108_v10, %v7107_v36  ;;  %v20792_v30 = vpack.c.bf16 %v7110_v2, %v7109_v35 }
 0x5d1   :  { %24050 = vst [vmem:[#allocation26_spill] sm:$0xff] %v20777_v34  ;;  %v20794_v34 = vpack.c.bf16 %v7112_v58, %v7111_v50  ;;  %v20796_v14 = vpack.c.bf16 %v7114_v45, %v7113_v43  ;;  %v20798_v18 = vpack.c.bf16 %v7116_v37, %v7115_v59  ;;  %7192 = vst [vmem:[#allocation2 + $0x68] sm:$0xff] %v20779_v42  ;;  %v24054_v58 = vld [vmem:[#allocation21_spill] sm:$0xff] }
 0x5d2   :  { %v20805_v49 = vpack.c.bf16 %v7118_v57, %v7117_v32  ;;  %v20807_v54 = vpack.c.bf16 %v7120_v9, %v7119_v28  ;;  %v20809_v24 = vpack.c.bf16 %v7122_v47, %v7121_v63  ;;  %v7172_v36 = vpack.c.bf16 %v7124_v61, %v7123_v27  ;;  %7193 = vst [vmem:[#allocation2 + $0x80] sm:$0xff] %v20781_v20  ;;  %v18027_v32 = vld [vmem:[%s23641_s2 + $0x10] sm:$0xff]  }
 0x5d3   :  { %7194 = vst [vmem:[#allocation2 + $0x98] sm:$0xff] %v20783_v5  ;;  %7195 = vst [vmem:[#allocation2 + $0xb0] sm:$0xff] %v20785_v15  ;;  %v20816_v10 = vpack.c.bf16 %v7126_v23, %v7125_v13  ;;  %v20818_v35 = vpack.c.bf16 %v7128_v29, %v7127_v21  ;;  %v20820_v2 = vpack.c.bf16 %v7130_v55, %v7129_v46  ;;  %v18028_v13 = vld [vmem:[%s23641_s2 + $0x18] sm:$0xff]   ;;  %v18029_v23 = vld [vmem:[%s23641_s2 + $0x20] sm:$0xff]  }
 0x5d4   :  { %7196 = vst [vmem:[#allocation2 + $0xc8] sm:$0xff] %v20787_v22  ;;  %v20822_v50 = vpack.c.bf16 %v7132_v56, %v7131_v33  ;;  %7197 = vst [vmem:[#allocation2 + $0xe0] sm:$0xff] %v20792_v30  ;;  %v20829_v43 = vpack.c.bf16 %v7134_v0, %v7133_v41  ;;  %v20831_v45 = vpack.c.bf16 %v7136_v31, %v7135_v11  ;;  %v18030_v21 = vld [vmem:[%s23641_s2 + $0x28] sm:$0xff]   ;;  %v18031_v29 = vld [vmem:[%s23641_s2 + $0x30] sm:$0xff]  }
 0x5d5   :  { %7198 = vst [vmem:[#allocation2 + $0xf8] sm:$0xff] %v20794_v34  ;;  %7199 = vst [vmem:[#allocation2 + $0x110] sm:$0xff] %v20796_v14  ;;  %v20833_v59 = vpack.c.bf16 %v7138_v44, %v7137_v40  ;;  %v20835_v37 = vpack.c.bf16 %v7140_v4, %v7139_v26  ;;  %v20843_v57 = vpack.c.bf16 %v7142_v1, %v7141_v19  ;;  %v18032_v46 = vld [vmem:[%s23641_s2 + $0x38] sm:$0xff]   ;;  %v20893_v55 = vld [vmem:[%s23641_s2 + $0x80] sm:$0xff]  }
 0x5d6   :  { %7200 = vst [vmem:[#allocation2 + $0x128] sm:$0xff] %v20798_v18  ;;  %7204 = vst [vmem:[#allocation2 + $0x188] sm:$0xff] %v7172_v36  ;;  %v20845_v28 = vpack.c.bf16 %v7144_v39, %v7143_v17  ;;  %v20847_v9 = vpack.c.bf16 %v7146_v3, %v7145_v38  ;;  %v20849_v63 = vpack.c.bf16 %v7148_v51, %v7147_v25  ;;  %v20903_v33 = vld [vmem:[#allocation2 + $0x8] sm:$0xff] }
 0x5d7   :  { %v24051_v53 = vld [vmem:[#allocation27_spill] sm:$0xff]  ;;  %v24052_v7 = vld [vmem:[#allocation29_spill] sm:$0xff]  ;;  %7201 = vst [vmem:[#allocation2 + $0x140] sm:$0xff] %v20805_v49  ;;  %7202 = vst [vmem:[#allocation2 + $0x158] sm:$0xff] %v20807_v54  ;;  %v20855_v47 = vpack.c.bf16 %v7150_v6, %v7149_v52  ;;  %v20857_v27 = vpack.c.bf16 %v7152_v60, %v7151_v48  ;;  %v7188_v61 = vpack.c.bf16 %v7156_v8, %v7155_v62 }
 0x5d8   :  { %7189 = vst [vmem:[#allocation2 + $0x20] sm:$0xff] %v24051_v53  ;;  %7190 = vst [vmem:[#allocation2 + $0x38] sm:$0xff] %v24052_v7  ;;  %v24053_v16 = vld [vmem:[#allocation26_spill] sm:$0xff]  ;;  %16214 = vmatmul.mubr.bf16.vlgmr.msra.gmra.mrb[0].mxu1 %v24051_v53  ;;  %v20920_v40 = vld [vmem:[#allocation2 + $0x68] sm:$0xff] }
 0x5d9   :  { %7191 = vst [vmem:[#allocation2 + $0x50] sm:$0xff] %v24053_v16  ;;  %16217 = vmatprep.mubr.bf16.mxu1 %v24052_v7  ;;  %16278 = vmatpush3.bf16.msra.mxu1 %v24054_v58  ;;  %7203 = vst [vmem:[#allocation2 + $0x170] sm:$0xff] %v20809_v24  ;;  %v20923_v26 = vld [vmem:[#allocation2 + $0x80] sm:$0xff]  ;;  %v23759_v1 = vshrl.u32 %v20920_v40, 16  ;;  %v23765_v36 = vshll.u32 %v20920_v40, 16 }
 0x5da   :  { %16279 = vmatprep.subr.bf16.mxu1 %v18026_v12  ;;  %7205 = vst [vmem:[#allocation2 + $0x1d0] sm:$0xff] %v20816_v10  ;;  %7206 = vst [vmem:[#allocation2 + $0x1e8] sm:$0xff] %v20818_v35  ;;  %v20925_v4 = vld [vmem:[#allocation2 + $0x98] sm:$0xff]  ;;  %v20929_v17 = vld [vmem:[#allocation2 + $0xb0] sm:$0xff]  ;;  %v23763_v25 = vshrl.u32 %v20923_v26, 16 }
 0x5db   :  { %7207 = vst [vmem:[#allocation2 + $0x200] sm:$0xff] %v20820_v2  ;;  %7208 = vst [vmem:[#allocation2 + $0x218] sm:$0xff] %v20822_v50  ;;  %v23764_v51 = vshrl.u32 %v20925_v4, 16  ;;  %v20938_v52 = vld [vmem:[#allocation2 + $0xc8] sm:$0xff]  ;;  %v23767_v60 = vshrl.u32 %v20929_v17, 16  ;;  %v20946_v62 = vld [vmem:[#allocation2 + $0xe0] sm:$0xff] }
 0x5dc   :  { %7209 = vst [vmem:[#allocation2 + $0x230] sm:$0xff] %v20829_v43  ;;  %7210 = vst [vmem:[#allocation2 + $0x248] sm:$0xff] %v20831_v45  ;;  %v9413_v58 = vrot.slane %v23759_v1, 7  ;;  %v23773_v1 = vshll.u32 %v20929_v17, 16 }
 0x5dd   :  { %7211 = vst [vmem:[#allocation2 + $0x260] sm:$0xff] %v20833_v59  ;;  %7212 = vst [vmem:[#allocation2 + $0x278] sm:$0xff] %v20835_v37  ;;  %16280 = vmatpush3.bf16.msra.mxu1 %v18026_v12 }
 0x5de   :  { %7213 = vst [vmem:[#allocation2 + $0x290] sm:$0xff] %v20843_v57  ;;  %7214 = vst [vmem:[#allocation2 + $0x2a8] sm:$0xff] %v20845_v28  ;;  %16281 = vmatprep.subr.bf16.mxu1 %v18027_v32 }
 0x5df   :  { %7215 = vst [vmem:[#allocation2 + $0x2c0] sm:$0xff] %v20847_v9  ;;  %7216 = vst [vmem:[#allocation2 + $0x2d8] sm:$0xff] %v20849_v63  ;;  %v20910_v56 = vld [vmem:[#allocation2 + $0x20] sm:$0xff]  ;;  %v20912_v41 = vld [vmem:[#allocation2 + $0x38] sm:$0xff] }
 0x5e0   :  { %7220 = vst [vmem:[#allocation2 + $0x338] sm:$0xff] %v7188_v61  ;;  %7217 = vst [vmem:[#allocation2 + $0x2f0] sm:$0xff] %v20855_v47  ;;  %16218 = vmatmul.mubr.bf16.gmra.mrb[4].mxu1 %v24053_v16  ;;  %v23766_v0 = vshrl.u32 %v20910_v56, 16  ;;  %v20916_v11 = vld [vmem:[#allocation2 + $0x50] sm:$0xff]  ;;  %v23762_v31 = vshrl.u32 %v20912_v41, 16  ;;  %v23771_v19 = vshll.u32 %v20910_v56, 16 }
 0x5e1   :  { %7218 = vst [vmem:[#allocation2 + $0x308] sm:$0xff] %v20857_v27  ;;  %16221 = vmatprep.mubr.bf16.mxu1 %v20779_v42  ;;  %16282 = vmatpush3.bf16.msra.mxu1 %v18027_v32  ;;  %v23760_v44 = vshrl.u32 %v20916_v11, 16  ;;  %v23768_v38 = vshll.u32 %v20912_v41, 16  ;;  %v23761_v48 = vshll.u32 %v20916_v11, 16  ;;  %v23769_v32 = vshll.u32 %v20923_v26, 16 }
 0x5e2   :  { %16283 = vmatprep.subr.bf16.mxu1 %v18028_v13  ;;  %v9377_v39 = vrot.slane %v23766_v0, 7  ;;  %v9389_v3 = vrot.slane %v23762_v31, 7  ;;  %v23770_v61 = vshll.u32 %v20925_v4, 16  ;;  %v20985_v31 = vld [vmem:[#allocation2 + $0x140] sm:$0xff]  ;;  %v20997_v0 = vld [vmem:[#allocation2 + $0x158] sm:$0xff] }
 0x5e3   :  { %v9401_v12 = vrot.slane %v23760_v44, 7  ;;  %v20980_v44 = vld [vmem:[#allocation2 + $0x128] sm:$0xff]  ;;  %24061 = vst [vmem:[#allocation7_spill] sm:$0xff] %v20997_v0 }
 0x5e4   :  { %v20942_v6 = vor.u32 %v9377_v39, %v23771_v19  ;;  %v20950_v8 = vor.u32 %v9389_v3, %v23768_v38  ;;  %v20973_v39 = vor.u32 %v9413_v58, %v23765_v36  ;;  %v9437_v3 = vrot.slane %v23764_v51, 7  ;;  %v21010_v19 = vld [vmem:[#allocation2 + $0x170] sm:$0xff] }
 0x5e5   :  { %16284 = vmatpush3.bf16.msra.mxu1 %v18028_v13  ;;  %v23772_v13 = vshrl.u32 %v20938_v52, 16  ;;  %v23775_v51 = vshll.u32 %v20938_v52, 16  ;;  %24063 = vst [vmem:[#allocation12_spill] sm:$0xff] %v21010_v19 }
 0x5e6   :  { %16285 = vmatprep.subr.bf16.mxu1 %v18029_v23  ;;  %24055 = vst [vmem:[#allocation28_spill] sm:$0xff] %v20942_v6  ;;  %24056 = vst [vmem:[#allocation30_spill] sm:$0xff] %v20950_v8  ;;  %v21109_v8 = vld [vmem:[#allocation2 + $0x290] sm:$0xff] }
 0x5e7   :  { %24058 = vst [vmem:[#allocation34_spill] sm:$0xff] %v20973_v39  ;;  %v9461_v38 = vrot.slane %v23772_v13, 7  ;;  %24094 = vst [vmem:[#allocation21_spill] sm:$0xff] %v21109_v8  ;;  %v24100_v39 = vshll.u32 %v20903_v33, 16 }
 0x5e8   :  { %16222 = vmatmul.mubr.bf16.gmra.mrb[8].mxu1 %v20781_v20 }
 0x5e9   :  { %16225 = vmatprep.mubr.bf16.mxu1 %v20783_v5  ;;  %16286 = vmatpush3.bf16.msra.mxu1 %v18029_v23  ;;  %v20962_v23 = vld [vmem:[#allocation2 + $0xf8] sm:$0xff]  ;;  %v21014_v36 = vor.u32 %v9461_v38, %v23775_v51 }
 0x5ea   :  { %16287 = vmatprep.subr.bf16.mxu1 %v18030_v21  ;;  %v24068_v13 = vshll.u32 %v20962_v23, 16 }
 0x5eb   :  { %24064 = vst [vmem:[#allocation9_spill] sm:$0xff] %v21014_v36  ;;  %v23779_v36 = vshll.u32 %v21010_v19, 16 }
 0x5ed   :  { %16288 = vmatpush3.bf16.msra.mxu1 %v18030_v21  ;;  %v20966_v21 = vor.u32 %v9401_v12, %v23761_v48  ;;  %v9449_v12 = vrot.slane %v23767_v60, 7  ;;  %v23777_v48 = vshrl.u32 %v20962_v23, 16 }
 0x5ee   :  { %16289 = vmatprep.subr.bf16.mxu1 %v18031_v29 }
 0x5ef   :  { %24057 = vst [vmem:[#allocation33_spill] sm:$0xff] %v20966_v21  ;;  %v21001_v60 = vor.u32 %v9449_v12, %v23773_v1  ;;  %v21031_v12 = vld [vmem:[#allocation2 + $0x1d0] sm:$0xff] }
 0x5f0   :  { %16226 = vmatmul.mubr.bf16.gmra.mrb[12].mxu1 %v20785_v15  ;;  %24067 = vst [vmem:[#allocation14_spill] sm:$0xff] %v21031_v12 }
 0x5f1   :  { %16229 = vmatprep.mubr.bf16.mxu1 %v20787_v22  ;;  %16290 = vmatpush3.bf16.msra.mxu1 %v18031_v29  ;;  %v23774_v29 = vshrl.u32 %v20946_v62, 16  ;;  %24062 = vst [vmem:[#allocation10_spill] sm:$0xff] %v21001_v60  ;;  %v21049_v60 = vld [vmem:[#allocation2 + $0x200] sm:$0xff] }
 0x5f2   :  { %16291 = vmatprep.subr.bf16.mxu1 %v18032_v46  ;;  %24074 = vst [vmem:[#allocation18_spill] sm:$0xff] %v21049_v60 }
 0x5f5   :  { %16292 = vmatpush3.bf16.msra.mxu1 %v18032_v46  ;;  %v20969_v46 = vld [vmem:[#allocation2 + $0x110] sm:$0xff] }
 0x5f6   :  { %16357 = vmatprep.subr.bf16.mxu1 %v20893_v55  ;;  %v24066_v38 = vshrl.u32 %v20969_v46, 16 }
 0x5f8   :  { %16230 = vmatmul.mubr.bf16.gmra.mrb[16].mxu1 %v20792_v30  ;;  %v9497_v51 = vrot.slane %v24066_v38, 7 }
 0x5f9   :  { %16233 = vmatprep.mubr.bf16.mxu1 %v20794_v34 }
 0x600   :  { %16234 = vmatmul.mubr.bf16.gmra.mrb[20].mxu1 %v20796_v14 }
 0x601   :  { %16237 = vmatprep.mubr.bf16.mxu1 %v20798_v18 }
 0x608   :  { %16238 = vmatmul.mubr.bf16.gmra.mrb[24].mxu1 %v20805_v49 }
 0x609   :  { %16241 = vmatprep.mubr.bf16.mxu1 %v20807_v54 }
 0x610   :  { %16242 = vmatmul.mubr.bf16.gmra.mrb[28].mxu1 %v20809_v24 }
 0x611   :  { %16245 = vmatprep.mubr.bf16.mxu1 %v20903_v33 }
 0x618   :  { %16246 = vmatmul.mubr.bf16.gmra.mrb[32].mxu1 %v20816_v10 }
 0x619   :  { %16249 = vmatprep.mubr.bf16.mxu1 %v20818_v35 }
 0x620   :  { %16250 = vmatmul.mubr.bf16.gmra.mrb[36].mxu1 %v20820_v2 }
 0x621   :  { %16253 = vmatprep.mubr.bf16.mxu1 %v20822_v50 }
 0x628   :  { %16254 = vmatmul.mubr.bf16.gmra.mrb[40].mxu1 %v20829_v43 }
 0x629   :  { %16257 = vmatprep.mubr.bf16.mxu1 %v20831_v45 }
 0x630   :  { %16258 = vmatmul.mubr.bf16.gmra.mrb[44].mxu1 %v20833_v59 }
 0x631   :  { %16261 = vmatprep.mubr.bf16.mxu1 %v20835_v37  ;;  %v9425_v37 = vrot.slane %v23763_v25, 7  ;;  %v20993_v25 = vor.u32 %v9437_v3, %v23770_v61  ;;  %v9473_v3 = vrot.slane %v23774_v29, 7  ;;  %v9485_v29 = vrot.slane %v23777_v48, 7 }
 0x632   :  { %v23778_v61 = vshll.u32 %v20969_v46, 16 }
 0x633   :  { %v20989_v58 = vor.u32 %v9425_v37, %v23769_v32  ;;  %24060 = vst [vmem:[#allocation6_spill] sm:$0xff] %v20993_v25  ;;  %v23776_v37 = vshll.u32 %v20946_v62, 16  ;;  %v23782_v25 = vshll.u32 %v21031_v12, 16 }
 0x634   :  { %v21044_v38 = vor.u32 %v9497_v51, %v23778_v61  ;;  %v21059_v51 = vld [vmem:[#allocation2 + $0x218] sm:$0xff]  ;;  %v24079_v61 = vshll.u32 %v20985_v31, 16 }
 0x635   :  { %24059 = vst [vmem:[#allocation8_spill] sm:$0xff] %v20989_v58  ;;  %v21021_v1 = vor.u32 %v9473_v3, %v23776_v37  ;;  %v21035_v3 = vor.u32 %v9485_v29, %v24068_v13  ;;  %v24070_v37 = vshrl.u32 %v20980_v44, 16  ;;  %v24075_v13 = vshll.u32 %v20980_v44, 16  ;;  %24078 = vst [vmem:[#allocation17_spill] sm:$0xff] %v21059_v51  ;;  %v21074_v58 = vld [vmem:[#allocation2 + $0x230] sm:$0xff] }
 0x636   :  { %24072 = vst [vmem:[#allocation15_spill] sm:$0xff] %v21044_v38  ;;  %24084 = vst [vmem:[#allocation25_spill] sm:$0xff] %v21074_v58 }
 0x637   :  { %24065 = vst [vmem:[#allocation11_spill] sm:$0xff] %v21021_v1  ;;  %24069 = vst [vmem:[#allocation16_spill] sm:$0xff] %v21035_v3  ;;  %v9509_v48 = vrot.slane %v24070_v37, 7  ;;  %v21040_v1 = vld [vmem:[#allocation2 + $0x1e8] sm:$0xff]  ;;  %v24077_v37 = vshrl.u32 %v20997_v0, 16 }
 0x638   :  { %16262 = vmatmul.mubr.bf16.gmra.mrb[48].mxu1 %v20843_v57  ;;  %24071 = vst [vmem:[#allocation13_spill] sm:$0xff] %v21040_v1  ;;  %v24073_v57 = vshrl.u32 %v20985_v31, 16  ;;  %v7221_v3 = vld [vmem:[#allocation2] sm:$0x80]  ;;  %v24095_v6 = vshll.u32 %v21040_v1, 16 }
 0x639   :  { %16265 = vmatprep.mubr.bf16.mxu1 %v20845_v28  ;;  %v21053_v29 = vor.u32 %v9509_v48, %v24075_v13  ;;  %v9533_v28 = vrot.slane %v24077_v37, 7  ;;  %v24081_v48 = vshll.u32 %v20997_v0, 16  ;;  %v24083_v37 = vshrl.u32 %v21010_v19, 16 }
 0x63a   :  { %v9521_v32 = vrot.slane %v24073_v57, 7 }
 0x63b   :  { %24076 = vst [vmem:[#allocation20_spill] sm:$0xff] %v21053_v29  ;;  %v21069_v13 = vor.u32 %v9533_v28, %v24081_v48  ;;  %v9545_v29 = vrot.slane %v24083_v37, 7  ;;  %v24087_v28 = vshrl.u32 %v20903_v33, 16  ;;  %v24097_v37 = vshrl.u32 %v21059_v51, 16 }
 0x63c   :  { %v21063_v57 = vor.u32 %v9521_v32, %v24079_v61  ;;  %v21078_v61 = vld [vmem:[#allocation2 + $0x248] sm:$0xff] }
 0x63d   :  { %24082 = vst [vmem:[#allocation23_spill] sm:$0xff] %v21069_v13  ;;  %24085 = vst [vmem:[#allocation22_spill] sm:$0xff] %v21078_v61  ;;  %v21082_v38 = vor.u32 %v9545_v29, %v23779_v36  ;;  %v7292_v48 = vrot.slane %v24087_v28, 7  ;;  %v21089_v13 = vld [vmem:[#allocation2 + $0x260] sm:$0xff]  ;;  %v21095_v36 = vld [vmem:[#allocation2 + $0x278] sm:$0xff]  ;;  %v24091_v28 = vshrl.u32 %v21040_v1, 16 }
 0x63e   :  { %24080 = vst [vmem:[#allocation19_spill] sm:$0xff] %v21063_v57  ;;  %24088 = vst [vmem:[#allocation27_spill] sm:$0xff] %v21089_v13  ;;  %v7286_v57 = vshrl.u32 %v7221_v3, 16  ;;  %v24110_v1 = vshrl.u32 %v21095_v36, 16 }
 0x63f   :  { %24086 = vst [vmem:[#allocation24_spill] sm:$0xff] %v21082_v38  ;;  %24090 = vst [vmem:[#allocation29_spill] sm:$0xff] %v21095_v36  ;;  %v9581_v38 = vrot.slane %v24091_v28, 7  ;;  %v21126_v29 = vor.u32 %v24100_v39, %v7292_v48  ;;  %v24104_v39 = vshrl.u32 %v21078_v61, 16 }
 0x640   :  { %16266 = vmatmul.mubr.bf16.gmra.mrb[52].mxu1 %v20847_v9  ;;  %v24089_v9 = vshrl.u32 %v21031_v12, 16  ;;  %v24103_v12 = vshrl.u32 %v21074_v58, 16  ;;  %v7288_v19 = vrot.slane %v7286_v57, 7 }
 0x641   :  { %16269 = vmatprep.mubr.bf16.mxu1 %v20849_v63  ;;  %v21113_v28 = vor.u32 %v9581_v38, %v24095_v6  ;;  %v9605_v63 = vrot.slane %v24097_v37, 7  ;;  %v21129_v6 = vld [vmem:[#allocation2 + $0x2c0] sm:$0xff]  ;;  %v24101_v38 = vshll.u32 %v21059_v51, 16  ;;  %v9629_v48 = vrot.slane %v24104_v39, 7 }
 0x642   :  { %v9569_v32 = vrot.slane %v24089_v9, 7  ;;  %v24093_v9 = vshrl.u32 %v21049_v60, 16  ;;  %v24108_v39 = vshll.u32 %v21078_v61, 16 }
 0x643   :  { %24096 = vst [vmem:[#allocation35_spill] sm:$0xff] %v21113_v28  ;;  %v21133_v37 = vor.u32 %v9605_v63, %v24101_v38  ;;  %v9617_v28 = vrot.slane %v24103_v12, 7  ;;  %v24105_v38 = vshll.u32 %v21074_v58, 16  ;;  %v24107_v12 = vshrl.u32 %v21089_v13, 16 }
 0x644   :  { %v21103_v21 = vor.u32 %v9569_v32, %v23782_v25  ;;  %v9593_v3 = vrot.slane %v24093_v9, 7  ;;  %v21118_v32 = vld [vmem:[#allocation2 + $0x2a8] sm:$0xff]  ;;  %v24098_v25 = vshll.u32 %v21049_v60, 16  ;;  %v9653_v63 = vrot.slane %v24110_v1, 7 }
 0x645   :  { %24102 = vst [vmem:[#allocation37_spill] sm:$0xff] %v21133_v37  ;;  %v21148_v37 = vor.u32 %v9617_v28, %v24105_v38  ;;  %v9641_v57 = vrot.slane %v24107_v12, 7  ;;  %v21162_v38 = vld [vmem:[#allocation2 + $0x2f0] sm:$0xff]  ;;  %v24111_v12 = vshll.u32 %v21089_v13, 16  ;;  %v24115_v1 = vshrl.u32 %v21109_v8, 16 }
 0x646   :  { %24092 = vst [vmem:[#allocation26_spill] sm:$0xff] %v21103_v21  ;;  %v21122_v9 = vor.u32 %v9593_v3, %v24098_v25  ;;  %v7223_v21 = vld [vmem:[#allocation2 + $0x18] sm:$0x80]  ;;  %v21170_v3 = vld [vmem:[#allocation2 + $0x308] sm:$0xff]  ;;  %v7314_v28 = vshrl.u32 %v24052_v7, 16  ;;  %v24116_v25 = vshrl.u32 %v21118_v32, 16 }
 0x647   :  { %24106 = vst [vmem:[#allocation38_spill] sm:$0xff] %v21148_v37  ;;  %v7298_v51 = vshrl.u32 %v7223_v21, 16  ;;  %v21166_v37 = vor.u32 %v9641_v57, %v24111_v12  ;;  %v9665_v21 = vrot.slane %v24115_v1, 7  ;;  %v21182_v12 = vld [vmem:[#allocation2 + $0x320] sm:$0xff]  ;;  %v7225_v13 = vld [vmem:[#allocation2 + $0x30] sm:$0x80] }
 0x648   :  { %24099 = vst [vmem:[#allocation36_spill] sm:$0xff] %v21122_v9  ;;  %v21139_v9 = vld [vmem:[#allocation2 + $0x2d8] sm:$0xff]  ;;  %16270 = vmatmul.mubr.bf16.gmra.mrb[56].mxu1 %v20855_v47  ;;  %v21157_v47 = vor.u32 %v9629_v48, %v24108_v39  ;;  %v24113_v48 = vshll.u32 %v21095_v36, 16  ;;  %v24120_v58 = vshll.u32 %v21118_v32, 16 }
 0x649   :  { %16273 = vmatprep.mubr.bf16.mxu1 %v20857_v27  ;;  %24112 = vst [vmem:[#allocation40_spill] sm:$0xff] %v21166_v37  ;;  %v7302_v27 = vshrl.u32 %v24051_v53, 16  ;;  %v9677_v37 = vrot.slane %v24116_v25, 7  ;;  %v24122_v25 = vshrl.u32 %v21139_v9, 16  ;;  %v24126_v57 = vshll.u32 %v21139_v9, 16 }
 0x64a   :  { %24109 = vst [vmem:[#allocation39_spill] sm:$0xff] %v21157_v47  ;;  %v21174_v39 = vor.u32 %v9653_v63, %v24113_v48  ;;  %v7296_v47 = vsel %vm290_vm0, %v7288_v19, %v21126_v29  ;;  %v24117_v48 = vshll.u32 %v21109_v8, 16  ;;  %v7310_v19 = vshrl.u32 %v7225_v13, 16 }
 0x64b   :  { %v21198_v60 = vor.u32 %v9677_v37, %v24120_v58  ;;  %v9701_v36 = vrot.slane %v24122_v25, 7  ;;  %v7304_v0 = vrot.slane %v7302_v27, 7  ;;  %v7305_v58 = vshll.u32 %v24051_v53, 16 }
 0x64c   :  { %24114 = vst [vmem:[#allocation41_spill] sm:$0xff] %v21174_v39  ;;  %v21190_v1 = vor.u32 %v9665_v21, %v24117_v48  ;;  %v24119_v39 = vshrl.u32 %v21129_v6, 16  ;;  %v24123_v21 = vshll.u32 %v21129_v6, 16  ;;  %v7300_v37 = vrot.slane %v7298_v51, 7 }
 0x64d   :  { %24121 = vst [vmem:[#allocation43_spill] sm:$0xff] %v21198_v60  ;;  %v21210_v8 = vor.u32 %v9701_v36, %v24126_v57  ;;  %v23803_v27 = vshll.u32 %v21162_v38, 16  ;;  %v24128_v25 = vshrl.u32 %v21162_v38, 16  ;;  %v24129_v13 = vshrl.u32 %v21170_v3, 16 }
 0x64e   :  { %24118 = vst [vmem:[#allocation42_spill] sm:$0xff] %v21190_v1  ;;  %v9689_v61 = vrot.slane %v24119_v39, 7  ;;  %v7316_v1 = vrot.slane %v7314_v28, 7  ;;  %v24125_v39 = vld [vmem:[#allocation32_spill] sm:$0xff]  ;;  %v7326_v28 = vshrl.u32 %v24053_v16, 16  ;;  %v7307_v36 = vor.u32 %v7305_v58, %v7304_v0 }
 0x64f   :  { %24127 = vst [vmem:[#allocation32_spill] sm:$0xff] %v21210_v8  ;;  %v9713_v63 = vrot.slane %v24128_v25, 7  ;;  %v23804_v57 = vshll.u32 %v21182_v12, 16  ;;  %v24131_v51 = vshrl.u32 %v21182_v12, 16  ;;  %v7312_v8 = vrot.slane %v7310_v19, 7 }
 0x650   :  { %v21205_v48 = vor.u32 %v9689_v61, %v24123_v21  ;;  %16274 = vmatmul.mubr.bf16.gmra.mrb[60].mxu1 %v24125_v39  ;;  %v7317_v61 = vshll.u32 %v24052_v7, 16  ;;  %v23807_v21 = vshll.u32 %v21170_v3, 16  ;;  %v9725_v39 = vrot.slane %v24129_v13, 7  ;;  %v7229_v13 = vld [vmem:[#allocation2 + $0x60] sm:$0x80] }
 0x651   :  { %16293 = vmatprep.mubr.bf16.mxu1 %v7296_v47  ;;  %v21224_v53 = vor.u32 %v9713_v63, %v23803_v27  ;;  %v9737_v47 = vrot.slane %v24131_v51, 7  ;;  %v7338_v7 = vshrl.u32 %v20779_v42, 16  ;;  %v18034_v63 = vld [vmem:[%s23641_s2 + $0x88] sm:$0xff]   ;;  %v7328_v58 = vrot.slane %v7326_v28, 7  ;;  %v18035_v28 = vld [vmem:[%s23641_s2 + $0x90] sm:$0xff]  }
 0x652   :  { %24124 = vst [vmem:[#allocation44_spill] sm:$0xff] %v21205_v48  ;;  %v7319_v25 = vor.u32 %v7317_v61, %v7316_v1  ;;  %v7227_v48 = vld [vmem:[#allocation2 + $0x48] sm:$0x80]  ;;  %v21231_v60 = vor.u32 %v9725_v39, %v23807_v21  ;;  %v7308_v1 = vsel %vm290_vm0, %v7300_v37, %v7307_v36  ;;  %v7334_v27 = vshrl.u32 %v7229_v13, 16 }
 0x653   :  { %24130 = vst [vmem:[#allocation45_spill] sm:$0xff] %v21224_v53  ;;  %v21235_v0 = vor.u32 %v9737_v47, %v23804_v57  ;;  %v7322_v61 = vshrl.u32 %v7227_v48, 16  ;;  %v7340_v51 = vrot.slane %v7338_v7, 7  ;;  %v7329_v39 = vshll.u32 %v24053_v16, 16  ;;  %v7231_v7 = vld [vmem:[#allocation2 + $0x78] sm:$0x80] }
 0x654   :  { %24132 = vst [vmem:[#allocation46_spill] sm:$0xff] %v21231_v60  ;;  %v7320_v19 = vsel %vm290_vm0, %v7312_v8, %v7319_v25  ;;  %v7341_v47 = vshll.u32 %v20779_v42, 16  ;;  %v7350_v48 = vshrl.u32 %v20781_v20, 16  ;;  %v7362_v8 = vshrl.u32 %v20783_v5, 16  ;;  %v7233_v16 = vld [vmem:[#allocation2 + $0x90] sm:$0x80] }
 0x655   :  { %24133 = vst [vmem:[#allocation47_spill] sm:$0xff] %v21235_v0  ;;  %v7331_v57 = vor.u32 %v7329_v39, %v7328_v58  ;;  %v7324_v37 = vrot.slane %v7322_v61, 7  ;;  %v7336_v25 = vrot.slane %v7334_v27, 7  ;;  %v18036_v42 = vld [vmem:[%s23641_s2 + $0x98] sm:$0xff]   ;;  %v7365_v27 = vshll.u32 %v20783_v5, 16  ;;  %v21369_v60 = vld [vmem:[#allocation2 + $0xb0] sm:$0xff] }
 0x656   :  { %v7343_v36 = vor.u32 %v7341_v47, %v7340_v51  ;;  %v7364_v58 = vrot.slane %v7362_v8, 7  ;;  %v7358_v51 = vshrl.u32 %v7233_v16, 16  ;;  %v7235_v8 = vld [vmem:[#allocation2 + $0xa8] sm:$0x80] }
 0x657   :  { %v7332_v13 = vsel %vm290_vm0, %v7324_v37, %v7331_v57  ;;  %v7374_v57 = vshrl.u32 %v20785_v15, 16  ;;  %v7386_v37 = vshrl.u32 %v20787_v22, 16 }
 0x658   :  { %16294 = vmatmul.mubr.bf16.vlgmr.msra.gmra.mrb[0].mxu1 %v7308_v1  ;;  %v7346_v1 = vshrl.u32 %v7231_v7, 16  ;;  %v7344_v61 = vsel %vm290_vm0, %v7336_v25, %v7343_v36  ;;  %v7360_v36 = vrot.slane %v7358_v51, 7  ;;  %v7237_v25 = vld [vmem:[#allocation2 + $0xc0] sm:$0x80]  ;;  %v7370_v7 = vshrl.u32 %v7235_v8, 16 }
 0x659   :  { %16297 = vmatprep.mubr.bf16.mxu1 %v7320_v19  ;;  %16358 = vmatpush3.bf16.msra.mxu1 %v20893_v55  ;;  %v7352_v55 = vrot.slane %v7350_v48, 7  ;;  %v7353_v19 = vshll.u32 %v20781_v20, 16  ;;  %v7367_v48 = vor.u32 %v7365_v27, %v7364_v58  ;;  %v18038_v20 = vld [vmem:[%s23641_s2 + $0xa8] sm:$0xff]   ;;  %v7376_v5 = vrot.slane %v7374_v57, 7 }
 0x65a   :  { %16359 = vmatprep.subr.bf16.mxu1 %v18034_v63  ;;  %v7348_v47 = vrot.slane %v7346_v1, 7  ;;  %v7388_v16 = vrot.slane %v7386_v37, 7  ;;  %v7377_v1 = vshll.u32 %v20785_v15, 16  ;;  %v21268_v58 = vld [vmem:[#allocation2 + $0x188] sm:$0xff]  ;;  %v7372_v27 = vrot.slane %v7370_v7, 7 }
 0x65b   :  { %v7355_v39 = vor.u32 %v7353_v19, %v7352_v55  ;;  %v7368_v55 = vsel %vm290_vm0, %v7360_v36, %v7367_v48  ;;  %v7398_v19 = vshrl.u32 %v20792_v30, 16  ;;  %v7241_v48 = vld [vmem:[#allocation2 + $0xf0] sm:$0x80]  ;;  %v23806_v7 = vshrl.u32 %v21268_v58, 16 }
 0x65c   :  { %v7379_v51 = vor.u32 %v7377_v1, %v7376_v5 }
 0x65d   :  { %16360 = vmatpush3.bf16.msra.mxu1 %v18034_v63  ;;  %v18037_v63 = vld [vmem:[%s23641_s2 + $0xa0] sm:$0xff]   ;;  %v7400_v37 = vrot.slane %v7398_v19, 7 }
 0x65e   :  { %16361 = vmatprep.subr.bf16.mxu1 %v18035_v28  ;;  %v7380_v36 = vsel %vm290_vm0, %v7372_v27, %v7379_v51  ;;  %v7422_v51 = vshrl.u32 %v20796_v14, 16 }
 0x660   :  { %16298 = vmatmul.mubr.bf16.gmra.mrb[4].mxu1 %v7332_v13  ;;  %v7382_v13 = vshrl.u32 %v7237_v25, 16  ;;  %v7406_v25 = vshrl.u32 %v7241_v48, 16 }
 0x661   :  { %16301 = vmatprep.mubr.bf16.mxu1 %v7344_v61  ;;  %16362 = vmatpush3.bf16.msra.mxu1 %v18035_v28  ;;  %v7356_v28 = vsel %vm290_vm0, %v7348_v47, %v7355_v39  ;;  %v18039_v61 = vld [vmem:[%s23641_s2 + $0xb0] sm:$0xff]   ;;  %v7239_v39 = vld [vmem:[#allocation2 + $0xd8] sm:$0x80]  ;;  %v7410_v47 = vshrl.u32 %v20794_v34, 16 }
 0x662   :  { %16363 = vmatprep.subr.bf16.mxu1 %v18036_v42  ;;  %v7384_v15 = vrot.slane %v7382_v13, 7  ;;  %v7394_v8 = vshrl.u32 %v7239_v39, 16  ;;  %v21290_v13 = vld [vmem:[%s23641_s2 + $0xc0] sm:$0xff]   ;;  %v7243_v39 = vld [vmem:[#allocation2 + $0x108] sm:$0x80] }
 0x663   :  { %v7412_v5 = vrot.slane %v7410_v47, 7 }
 0x664   :  { %v7396_v19 = vrot.slane %v7394_v8, 7  ;;  %v7425_v8 = vshll.u32 %v20796_v14, 16 }
 0x665   :  { %16364 = vmatpush3.bf16.msra.mxu1 %v18036_v42  ;;  %v7389_v42 = vshll.u32 %v20787_v22, 16  ;;  %v18040_v22 = vld [vmem:[%s23641_s2 + $0xb8] sm:$0xff]  }
 0x666   :  { %16365 = vmatprep.subr.bf16.mxu1 %v18037_v63 }
 0x667   :  { %v7391_v57 = vor.u32 %v7389_v42, %v7388_v16 }
 0x668   :  { %16302 = vmatmul.mubr.bf16.gmra.mrb[8].mxu1 %v7356_v28 }
 0x669   :  { %16305 = vmatprep.mubr.bf16.mxu1 %v7368_v55  ;;  %16366 = vmatpush3.bf16.msra.mxu1 %v18037_v63  ;;  %v23805_v63 = vshll.u32 %v21268_v58, 16  ;;  %v7392_v28 = vsel %vm290_vm0, %v7384_v15, %v7391_v57  ;;  %v7413_v55 = vshll.u32 %v20794_v34, 16  ;;  %v7245_v34 = vld [vmem:[#allocation2 + $0x120] sm:$0x80]  ;;  %v7424_v57 = vrot.slane %v7422_v51, 7 }
 0x66a   :  { %16367 = vmatprep.subr.bf16.mxu1 %v18038_v20  ;;  %v7418_v15 = vshrl.u32 %v7243_v39, 16  ;;  %v7249_v51 = vld [vmem:[#allocation2 + $0x150] sm:$0x80]  ;;  %v7257_v39 = vld [vmem:[#allocation2 + $0x1e0] sm:$0x80] }
 0x66b   :  { %v10871_v16 = vrot.slane %v23805_v63, 1  ;;  %v7415_v27 = vor.u32 %v7413_v55, %v7412_v5  ;;  %v7437_v5 = vshll.u32 %v20798_v18, 16  ;;  %v7263_v63 = vld [vmem:[#allocation2 + $0x228] sm:$0x80] }
 0x66d   :  { %16368 = vmatpush3.bf16.msra.mxu1 %v18038_v20  ;;  %v7401_v20 = vshll.u32 %v20792_v30, 16  ;;  %v21294_v1 = vor.u32 %v10871_v16, %v23806_v7  ;;  %v7434_v30 = vshrl.u32 %v20798_v18, 16 }
 0x66e   :  { %16369 = vmatprep.subr.bf16.mxu1 %v18039_v61 }
 0x66f   :  { %24134 = vst [vmem:[#allocation48_spill] sm:$0xff] %v21294_v1  ;;  %v7403_v42 = vor.u32 %v7401_v20, %v7400_v37  ;;  %v7436_v48 = vrot.slane %v7434_v30, 7  ;;  %v7458_v20 = vshrl.u32 %v20807_v54, 16  ;;  %v7255_v30 = vld [vmem:[#allocation2 + $0x1c8] sm:$0x80] }
 0x670   :  { %16306 = vmatmul.mubr.bf16.gmra.mrb[12].mxu1 %v7380_v36  ;;  %v7430_v36 = vshrl.u32 %v7245_v34, 16 }
 0x671   :  { %16309 = vmatprep.mubr.bf16.mxu1 %v7392_v28  ;;  %16370 = vmatpush3.bf16.msra.mxu1 %v18039_v61  ;;  %v7408_v61 = vrot.slane %v7406_v25, 7  ;;  %v7404_v47 = vsel %vm290_vm0, %v7396_v19, %v7403_v42  ;;  %v7427_v25 = vor.u32 %v7425_v8, %v7424_v57  ;;  %v7446_v28 = vshrl.u32 %v20805_v49, 16  ;;  %v7247_v42 = vld [vmem:[#allocation2 + $0x138] sm:$0x80]  ;;  %v7251_v19 = vld [vmem:[#allocation2 + $0x168] sm:$0x80] }
 0x672   :  { %16371 = vmatprep.subr.bf16.mxu1 %v18040_v22  ;;  %v7439_v16 = vor.u32 %v7437_v5, %v7436_v48  ;;  %v7432_v55 = vrot.slane %v7430_v36, 7  ;;  %v7442_v14 = vshrl.u32 %v7247_v42, 16  ;;  %v7460_v34 = vrot.slane %v7458_v20, 7  ;;  %v7261_v8 = vld [vmem:[#allocation2 + $0x210] sm:$0x80] }
 0x673   :  { %v7416_v37 = vsel %vm290_vm0, %v7408_v61, %v7415_v27  ;;  %v7448_v27 = vrot.slane %v7446_v28, 7  ;;  %v7454_v57 = vshrl.u32 %v7249_v51, 16  ;;  %v7466_v48 = vshrl.u32 %v7251_v19, 16  ;;  %v7253_v42 = vld [vmem:[#allocation2 + $0x1b0] sm:$0x80] }
 0x674   :  { %v7440_v18 = vsel %vm290_vm0, %v7432_v55, %v7439_v16  ;;  %v7502_v36 = vshrl.u32 %v7257_v39, 16  ;;  %v7461_v5 = vshll.u32 %v20807_v54, 16  ;;  %v7470_v28 = vshrl.u32 %v20809_v24, 16  ;;  %v7267_v16 = vld [vmem:[#allocation2 + $0x258] sm:$0x80] }
 0x675   :  { %16372 = vmatpush3.bf16.msra.mxu1 %v18040_v22  ;;  %v7420_v22 = vrot.slane %v7418_v15, 7  ;;  %v7449_v15 = vshll.u32 %v20805_v49, 16  ;;  %v7444_v20 = vrot.slane %v7442_v14, 7  ;;  %v7456_v51 = vrot.slane %v7454_v57, 7  ;;  %v7269_v49 = vld [vmem:[#allocation2 + $0x270] sm:$0x80] }
 0x676   :  { %16437 = vmatprep.subr.bf16.mxu1 %v21290_v13  ;;  %v7463_v55 = vor.u32 %v7461_v5, %v7460_v34  ;;  %v7526_v7 = vshrl.u32 %v7261_v8, 16  ;;  %v7468_v19 = vrot.slane %v7466_v48, 7  ;;  %v7538_v39 = vshrl.u32 %v7263_v63, 16  ;;  %v21316_v14 = vld [vmem:[#allocation2 + $0x38] sm:$0xff]  ;;  %v21329_v5 = vld [vmem:[#allocation2 + $0x50] sm:$0xff] }
 0x677   :  { %v7428_v61 = vsel %vm290_vm0, %v7420_v22, %v7427_v25  ;;  %v7265_v25 = vld [vmem:[#allocation2 + $0x240] sm:$0x80]  ;;  %v7451_v22 = vor.u32 %v7449_v15, %v7448_v27  ;;  %v7472_v21 = vrot.slane %v7470_v28, 7  ;;  %v7478_v1 = vshrl.u32 %v7253_v42, 16  ;;  %24136 = vst [vmem:[#allocation50_spill] sm:$0xff] %v21316_v14  ;;  %24137 = vst [vmem:[#allocation51_spill] sm:$0xff] %v21329_v5 }
 0x678   :  { %16310 = vmatmul.mubr.bf16.gmra.mrb[16].mxu1 %v7404_v47  ;;  %v7259_v47 = vld [vmem:[#allocation2 + $0x1f8] sm:$0x80]  ;;  %v7550_v54 = vshrl.u32 %v7265_v25, 16  ;;  %v21314_v0 = vrot.slane %v7502_v36, 7  ;;  %v7562_v27 = vshrl.u32 %v7267_v16, 16  ;;  %v7574_v57 = vshrl.u32 %v7269_v49, 16 }
 0x679   :  { %16313 = vmatprep.mubr.bf16.mxu1 %v7416_v37  ;;  %v7490_v37 = vshrl.u32 %v7255_v30, 16  ;;  %v21321_v15 = vld [vmem:[#allocation2 + $0x288] sm:$0x80]  ;;  %v7494_v63 = vshrl.u32 %v20816_v10, 16  ;;  %v7464_v36 = vsel %vm290_vm0, %v7456_v51, %v7463_v55  ;;  %v21327_v8 = vrot.slane %v7526_v7, 7  ;;  %v21356_v7 = vld [vmem:[#allocation2 + $0x98] sm:$0xff] }
 0x67a   :  { %v7506_v28 = vshrl.u32 %v20818_v35, 16  ;;  %v21332_v25 = vrot.slane %v7538_v39, 7  ;;  %v21339_v16 = vrot.slane %v7562_v27, 7  ;;  %v21342_v55 = vrot.slane %v7574_v57, 7  ;;  %v21346_v39 = vld [vmem:[#allocation2 + $0x68] sm:$0xff]  ;;  %v21353_v27 = vld [vmem:[#allocation2 + $0x80] sm:$0xff] }
 0x67b   :  { %v21312_v30 = vrot.slane %v7490_v37, 7  ;;  %v7473_v37 = vshll.u32 %v20809_v24, 16  ;;  %v23812_v24 = vshrl.u32 %v21316_v14, 16 }
 0x67c   :  { %v7508_v57 = vrot.slane %v7506_v28, 7 }
 0x67d   :  { %v7475_v42 = vor.u32 %v7473_v37, %v7472_v21  ;;  %v7518_v21 = vshrl.u32 %v20820_v2, 16  ;;  %v23813_v37 = vshll.u32 %v21329_v5, 16 }
 0x67f   :  { %v7520_v28 = vrot.slane %v7518_v21, 7 }
 0x680   :  { %16314 = vmatmul.mubr.bf16.gmra.mrb[20].mxu1 %v7428_v61  ;;  %v7514_v61 = vshrl.u32 %v7259_v47, 16  ;;  %v7452_v47 = vsel %vm290_vm0, %v7444_v20, %v7451_v22  ;;  %v21334_v22 = vrot.slane %v7550_v54, 7  ;;  %v21336_v20 = vld [vmem:[#allocation2 + $0x2a0] sm:$0x80] }
 0x681   :  { %16317 = vmatprep.mubr.bf16.mxu1 %v7440_v18  ;;  %v21310_v18 = vld [vmem:[#allocation2 + $0x338] sm:$0xff] }
 0x682   :  { %24135 = vst [vmem:[#allocation49_spill] sm:$0xff] %v21310_v18  ;;  %v21319_v34 = vrot.slane %v7514_v61, 7  ;;  %v23808_v48 = vshll.u32 %v21310_v18, 16  ;;  %v7480_v61 = vrot.slane %v7478_v1, 7  ;;  %v23811_v51 = vshrl.u32 %v21310_v18, 16 }
 0x683   :  { %v7533_v18 = vshll.u32 %v20822_v50, 16 }
 0x684   :  { %v11063_v54 = vrot.slane %v23808_v48, 1  ;;  %v7476_v48 = vsel %vm290_vm0, %v7468_v19, %v7475_v42  ;;  %v7488_v1 = vsel %vm290_vm0, %v7480_v61, %v21126_v29  ;;  %v7509_v19 = vshll.u32 %v20818_v35, 16  ;;  %v21382_v61 = vld [vmem:[#allocation2 + $0xc8] sm:$0xff]  ;;  %v21400_v42 = vld [vmem:[#allocation2 + $0x110] sm:$0xff] }
 0x685   :  { %v7521_v29 = vshll.u32 %v20820_v2, 16  ;;  %v7542_v2 = vshrl.u32 %v20829_v43, 16  ;;  %24146 = vst [vmem:[#allocation57_spill] sm:$0xff] %v21400_v42 }
 0x686   :  { %v21360_v49 = vor.u32 %v11063_v54, %v23811_v51  ;;  %v24139_v54 = vshll.u32 %v21316_v14, 16  ;;  %v7511_v35 = vor.u32 %v7509_v19, %v7508_v57  ;;  %v24153_v57 = vshrl.u32 %v21369_v60, 16 }
 0x687   :  { %v7523_v14 = vor.u32 %v7521_v29, %v7520_v28 }
 0x688   :  { %16318 = vmatmul.mubr.bf16.gmra.mrb[24].mxu1 %v7452_v47  ;;  %v7496_v47 = vrot.slane %v7494_v63, 7  ;;  %24138 = vst [vmem:[#allocation52_spill] sm:$0xff] %v21360_v49  ;;  %v11591_v63 = vrot.slane %v23812_v24, 7  ;;  %v24141_v24 = vshrl.u32 %v21329_v5, 16  ;;  %v24151_v5 = vshll.u32 %v21353_v27, 16 }
 0x689   :  { %16321 = vmatprep.mubr.bf16.mxu1 %v7464_v36  ;;  %v7497_v36 = vshll.u32 %v20816_v10, 16  ;;  %v7530_v10 = vshrl.u32 %v20822_v50, 16  ;;  %v11651_v19 = vrot.slane %v24153_v57, 7  ;;  %v24158_v57 = vshll.u32 %v21369_v60, 16 }
 0x68a   :  { %v21375_v51 = vor.u32 %v11591_v63, %v24139_v54  ;;  %v11603_v49 = vrot.slane %v24141_v24, 7  ;;  %v21386_v54 = vld [vmem:[#allocation2 + $0xe0] sm:$0xff] }
 0x68b   :  { %v7499_v53 = vor.u32 %v7497_v36, %v7496_v47  ;;  %24142 = vst [vmem:[#allocation54_spill] sm:$0xff] %v21386_v54  ;;  %v21394_v47 = vld [vmem:[#allocation2 + $0xf8] sm:$0xff]  ;;  %v24145_v36 = vshrl.u32 %v21346_v39, 16  ;;  %v7532_v50 = vrot.slane %v7530_v10, 7  ;;  %v21437_v28 = vor.u32 %v11651_v19, %v24158_v57 }
 0x68c   :  { %24140 = vst [vmem:[#allocation53_spill] sm:$0xff] %v21375_v51  ;;  %v21390_v24 = vor.u32 %v11603_v49, %v23813_v37  ;;  %24144 = vst [vmem:[#allocation56_spill] sm:$0xff] %v21394_v47  ;;  %v24147_v49 = vshrl.u32 %v21353_v27, 16  ;;  %v21414_v51 = vld [vmem:[#allocation2 + $0x128] sm:$0xff]  ;;  %v7544_v19 = vrot.slane %v7542_v2, 7  ;;  %v7545_v57 = vshll.u32 %v20829_v43, 16 }
 0x68d   :  { %v11615_v21 = vrot.slane %v24145_v36, 7  ;;  %v24149_v36 = vshrl.u32 %v21356_v7, 16  ;;  %24150 = vst [vmem:[#allocation59_spill] sm:$0xff] %v21414_v51  ;;  %v7500_v63 = vsel %vm290_vm0, %v21312_v30, %v7499_v53  ;;  %24159 = vst [vmem:[#allocation64_spill] sm:$0xff] %v21437_v28  ;;  %v21445_v53 = vld [vmem:[#allocation2 + $0x170] sm:$0xff]  ;;  %v24162_v30 = vshrl.u32 %v21386_v54, 16 }
 0x68e   :  { %24143 = vst [vmem:[#allocation55_spill] sm:$0xff] %v21390_v24  ;;  %v11627_v37 = vrot.slane %v24147_v49, 7  ;;  %24161 = vst [vmem:[#allocation65_spill] sm:$0xff] %v21445_v53  ;;  %v24166_v28 = vshll.u32 %v21386_v54, 16  ;;  %v7566_v43 = vshrl.u32 %v20833_v59, 16  ;;  %v21560_v54 = vld [vmem:[#allocation2 + $0x2a8] sm:$0xff] }
 0x68f   :  { %v11639_v10 = vrot.slane %v24149_v36, 7  ;;  %v24155_v36 = vshll.u32 %v21356_v7, 16 }
 0x690   :  { %16322 = vmatmul.mubr.bf16.gmra.mrb[28].mxu1 %v7476_v48  ;;  %v23818_v48 = vshll.u32 %v21346_v39, 16  ;;  %v21418_v49 = vor.u32 %v11627_v37, %v24151_v5  ;;  %v21433_v37 = vld [vmem:[#allocation2 + $0x158] sm:$0xff]  ;;  %v11675_v5 = vrot.slane %v24162_v30, 7 }
 0x691   :  { %16325 = vmatprep.mubr.bf16.mxu1 %v7488_v1  ;;  %v21428_v1 = vor.u32 %v11639_v10, %v24155_v36  ;;  %24157 = vst [vmem:[#allocation63_spill] sm:$0xff] %v21433_v37  ;;  %v23819_v10 = vshll.u32 %v21414_v51, 16  ;;  %v21472_v36 = vld [vmem:[#allocation2 + $0x1e8] sm:$0xff]  ;;  %v24176_v59 = vshrl.u32 %v21433_v37, 16 }
 0x692   :  { %v21408_v24 = vor.u32 %v11615_v21, %v23818_v48  ;;  %24152 = vst [vmem:[#allocation60_spill] sm:$0xff] %v21418_v49  ;;  %v7554_v21 = vshrl.u32 %v20831_v45, 16  ;;  %v24160_v45 = vshrl.u32 %v21382_v61, 16  ;;  %v7512_v48 = vsel %vm290_vm0, %v21314_v0, %v7511_v35  ;;  %v21482_v49 = vld [vmem:[#allocation2 + $0x200] sm:$0xff] }
 0x693   :  { %24156 = vst [vmem:[#allocation62_spill] sm:$0xff] %v21428_v1  ;;  %v24165_v0 = vshrl.u32 %v21394_v47, 16  ;;  %v21461_v1 = vor.u32 %v11675_v5, %v24166_v28  ;;  %v24171_v5 = vshll.u32 %v21400_v42, 16 }
 0x694   :  { %24148 = vst [vmem:[#allocation58_spill] sm:$0xff] %v21408_v24  ;;  %v21424_v24 = vld [vmem:[#allocation2 + $0x140] sm:$0xff]  ;;  %v11663_v29 = vrot.slane %v24160_v45, 7  ;;  %v24163_v45 = vshll.u32 %v21382_v61, 16 }
 0x695   :  { %24154 = vst [vmem:[#allocation61_spill] sm:$0xff] %v21424_v24  ;;  %v11687_v35 = vrot.slane %v24165_v0, 7  ;;  %24167 = vst [vmem:[#allocation67_spill] sm:$0xff] %v21461_v1  ;;  %v7535_v0 = vor.u32 %v7533_v18, %v7532_v50  ;;  %v7556_v1 = vrot.slane %v7554_v21, 7  ;;  %v24174_v18 = vshrl.u32 %v21424_v24, 16 }
 0x696   :  { %v11735_v21 = vrot.slane %v24176_v59, 7 }
 0x697   :  { %v11723_v50 = vrot.slane %v24174_v18, 7  ;;  %v24178_v18 = vshll.u32 %v21424_v24, 16  ;;  %v18139_v24 = vld [vmem:[#allocation2 + $0x260] sm:$0xff] }
 0x698   :  { %16326 = vmatmul.mubr.bf16.gmra.mrb[32].mxu1 %v7500_v63  ;;  %v21453_v63 = vor.u32 %v11663_v29, %v24163_v45  ;;  %v24169_v45 = vshll.u32 %v21394_v47, 16 }
 0x699   :  { %16329 = vmatprep.mubr.bf16.mxu1 %v7512_v48  ;;  %v24168_v48 = vshrl.u32 %v21400_v42, 16 }
 0x69a   :  { %24164 = vst [vmem:[#allocation66_spill] sm:$0xff] %v21453_v63  ;;  %v21469_v63 = vor.u32 %v11687_v35, %v24169_v45  ;;  %v21484_v35 = vld [vmem:[#allocation2 + $0x218] sm:$0xff]  ;;  %v7524_v45 = vsel %vm290_vm0, %v21319_v34, %v7523_v14  ;;  %v24180_v14 = vshrl.u32 %v21445_v53, 16 }
 0x69b   :  { %v11699_v30 = vrot.slane %v24168_v48, 7  ;;  %v24173_v48 = vshrl.u32 %v21414_v51, 16 }
 0x69c   :  { %24170 = vst [vmem:[#allocation68_spill] sm:$0xff] %v21469_v63  ;;  %v21503_v63 = vor.u32 %v11723_v50, %v24178_v18  ;;  %v11747_v34 = vrot.slane %v24180_v14, 7  ;;  %v7569_v50 = vshll.u32 %v18139_v24, 16  ;;  %v18140_v18 = vld [vmem:[#allocation2 + $0x278] sm:$0xff]  ;;  %v21515_v14 = vld [vmem:[#allocation2 + $0x248] sm:$0xff] }
 0x69d   :  { %v21476_v28 = vor.u32 %v11699_v30, %v24171_v5  ;;  %v11711_v2 = vrot.slane %v24173_v48, 7  ;;  %v23824_v30 = vshll.u32 %v21433_v37, 16  ;;  %v18138_v48 = vld [vmem:[#allocation2 + $0x248] sm:$0xff]  ;;  %24182 = vst [vmem:[#allocation74_spill] sm:$0xff] %v21515_v14  ;;  %v7581_v59 = vshll.u32 %v18140_v18, 16 }
 0x69e   :  { %24179 = vst [vmem:[#allocation72_spill] sm:$0xff] %v21503_v63  ;;  %v7578_v63 = vshrl.u32 %v18140_v18, 16 }
 0x69f   :  { %24172 = vst [vmem:[#allocation69_spill] sm:$0xff] %v21476_v28  ;;  %v21493_v5 = vor.u32 %v11711_v2, %v23819_v10  ;;  %v21499_v28 = vld [vmem:[#allocation2 + $0x230] sm:$0xff]  ;;  %v7536_v2 = vsel %vm290_vm0, %v21327_v8, %v7535_v0  ;;  %v21513_v29 = vor.u32 %v11735_v21, %v23824_v30  ;;  %v7547_v0 = vor.u32 %v7545_v57, %v7544_v19  ;;  %v21522_v21 = vld [vmem:[#allocation2 + $0x260] sm:$0xff] }
 0x6a0   :  { %24177 = vst [vmem:[#allocation71_spill] sm:$0xff] %v21499_v28  ;;  %16330 = vmatmul.mubr.bf16.gmra.mrb[36].mxu1 %v7524_v45  ;;  %v24183_v45 = vshll.u32 %v21445_v53, 16  ;;  %v7568_v10 = vrot.slane %v7566_v43, 7  ;;  %v21532_v57 = vld [vmem:[#allocation2 + $0x290] sm:$0xff]  ;;  %v24186_v43 = vshrl.u32 %v21482_v49, 16  ;;  %v24193_v24 = vshrl.u32 %v21499_v28, 16 }
 0x6a1   :  { %24175 = vst [vmem:[#allocation70_spill] sm:$0xff] %v21493_v5  ;;  %24181 = vst [vmem:[#allocation73_spill] sm:$0xff] %v21513_v29  ;;  %v7557_v5 = vshll.u32 %v18138_v48, 16  ;;  %16333 = vmatprep.mubr.bf16.mxu1 %v7536_v2  ;;  %v23835_v48 = vshll.u32 %v21472_v36, 16  ;;  %v21526_v29 = vld [vmem:[#allocation2 + $0x278] sm:$0xff]  ;;  %v24185_v2 = vshrl.u32 %v21472_v36, 16 }
 0x6a2   :  { %v21519_v8 = vor.u32 %v11747_v34, %v24183_v45  ;;  %v11795_v18 = vrot.slane %v24186_v43, 7  ;;  %v21538_v45 = vld [vmem:[#allocation2 + $0x290] sm:$0xff]  ;;  %v24189_v43 = vshll.u32 %v21482_v49, 16  ;;  %v11819_v47 = vrot.slane %v24193_v24, 7 }
 0x6a3   :  { %v7559_v30 = vor.u32 %v7557_v5, %v7556_v1  ;;  %v11783_v51 = vrot.slane %v24185_v2, 7  ;;  %v24187_v1 = vshrl.u32 %v21484_v35, 16  ;;  %v7590_v37 = vshrl.u32 %v21538_v45, 16  ;;  %v21581_v19 = vld [vmem:[#allocation2 + $0x2f0] sm:$0xff] }
 0x6a4   :  { %24184 = vst [vmem:[#allocation75_spill] sm:$0xff] %v21519_v8  ;;  %v21548_v8 = vld [vmem:[#allocation2 + $0x2a8] sm:$0xff]  ;;  %v21552_v53 = vor.u32 %v11795_v18, %v24189_v43  ;;  %v7580_v2 = vrot.slane %v7578_v63, 7  ;;  %v21571_v43 = vld [vmem:[#allocation2 + $0x2d8] sm:$0xff]  ;;  %v24194_v63 = vshll.u32 %v21499_v28, 16 }
 0x6a5   :  { %v11807_v5 = vrot.slane %v24187_v1, 7  ;;  %v21545_v34 = vor.u32 %v11783_v51, %v23835_v48  ;;  %v24191_v1 = vshll.u32 %v21484_v35, 16  ;;  %v7602_v51 = vshrl.u32 %v21560_v54, 16 }
 0x6a6   :  { %24190 = vst [vmem:[#allocation77_spill] sm:$0xff] %v21552_v53  ;;  %v7548_v48 = vsel %vm290_vm0, %v21332_v25, %v7547_v0  ;;  %v7560_v18 = vsel %vm290_vm0, %v21334_v22, %v7559_v30  ;;  %v21575_v24 = vor.u32 %v11819_v47, %v24194_v63  ;;  %v7571_v25 = vor.u32 %v7569_v50, %v7568_v10  ;;  %v21587_v47 = vld [vmem:[#allocation2 + $0x308] sm:$0xff] }
 0x6a7   :  { %24188 = vst [vmem:[#allocation76_spill] sm:$0xff] %v21545_v34  ;;  %v21556_v42 = vor.u32 %v11807_v5, %v24191_v1  ;;  %v21566_v34 = vld [vmem:[#allocation2 + $0x2c0] sm:$0xff]  ;;  %v24196_v1 = vshrl.u32 %v21515_v14, 16  ;;  %v23840_v0 = vshll.u32 %v21522_v21, 16  ;;  %v24197_v22 = vshrl.u32 %v21522_v21, 16  ;;  %24198 = vst [vmem:[#allocation80_spill] sm:$0xff] %v21587_v47 }
 0x6a8   :  { %16334 = vmatmul.mubr.bf16.gmra.mrb[40].mxu1 %v7548_v48  ;;  %24195 = vst [vmem:[#allocation79_spill] sm:$0xff] %v21575_v24  ;;  %v24199_v63 = vshll.u32 %v21515_v14, 16  ;;  %v24201_v10 = vshrl.u32 %v21526_v29, 16  ;;  %v24203_v5 = vshrl.u32 %v21532_v57, 16  ;;  %v7583_v24 = vor.u32 %v7581_v59, %v7580_v2 }
 0x6a9   :  { %24192 = vst [vmem:[#allocation78_spill] sm:$0xff] %v21556_v42  ;;  %v11831_v42 = vrot.slane %v24196_v1, 7  ;;  %16337 = vmatprep.mubr.bf16.mxu1 %v7560_v18  ;;  %v11843_v30 = vrot.slane %v24197_v22, 7  ;;  %v7592_v28 = vrot.slane %v7590_v37, 7  ;;  %v7604_v37 = vrot.slane %v7602_v51, 7  ;;  %v18143_v51 = vld [vmem:[#allocation2 + $0x2c0] sm:$0xff] }
 0x6aa   :  { %v11855_v50 = vrot.slane %v24201_v10, 7  ;;  %v11867_v53 = vrot.slane %v24203_v5, 7  ;;  %v24209_v5 = vshrl.u32 %v21548_v8, 16  ;;  %v7572_v2 = vsel %vm290_vm0, %v21339_v16, %v7571_v25 }
 0x6ab   :  { %v21591_v1 = vor.u32 %v11831_v42, %v24199_v63  ;;  %v21599_v22 = vor.u32 %v11843_v30, %v23840_v0  ;;  %v21604_v42 = vld [vmem:[#allocation2 + $0x320] sm:$0xff]  ;;  %v24205_v63 = vshll.u32 %v21526_v29, 16  ;;  %v24207_v30 = vshll.u32 %v21532_v57, 16 }
 0x6ac   :  { %24204 = vst [vmem:[#allocation83_spill] sm:$0xff] %v21604_v42  ;;  %v11879_v59 = vrot.slane %v24209_v5, 7  ;;  %v23841_v14 = vshll.u32 %v21566_v34, 16  ;;  %v7584_v16 = vsel %vm290_vm0, %v21342_v55, %v7583_v24  ;;  %v7593_v18 = vshll.u32 %v21538_v45, 16 }
 0x6ad   :  { %24200 = vst [vmem:[#allocation81_spill] sm:$0xff] %v21591_v1  ;;  %24202 = vst [vmem:[#allocation82_spill] sm:$0xff] %v21599_v22  ;;  %v21608_v10 = vor.u32 %v11855_v50, %v24205_v63  ;;  %v21614_v0 = vor.u32 %v11867_v53, %v24207_v30  ;;  %v24210_v50 = vshrl.u32 %v21566_v34, 16  ;;  %v24213_v30 = vshrl.u32 %v21571_v43, 16  ;;  %v7275_v22 = vld [vmem:[#allocation2 + $0x2b8] sm:$0x80] }
 0x6ae   :  { %v24218_v55 = vshrl.u32 %v21587_v47, 16  ;;  %v7277_v1 = vld [vmem:[#allocation2 + $0x2d0] sm:$0x80] }
 0x6af   :  { %24206 = vst [vmem:[#allocation84_spill] sm:$0xff] %v21608_v10  ;;  %24208 = vst [vmem:[#allocation85_spill] sm:$0xff] %v21614_v0  ;;  %v11891_v63 = vrot.slane %v24210_v50, 7  ;;  %v24211_v10 = vshll.u32 %v21548_v8, 16  ;;  %v11903_v5 = vrot.slane %v24213_v30, 7  ;;  %v24215_v50 = vshrl.u32 %v21581_v19, 16 }
 0x6b0   :  { %16338 = vmatmul.mubr.bf16.gmra.mrb[44].mxu1 %v7572_v2  ;;  %v11927_v24 = vrot.slane %v24218_v55, 7  ;;  %v7605_v30 = vshll.u32 %v21560_v54, 16  ;;  %v24224_v55 = vshrl.u32 %v21604_v42, 16 }
 0x6b1   :  { %v21627_v53 = vor.u32 %v11879_v59, %v24211_v10  ;;  %v21636_v25 = vor.u32 %v11891_v63, %v23841_v14  ;;  %v11915_v48 = vrot.slane %v24215_v50, 7  ;;  %16341 = vmatprep.mubr.bf16.mxu1 %v7584_v16  ;;  %v24216_v59 = vshll.u32 %v21571_v43, 16 }
 0x6b2   :  { %v7614_v63 = vshrl.u32 %v18143_v51, 16  ;;  %v24219_v14 = vshrl.u32 %v21321_v15, 16  ;;  %v24220_v50 = vshll.u32 %v21581_v19, 16  ;;  %v7595_v16 = vor.u32 %v7593_v18, %v7592_v28 }
 0x6b3   :  { %24212 = vst [vmem:[#allocation86_spill] sm:$0xff] %v21627_v53  ;;  %24214 = vst [vmem:[#allocation87_spill] sm:$0xff] %v21636_v25  ;;  %v21644_v2 = vor.u32 %v11903_v5, %v24216_v59  ;;  %v23846_v10 = vshll.u32 %v21604_v42, 16  ;;  %v24222_v5 = vshll.u32 %v21587_v47, 16  ;;  %v7607_v54 = vor.u32 %v7605_v30, %v7604_v37  ;;  %v18144_v53 = vld [vmem:[#allocation2 + $0x2d8] sm:$0xff]  ;;  %v18146_v42 = vld [vmem:[#allocation2 + $0x308] sm:$0xff] }
 0x6b4   :  { %v7588_v25 = vrot.slane %v24219_v14, 7  ;;  %v21653_v45 = vor.u32 %v11915_v48, %v24220_v50  ;;  %v7626_v0 = vshrl.u32 %v18144_v53, 16  ;;  %v24225_v15 = vshrl.u32 %v21336_v20, 16 }
 0x6b5   :  { %24217 = vst [vmem:[#allocation88_spill] sm:$0xff] %v21644_v2  ;;  %v21658_v59 = vor.u32 %v11927_v24, %v24222_v5  ;;  %v11939_v2 = vrot.slane %v24224_v55, 7  ;;  %v7616_v48 = vrot.slane %v7614_v63, 7  ;;  %v7610_v24 = vshrl.u32 %v7275_v22, 16  ;;  %v7279_v63 = vld [vmem:[#allocation2 + $0x2e8] sm:$0x80] }
 0x6b6   :  { %24221 = vst [vmem:[#allocation89_spill] sm:$0xff] %v21653_v45  ;;  %v7600_v14 = vrot.slane %v24225_v15, 7  ;;  %v7596_v18 = vsel %vm290_vm0, %v7588_v25, %v7595_v16  ;;  %v7628_v50 = vrot.slane %v7626_v0, 7  ;;  %v7622_v37 = vshrl.u32 %v7277_v1, 16  ;;  %v18145_v15 = vld [vmem:[#allocation2 + $0x2f0] sm:$0xff] }
 0x6b7   :  { %24223 = vst [vmem:[#allocation90_spill] sm:$0xff] %v21658_v59  ;;  %v21666_v28 = vor.u32 %v11939_v2, %v23846_v10  ;;  %v7617_v30 = vshll.u32 %v18143_v51, 16  ;;  %v7629_v55 = vshll.u32 %v18144_v53, 16  ;;  %v7638_v59 = vshrl.u32 %v18145_v15, 16 }
 0x6b8   :  { %16342 = vmatmul.mubr.bf16.gmra.mrb[48].mxu1 %v7596_v18  ;;  %v7608_v5 = vsel %vm290_vm0, %v7600_v14, %v7607_v54  ;;  %v7612_v45 = vrot.slane %v7610_v24, 7  ;;  %v7650_v2 = vshrl.u32 %v18146_v42, 16  ;;  %v7624_v10 = vrot.slane %v7622_v37, 7 }
 0x6b9   :  { %24226 = vst [vmem:[#allocation91_spill] sm:$0xff] %v21666_v28  ;;  %16345 = vmatprep.mubr.bf16.mxu1 %v7608_v5  ;;  %v7619_v20 = vor.u32 %v7617_v30, %v7616_v48  ;;  %v7631_v47 = vor.u32 %v7629_v55, %v7628_v50  ;;  %v7281_v28 = vld [vmem:[#allocation2 + $0x300] sm:$0x80]  ;;  %v7640_v25 = vrot.slane %v7638_v59, 7  ;;  %v7634_v22 = vshrl.u32 %v7279_v63, 16 }
 0x6ba   :  { %v7652_v16 = vrot.slane %v7650_v2, 7  ;;  %v7646_v51 = vshrl.u32 %v7281_v28, 16  ;;  %v7641_v53 = vshll.u32 %v18145_v15, 16  ;;  %v7653_v54 = vshll.u32 %v18146_v42, 16  ;;  %v18147_v48 = vld [vmem:[#allocation2 + $0x320] sm:$0xff] }
 0x6bb   :  { %v7620_v0 = vsel %vm290_vm0, %v7612_v45, %v7619_v20  ;;  %v7632_v1 = vsel %vm290_vm0, %v7624_v10, %v7631_v47  ;;  %v7662_v18 = vshrl.u32 %v18147_v48, 16  ;;  %v7636_v24 = vrot.slane %v7634_v22, 7  ;;  %v8409_v50 = vld [vmem:[#allocation2 + $0x10] sm:$0x1]  ;;  %v7283_v30 = vld [vmem:[#allocation2 + $0x318] sm:$0x80] }
 0x6bc   :  { %v7643_v14 = vor.u32 %v7641_v53, %v7640_v25  ;;  %v7655_v5 = vor.u32 %v7653_v54, %v7652_v16  ;;  %v7648_v37 = vrot.slane %v7646_v51, 7  ;;  %v24227_v59 = vshll.u32 %v20903_v33, 16  ;;  %v21674_v20 = vld [vmem:[#allocation2 + $0x188] sm:$0xff]  ;;  %v8413_v51 = vld [vmem:[#allocation2 + $0x40] sm:$0x1] }
 0x6bd   :  { %v8480_v55 = vshll.u32 %v8409_v50, 16  ;;  %v7664_v2 = vrot.slane %v7662_v18, 7  ;;  %v7658_v10 = vshrl.u32 %v7283_v30, 16  ;;  %v7665_v28 = vshll.u32 %v18147_v48, 16 }
 0x6be   :  { %v8477_v45 = vrot.slane %v24227_v59, 1  ;;  %v7644_v47 = vsel %vm290_vm0, %v7636_v24, %v7643_v14  ;;  %v7656_v42 = vsel %vm290_vm0, %v7648_v37, %v7655_v5  ;;  %v11760_v15 = vshll.u32 %v21674_v20, 16 }
 0x6bf   :  { %v24228_v63 = vshrl.u32 %v20903_v33, 16  ;;  %v7667_v22 = vor.u32 %v7665_v28, %v7664_v2  ;;  %v7660_v16 = vrot.slane %v7658_v10, 7  ;;  %v11757_v53 = vshrl.u32 %v21674_v20, 16  ;;  %v8417_v28 = vld [vmem:[#allocation2 + $0x70] sm:$0x1] }
 0x6c0   :  { %16346 = vmatmul.mubr.bf16.gmra.mrb[52].mxu1 %v7620_v0  ;;  %v8482_v0 = vrot.slane %v8480_v55, 1  ;;  %v13073_v54 = vrot.slane %v11760_v15, 1  ;;  %v24229_v18 = vshll.u32 %v20910_v56, 16  ;;  %v24230_v5 = vshll.u32 %v20912_v41, 16 }
 0x6c1   :  { %16349 = vmatprep.mubr.bf16.mxu1 %v7632_v1  ;;  %v8478_v25 = vor.u32 %v8477_v45, %v24228_v63  ;;  %v8411_v1 = vld [vmem:[#allocation2 + $0x28] sm:$0x1]  ;;  %v7668_v48 = vsel %vm290_vm0, %v7660_v16, %v7667_v22  ;;  %v8504_v30 = vshll.u32 %v8413_v51, 16  ;;  %v24231_v59 = vshrl.u32 %v20910_v56, 16 }
 0x6c2   :  { %v8489_v24 = vrot.slane %v24229_v18, 1  ;;  %v8492_v50 = vshll.u32 %v8411_v1, 16  ;;  %v21690_v33 = vor.u32 %v13073_v54, %v11757_v53  ;;  %v8501_v37 = vrot.slane %v24230_v5, 1  ;;  %v18042_v63 = vld [vmem:[%s23641_s2 + $0xc8] sm:$0xff]   ;;  %v18043_v54 = vld [vmem:[%s23641_s2 + $0xd0] sm:$0xff]  }
 0x6c3   :  { %v8483_v14 = vsel %vm1478_vm1, %v8478_v25, %v8482_v0  ;;  %v24232_v2 = vshrl.u32 %v20912_v41, 16  ;;  %v8506_v10 = vrot.slane %v8504_v30, 1  ;;  %v24233_v0 = vshll.u32 %v20916_v11, 16  ;;  %v8421_v30 = vld [vmem:[#allocation2 + $0xa0] sm:$0x1] }
 0x6c4   :  { %v8490_v45 = vor.u32 %v8489_v24, %v24231_v59  ;;  %v8494_v55 = vrot.slane %v8492_v50, 1  ;;  %v24234_v1 = vshll.u32 %v20920_v40, 16  ;;  %v8528_v51 = vshll.u32 %v8417_v28, 16  ;;  %v18045_v28 = vld [vmem:[%s23641_s2 + $0xe0] sm:$0xff]  }
 0x6c5   :  { %v8513_v22 = vrot.slane %v24233_v0, 1  ;;  %v24236_v24 = vshrl.u32 %v20920_v40, 16  ;;  %v24238_v40 = vshll.u32 %v20925_v4, 16 }
 0x6c6   :  { %v8495_v25 = vsel %vm1478_vm1, %v8490_v45, %v8494_v55  ;;  %v8525_v41 = vrot.slane %v24234_v1, 1  ;;  %v8530_v5 = vrot.slane %v8528_v51, 1  ;;  %v24237_v45 = vshll.u32 %v20923_v26, 16  ;;  %v8425_v51 = vld [vmem:[#allocation2 + $0xd0] sm:$0x1] }
 0x6c8   :  { %16350 = vmatmul.mubr.bf16.gmra.mrb[56].mxu1 %v7644_v47  ;;  %v8502_v47 = vor.u32 %v8501_v37, %v24232_v2  ;;  %v8526_v50 = vor.u32 %v8525_v41, %v24236_v24  ;;  %v8419_v37 = vld [vmem:[#allocation2 + $0x88] sm:$0x1]  ;;  %v8537_v55 = vrot.slane %v24237_v45, 1  ;;  %v24243_v45 = vshrl.u32 %v20929_v17, 16 }
 0x6c9   :  { %16353 = vmatprep.mubr.bf16.mxu1 %v7656_v42  ;;  %v8415_v42 = vld [vmem:[#allocation2 + $0x58] sm:$0x1] }
 0x6ca   :  { %v8516_v16 = vshll.u32 %v8415_v42, 16  ;;  %v8507_v56 = vsel %vm1478_vm1, %v8502_v47, %v8506_v10  ;;  %v8531_v2 = vsel %vm1478_vm1, %v8526_v50, %v8530_v5  ;;  %v8549_v47 = vrot.slane %v24238_v40, 1  ;;  %v21724_v42 = vld [vmem:[#allocation2 + $0x338] sm:$0xff] }
 0x6cb   :  { %v8552_v10 = vshll.u32 %v8421_v30, 16  ;;  %v11949_v24 = vshrl.u32 %v21724_v42, 16  ;;  %v24242_v5 = vshll.u32 %v20938_v52, 16  ;;  %v8576_v30 = vshll.u32 %v8425_v51, 16  ;;  %v21769_v51 = vld [vmem:[%s23641_s2 + $0x100] sm:$0xff]  }
 0x6cc   :  { %v8518_v18 = vrot.slane %v8516_v16, 1  ;;  %v11952_v16 = vshll.u32 %v21724_v42, 16  ;;  %v18082_v42 = vld [vmem:[%s23641_s2 + $0x208] sm:$0xff]  }
 0x6cd   :  { %v8554_v41 = vrot.slane %v8552_v10, 1  ;;  %v8427_v10 = vld [vmem:[#allocation2 + $0xe8] sm:$0x1] }
 0x6d0   :  { %16354 = vmatmul.mubr.bf16.gmra.mrb[60].mxu1 %v7668_v48 }
 0x6d1   :  { %16373 = vmatprep.mubr.bf16.mxu1 %v8483_v14  ;;  %v24235_v14 = vshrl.u32 %v20916_v11, 16  ;;  %v8540_v11 = vshll.u32 %v8419_v37, 16  ;;  %v8573_v37 = vrot.slane %v24242_v5, 1  ;;  %v8433_v5 = vld [vmem:[#allocation2 + $0x130] sm:$0x1] }
 0x6d3   :  { %v8514_v48 = vor.u32 %v8513_v22, %v24235_v14  ;;  %v8542_v0 = vrot.slane %v8540_v11, 1  ;;  %v8423_v22 = vld [vmem:[#allocation2 + $0xb8] sm:$0x1] }
 0x6d4   :  { %v8564_v14 = vshll.u32 %v8423_v22, 16 }
 0x6d5   :  { %v8519_v59 = vsel %vm1478_vm1, %v8514_v48, %v8518_v18 }
 0x6d6   :  { %v8566_v11 = vrot.slane %v8564_v14, 1  ;;  %v24247_v14 = vshrl.u32 %v20946_v62, 16 }
 0x6d8   :  { %16374 = vmatmul.mubr.bf16.vlgmr.msra.gmra.mrb[0].mxu1 %v8495_v25 }
 0x6d9   :  { %16377 = vmatprep.mubr.bf16.mxu1 %v8507_v56  ;;  %16438 = vmatpush3.bf16.msra.mxu1 %v21290_v13  ;;  %v18044_v13 = vld [vmem:[%s23641_s2 + $0xd8] sm:$0xff]   ;;  %v24240_v56 = vshrl.u32 %v20925_v4, 16  ;;  %v13265_v4 = vrot.slane %v11952_v16, 1 }
 0x6da   :  { %16439 = vmatprep.subr.bf16.mxu1 %v18042_v63 }
 0x6db   :  { %v8550_v1 = vor.u32 %v8549_v47, %v24240_v56  ;;  %v8578_v47 = vrot.slane %v8576_v30, 1  ;;  %v24249_v30 = vshll.u32 %v20969_v46, 16 }
 0x6dd   :  { %16440 = vmatpush3.bf16.msra.mxu1 %v18042_v63  ;;  %v24239_v63 = vshrl.u32 %v20923_v26, 16  ;;  %v24241_v26 = vshll.u32 %v20929_v17, 16  ;;  %v8555_v50 = vsel %vm1478_vm1, %v8550_v1, %v8554_v41  ;;  %v8588_v17 = vshll.u32 %v8427_v10, 16 }
 0x6de   :  { %16441 = vmatprep.subr.bf16.mxu1 %v18043_v54  ;;  %v24252_v10 = vshrl.u32 %v20980_v44, 16 }
 0x6df   :  { %v8538_v25 = vor.u32 %v8537_v55, %v24239_v63  ;;  %v8561_v18 = vrot.slane %v24241_v26, 1  ;;  %v8429_v63 = vld [vmem:[#allocation2 + $0x100] sm:$0x1]  ;;  %v24248_v26 = vshrl.u32 %v20962_v23, 16 }
 0x6e0   :  { %16378 = vmatmul.mubr.bf16.gmra.mrb[4].mxu1 %v8519_v59  ;;  %v18047_v59 = vld [vmem:[%s23641_s2 + $0xf0] sm:$0xff]   ;;  %v8600_v41 = vshll.u32 %v8429_v63, 16 }
 0x6e1   :  { %16381 = vmatprep.mubr.bf16.mxu1 %v8531_v2  ;;  %16442 = vmatpush3.bf16.msra.mxu1 %v18043_v54  ;;  %v18046_v54 = vld [vmem:[%s23641_s2 + $0xe8] sm:$0xff]   ;;  %v8543_v48 = vsel %vm1478_vm1, %v8538_v25, %v8542_v0  ;;  %v8562_v55 = vor.u32 %v8561_v18, %v24243_v45  ;;  %v24244_v2 = vshrl.u32 %v20938_v52, 16  ;;  %v24245_v0 = vshll.u32 %v20946_v62, 16 }
 0x6e2   :  { %16443 = vmatprep.subr.bf16.mxu1 %v18044_v13  ;;  %v24246_v52 = vshll.u32 %v20962_v23, 16  ;;  %v8624_v23 = vshll.u32 %v8433_v5, 16 }
 0x6e3   :  { %v8574_v40 = vor.u32 %v8573_v37, %v24244_v2  ;;  %v8567_v25 = vsel %vm1478_vm1, %v8562_v55, %v8566_v11  ;;  %v8585_v22 = vrot.slane %v24245_v0, 1  ;;  %v24250_v55 = vshll.u32 %v20980_v44, 16  ;;  %v8437_v0 = vld [vmem:[#allocation2 + $0x160] sm:$0x1] }
 0x6e4   :  { %v8597_v1 = vrot.slane %v24246_v52, 1  ;;  %v24251_v2 = vshrl.u32 %v20969_v46, 16 }
 0x6e5   :  { %16444 = vmatpush3.bf16.msra.mxu1 %v18044_v13  ;;  %v21748_v13 = vor.u32 %v13265_v4, %v11949_v24  ;;  %v8579_v56 = vsel %vm1478_vm1, %v8574_v40, %v8578_v47  ;;  %v8602_v4 = vrot.slane %v8600_v41, 1  ;;  %v8621_v11 = vrot.slane %v24250_v55, 1  ;;  %v24254_v41 = vld [vmem:[#allocation7_spill] sm:$0xff] }
 0x6e6   :  { %16445 = vmatprep.subr.bf16.mxu1 %v18045_v28  ;;  %v8598_v18 = vor.u32 %v8597_v1, %v24248_v26  ;;  %v24256_v26 = vshrl.u32 %v20985_v31, 16  ;;  %v24257_v5 = vshrl.u32 %v24254_v41, 16 }
 0x6e7   :  { %v8622_v63 = vor.u32 %v8621_v11, %v24252_v10 }
 0x6e8   :  { %16382 = vmatmul.mubr.bf16.gmra.mrb[8].mxu1 %v8543_v48  ;;  %v8590_v48 = vrot.slane %v8588_v17, 1  ;;  %v8603_v62 = vsel %vm1478_vm1, %v8598_v18, %v8602_v4  ;;  %v24253_v17 = vshll.u32 %v20985_v31, 16 }
 0x6e9   :  { %16385 = vmatprep.mubr.bf16.mxu1 %v8555_v50  ;;  %16446 = vmatpush3.bf16.msra.mxu1 %v18045_v28  ;;  %v18048_v28 = vld [vmem:[%s23641_s2 + $0xf8] sm:$0xff]  }
 0x6ea   :  { %16447 = vmatprep.subr.bf16.mxu1 %v18046_v54  ;;  %v8431_v50 = vld [vmem:[#allocation2 + $0x118] sm:$0x1] }
 0x6eb   :  { %v8612_v45 = vshll.u32 %v8431_v50, 16  ;;  %v8441_v50 = vld [vmem:[#allocation2 + $0x1c0] sm:$0x1] }
 0x6ec   :  { %v8672_v55 = vshll.u32 %v8441_v50, 16 }
 0x6ed   :  { %16448 = vmatpush3.bf16.msra.mxu1 %v18046_v54  ;;  %v8586_v54 = vor.u32 %v8585_v22, %v24247_v14  ;;  %v8614_v47 = vrot.slane %v8612_v45, 1  ;;  %v24255_v14 = vshll.u32 %v24254_v41, 16 }
 0x6ee   :  { %16449 = vmatprep.subr.bf16.mxu1 %v18047_v59 }
 0x6ef   :  { %v8591_v37 = vsel %vm1478_vm1, %v8586_v54, %v8590_v48  ;;  %v8645_v46 = vrot.slane %v24255_v14, 1  ;;  %v8648_v54 = vshll.u32 %v8437_v0, 16  ;;  %v18148_v48 = vld [vmem:[#allocation2 + $0x8] sm:$0xff] }
 0x6f0   :  { %16386 = vmatmul.mubr.bf16.gmra.mrb[12].mxu1 %v8567_v25  ;;  %v8435_v25 = vld [vmem:[#allocation2 + $0x148] sm:$0x1]  ;;  %v8667_v44 = vshll.u32 %v18148_v48, 16  ;;  %v8665_v45 = vshrl.u32 %v18148_v48, 16 }
 0x6f1   :  { %16389 = vmatprep.mubr.bf16.mxu1 %v8579_v56  ;;  %16450 = vmatpush3.bf16.msra.mxu1 %v18047_v59  ;;  %v8609_v59 = vrot.slane %v24249_v30, 1  ;;  %v8633_v56 = vrot.slane %v24253_v17, 1  ;;  %v8636_v52 = vshll.u32 %v8435_v25, 16  ;;  %v8650_v30 = vrot.slane %v8648_v54, 1  ;;  %v8445_v17 = vld [vmem:[#allocation2 + $0x1f0] sm:$0x1] }
 0x6f2   :  { %16451 = vmatprep.subr.bf16.mxu1 %v18048_v28  ;;  %v24263_v54 = vld [vmem:[#allocation13_spill] sm:$0xff] }
 0x6f3   :  { %v8610_v40 = vor.u32 %v8609_v59, %v24251_v2  ;;  %v8634_v18 = vor.u32 %v8633_v56, %v24256_v26  ;;  %v8638_v4 = vrot.slane %v8636_v52, 1  ;;  %v8439_v59 = vld [vmem:[#allocation2 + $0x178] sm:$0x1]  ;;  %v24264_v48 = vshll.u32 %v24263_v54, 16 }
 0x6f4   :  { %v8696_v26 = vshll.u32 %v8445_v17, 16 }
 0x6f5   :  { %16452 = vmatpush3.bf16.msra.mxu1 %v18048_v28  ;;  %v8626_v28 = vrot.slane %v8624_v23, 1  ;;  %v8615_v22 = vsel %vm1478_vm1, %v8610_v40, %v8614_v47  ;;  %v8639_v11 = vsel %vm1478_vm1, %v8634_v18, %v8638_v4  ;;  %v24258_v23 = vld [vmem:[#allocation12_spill] sm:$0xff]  ;;  %v8660_v47 = vshll.u32 %v8439_v59, 16  ;;  %v8447_v59 = vld [vmem:[#allocation2 + $0x208] sm:$0x1] }
 0x6f6   :  { %16517 = vmatprep.subr.bf16.mxu1 %v21769_v51  ;;  %v24259_v2 = vshll.u32 %v24258_v23, 16 }
 0x6f7   :  { %v8627_v1 = vsel %vm1478_vm1, %v8622_v63, %v8626_v28  ;;  %v8674_v63 = vrot.slane %v8672_v55, 1  ;;  %v24260_v28 = vshrl.u32 %v24258_v23, 16  ;;  %v8662_v0 = vrot.slane %v8660_v47, 1  ;;  %v24267_v55 = vld [vmem:[#allocation18_spill] sm:$0xff]  ;;  %v24269_v47 = vld [vmem:[#allocation17_spill] sm:$0xff] }
 0x6f8   :  { %16390 = vmatmul.mubr.bf16.gmra.mrb[16].mxu1 %v8591_v37  ;;  %v8646_v37 = vor.u32 %v8645_v46, %v24257_v5  ;;  %v8657_v40 = vrot.slane %v24259_v2, 1  ;;  %v24266_v5 = vshrl.u32 %v24263_v54, 16  ;;  %v8708_v2 = vshll.u32 %v8447_v59, 16 }
 0x6f9   :  { %16393 = vmatprep.mubr.bf16.mxu1 %v8603_v62  ;;  %v8669_v62 = vrot.slane %v8667_v44, 1  ;;  %v8693_v44 = vrot.slane %v24264_v48, 1 }
 0x6fa   :  { %v8651_v31 = vsel %vm1478_vm1, %v8646_v37, %v8650_v30  ;;  %v8658_v25 = vor.u32 %v8657_v40, %v24260_v28  ;;  %v8698_v30 = vrot.slane %v8696_v26, 1  ;;  %v24271_v28 = vshrl.u32 %v24267_v55, 16  ;;  %v24275_v26 = vld [vmem:[#allocation22_spill] sm:$0xff] }
 0x6fb   :  { %v8670_v10 = vor.u32 %v8669_v62, %v8665_v45  ;;  %v8694_v37 = vor.u32 %v8693_v44, %v24266_v5  ;;  %v8449_v45 = vld [vmem:[#allocation2 + $0x220] sm:$0x1]  ;;  %v24278_v59 = vshrl.u32 %v24275_v26, 16 }
 0x6fc   :  { %v8663_v52 = vsel %vm1478_vm1, %v8658_v25, %v8662_v0  ;;  %v8710_v0 = vrot.slane %v8708_v2, 1  ;;  %v24279_v2 = vld [vmem:[#allocation27_spill] sm:$0xff] }
 0x6fd   :  { %v8675_v56 = vsel %vm1478_vm1, %v8670_v10, %v8674_v63  ;;  %v8699_v40 = vsel %vm1478_vm1, %v8694_v37, %v8698_v30  ;;  %v8720_v63 = vshll.u32 %v8449_v45, 16 }
 0x700   :  { %16394 = vmatmul.mubr.bf16.gmra.mrb[20].mxu1 %v8615_v22  ;;  %v8443_v22 = vld [vmem:[#allocation2 + $0x1d8] sm:$0x1] }
 0x701   :  { %16397 = vmatprep.mubr.bf16.mxu1 %v8627_v1  ;;  %v24261_v1 = vld [vmem:[#allocation14_spill] sm:$0xff]  ;;  %v8684_v46 = vshll.u32 %v8443_v22, 16  ;;  %v24272_v22 = vshrl.u32 %v24269_v47, 16 }
 0x702   :  { %v24262_v41 = vshll.u32 %v24261_v1, 16  ;;  %v24265_v18 = vshrl.u32 %v24261_v1, 16  ;;  %v8453_v1 = vld [vmem:[#allocation2 + $0x250] sm:$0x1] }
 0x703   :  { %v8686_v50 = vrot.slane %v8684_v46, 1 }
 0x704   :  { %v8681_v14 = vrot.slane %v24262_v41, 1 }
 0x706   :  { %v8682_v4 = vor.u32 %v8681_v14, %v24265_v18  ;;  %v24273_v14 = vld [vmem:[#allocation25_spill] sm:$0xff]  ;;  %v24276_v18 = vshll.u32 %v24275_v26, 16 }
 0x707   :  { %v24274_v46 = vshll.u32 %v24273_v14, 16  ;;  %v24277_v5 = vshrl.u32 %v24273_v14, 16  ;;  %v8459_v14 = vld [vmem:[#allocation2 + $0x298] sm:$0x1] }
 0x708   :  { %16398 = vmatmul.mubr.bf16.gmra.mrb[24].mxu1 %v8639_v11  ;;  %v8687_v62 = vsel %vm1478_vm1, %v8682_v4, %v8686_v50  ;;  %v24268_v11 = vshll.u32 %v24267_v55, 16  ;;  %v8741_v4 = vrot.slane %v24276_v18, 1  ;;  %v8744_v50 = vshll.u32 %v8453_v1, 16  ;;  %v8455_v55 = vld [vmem:[#allocation2 + $0x268] sm:$0x1] }
 0x709   :  { %16401 = vmatprep.mubr.bf16.mxu1 %v8651_v31  ;;  %v24270_v31 = vshll.u32 %v24269_v47, 16  ;;  %v8729_v54 = vrot.slane %v24274_v46, 1  ;;  %v8461_v46 = vld [vmem:[#allocation2 + $0x2b0] sm:$0x1]  ;;  %v8780_v18 = vshll.u32 %v8459_v14, 16 }
 0x70a   :  { %v8705_v23 = vrot.slane %v24268_v11, 1  ;;  %v8742_v45 = vor.u32 %v8741_v4, %v24278_v59  ;;  %v8457_v11 = vld [vmem:[#allocation2 + $0x280] sm:$0x1]  ;;  %v8469_v14 = vld [vmem:[#allocation2 + $0x310] sm:$0x1] }
 0x70b   :  { %v8717_v10 = vrot.slane %v24270_v31, 1  ;;  %v8730_v37 = vor.u32 %v8729_v54, %v24277_v5  ;;  %v8756_v31 = vshll.u32 %v8455_v55, 16 }
 0x70c   :  { %v8706_v25 = vor.u32 %v8705_v23, %v24271_v28 }
 0x70d   :  { %v8718_v17 = vor.u32 %v8717_v10, %v24272_v22  ;;  %v24283_v22 = vshrl.u32 %v24279_v2, 16 }
 0x70e   :  { %v8711_v41 = vsel %vm1478_vm1, %v8706_v25, %v8710_v0  ;;  %v8768_v0 = vshll.u32 %v8457_v11, 16 }
 0x710   :  { %16402 = vmatmul.mubr.bf16.gmra.mrb[28].mxu1 %v8663_v52  ;;  %v8451_v52 = vld [vmem:[#allocation2 + $0x238] sm:$0x1] }
 0x711   :  { %16405 = vmatprep.mubr.bf16.mxu1 %v8675_v56  ;;  %v8722_v56 = vrot.slane %v8720_v63, 1  ;;  %v8732_v48 = vshll.u32 %v8451_v52, 16  ;;  %v24281_v63 = vld [vmem:[#allocation29_spill] sm:$0xff] }
 0x712   :  { %v24282_v28 = vshll.u32 %v24281_v63, 16  ;;  %v24284_v52 = vshrl.u32 %v24281_v63, 16 }
 0x713   :  { %v8723_v44 = vsel %vm1478_vm1, %v8718_v17, %v8722_v56  ;;  %v8734_v30 = vrot.slane %v8732_v48, 1  ;;  %v8758_v56 = vrot.slane %v8756_v31, 1  ;;  %v24285_v48 = vld [vmem:[#allocation21_spill] sm:$0xff] }
 0x714   :  { %v8765_v25 = vrot.slane %v24282_v28, 1  ;;  %v24291_v28 = vshll.u32 %v21139_v9, 16 }
 0x715   :  { %v8735_v23 = vsel %vm1478_vm1, %v8730_v37, %v8734_v30  ;;  %v8792_v37 = vshll.u32 %v8461_v46, 16  ;;  %v24288_v30 = vshrl.u32 %v24285_v48, 16 }
 0x716   :  { %v8766_v1 = vor.u32 %v8765_v25, %v24284_v52  ;;  %v8813_v25 = vrot.slane %v24291_v28, 1  ;;  %v9310_v28 = vld [vmem:[#allocation2 + $0x48] sm:$0x80] }
 0x717   :  { %v8794_v11 = vrot.slane %v8792_v37, 1  ;;  %v24297_v37 = vshrl.u32 %v21170_v3, 16 }
 0x718   :  { %16406 = vmatmul.mubr.bf16.gmra.mrb[32].mxu1 %v8687_v62  ;;  %v8746_v62 = vrot.slane %v8744_v50, 1  ;;  %v24287_v50 = vshll.u32 %v21118_v32, 16 }
 0x719   :  { %16409 = vmatprep.mubr.bf16.mxu1 %v8699_v40  ;;  %v24280_v40 = vshll.u32 %v24279_v2, 16  ;;  %v8465_v2 = vld [vmem:[#allocation2 + $0x2e0] sm:$0x1] }
 0x71a   :  { %v8747_v10 = vsel %vm1478_vm1, %v8742_v45, %v8746_v62  ;;  %v8789_v5 = vrot.slane %v24287_v50, 1  ;;  %v8782_v45 = vrot.slane %v8780_v18, 1  ;;  %v24289_v62 = vshrl.u32 %v21118_v32, 16 }
 0x71b   :  { %v8753_v47 = vrot.slane %v24280_v40, 1  ;;  %v24292_v32 = vshrl.u32 %v21129_v6, 16  ;;  %v24295_v18 = vshll.u32 %v21170_v3, 16 }
 0x71c   :  { %v8790_v55 = vor.u32 %v8789_v5, %v24289_v62  ;;  %v9306_v62 = vld [vmem:[#allocation2 + $0x18] sm:$0x80] }
 0x71d   :  { %v8754_v17 = vor.u32 %v8753_v47, %v24283_v22  ;;  %v24290_v47 = vshll.u32 %v21129_v6, 16  ;;  %v8837_v6 = vrot.slane %v24295_v18, 1  ;;  %v18051_v18 = vld [vmem:[%s23641_s2 + $0x110] sm:$0xff]  }
 0x71e   :  { %v8795_v63 = vsel %vm1478_vm1, %v8790_v55, %v8794_v11  ;;  %v24298_v11 = vshll.u32 %v21182_v12, 16 }
 0x71f   :  { %v8759_v54 = vsel %vm1478_vm1, %v8754_v17, %v8758_v56  ;;  %v8801_v31 = vrot.slane %v24290_v47, 1  ;;  %v24293_v56 = vshrl.u32 %v21139_v9, 16  ;;  %v24296_v9 = vshrl.u32 %v21162_v38, 16 }
 0x720   :  { %16410 = vmatmul.mubr.bf16.gmra.mrb[36].mxu1 %v8711_v41  ;;  %v8770_v41 = vrot.slane %v8768_v0, 1  ;;  %v8816_v0 = vshll.u32 %v8465_v2, 16  ;;  %v9371_v47 = vshrl.u32 %v9306_v62, 16 }
 0x721   :  { %16413 = vmatprep.mubr.bf16.mxu1 %v8723_v44  ;;  %v24286_v44 = vshll.u32 %v24285_v48, 16  ;;  %v8802_v22 = vor.u32 %v8801_v31, %v24292_v32  ;;  %v8814_v52 = vor.u32 %v8813_v25, %v24293_v56  ;;  %v24300_v32 = vld [vmem:[#allocation28_spill] sm:$0xff] }
 0x722   :  { %v8771_v4 = vsel %vm1478_vm1, %v8766_v1, %v8770_v41  ;;  %v8818_v1 = vrot.slane %v8816_v0, 1  ;;  %v8467_v41 = vld [vmem:[#allocation2 + $0x2f8] sm:$0x1]  ;;  %v9373_v3 = vrot.slane %v9371_v47, 7  ;;  %v18054_v47 = vld [vmem:[%s23641_s2 + $0x128] sm:$0xff]  }
 0x723   :  { %v8777_v26 = vrot.slane %v24286_v44, 1  ;;  %v8828_v44 = vshll.u32 %v8467_v41, 16  ;;  %v9314_v41 = vld [vmem:[#allocation2 + $0x78] sm:$0x80] }
 0x725   :  { %v8778_v59 = vor.u32 %v8777_v26, %v24288_v30  ;;  %v8819_v26 = vsel %vm1478_vm1, %v8814_v52, %v8818_v1  ;;  %v8830_v5 = vrot.slane %v8828_v44, 1  ;;  %v8838_v30 = vor.u32 %v8837_v6, %v24297_v37  ;;  %v9312_v1 = vld [vmem:[#allocation2 + $0x60] sm:$0x80] }
 0x726   :  { %v24303_v37 = vld [vmem:[#allocation34_spill] sm:$0xff] }
 0x727   :  { %v8783_v40 = vsel %vm1478_vm1, %v8778_v59, %v8782_v45  ;;  %v8471_v45 = vld [vmem:[#allocation2 + $0x328] sm:$0x1] }
 0x728   :  { %16414 = vmatmul.mubr.bf16.gmra.mrb[40].mxu1 %v8735_v23  ;;  %v8463_v23 = vld [vmem:[#allocation2 + $0x2c8] sm:$0x1]  ;;  %v8852_v2 = vshll.u32 %v8471_v45, 16 }
 0x729   :  { %16417 = vmatprep.mubr.bf16.mxu1 %v8747_v10  ;;  %v8804_v10 = vshll.u32 %v8463_v23, 16  ;;  %v8849_v23 = vrot.slane %v24298_v11, 1 }
 0x72b   :  { %v8806_v17 = vrot.slane %v8804_v10, 1  ;;  %v8854_v10 = vrot.slane %v8852_v2, 1  ;;  %v9320_v2 = vld [vmem:[#allocation2 + $0xc0] sm:$0x80] }
 0x72d   :  { %v8807_v46 = vsel %vm1478_vm1, %v8802_v22, %v8806_v17  ;;  %v9381_v22 = vsel %vm290_vm0, %v9373_v3, %v24300_v32  ;;  %v9395_v17 = vshrl.u32 %v9310_v28, 16  ;;  %v24306_v3 = vld [vmem:[#allocation10_spill] sm:$0xff] }
 0x72f   :  { %v9397_v52 = vrot.slane %v9395_v17, 7  ;;  %v9326_v17 = vld [vmem:[#allocation2 + $0x108] sm:$0x80] }
 0x730   :  { %16418 = vmatmul.mubr.bf16.gmra.mrb[44].mxu1 %v8759_v54  ;;  %v24294_v54 = vshll.u32 %v21162_v38, 16  ;;  %v24299_v38 = vshrl.u32 %v21182_v12, 16  ;;  %v18050_v12 = vld [vmem:[%s23641_s2 + $0x108] sm:$0xff]  }
 0x731   :  { %16421 = vmatprep.mubr.bf16.mxu1 %v8771_v4  ;;  %v8840_v4 = vshll.u32 %v8469_v14, 16  ;;  %v24301_v14 = vld [vmem:[#allocation30_spill] sm:$0xff] }
 0x732   :  { %v8825_v48 = vrot.slane %v24294_v54, 1  ;;  %v8850_v31 = vor.u32 %v8849_v23, %v24299_v38  ;;  %v9407_v54 = vshrl.u32 %v9312_v1, 16  ;;  %v24305_v38 = vld [vmem:[#allocation6_spill] sm:$0xff] }
 0x733   :  { %v8842_v59 = vrot.slane %v8840_v4, 1 }
 0x734   :  { %v8826_v50 = vor.u32 %v8825_v48, %v24296_v9  ;;  %v8855_v25 = vsel %vm1478_vm1, %v8850_v31, %v8854_v10  ;;  %v24302_v48 = vld [vmem:[#allocation33_spill] sm:$0xff]  ;;  %v9409_v6 = vrot.slane %v9407_v54, 7  ;;  %v9316_v9 = vld [vmem:[#allocation2 + $0x90] sm:$0x80]  ;;  %v9455_v10 = vshrl.u32 %v9320_v2, 16  ;;  %v21922_v54 = vld [vmem:[%s23641_s2 + $0x140] sm:$0xff]  }
 0x735   :  { %v9405_v44 = vsel %vm290_vm0, %v9397_v52, %v24302_v48  ;;  %v24307_v52 = vld [vmem:[#allocation9_spill] sm:$0xff] }
 0x736   :  { %v8831_v55 = vsel %vm1478_vm1, %v8826_v50, %v8830_v5  ;;  %v9318_v50 = vld [vmem:[#allocation2 + $0xa8] sm:$0x80]  ;;  %v18052_v5 = vld [vmem:[%s23641_s2 + $0x118] sm:$0xff]  }
 0x737   :  { %v9443_v62 = vshrl.u32 %v9318_v50, 16  ;;  %v24310_v50 = vld [vmem:[#allocation15_spill] sm:$0xff] }
 0x738   :  { %16422 = vmatmul.mubr.bf16.gmra.mrb[48].mxu1 %v8783_v40  ;;  %v8843_v40 = vsel %vm1478_vm1, %v8838_v30, %v8842_v59  ;;  %v9417_v30 = vsel %vm290_vm0, %v9409_v6, %v24303_v37  ;;  %v9431_v59 = vshrl.u32 %v9316_v9, 16  ;;  %v24309_v6 = vld [vmem:[#allocation16_spill] sm:$0xff] }
 0x739   :  { %16425 = vmatprep.mubr.bf16.mxu1 %v8795_v63  ;;  %v9308_v63 = vld [vmem:[#allocation2 + $0x30] sm:$0x80]  ;;  %v9445_v23 = vrot.slane %v9443_v62, 7 }
 0x73a   :  { %v9383_v0 = vshrl.u32 %v9308_v63, 16  ;;  %v9433_v11 = vrot.slane %v9431_v59, 7  ;;  %v24311_v62 = vld [vmem:[#allocation20_spill] sm:$0xff] }
 0x73b   :  { %v9453_v63 = vsel %vm290_vm0, %v9445_v23, %v24306_v3  ;;  %v24312_v23 = vld [vmem:[#allocation19_spill] sm:$0xff] }
 0x73c   :  { %v9385_v56 = vrot.slane %v9383_v0, 7  ;;  %v9441_v31 = vsel %vm290_vm0, %v9433_v11, %v24305_v38  ;;  %v9457_v0 = vrot.slane %v9455_v10, 7  ;;  %v9338_v10 = vld [vmem:[#allocation2 + $0x1c8] sm:$0x80] }
 0x73d   :  { %v24313_v3 = vld [vmem:[#allocation23_spill] sm:$0xff] }
 0x73e   :  { %v9465_v1 = vsel %vm290_vm0, %v9457_v0, %v24307_v52  ;;  %v24316_v52 = vshll.u32 %v21268_v58, 16 }
 0x740   :  { %16426 = vmatmul.mubr.bf16.gmra.mrb[52].mxu1 %v8807_v46  ;;  %v9393_v46 = vsel %vm290_vm0, %v9385_v56, %v24301_v14  ;;  %v18056_v56 = vld [vmem:[%s23641_s2 + $0x138] sm:$0xff]  }
 0x741   :  { %16429 = vmatprep.mubr.bf16.mxu1 %v8819_v26  ;;  %v9419_v26 = vshrl.u32 %v9314_v41, 16 }
 0x743   :  { %v9421_v4 = vrot.slane %v9419_v26, 7  ;;  %v9328_v26 = vld [vmem:[#allocation2 + $0x120] sm:$0x80] }
 0x744   :  { %v9503_v9 = vshrl.u32 %v9328_v26, 16 }
 0x748   :  { %16430 = vmatmul.mubr.bf16.gmra.mrb[56].mxu1 %v8831_v55  ;;  %v18053_v55 = vld [vmem:[%s23641_s2 + $0x120] sm:$0xff]  }
 0x749   :  { %16433 = vmatprep.mubr.bf16.mxu1 %v8843_v40  ;;  %v9322_v40 = vld [vmem:[#allocation2 + $0xd8] sm:$0x80] }
 0x74a   :  { %v9467_v28 = vshrl.u32 %v9322_v40, 16 }
 0x74c   :  { %v9469_v32 = vrot.slane %v9467_v28, 7 }
 0x750   :  { %16434 = vmatmul.mubr.bf16.gmra.mrb[60].mxu1 %v8855_v25  ;;  %v18055_v25 = vld [vmem:[%s23641_s2 + $0x130] sm:$0xff]  }
 0x751   :  { %16453 = vmatprep.mubr.bf16.mxu1 %v9381_v22  ;;  %v9324_v22 = vld [vmem:[#allocation2 + $0xf0] sm:$0x80] }
 0x752   :  { %v9479_v41 = vshrl.u32 %v9324_v22, 16 }
 0x754   :  { %v9481_v48 = vrot.slane %v9479_v41, 7 }
 0x758   :  { %16454 = vmatmul.mubr.bf16.vlgmr.msra.gmra.mrb[0].mxu1 %v9393_v46  ;;  %v9491_v46 = vshrl.u32 %v9326_v17, 16  ;;  %v9563_v17 = vshrl.u32 %v9338_v10, 16 }
 0x759   :  { %16457 = vmatprep.mubr.bf16.mxu1 %v9405_v44  ;;  %16518 = vmatpush3.bf16.msra.mxu1 %v21769_v51  ;;  %v24304_v51 = vld [vmem:[#allocation8_spill] sm:$0xff] }
 0x75a   :  { %16519 = vmatprep.subr.bf16.mxu1 %v18050_v12  ;;  %v9429_v45 = vsel %vm290_vm0, %v9421_v4, %v24304_v51  ;;  %v9493_v44 = vrot.slane %v9491_v46, 7  ;;  %v9489_v4 = vsel %vm290_vm0, %v9481_v48, %v24309_v6  ;;  %v9332_v51 = vld [vmem:[#allocation2 + $0x150] sm:$0x80]  ;;  %v9565_v41 = vrot.slane %v9563_v17, 7 }
 0x75b   :  { %v9527_v11 = vshrl.u32 %v9332_v51, 16 }
 0x75d   :  { %16520 = vmatpush3.bf16.msra.mxu1 %v18050_v12  ;;  %v24308_v12 = vld [vmem:[#allocation11_spill] sm:$0xff] }
 0x75e   :  { %16521 = vmatprep.subr.bf16.mxu1 %v18051_v18  ;;  %v9477_v14 = vsel %vm290_vm0, %v9469_v32, %v24308_v12  ;;  %v24315_v32 = vld [vmem:[#allocation24_spill] sm:$0xff]  ;;  %v9340_v12 = vld [vmem:[#allocation2 + $0x1e0] sm:$0x80] }
 0x75f   :  { %v9575_v48 = vshrl.u32 %v9340_v12, 16  ;;  %v9358_v12 = vld [vmem:[#allocation2 + $0x2b8] sm:$0x80] }
 0x760   :  { %16458 = vmatmul.mubr.bf16.gmra.mrb[4].mxu1 %v9417_v30  ;;  %v9505_v30 = vrot.slane %v9503_v9, 7  ;;  %v9344_v9 = vld [vmem:[#allocation2 + $0x210] sm:$0x80] }
 0x761   :  { %16461 = vmatprep.mubr.bf16.mxu1 %v9429_v45  ;;  %16522 = vmatpush3.bf16.msra.mxu1 %v18051_v18  ;;  %v9330_v18 = vld [vmem:[#allocation2 + $0x138] sm:$0x80]  ;;  %v9334_v45 = vld [vmem:[#allocation2 + $0x168] sm:$0x80]  ;;  %v9577_v6 = vrot.slane %v9575_v48, 7 }
 0x762   :  { %16523 = vmatprep.subr.bf16.mxu1 %v18052_v5  ;;  %v9515_v37 = vshrl.u32 %v9330_v18, 16  ;;  %v9539_v40 = vshrl.u32 %v9334_v45, 16 }
 0x764   :  { %v9517_v59 = vrot.slane %v9515_v37, 7  ;;  %v9541_v38 = vrot.slane %v9539_v40, 7  ;;  %v9599_v37 = vshrl.u32 %v9344_v9, 16  ;;  %v9360_v9 = vld [vmem:[#allocation2 + $0x2d0] sm:$0x80] }
 0x765   :  { %16524 = vmatpush3.bf16.msra.mxu1 %v18052_v5  ;;  %v9501_v5 = vsel %vm290_vm0, %v9493_v44, %v24310_v50  ;;  %v24317_v44 = vld [vmem:[#allocation26_spill] sm:$0xff]  ;;  %v9346_v50 = vld [vmem:[#allocation2 + $0x228] sm:$0x80] }
 0x766   :  { %16525 = vmatprep.subr.bf16.mxu1 %v18053_v55  ;;  %v9525_v2 = vsel %vm290_vm0, %v9517_v59, %v24312_v23  ;;  %v9549_v22 = vsel %vm290_vm0, %v9541_v38, %v24315_v32  ;;  %v9573_v26 = vsel %vm290_vm0, %v9565_v41, %v24317_v44  ;;  %v9611_v51 = vshrl.u32 %v9346_v50, 16  ;;  %v24320_v23 = vld [vmem:[#allocation37_spill] sm:$0xff]  ;;  %v9356_v41 = vld [vmem:[#allocation2 + $0x2a0] sm:$0x80]  ;;  %v9362_v50 = vld [vmem:[#allocation2 + $0x2e8] sm:$0x80] }
 0x767   :  { %v9601_v45 = vrot.slane %v9599_v37, 7  ;;  %v9671_v48 = vshrl.u32 %v9356_v41, 16  ;;  %v24325_v44 = vld [vmem:[#allocation42_spill] sm:$0xff]  ;;  %v9695_v37 = vshrl.u32 %v9360_v9, 16 }
 0x768   :  { %16462 = vmatmul.mubr.bf16.gmra.mrb[8].mxu1 %v9441_v31  ;;  %v9336_v31 = vld [vmem:[#allocation2 + $0x180] sm:$0x80] }
 0x769   :  { %16465 = vmatprep.mubr.bf16.mxu1 %v9453_v63  ;;  %16526 = vmatpush3.bf16.msra.mxu1 %v18053_v55  ;;  %v9513_v55 = vsel %vm290_vm0, %v9505_v30, %v24311_v62  ;;  %v9551_v28 = vshrl.u32 %v9336_v31, 16  ;;  %v24319_v30 = vld [vmem:[#allocation36_spill] sm:$0xff]  ;;  %v9613_v62 = vrot.slane %v9611_v51, 7  ;;  %v9707_v51 = vshrl.u32 %v9362_v50, 16  ;;  %v18153_v9 = vld [vmem:[#allocation2 + $0x80] sm:$0xff]  ;;  %v18062_v50 = vld [vmem:[%s23641_s2 + $0x168] sm:$0xff]  }
 0x76a   :  { %16527 = vmatprep.subr.bf16.mxu1 %v18054_v47 }
 0x76d   :  { %16528 = vmatpush3.bf16.msra.mxu1 %v18054_v47  ;;  %v9529_v47 = vrot.slane %v9527_v11, 7  ;;  %v9350_v11 = vld [vmem:[#allocation2 + $0x258] sm:$0x80] }
 0x76e   :  { %16529 = vmatprep.subr.bf16.mxu1 %v18055_v25  ;;  %v9635_v31 = vshrl.u32 %v9350_v11, 16  ;;  %v9366_v11 = vld [vmem:[#allocation2 + $0x318] sm:$0x80] }
 0x76f   :  { %v9537_v63 = vsel %vm290_vm0, %v9529_v47, %v24313_v3  ;;  %v24321_v47 = vld [vmem:[#allocation38_spill] sm:$0xff] }
 0x770   :  { %16466 = vmatmul.mubr.bf16.gmra.mrb[12].mxu1 %v9465_v1  ;;  %v9621_v38 = vsel %vm290_vm0, %v9613_v62, %v24321_v47  ;;  %v9637_v3 = vrot.slane %v9635_v31, 7  ;;  %v9709_v62 = vrot.slane %v9707_v51, 7  ;;  %v24329_v47 = vld [vmem:[#allocation45_spill] sm:$0xff]  ;;  %v9731_v31 = vshrl.u32 %v9366_v11, 16  ;;  %v18157_v51 = vld [vmem:[#allocation2 + $0xe0] sm:$0xff]  ;;  %v18160_v11 = vld [vmem:[#allocation2 + $0x128] sm:$0xff] }
 0x771   :  { %16469 = vmatprep.mubr.bf16.mxu1 %v9477_v14  ;;  %16530 = vmatpush3.bf16.msra.mxu1 %v18055_v25  ;;  %v24314_v25 = vshrl.u32 %v21268_v58, 16  ;;  %v9342_v14 = vld [vmem:[#allocation2 + $0x1f8] sm:$0x80] }
 0x772   :  { %16531 = vmatprep.subr.bf16.mxu1 %v18056_v56  ;;  %v9587_v18 = vshrl.u32 %v9342_v14, 16  ;;  %v24324_v14 = vld [vmem:[#allocation41_spill] sm:$0xff] }
 0x773   :  { %v9557_v0 = vrot.slane %v24314_v25, 7  ;;  %v24322_v25 = vld [vmem:[#allocation39_spill] sm:$0xff] }
 0x775   :  { %16532 = vmatpush3.bf16.msra.mxu1 %v18056_v56  ;;  %v9553_v56 = vrot.slane %v9551_v28, 7  ;;  %v9560_v1 = vor.u32 %v24316_v52, %v9557_v0  ;;  %v9354_v28 = vld [vmem:[#allocation2 + $0x288] sm:$0x80] }
 0x776   :  { %16597 = vmatprep.subr.bf16.mxu1 %v21922_v54 }
 0x777   :  { %v9561_v46 = vsel %vm290_vm0, %v9553_v56, %v9560_v1  ;;  %v9659_v56 = vshrl.u32 %v9354_v28, 16  ;;  %v24330_v28 = vld [vmem:[#allocation46_spill] sm:$0xff] }
 0x778   :  { %16470 = vmatmul.mubr.bf16.gmra.mrb[16].mxu1 %v9489_v4  ;;  %v9589_v4 = vrot.slane %v9587_v18, 7  ;;  %v9683_v18 = vshrl.u32 %v9358_v12, 16 }
 0x779   :  { %16473 = vmatprep.mubr.bf16.mxu1 %v9501_v5  ;;  %v24318_v5 = vld [vmem:[#allocation35_spill] sm:$0xff]  ;;  %v9661_v1 = vrot.slane %v9659_v56, 7 }
 0x77a   :  { %v9585_v58 = vsel %vm290_vm0, %v9577_v6, %v24318_v5  ;;  %v9597_v59 = vsel %vm290_vm0, %v9589_v4, %v24319_v30  ;;  %v9673_v6 = vrot.slane %v9671_v48, 7  ;;  %v9685_v4 = vrot.slane %v9683_v18, 7  ;;  %v24326_v5 = vld [vmem:[#allocation43_spill] sm:$0xff]  ;;  %v24327_v30 = vld [vmem:[#allocation44_spill] sm:$0xff] }
 0x77b   :  { %v24333_v56 = vld [vmem:[#allocation47_spill] sm:$0xff]  ;;  %v18059_v18 = vld [vmem:[%s23641_s2 + $0x150] sm:$0xff]  }
 0x77c   :  { %v18058_v48 = vld [vmem:[%s23641_s2 + $0x148] sm:$0xff]  }
 0x780   :  { %16474 = vmatmul.mubr.bf16.gmra.mrb[20].mxu1 %v9513_v55  ;;  %v9348_v55 = vld [vmem:[#allocation2 + $0x240] sm:$0x80] }
 0x781   :  { %16477 = vmatprep.mubr.bf16.mxu1 %v9525_v2  ;;  %v9609_v2 = vsel %vm290_vm0, %v9601_v45, %v24320_v23  ;;  %v9623_v40 = vshrl.u32 %v9348_v55, 16  ;;  %v9697_v45 = vrot.slane %v9695_v37, 7  ;;  %v9364_v55 = vld [vmem:[#allocation2 + $0x300] sm:$0x80]  ;;  %v24328_v23 = vld [vmem:[#allocation32_spill] sm:$0xff] }
 0x782   :  { %v18063_v37 = vld [vmem:[%s23641_s2 + $0x170] sm:$0xff]  }
 0x783   :  { %v9625_v10 = vrot.slane %v9623_v40, 7  ;;  %v9719_v40 = vshrl.u32 %v9364_v55, 16  ;;  %v18159_v55 = vld [vmem:[#allocation2 + $0x110] sm:$0xff] }
 0x785   :  { %v9633_v0 = vsel %vm290_vm0, %v9625_v10, %v24322_v25  ;;  %v9721_v10 = vrot.slane %v9719_v40, 7  ;;  %v18163_v40 = vld [vmem:[#allocation2 + $0x170] sm:$0xff] }
 0x787   :  { %v9729_v25 = vsel %vm290_vm0, %v9721_v10, %v24330_v28  ;;  %v18167_v10 = vld [vmem:[#allocation2 + $0x200] sm:$0xff]  ;;  %v18170_v28 = vld [vmem:[#allocation2 + $0x248] sm:$0xff] }
 0x788   :  { %16478 = vmatmul.mubr.bf16.gmra.mrb[24].mxu1 %v9537_v63  ;;  %v9352_v63 = vld [vmem:[#allocation2 + $0x270] sm:$0x80] }
 0x789   :  { %16481 = vmatprep.mubr.bf16.mxu1 %v9549_v22  ;;  %v9647_v32 = vshrl.u32 %v9352_v63, 16  ;;  %v24323_v22 = vld [vmem:[#allocation40_spill] sm:$0xff] }
 0x78a   :  { %v9645_v17 = vsel %vm290_vm0, %v9637_v3, %v24323_v22  ;;  %v9733_v3 = vrot.slane %v9731_v31, 7  ;;  %v9368_v63 = vld [vmem:[#allocation2 + $0x330] sm:$0x80]  ;;  %v18166_v31 = vld [vmem:[#allocation2 + $0x1e8] sm:$0xff] }
 0x78b   :  { %v9649_v52 = vrot.slane %v9647_v32, 7  ;;  %v24331_v32 = vld [vmem:[#allocation49_spill] sm:$0xff] }
 0x78c   :  { %v24332_v22 = vshrl.u32 %v24331_v32, 16  ;;  %v24334_v41 = vshll.u32 %v24331_v32, 16  ;;  %v18173_v32 = vld [vmem:[#allocation2 + $0x290] sm:$0xff] }
 0x790   :  { %16482 = vmatmul.mubr.bf16.gmra.mrb[28].mxu1 %v9561_v46  ;;  %v9657_v46 = vsel %vm290_vm0, %v9649_v52, %v24324_v14  ;;  %v9741_v52 = vsel %vm290_vm0, %v9733_v3, %v24333_v56  ;;  %v18168_v3 = vld [vmem:[#allocation2 + $0x218] sm:$0xff] }
 0x791   :  { %16485 = vmatprep.mubr.bf16.mxu1 %v9573_v26  ;;  %v9669_v26 = vsel %vm290_vm0, %v9661_v1, %v24325_v44  ;;  %v18150_v44 = vld [vmem:[#allocation2 + $0x38] sm:$0xff] }
 0x792   :  { %v18176_v56 = vld [vmem:[#allocation2 + $0x2d8] sm:$0xff] }
 0x798   :  { %16486 = vmatmul.mubr.bf16.gmra.mrb[32].mxu1 %v9585_v58  ;;  %v9681_v58 = vsel %vm290_vm0, %v9673_v6, %v24326_v5  ;;  %v18060_v6 = vld [vmem:[%s23641_s2 + $0x158] sm:$0xff]  }
 0x799   :  { %16489 = vmatprep.mubr.bf16.mxu1 %v9597_v59  ;;  %v9693_v59 = vsel %vm290_vm0, %v9685_v4, %v24327_v30  ;;  %v18152_v4 = vld [vmem:[#allocation2 + $0x68] sm:$0xff]  ;;  %v18154_v5 = vld [vmem:[#allocation2 + $0x98] sm:$0xff] }
 0x79a   :  { %v18064_v30 = vld [vmem:[%s23641_s2 + $0x178] sm:$0xff]  }
 0x7a0   :  { %16490 = vmatmul.mubr.bf16.gmra.mrb[36].mxu1 %v9609_v2  ;;  %v9705_v2 = vsel %vm290_vm0, %v9697_v45, %v24328_v23  ;;  %v22002_v45 = vld [vmem:[%s23641_s2 + $0x180] sm:$0xff]  }
 0x7a1   :  { %16493 = vmatprep.mubr.bf16.mxu1 %v9621_v38  ;;  %v9717_v38 = vsel %vm290_vm0, %v9709_v62, %v24329_v47  ;;  %v18158_v62 = vld [vmem:[#allocation2 + $0xf8] sm:$0xff]  ;;  %v18161_v23 = vld [vmem:[#allocation2 + $0x140] sm:$0xff]  ;;  %v18164_v47 = vld [vmem:[#allocation2 + $0x188] sm:$0xff] }
 0x7a8   :  { %16494 = vmatmul.mubr.bf16.gmra.mrb[40].mxu1 %v9633_v0  ;;  %v9743_v0 = vshrl.u32 %v9368_v63, 16  ;;  %v18169_v63 = vld [vmem:[#allocation2 + $0x230] sm:$0xff] }
 0x7a9   :  { %16497 = vmatprep.mubr.bf16.mxu1 %v9645_v17  ;;  %v9749_v17 = vrot.slane %v24332_v22, 7  ;;  %v18174_v22 = vld [vmem:[#allocation2 + $0x2a8] sm:$0xff] }
 0x7aa   :  { %v9745_v1 = vrot.slane %v9743_v0, 7  ;;  %v18172_v0 = vld [vmem:[#allocation2 + $0x278] sm:$0xff] }
 0x7ab   :  { %v9752_v12 = vor.u32 %v24334_v41, %v9749_v17  ;;  %v18175_v17 = vld [vmem:[#allocation2 + $0x2c0] sm:$0xff] }
 0x7ad   :  { %v9753_v14 = vsel %vm290_vm0, %v9745_v1, %v9752_v12  ;;  %v10622_v1 = vld [vmem:[#allocation2 + $0x20] sm:$0xff]  ;;  %v10623_v12 = vld [vmem:[#allocation2 + $0x28] sm:$0x1] }
 0x7ae   :  { %v10689_v41 = vshll.u32 %v10622_v1, 16 }
 0x7b0   :  { %16498 = vmatmul.mubr.bf16.gmra.mrb[44].mxu1 %v9657_v46  ;;  %v18149_v46 = vld [vmem:[#allocation2 + $0x20] sm:$0xff] }
 0x7b1   :  { %16501 = vmatprep.mubr.bf16.mxu1 %v9669_v26  ;;  %v18151_v26 = vld [vmem:[#allocation2 + $0x50] sm:$0xff] }
 0x7b8   :  { %16502 = vmatmul.mubr.bf16.gmra.mrb[48].mxu1 %v9681_v58  ;;  %v18155_v58 = vld [vmem:[#allocation2 + $0xb0] sm:$0xff] }
 0x7b9   :  { %16505 = vmatprep.mubr.bf16.mxu1 %v9693_v59  ;;  %v18156_v59 = vld [vmem:[#allocation2 + $0xc8] sm:$0xff] }
 0x7c0   :  { %16506 = vmatmul.mubr.bf16.gmra.mrb[52].mxu1 %v9705_v2  ;;  %v18162_v2 = vld [vmem:[#allocation2 + $0x158] sm:$0xff] }
 0x7c1   :  { %16509 = vmatprep.mubr.bf16.mxu1 %v9717_v38  ;;  %v18165_v38 = vld [vmem:[#allocation2 + $0x1d0] sm:$0xff] }
 0x7c8   :  { %16510 = vmatmul.mubr.bf16.gmra.mrb[56].mxu1 %v9729_v25  ;;  %v18171_v25 = vld [vmem:[#allocation2 + $0x260] sm:$0xff] }
 0x7c9   :  { %16513 = vmatprep.mubr.bf16.mxu1 %v9741_v52  ;;  %v18177_v52 = vld [vmem:[#allocation2 + $0x2f0] sm:$0xff] }
 0x7d0   :  { %16514 = vmatmul.mubr.bf16.gmra.mrb[60].mxu1 %v9753_v14  ;;  %v18178_v14 = vld [vmem:[#allocation2 + $0x308] sm:$0xff] }
 0x7d1   :  { %16533 = vmatprep.mubr.bf16.mxu1 %v18149_v46  ;;  %v10691_v46 = vrot.slane %v10689_v41, 1 }
 0x7d8   :  { %16534 = vmatmul.mubr.bf16.vlgmr.msra.gmra.mrb[0].mxu1 %v18150_v44  ;;  %v18179_v44 = vld [vmem:[#allocation2 + $0x320] sm:$0xff] }
 0x7d9   :  { %16537 = vmatprep.mubr.bf16.mxu1 %v18151_v26  ;;  %16598 = vmatpush3.bf16.msra.mxu1 %v21922_v54  ;;  %v18061_v54 = vld [vmem:[%s23641_s2 + $0x160] sm:$0xff]   ;;  %v10687_v26 = vshrl.u32 %v10622_v1, 16  ;;  %v24343_v1 = vshrl.u32 %v21346_v39, 16 }
 0x7da   :  { %16599 = vmatprep.subr.bf16.mxu1 %v18058_v48 }
 0x7dd   :  { %16600 = vmatpush3.bf16.msra.mxu1 %v18058_v48  ;;  %v10694_v48 = vshll.u32 %v10623_v12, 16 }
 0x7de   :  { %16601 = vmatprep.subr.bf16.mxu1 %v18059_v18 }
 0x7e0   :  { %16538 = vmatmul.mubr.bf16.gmra.mrb[4].mxu1 %v18152_v4  ;;  %v10625_v4 = vld [vmem:[#allocation2 + $0x40] sm:$0x1] }
 0x7e1   :  { %16541 = vmatprep.mubr.bf16.mxu1 %v18153_v9  ;;  %16602 = vmatpush3.bf16.msra.mxu1 %v18059_v18  ;;  %v10692_v18 = vor.u32 %v10691_v46, %v10687_v26  ;;  %v10627_v9 = vld [vmem:[#allocation2 + $0x58] sm:$0x1] }
 0x7e2   :  { %16603 = vmatprep.subr.bf16.mxu1 %v18060_v6  ;;  %v10635_v26 = vld [vmem:[#allocation2 + $0xb8] sm:$0x1] }
 0x7e5   :  { %16604 = vmatpush3.bf16.msra.mxu1 %v18060_v6  ;;  %v10696_v6 = vrot.slane %v10694_v48, 1 }
 0x7e6   :  { %16605 = vmatprep.subr.bf16.mxu1 %v18061_v54 }
 0x7e8   :  { %16542 = vmatmul.mubr.bf16.gmra.mrb[8].mxu1 %v18154_v5 }
 0x7e9   :  { %16545 = vmatprep.mubr.bf16.mxu1 %v18155_v58  ;;  %16606 = vmatpush3.bf16.msra.mxu1 %v18061_v54  ;;  %v24335_v54 = vld [vmem:[#allocation50_spill] sm:$0xff]  ;;  %v10706_v58 = vshll.u32 %v10625_v4, 16 }
 0x7ea   :  { %16607 = vmatprep.subr.bf16.mxu1 %v18062_v50 }
 0x7ed   :  { %16608 = vmatpush3.bf16.msra.mxu1 %v18062_v50  ;;  %v24336_v50 = vshll.u32 %v24335_v54, 16 }
 0x7ee   :  { %16609 = vmatprep.subr.bf16.mxu1 %v18063_v37 }
 0x7ef   :  { %v10703_v5 = vrot.slane %v24336_v50, 1  ;;  %v10766_v50 = vshll.u32 %v10635_v26, 16 }
 0x7f0   :  { %16546 = vmatmul.mubr.bf16.gmra.mrb[12].mxu1 %v18156_v59  ;;  %v24337_v59 = vld [vmem:[#allocation51_spill] sm:$0xff] }
 0x7f1   :  { %16549 = vmatprep.mubr.bf16.mxu1 %v18157_v51  ;;  %16610 = vmatpush3.bf16.msra.mxu1 %v18063_v37  ;;  %v18180_v37 = vld [vmem:[#allocation2 + $0x338] sm:$0xff]  ;;  %v24338_v51 = vshll.u32 %v24337_v59, 16 }
 0x7f2   :  { %16611 = vmatprep.subr.bf16.mxu1 %v18064_v30 }
 0x7f5   :  { %16612 = vmatpush3.bf16.msra.mxu1 %v18064_v30  ;;  %v10697_v30 = vsel %vm1478_vm1, %v10692_v18, %v10696_v6  ;;  %v24345_v6 = vshll.u32 %v21356_v7, 16 }
 0x7f6   :  { %16677 = vmatprep.subr.bf16.mxu1 %v22002_v45 }
 0x7f7   :  { %v10751_v4 = vrot.slane %v24345_v6, 1  ;;  %v22075_v6 = vld [vmem:[%s23641_s2 + $0x1c0] sm:$0xff]  }
 0x7f8   :  { %16550 = vmatmul.mubr.bf16.gmra.mrb[16].mxu1 %v18158_v62  ;;  %v10715_v62 = vrot.slane %v24338_v51, 1 }
 0x7f9   :  { %16553 = vmatprep.mubr.bf16.mxu1 %v18159_v55  ;;  %v10718_v55 = vshll.u32 %v10627_v9, 16 }
 0x800   :  { %16554 = vmatmul.mubr.bf16.gmra.mrb[20].mxu1 %v18160_v11  ;;  %v24339_v11 = vshrl.u32 %v24335_v54, 16 }
 0x801   :  { %16557 = vmatprep.mubr.bf16.mxu1 %v18161_v23 }
 0x802   :  { %v10704_v23 = vor.u32 %v10703_v5, %v24339_v11  ;;  %v18069_v5 = vld [vmem:[%s23641_s2 + $0x1a0] sm:$0xff]   ;;  %v10639_v11 = vld [vmem:[#allocation2 + $0xe8] sm:$0x1] }
 0x808   :  { %16558 = vmatmul.mubr.bf16.gmra.mrb[24].mxu1 %v18162_v2  ;;  %v10708_v2 = vrot.slane %v10706_v58, 1  ;;  %v24347_v58 = vshrl.u32 %v21356_v7, 16 }
 0x809   :  { %16561 = vmatprep.mubr.bf16.mxu1 %v18163_v40  ;;  %v24340_v40 = vshrl.u32 %v24337_v59, 16  ;;  %v24348_v59 = vshrl.u32 %v21369_v60, 16 }
 0x810   :  { %16562 = vmatmul.mubr.bf16.gmra.mrb[28].mxu1 %v18164_v47  ;;  %v10716_v47 = vor.u32 %v10715_v62, %v24340_v40  ;;  %v10768_v62 = vrot.slane %v10766_v50, 1  ;;  %v24349_v40 = vshll.u32 %v21382_v61, 16 }
 0x811   :  { %16565 = vmatprep.mubr.bf16.mxu1 %v18165_v38  ;;  %v10720_v38 = vrot.slane %v10718_v55, 1  ;;  %v10637_v55 = vld [vmem:[#allocation2 + $0xd0] sm:$0x1] }
 0x812   :  { %v10778_v7 = vshll.u32 %v10637_v55, 16 }
 0x818   :  { %16566 = vmatmul.mubr.bf16.gmra.mrb[32].mxu1 %v18166_v31  ;;  %v10629_v31 = vld [vmem:[#allocation2 + $0x70] sm:$0x1] }
 0x819   :  { %16569 = vmatprep.mubr.bf16.mxu1 %v18167_v10  ;;  %v10631_v10 = vld [vmem:[#allocation2 + $0x88] sm:$0x1] }
 0x820   :  { %16570 = vmatmul.mubr.bf16.gmra.mrb[36].mxu1 %v18168_v3  ;;  %v18066_v3 = vld [vmem:[%s23641_s2 + $0x188] sm:$0xff]  }
 0x821   :  { %16573 = vmatprep.mubr.bf16.mxu1 %v18169_v63  ;;  %v10709_v63 = vsel %vm1478_vm1, %v10704_v23, %v10708_v2  ;;  %v18070_v23 = vld [vmem:[%s23641_s2 + $0x1a8] sm:$0xff]  }
 0x828   :  { %16574 = vmatmul.mubr.bf16.gmra.mrb[40].mxu1 %v18170_v28  ;;  %v24341_v28 = vshll.u32 %v21346_v39, 16 }
 0x829   :  { %16577 = vmatprep.mubr.bf16.mxu1 %v18171_v25 }
 0x82a   :  { %v10727_v25 = vrot.slane %v24341_v28, 1  ;;  %v24352_v28 = vshrl.u32 %v21382_v61, 16 }
 0x82c   :  { %v10728_v41 = vor.u32 %v10727_v25, %v24343_v1  ;;  %v18072_v1 = vld [vmem:[%s23641_s2 + $0x1b8] sm:$0xff]  }
 0x830   :  { %16578 = vmatmul.mubr.bf16.gmra.mrb[44].mxu1 %v18172_v0  ;;  %v10730_v0 = vshll.u32 %v10629_v31, 16 }
 0x831   :  { %16581 = vmatprep.mubr.bf16.mxu1 %v18173_v32  ;;  %v10721_v32 = vsel %vm1478_vm1, %v10716_v47, %v10720_v38  ;;  %v10775_v47 = vrot.slane %v24349_v40, 1 }
 0x832   :  { %v10732_v12 = vrot.slane %v10730_v0, 1  ;;  %v10780_v0 = vrot.slane %v10778_v7, 1 }
 0x833   :  { %v10776_v25 = vor.u32 %v10775_v47, %v24352_v28 }
 0x834   :  { %v10733_v18 = vsel %vm1478_vm1, %v10728_v41, %v10732_v12  ;;  %v24354_v12 = vld [vmem:[#allocation56_spill] sm:$0xff] }
 0x835   :  { %v10781_v41 = vsel %vm1478_vm1, %v10776_v25, %v10780_v0  ;;  %v24366_v25 = vld [vmem:[#allocation63_spill] sm:$0xff] }
 0x836   :  { %v24367_v0 = vshll.u32 %v24366_v25, 16 }
 0x838   :  { %16582 = vmatmul.mubr.bf16.gmra.mrb[48].mxu1 %v18174_v22  ;;  %v24342_v22 = vshll.u32 %v21353_v27, 16 }
 0x839   :  { %16585 = vmatprep.mubr.bf16.mxu1 %v18175_v17 }
 0x83a   :  { %v10739_v17 = vrot.slane %v24342_v22, 1 }
 0x840   :  { %16586 = vmatmul.mubr.bf16.gmra.mrb[52].mxu1 %v18176_v56  ;;  %v10742_v56 = vshll.u32 %v10631_v10, 16 }
 0x841   :  { %16589 = vmatprep.mubr.bf16.mxu1 %v18177_v52  ;;  %v18067_v52 = vld [vmem:[%s23641_s2 + $0x190] sm:$0xff]  }
 0x842   :  { %v10744_v48 = vrot.slane %v10742_v56, 1  ;;  %v10641_v56 = vld [vmem:[#allocation2 + $0x100] sm:$0x1] }
 0x843   :  { %v10802_v61 = vshll.u32 %v10641_v56, 16  ;;  %v24368_v56 = vld [vmem:[#allocation65_spill] sm:$0xff] }
 0x848   :  { %16590 = vmatmul.mubr.bf16.gmra.mrb[56].mxu1 %v18178_v14  ;;  %v24344_v14 = vshrl.u32 %v21353_v27, 16  ;;  %v24346_v27 = vshll.u32 %v21369_v60, 16  ;;  %v24350_v60 = vld [vmem:[#allocation54_spill] sm:$0xff] }
 0x849   :  { %16593 = vmatprep.mubr.bf16.mxu1 %v18179_v44  ;;  %v10633_v44 = vld [vmem:[#allocation2 + $0xa0] sm:$0x1]  ;;  %v24351_v31 = vshll.u32 %v24350_v60, 16 }
 0x84a   :  { %v10740_v46 = vor.u32 %v10739_v17, %v24344_v14  ;;  %v10754_v39 = vshll.u32 %v10633_v44, 16  ;;  %v10763_v54 = vrot.slane %v24346_v27, 1  ;;  %v24355_v14 = vshll.u32 %v24354_v12, 16  ;;  %v24356_v44 = vld [vmem:[#allocation57_spill] sm:$0xff] }
 0x84b   :  { %v10787_v10 = vrot.slane %v24351_v31, 1  ;;  %v24357_v26 = vshll.u32 %v24356_v44, 16  ;;  %v24359_v27 = vshrl.u32 %v24356_v44, 16 }
 0x84c   :  { %v10745_v9 = vsel %vm1478_vm1, %v10740_v46, %v10744_v48  ;;  %v10764_v51 = vor.u32 %v10763_v54, %v24348_v59  ;;  %v10799_v46 = vrot.slane %v24355_v14, 1  ;;  %v24370_v14 = vshrl.u32 %v24366_v25, 16  ;;  %v10661_v25 = vld [vmem:[#allocation2 + $0x220] sm:$0x1] }
 0x84e   :  { %v10769_v38 = vsel %vm1478_vm1, %v10764_v51, %v10768_v62 }
 0x850   :  { %16594 = vmatmul.mubr.bf16.gmra.mrb[60].mxu1 %v18180_v37  ;;  %v10752_v37 = vor.u32 %v10751_v4, %v24347_v58  ;;  %v24358_v4 = vshrl.u32 %v24354_v12, 16  ;;  %v10647_v58 = vld [vmem:[#allocation2 + $0x148] sm:$0x1]  ;;  %v10654_v12 = vld [vmem:[#allocation2 + $0x1d0] sm:$0xff] }
 0x851   :  { %16613 = vmatprep.mubr.bf16.mxu1 %v10697_v30  ;;  %v10756_v30 = vrot.slane %v10754_v39, 1  ;;  %v10838_v40 = vshll.u32 %v10647_v58, 16 }
 0x852   :  { %v10800_v39 = vor.u32 %v10799_v46, %v24358_v4  ;;  %v10655_v4 = vld [vmem:[#allocation2 + $0x1d8] sm:$0x1] }
 0x853   :  { %v10757_v2 = vsel %vm1478_vm1, %v10752_v37, %v10756_v30  ;;  %v24360_v30 = vld [vmem:[#allocation59_spill] sm:$0xff] }
 0x854   :  { %v24361_v59 = vshll.u32 %v24360_v30, 16  ;;  %v24364_v47 = vshrl.u32 %v24360_v30, 16 }
 0x856   :  { %v10823_v51 = vrot.slane %v24361_v59, 1  ;;  %v10657_v59 = vld [vmem:[#allocation2 + $0x1f0] sm:$0x1] }
 0x858   :  { %16614 = vmatmul.mubr.bf16.vlgmr.msra.gmra.mrb[0].mxu1 %v10709_v63  ;;  %v18071_v63 = vld [vmem:[%s23641_s2 + $0x1b0] sm:$0xff]   ;;  %v10824_v7 = vor.u32 %v10823_v51, %v24364_v47  ;;  %v10659_v51 = vld [vmem:[#allocation2 + $0x208] sm:$0x1]  ;;  %v24374_v47 = vshll.u32 %v21482_v49, 16 }
 0x859   :  { %16617 = vmatprep.mubr.bf16.mxu1 %v10721_v32  ;;  %16678 = vmatpush3.bf16.msra.mxu1 %v22002_v45  ;;  %v18068_v45 = vld [vmem:[%s23641_s2 + $0x198] sm:$0xff]   ;;  %v24353_v32 = vshrl.u32 %v24350_v60, 16 }
 0x85a   :  { %16679 = vmatprep.subr.bf16.mxu1 %v18066_v3 }
 0x85b   :  { %v10788_v22 = vor.u32 %v10787_v10, %v24353_v32  ;;  %v10840_v10 = vrot.slane %v10838_v40, 1  ;;  %v10847_v32 = vrot.slane %v24367_v0, 1  ;;  %v10663_v0 = vld [vmem:[#allocation2 + $0x238] sm:$0x1] }
 0x85d   :  { %16680 = vmatpush3.bf16.msra.mxu1 %v18066_v3  ;;  %v10790_v3 = vshll.u32 %v10639_v11, 16  ;;  %v24362_v11 = vld [vmem:[#allocation61_spill] sm:$0xff]  ;;  %v10848_v46 = vor.u32 %v10847_v32, %v24370_v14 }
 0x85e   :  { %16681 = vmatprep.subr.bf16.mxu1 %v18067_v52  ;;  %v24365_v60 = vshrl.u32 %v24362_v11, 16 }
 0x85f   :  { %v10792_v17 = vrot.slane %v10790_v3, 1  ;;  %v10649_v3 = vld [vmem:[#allocation2 + $0x160] sm:$0x1] }
 0x860   :  { %16618 = vmatmul.mubr.bf16.gmra.mrb[4].mxu1 %v10733_v18 }
 0x861   :  { %16621 = vmatprep.mubr.bf16.mxu1 %v10745_v9  ;;  %16682 = vmatpush3.bf16.msra.mxu1 %v18067_v52  ;;  %v10643_v52 = vld [vmem:[#allocation2 + $0x118] sm:$0x1]  ;;  %v10793_v48 = vsel %vm1478_vm1, %v10788_v22, %v10792_v17  ;;  %v10804_v9 = vrot.slane %v10802_v61, 1  ;;  %v10850_v22 = vshll.u32 %v10649_v3, 16  ;;  %v24376_v3 = vshrl.u32 %v21482_v49, 16 }
 0x862   :  { %16683 = vmatprep.subr.bf16.mxu1 %v18068_v45  ;;  %v10814_v18 = vshll.u32 %v10643_v52, 16  ;;  %v24369_v52 = vshll.u32 %v24368_v56, 16  ;;  %v24380_v49 = vshrl.u32 %v21484_v35, 16 }
 0x863   :  { %v10805_v37 = vsel %vm1478_vm1, %v10800_v39, %v10804_v9  ;;  %v10852_v61 = vrot.slane %v10850_v22, 1  ;;  %v24377_v22 = vshll.u32 %v21484_v35, 16 }
 0x864   :  { %v10816_v50 = vrot.slane %v10814_v18, 1  ;;  %v10881_v18 = vshll.u32 %v10654_v12, 16 }
 0x865   :  { %16684 = vmatpush3.bf16.msra.mxu1 %v18068_v45  ;;  %v10811_v45 = vrot.slane %v24357_v26, 1  ;;  %v10853_v39 = vsel %vm1478_vm1, %v10848_v46, %v10852_v61 }
 0x866   :  { %16685 = vmatprep.subr.bf16.mxu1 %v18069_v5 }
 0x867   :  { %v10812_v54 = vor.u32 %v10811_v45, %v24359_v27  ;;  %v10653_v45 = vld [vmem:[#allocation2 + $0x190] sm:$0x1] }
 0x868   :  { %16622 = vmatmul.mubr.bf16.gmra.mrb[8].mxu1 %v10757_v2  ;;  %v10874_v9 = vshll.u32 %v10653_v45, 16  ;;  %v10667_v45 = vld [vmem:[#allocation2 + $0x268] sm:$0x1] }
 0x869   :  { %16625 = vmatprep.mubr.bf16.mxu1 %v10769_v38  ;;  %16686 = vmatpush3.bf16.msra.mxu1 %v18069_v5  ;;  %v10645_v5 = vld [vmem:[#allocation2 + $0x130] sm:$0x1]  ;;  %v10817_v55 = vsel %vm1478_vm1, %v10812_v54, %v10816_v50  ;;  %v10883_v54 = vrot.slane %v10881_v18, 1  ;;  %v10886_v50 = vshll.u32 %v10655_v4, 16  ;;  %v24382_v4 = vld [vmem:[#allocation74_spill] sm:$0xff] }
 0x86a   :  { %16687 = vmatprep.subr.bf16.mxu1 %v18070_v23  ;;  %v10826_v62 = vshll.u32 %v10645_v5, 16  ;;  %v10879_v5 = vshrl.u32 %v10654_v12, 16  ;;  %v10876_v58 = vrot.slane %v10874_v9, 1  ;;  %v10934_v12 = vshll.u32 %v10663_v0, 16  ;;  %v10673_v0 = vld [vmem:[#allocation2 + $0x2b0] sm:$0x1] }
 0x86b   :  { %v10888_v30 = vrot.slane %v10886_v50, 1  ;;  %v24384_v50 = vshll.u32 %v21522_v21, 16 }
 0x86c   :  { %v10828_v38 = vrot.slane %v10826_v62, 1  ;;  %v24372_v62 = vld [vmem:[#allocation48_spill] sm:$0xff] }
 0x86d   :  { %16688 = vmatpush3.bf16.msra.mxu1 %v18070_v23  ;;  %v24363_v23 = vshll.u32 %v24362_v11, 16  ;;  %v24373_v11 = vshll.u32 %v21472_v36, 16  ;;  %v10955_v35 = vrot.slane %v24384_v50, 1 }
 0x86e   :  { %16689 = vmatprep.subr.bf16.mxu1 %v18071_v63  ;;  %v10829_v28 = vsel %vm1478_vm1, %v10824_v7, %v10828_v38  ;;  %v10907_v7 = vrot.slane %v24374_v47, 1  ;;  %v10910_v38 = vshll.u32 %v10659_v51, 16 }
 0x86f   :  { %v10835_v2 = vrot.slane %v24363_v23, 1  ;;  %v10895_v23 = vrot.slane %v24373_v11, 1  ;;  %v10671_v11 = vld [vmem:[#allocation2 + $0x298] sm:$0x1] }
 0x870   :  { %16626 = vmatmul.mubr.bf16.gmra.mrb[12].mxu1 %v10781_v41 }
 0x871   :  { %16629 = vmatprep.mubr.bf16.mxu1 %v10793_v48  ;;  %16690 = vmatpush3.bf16.msra.mxu1 %v18071_v63  ;;  %v10836_v31 = vor.u32 %v10835_v2, %v24365_v60  ;;  %v10651_v63 = vld [vmem:[#allocation2 + $0x178] sm:$0x1]  ;;  %v24371_v48 = vshrl.u32 %v24368_v56, 16  ;;  %v10898_v2 = vshll.u32 %v10657_v59, 16  ;;  %v24375_v60 = vshrl.u32 %v21472_v36, 16 }
 0x872   :  { %16691 = vmatprep.subr.bf16.mxu1 %v18072_v1  ;;  %v10862_v41 = vshll.u32 %v10651_v63, 16  ;;  %v10908_v63 = vor.u32 %v10907_v7, %v24376_v3  ;;  %v10922_v56 = vshll.u32 %v10661_v25, 16  ;;  %v24386_v59 = vshrl.u32 %v21522_v21, 16 }
 0x873   :  { %v10841_v17 = vsel %vm1478_vm1, %v10836_v31, %v10840_v10  ;;  %v10896_v31 = vor.u32 %v10895_v23, %v24375_v60  ;;  %v10900_v10 = vrot.slane %v10898_v2, 1  ;;  %v24387_v2 = vshll.u32 %v21526_v29, 16 }
 0x874   :  { %v10864_v26 = vrot.slane %v10862_v41, 1  ;;  %v10924_v46 = vrot.slane %v10922_v56, 1  ;;  %v10956_v51 = vor.u32 %v10955_v35, %v24386_v59  ;;  %v24389_v21 = vshrl.u32 %v21526_v29, 16 }
 0x875   :  { %16692 = vmatpush3.bf16.msra.mxu1 %v18072_v1  ;;  %v10859_v1 = vrot.slane %v24369_v52, 1  ;;  %v10901_v32 = vsel %vm1478_vm1, %v10896_v31, %v10900_v10  ;;  %v10982_v31 = vshll.u32 %v10671_v11, 16  ;;  %v24398_v35 = vshrl.u32 %v21581_v19, 16 }
 0x876   :  { %16757 = vmatprep.subr.bf16.mxu1 %v22075_v6 }
 0x877   :  { %v10860_v44 = vor.u32 %v10859_v1, %v24371_v48  ;;  %v24378_v1 = vld [vmem:[#allocation71_spill] sm:$0xff]  ;;  %v10984_v25 = vrot.slane %v10982_v31, 1 }
 0x878   :  { %16630 = vmatmul.mubr.bf16.gmra.mrb[16].mxu1 %v10805_v37  ;;  %v10884_v37 = vor.u32 %v10883_v54, %v10879_v5  ;;  %v24379_v41 = vshll.u32 %v24378_v1, 16  ;;  %v24381_v61 = vshrl.u32 %v24378_v1, 16  ;;  %v10958_v5 = vshll.u32 %v10667_v45, 16 }
 0x879   :  { %16633 = vmatprep.mubr.bf16.mxu1 %v10817_v55  ;;  %v10865_v27 = vsel %vm1478_vm1, %v10860_v44, %v10864_v26  ;;  %v10877_v55 = vsel %vm1478_vm1, %v24372_v62, %v10876_v58  ;;  %v10936_v44 = vrot.slane %v10934_v12, 1  ;;  %v10665_v26 = vld [vmem:[#allocation2 + $0x250] sm:$0x1]  ;;  %v24385_v58 = vshrl.u32 %v24382_v4, 16 }
 0x87a   :  { %v10889_v40 = vsel %vm1478_vm1, %v10884_v37, %v10888_v30  ;;  %v10931_v36 = vrot.slane %v24379_v41, 1  ;;  %v10960_v62 = vrot.slane %v10958_v5, 1  ;;  %v24392_v41 = vshll.u32 %v21566_v34, 16 }
 0x87b   :  { %v24395_v45 = vshll.u32 %v21571_v43, 16 }
 0x87c   :  { %v10932_v48 = vor.u32 %v10931_v36, %v24381_v61  ;;  %v10961_v7 = vsel %vm1478_vm1, %v10956_v51, %v10960_v62  ;;  %v11003_v29 = vrot.slane %v24392_v41, 1  ;;  %v24399_v51 = vld [vmem:[#allocation80_spill] sm:$0xff] }
 0x87d   :  { %v24400_v62 = vshll.u32 %v24399_v51, 16 }
 0x87e   :  { %v10937_v54 = vsel %vm1478_vm1, %v10932_v48, %v10936_v44  ;;  %v10677_v48 = vld [vmem:[#allocation2 + $0x2e0] sm:$0x1]  ;;  %v10679_v44 = vld [vmem:[#allocation2 + $0x2f8] sm:$0x1] }
 0x880   :  { %16634 = vmatmul.mubr.bf16.gmra.mrb[20].mxu1 %v10829_v28  ;;  %v10912_v28 = vrot.slane %v10910_v38, 1  ;;  %v24388_v38 = vshll.u32 %v21532_v57, 16 }
 0x881   :  { %16637 = vmatprep.mubr.bf16.mxu1 %v10841_v17  ;;  %v10919_v17 = vrot.slane %v24377_v22, 1 }
 0x882   :  { %v10913_v52 = vsel %vm1478_vm1, %v10908_v63, %v10912_v28  ;;  %v10979_v60 = vrot.slane %v24388_v38, 1  ;;  %v24390_v63 = vshrl.u32 %v21532_v57, 16  ;;  %v24393_v57 = vshrl.u32 %v21548_v8, 16 }
 0x883   :  { %v10920_v14 = vor.u32 %v10919_v17, %v24380_v49  ;;  %v24391_v17 = vshll.u32 %v21548_v8, 16 }
 0x884   :  { %v10980_v28 = vor.u32 %v10979_v60, %v24390_v63 }
 0x885   :  { %v10925_v18 = vsel %vm1478_vm1, %v10920_v14, %v10924_v46  ;;  %v10991_v56 = vrot.slane %v24391_v17, 1  ;;  %v24394_v14 = vshrl.u32 %v21566_v34, 16  ;;  %v24397_v34 = vshrl.u32 %v21571_v43, 16  ;;  %v11522_v17 = vld [vmem:[#allocation2 + $0x48] sm:$0x80] }
 0x886   :  { %v10985_v1 = vsel %vm1478_vm1, %v10980_v28, %v10984_v25  ;;  %v11597_v41 = vshrl.u32 %v11522_v17, 16 }
 0x887   :  { %v10992_v12 = vor.u32 %v10991_v56, %v24393_v57  ;;  %v11004_v46 = vor.u32 %v11003_v29, %v24394_v14  ;;  %v11524_v56 = vld [vmem:[#allocation2 + $0x60] sm:$0x80]  ;;  %v24406_v29 = vld [vmem:[#allocation53_spill] sm:$0xff] }
 0x888   :  { %16638 = vmatmul.mubr.bf16.gmra.mrb[24].mxu1 %v10853_v39  ;;  %v24383_v39 = vshll.u32 %v24382_v4, 16  ;;  %v11018_v4 = vshll.u32 %v10677_v48, 16  ;;  %v11609_v57 = vshrl.u32 %v11524_v56, 16  ;;  %v11526_v14 = vld [vmem:[#allocation2 + $0x78] sm:$0x80]  ;;  %v24407_v48 = vld [vmem:[#allocation55_spill] sm:$0xff] }
 0x889   :  { %16641 = vmatprep.mubr.bf16.mxu1 %v10865_v27  ;;  %v10946_v27 = vshll.u32 %v10665_v26, 16 }
 0x88a   :  { %v10943_v9 = vrot.slane %v24383_v39, 1  ;;  %v11020_v50 = vrot.slane %v11018_v4, 1 }
 0x88b   :  { %v10948_v30 = vrot.slane %v10946_v27, 1  ;;  %v11030_v27 = vshll.u32 %v10679_v44, 16 }
 0x88c   :  { %v10944_v37 = vor.u32 %v10943_v9, %v24385_v58  ;;  %v24396_v9 = vshll.u32 %v21581_v19, 16  ;;  %v24403_v19 = vshrl.u32 %v24399_v51, 16 }
 0x88d   :  { %v11032_v58 = vrot.slane %v11030_v27, 1  ;;  %v11530_v27 = vld [vmem:[#allocation2 + $0xa8] sm:$0x80] }
 0x88e   :  { %v10949_v23 = vsel %vm1478_vm1, %v10944_v37, %v10948_v30  ;;  %v11027_v8 = vrot.slane %v24396_v9, 1  ;;  %v10681_v37 = vld [vmem:[#allocation2 + $0x310] sm:$0x1]  ;;  %v10683_v30 = vld [vmem:[#allocation2 + $0x328] sm:$0x1] }
 0x88f   :  { %v11042_v11 = vshll.u32 %v10681_v37, 16 }
 0x890   :  { %16642 = vmatmul.mubr.bf16.gmra.mrb[28].mxu1 %v10877_v55  ;;  %v10669_v55 = vld [vmem:[#allocation2 + $0x280] sm:$0x1]  ;;  %v11028_v5 = vor.u32 %v11027_v8, %v24398_v35 }
 0x891   :  { %16645 = vmatprep.mubr.bf16.mxu1 %v10889_v40  ;;  %v10967_v40 = vrot.slane %v24387_v2, 1  ;;  %v10970_v47 = vshll.u32 %v10669_v55, 16  ;;  %v11039_v55 = vrot.slane %v24400_v62, 1  ;;  %v24401_v2 = vld [vmem:[#allocation83_spill] sm:$0xff]  ;;  %v11044_v38 = vrot.slane %v11042_v11, 1 }
 0x892   :  { %v24404_v60 = vshrl.u32 %v24401_v2, 16  ;;  %v11534_v62 = vld [vmem:[#allocation2 + $0xd8] sm:$0x80]  ;;  %v18078_v11 = vld [vmem:[%s23641_s2 + $0x1e8] sm:$0xff]  }
 0x893   :  { %v10968_v10 = vor.u32 %v10967_v40, %v24389_v21  ;;  %v10972_v3 = vrot.slane %v10970_v47, 1  ;;  %v24402_v40 = vshll.u32 %v24401_v2, 16  ;;  %v11054_v47 = vshll.u32 %v10683_v30, 16  ;;  %v18077_v30 = vld [vmem:[%s23641_s2 + $0x1e0] sm:$0xff]  }
 0x895   :  { %v10973_v22 = vsel %vm1478_vm1, %v10968_v10, %v10972_v3  ;;  %v11051_v43 = vrot.slane %v24402_v40, 1  ;;  %v11056_v21 = vrot.slane %v11054_v47, 1  ;;  %v10685_v10 = vld [vmem:[#allocation2 + $0x340] sm:$0x1]  ;;  %v11520_v3 = vld [vmem:[#allocation2 + $0x30] sm:$0x80] }
 0x896   :  { %v11066_v28 = vshll.u32 %v10685_v10, 16  ;;  %v11669_v40 = vshrl.u32 %v11534_v62, 16  ;;  %v18080_v10 = vld [vmem:[%s23641_s2 + $0x1f8] sm:$0xff]  }
 0x897   :  { %v11052_v31 = vor.u32 %v11051_v43, %v24404_v60  ;;  %v24412_v43 = vld [vmem:[#allocation66_spill] sm:$0xff] }
 0x898   :  { %16646 = vmatmul.mubr.bf16.gmra.mrb[32].mxu1 %v10901_v32  ;;  %v10675_v32 = vld [vmem:[#allocation2 + $0x2c8] sm:$0x1] }
 0x899   :  { %16649 = vmatprep.mubr.bf16.mxu1 %v10913_v52  ;;  %v10994_v52 = vshll.u32 %v10673_v0, 16  ;;  %v11006_v36 = vshll.u32 %v10675_v32, 16  ;;  %v11057_v25 = vsel %vm1478_vm1, %v11052_v31, %v11056_v21  ;;  %v11585_v0 = vshrl.u32 %v11520_v3, 16  ;;  %v11538_v31 = vld [vmem:[#allocation2 + $0x108] sm:$0x80] }
 0x89a   :  { %v11068_v32 = vrot.slane %v11066_v28, 1  ;;  %v11540_v21 = vld [vmem:[#allocation2 + $0x120] sm:$0x80]  ;;  %v24413_v3 = vld [vmem:[#allocation67_spill] sm:$0xff]  ;;  %v11693_v28 = vshrl.u32 %v11538_v31, 16  ;;  %v24421_v31 = vld [vmem:[#allocation77_spill] sm:$0xff] }
 0x89b   :  { %v10996_v49 = vrot.slane %v10994_v52, 1  ;;  %v11008_v61 = vrot.slane %v11006_v36, 1  ;;  %v24405_v52 = vld [vmem:[#allocation52_spill] sm:$0xff] }
 0x89c   :  { %v11695_v17 = vrot.slane %v11693_v28, 7 }
 0x89d   :  { %v10997_v26 = vsel %vm1478_vm1, %v10992_v12, %v10996_v49  ;;  %v11009_v39 = vsel %vm1478_vm1, %v11004_v46, %v11008_v61  ;;  %v11599_v12 = vrot.slane %v11597_v41, 7  ;;  %v11611_v49 = vrot.slane %v11609_v57, 7  ;;  %v11528_v46 = vld [vmem:[#allocation2 + $0x90] sm:$0x80]  ;;  %v18074_v61 = vld [vmem:[%s23641_s2 + $0x1c8] sm:$0xff]   ;;  %v24415_v41 = vld [vmem:[#allocation69_spill] sm:$0xff] }
 0x89e   :  { %v11633_v4 = vshrl.u32 %v11528_v46, 16  ;;  %v24416_v57 = vld [vmem:[#allocation70_spill] sm:$0xff] }
 0x89f   :  { %v11607_v44 = vsel %vm290_vm0, %v11599_v12, %v24407_v48  ;;  %v11548_v48 = vld [vmem:[#allocation2 + $0x180] sm:$0x80] }
 0x8a0   :  { %16650 = vmatmul.mubr.bf16.gmra.mrb[36].mxu1 %v10925_v18  ;;  %v11015_v18 = vrot.slane %v24395_v45, 1  ;;  %v24408_v45 = vld [vmem:[#allocation58_spill] sm:$0xff]  ;;  %v11635_v8 = vrot.slane %v11633_v4, 7 }
 0x8a1   :  { %16653 = vmatprep.mubr.bf16.mxu1 %v10937_v54 }
 0x8a2   :  { %v11016_v54 = vor.u32 %v11015_v18, %v24397_v34  ;;  %v11619_v18 = vsel %vm290_vm0, %v11611_v49, %v24408_v45  ;;  %v11532_v34 = vld [vmem:[#allocation2 + $0xc0] sm:$0x80] }
 0x8a3   :  { %v11657_v37 = vshrl.u32 %v11532_v34, 16  ;;  %v11550_v34 = vld [vmem:[#allocation2 + $0x198] sm:$0x80] }
 0x8a4   :  { %v11021_v59 = vsel %vm1478_vm1, %v11016_v54, %v11020_v50  ;;  %v18076_v54 = vld [vmem:[%s23641_s2 + $0x1d8] sm:$0xff]   ;;  %v24409_v50 = vld [vmem:[#allocation60_spill] sm:$0xff] }
 0x8a5   :  { %v11659_v51 = vrot.slane %v11657_v37, 7  ;;  %v11552_v37 = vld [vmem:[#allocation2 + $0x1e0] sm:$0x80] }
 0x8a7   :  { %v11667_v47 = vsel %vm290_vm0, %v11659_v51, %v24412_v43  ;;  %v11777_v51 = vshrl.u32 %v11552_v37, 16 }
 0x8a8   :  { %16654 = vmatmul.mubr.bf16.gmra.mrb[40].mxu1 %v10949_v23  ;;  %v11033_v23 = vsel %vm1478_vm1, %v11028_v5, %v11032_v58  ;;  %v11645_v5 = vshrl.u32 %v11530_v27, 16 }
 0x8a9   :  { %16657 = vmatprep.mubr.bf16.mxu1 %v10961_v7  ;;  %v11040_v7 = vor.u32 %v11039_v55, %v24403_v19  ;;  %v11536_v55 = vld [vmem:[#allocation2 + $0xf0] sm:$0x80] }
 0x8aa   :  { %v11681_v19 = vshrl.u32 %v11536_v55, 16  ;;  %v11554_v55 = vld [vmem:[#allocation2 + $0x1f8] sm:$0x80] }
 0x8ab   :  { %v11045_v63 = vsel %vm1478_vm1, %v11040_v7, %v11044_v38  ;;  %v18079_v7 = vld [vmem:[%s23641_s2 + $0x1f0] sm:$0xff]   ;;  %v11671_v38 = vrot.slane %v11669_v40, 7 }
 0x8ac   :  { %v11683_v60 = vrot.slane %v11681_v19, 7  ;;  %v24420_v40 = vld [vmem:[#allocation76_spill] sm:$0xff] }
 0x8b0   :  { %16658 = vmatmul.mubr.bf16.gmra.mrb[44].mxu1 %v10973_v22  ;;  %v11587_v22 = vrot.slane %v11585_v0, 7 }
 0x8b1   :  { %16661 = vmatprep.mubr.bf16.mxu1 %v10985_v1  ;;  %v11069_v1 = vsel %vm1478_vm1, %v24405_v52, %v11068_v32  ;;  %v11705_v32 = vshrl.u32 %v11540_v21, 16  ;;  %v11542_v52 = vld [vmem:[#allocation2 + $0x138] sm:$0x80] }
 0x8b2   :  { %v11595_v36 = vsel %vm290_vm0, %v11587_v22, %v24406_v29  ;;  %v22222_v22 = vld [vmem:[%s23641_s2 + $0x200] sm:$0xff]   ;;  %v11703_v29 = vsel %vm290_vm0, %v11695_v17, %v24415_v41  ;;  %v11564_v17 = vld [vmem:[#allocation2 + $0x270] sm:$0x80]  ;;  %v24424_v41 = vld [vmem:[#allocation81_spill] sm:$0xff] }
 0x8b3   :  { %v11707_v56 = vrot.slane %v11705_v32, 7  ;;  %v11562_v32 = vld [vmem:[#allocation2 + $0x258] sm:$0x80] }
 0x8b5   :  { %v11715_v12 = vsel %vm290_vm0, %v11707_v56, %v24416_v57  ;;  %v24423_v56 = vld [vmem:[#allocation79_spill] sm:$0xff] }
 0x8b8   :  { %16662 = vmatmul.mubr.bf16.gmra.mrb[48].mxu1 %v10997_v26  ;;  %v11621_v26 = vshrl.u32 %v11526_v14, 16 }
 0x8b9   :  { %16665 = vmatprep.mubr.bf16.mxu1 %v11009_v39  ;;  %v18075_v39 = vld [vmem:[%s23641_s2 + $0x1d0] sm:$0xff]  }
 0x8ba   :  { %v11623_v9 = vrot.slane %v11621_v26, 7 }
 0x8bc   :  { %v11631_v35 = vsel %vm290_vm0, %v11623_v9, %v24409_v50  ;;  %v11759_v9 = vrot.slane %v11757_v53, 7 }
 0x8c0   :  { %16666 = vmatmul.mubr.bf16.gmra.mrb[52].mxu1 %v11021_v59  ;;  %v11647_v59 = vrot.slane %v11645_v5, 7  ;;  %v11765_v5 = vshrl.u32 %v11550_v34, 16  ;;  %v24427_v34 = vld [vmem:[#allocation85_spill] sm:$0xff] }
 0x8c1   :  { %16669 = vmatprep.mubr.bf16.mxu1 %v11033_v23  ;;  %v24411_v23 = vld [vmem:[#allocation64_spill] sm:$0xff] }
 0x8c2   :  { %v11655_v2 = vsel %vm290_vm0, %v11647_v59, %v24411_v23  ;;  %v11767_v62 = vrot.slane %v11765_v5, 7  ;;  %v11556_v23 = vld [vmem:[#allocation2 + $0x210] sm:$0x80] }
 0x8c8   :  { %16670 = vmatmul.mubr.bf16.gmra.mrb[56].mxu1 %v11045_v63  ;;  %v11679_v63 = vsel %vm290_vm0, %v11671_v38, %v24413_v3  ;;  %v11558_v38 = vld [vmem:[#allocation2 + $0x228] sm:$0x80]  ;;  %v24422_v3 = vld [vmem:[#allocation78_spill] sm:$0xff] }
 0x8c9   :  { %16673 = vmatprep.mubr.bf16.mxu1 %v11057_v25  ;;  %v24414_v25 = vld [vmem:[#allocation68_spill] sm:$0xff] }
 0x8ca   :  { %v11691_v0 = vsel %vm290_vm0, %v11683_v60, %v24414_v25  ;;  %v11560_v60 = vld [vmem:[#allocation2 + $0x240] sm:$0x80] }
 0x8cb   :  { %v11825_v28 = vshrl.u32 %v11560_v60, 16  ;;  %v24432_v60 = vld [vmem:[#allocation90_spill] sm:$0xff] }
 0x8d0   :  { %16674 = vmatmul.mubr.bf16.gmra.mrb[60].mxu1 %v11069_v1  ;;  %v11544_v1 = vld [vmem:[#allocation2 + $0x150] sm:$0x80] }
 0x8d1   :  { %16693 = vmatprep.mubr.bf16.mxu1 %v11595_v36  ;;  %v11717_v36 = vshrl.u32 %v11542_v52, 16  ;;  %v11729_v49 = vshrl.u32 %v11544_v1, 16  ;;  %v11837_v1 = vshrl.u32 %v11562_v32, 16  ;;  %v24433_v32 = vld [vmem:[#allocation91_spill] sm:$0xff] }
 0x8d3   :  { %v11719_v14 = vrot.slane %v11717_v36, 7  ;;  %v11731_v46 = vrot.slane %v11729_v49, 7  ;;  %v11849_v36 = vshrl.u32 %v11564_v17, 16  ;;  %v11839_v57 = vrot.slane %v11837_v1, 7  ;;  %v11566_v49 = vld [vmem:[#allocation2 + $0x288] sm:$0x80] }
 0x8d8   :  { %16694 = vmatmul.mubr.bf16.vlgmr.msra.gmra.mrb[0].mxu1 %v11607_v44  ;;  %v24417_v44 = vld [vmem:[#allocation72_spill] sm:$0xff] }
 0x8d9   :  { %16697 = vmatprep.mubr.bf16.mxu1 %v11619_v18  ;;  %16758 = vmatpush3.bf16.msra.mxu1 %v22075_v6  ;;  %v24410_v6 = vld [vmem:[#allocation62_spill] sm:$0xff]  ;;  %v11727_v26 = vsel %vm290_vm0, %v11719_v14, %v24417_v44  ;;  %v24418_v18 = vld [vmem:[#allocation73_spill] sm:$0xff]  ;;  %v24426_v44 = vld [vmem:[#allocation84_spill] sm:$0xff] }
 0x8da   :  { %16759 = vmatprep.subr.bf16.mxu1 %v18074_v61  ;;  %v11643_v58 = vsel %vm290_vm0, %v11635_v8, %v24410_v6  ;;  %v11739_v4 = vsel %vm290_vm0, %v11731_v46, %v24418_v18  ;;  %v22235_v8 = vld [vmem:[#allocation2 + $0x8] sm:$0xff]  ;;  %v11568_v14 = vld [vmem:[#allocation2 + $0x2a0] sm:$0x80] }
 0x8db   :  { %v11769_v27 = vshrl.u32 %v22235_v8, 16  ;;  %v24425_v46 = vld [vmem:[#allocation82_spill] sm:$0xff] }
 0x8dd   :  { %16760 = vmatpush3.bf16.msra.mxu1 %v18074_v61  ;;  %v11546_v61 = vld [vmem:[#allocation2 + $0x168] sm:$0x80]  ;;  %v11771_v6 = vrot.slane %v11769_v27, 7 }
 0x8de   :  { %16761 = vmatprep.subr.bf16.mxu1 %v18075_v39  ;;  %v11741_v45 = vshrl.u32 %v11546_v61, 16  ;;  %v11847_v61 = vsel %vm290_vm0, %v11839_v57, %v24425_v46  ;;  %v18186_v57 = vld [vmem:[#allocation2 + $0x98] sm:$0xff]  ;;  %v18087_v46 = vld [vmem:[%s23641_s2 + $0x230] sm:$0xff]  }
 0x8e0   :  { %16698 = vmatmul.mubr.bf16.gmra.mrb[4].mxu1 %v11631_v35  ;;  %v11762_v35 = vor.u32 %v11760_v15, %v11759_v9  ;;  %v11779_v15 = vrot.slane %v11777_v51, 7  ;;  %v11572_v9 = vld [vmem:[#allocation2 + $0x2d0] sm:$0x80]  ;;  %v24429_v51 = vld [vmem:[#allocation87_spill] sm:$0xff] }
 0x8e1   :  { %16701 = vmatprep.mubr.bf16.mxu1 %v11643_v58  ;;  %16762 = vmatpush3.bf16.msra.mxu1 %v18075_v39  ;;  %v11753_v39 = vshrl.u32 %v11548_v48, 16  ;;  %v11772_v58 = vshll.u32 %v22235_v8, 16  ;;  %v11861_v48 = vshrl.u32 %v11566_v49, 16  ;;  %v18187_v49 = vld [vmem:[#allocation2 + $0xb0] sm:$0xff] }
 0x8e2   :  { %16763 = vmatprep.subr.bf16.mxu1 %v18076_v54  ;;  %v11787_v43 = vsel %vm290_vm0, %v11779_v15, %v24420_v40 }
 0x8e3   :  { %v11755_v50 = vrot.slane %v11753_v39, 7  ;;  %v22248_v20 = vor.u32 %v11772_v58, %v11771_v6  ;;  %v11863_v18 = vrot.slane %v11861_v48, 7  ;;  %v11570_v39 = vld [vmem:[#allocation2 + $0x2b8] sm:$0x80]  ;;  %v11897_v6 = vshrl.u32 %v11572_v9, 16  ;;  %v18189_v48 = vld [vmem:[#allocation2 + $0xe0] sm:$0xff] }
 0x8e4   :  { %v18196_v9 = vld [vmem:[#allocation2 + $0x188] sm:$0xff] }
 0x8e5   :  { %16764 = vmatpush3.bf16.msra.mxu1 %v18076_v54  ;;  %v11743_v54 = vrot.slane %v11741_v45, 7  ;;  %v11763_v59 = vsel %vm290_vm0, %v11755_v50, %v11762_v35  ;;  %v11873_v45 = vshrl.u32 %v11568_v14, 16  ;;  %v11885_v50 = vshrl.u32 %v11570_v39, 16  ;;  %v24428_v35 = vld [vmem:[#allocation86_spill] sm:$0xff]  ;;  %v18188_v14 = vld [vmem:[#allocation2 + $0xc8] sm:$0xff]  ;;  %v18195_v39 = vld [vmem:[#allocation2 + $0x170] sm:$0xff] }
 0x8e6   :  { %16765 = vmatprep.subr.bf16.mxu1 %v18077_v30 }
 0x8e7   :  { %v11887_v37 = vrot.slane %v11885_v50, 7  ;;  %v18199_v50 = vld [vmem:[#allocation2 + $0x218] sm:$0xff] }
 0x8e8   :  { %16702 = vmatmul.mubr.bf16.gmra.mrb[8].mxu1 %v11655_v2  ;;  %v11789_v2 = vshrl.u32 %v11554_v55, 16  ;;  %v24430_v55 = vld [vmem:[#allocation88_spill] sm:$0xff] }
 0x8e9   :  { %16705 = vmatprep.mubr.bf16.mxu1 %v11667_v47  ;;  %16766 = vmatpush3.bf16.msra.mxu1 %v18077_v30  ;;  %v24419_v30 = vld [vmem:[#allocation75_spill] sm:$0xff]  ;;  %v11801_v47 = vshrl.u32 %v11556_v23, 16 }
 0x8ea   :  { %16767 = vmatprep.subr.bf16.mxu1 %v18078_v11  ;;  %v11751_v53 = vsel %vm290_vm0, %v11743_v54, %v24419_v30  ;;  %v11791_v19 = vrot.slane %v11789_v2, 7  ;;  %v11871_v54 = vsel %vm290_vm0, %v11863_v18, %v24427_v34  ;;  %v11899_v30 = vrot.slane %v11897_v6, 7  ;;  %v18193_v18 = vld [vmem:[#allocation2 + $0x140] sm:$0xff]  ;;  %v18197_v34 = vld [vmem:[#allocation2 + $0x1e8] sm:$0xff] }
 0x8eb   :  { %v18202_v6 = vld [vmem:[#allocation2 + $0x260] sm:$0xff] }
 0x8ec   :  { %v11799_v21 = vsel %vm290_vm0, %v11791_v19, %v24421_v31  ;;  %v24431_v19 = vld [vmem:[#allocation89_spill] sm:$0xff] }
 0x8ed   :  { %16768 = vmatpush3.bf16.msra.mxu1 %v18078_v11  ;;  %v11775_v11 = vsel %vm290_vm0, %v11767_v62, %v22248_v20  ;;  %v11895_v62 = vsel %vm290_vm0, %v11887_v37, %v24429_v51  ;;  %v18203_v37 = vld [vmem:[#allocation2 + $0x278] sm:$0xff] }
 0x8ee   :  { %16769 = vmatprep.subr.bf16.mxu1 %v18079_v7  ;;  %v18207_v51 = vld [vmem:[#allocation2 + $0x2d8] sm:$0xff] }
 0x8f0   :  { %16706 = vmatmul.mubr.bf16.gmra.mrb[12].mxu1 %v11679_v63 }
 0x8f1   :  { %16709 = vmatprep.mubr.bf16.mxu1 %v11691_v0  ;;  %16770 = vmatpush3.bf16.msra.mxu1 %v18079_v7  ;;  %v11803_v7 = vrot.slane %v11801_v47, 7  ;;  %v11827_v0 = vrot.slane %v11825_v28, 7  ;;  %v11580_v47 = vld [vmem:[#allocation2 + $0x330] sm:$0x80] }
 0x8f2   :  { %16771 = vmatprep.subr.bf16.mxu1 %v18080_v10 }
 0x8f3   :  { %v11811_v63 = vsel %vm290_vm0, %v11803_v7, %v24422_v3  ;;  %v11582_v3 = vld [vmem:[#allocation2 + $0x348] sm:$0x80] }
 0x8f5   :  { %16772 = vmatpush3.bf16.msra.mxu1 %v18080_v10  ;;  %v11813_v10 = vshrl.u32 %v11558_v38, 16 }
 0x8f6   :  { %16837 = vmatprep.subr.bf16.mxu1 %v22222_v22 }
 0x8f7   :  { %v11815_v25 = vrot.slane %v11813_v10, 7  ;;  %v11951_v10 = vrot.slane %v11949_v24, 7  ;;  %v18182_v24 = vld [vmem:[#allocation2 + $0x38] sm:$0xff] }
 0x8f8   :  { %16710 = vmatmul.mubr.bf16.gmra.mrb[16].mxu1 %v11703_v29  ;;  %v11835_v29 = vsel %vm290_vm0, %v11827_v0, %v24424_v41  ;;  %v11957_v0 = vshrl.u32 %v11582_v3, 16  ;;  %v18184_v41 = vld [vmem:[#allocation2 + $0x68] sm:$0xff] }
 0x8f9   :  { %16713 = vmatprep.mubr.bf16.mxu1 %v11715_v12  ;;  %v11823_v52 = vsel %vm290_vm0, %v11815_v25, %v24423_v56  ;;  %v11851_v12 = vrot.slane %v11849_v36, 7  ;;  %v11954_v25 = vor.u32 %v11952_v16, %v11951_v10  ;;  %v18183_v16 = vld [vmem:[#allocation2 + $0x50] sm:$0xff]  ;;  %v18185_v36 = vld [vmem:[#allocation2 + $0x80] sm:$0xff]  ;;  %v12839_v10 = vld [vmem:[#allocation2 + $0x58] sm:$0x1] }
 0x900   :  { %16714 = vmatmul.mubr.bf16.gmra.mrb[20].mxu1 %v11727_v26  ;;  %v11859_v26 = vsel %vm290_vm0, %v11851_v12, %v24426_v44  ;;  %v18086_v12 = vld [vmem:[%s23641_s2 + $0x228] sm:$0xff]   ;;  %v18190_v44 = vld [vmem:[#allocation2 + $0xf8] sm:$0xff] }
 0x901   :  { %16717 = vmatprep.mubr.bf16.mxu1 %v11739_v4  ;;  %v11875_v4 = vrot.slane %v11873_v45, 7  ;;  %v18192_v45 = vld [vmem:[#allocation2 + $0x128] sm:$0xff] }
 0x903   :  { %v11883_v5 = vsel %vm290_vm0, %v11875_v4, %v24428_v35  ;;  %v18194_v4 = vld [vmem:[#allocation2 + $0x158] sm:$0xff]  ;;  %v18200_v35 = vld [vmem:[#allocation2 + $0x230] sm:$0xff] }
 0x908   :  { %16718 = vmatmul.mubr.bf16.gmra.mrb[24].mxu1 %v11751_v53  ;;  %v11574_v53 = vld [vmem:[#allocation2 + $0x2e8] sm:$0x80] }
 0x909   :  { %16721 = vmatprep.mubr.bf16.mxu1 %v11763_v59  ;;  %v11576_v59 = vld [vmem:[#allocation2 + $0x300] sm:$0x80]  ;;  %v11909_v15 = vshrl.u32 %v11574_v53, 16  ;;  %v18205_v53 = vld [vmem:[#allocation2 + $0x2a8] sm:$0xff] }
 0x90a   :  { %v11921_v23 = vshrl.u32 %v11576_v59, 16  ;;  %v18206_v59 = vld [vmem:[#allocation2 + $0x2c0] sm:$0xff] }
 0x90b   :  { %v11911_v2 = vrot.slane %v11909_v15, 7  ;;  %v18209_v15 = vld [vmem:[#allocation2 + $0x308] sm:$0xff] }
 0x90c   :  { %v11923_v40 = vrot.slane %v11921_v23, 7  ;;  %v12837_v23 = vld [vmem:[#allocation2 + $0x40] sm:$0x1] }
 0x90d   :  { %v11919_v7 = vsel %vm290_vm0, %v11911_v2, %v24431_v19  ;;  %v18210_v2 = vld [vmem:[#allocation2 + $0x320] sm:$0xff]  ;;  %v18211_v19 = vld [vmem:[#allocation2 + $0x338] sm:$0xff] }
 0x90e   :  { %v11931_v31 = vsel %vm290_vm0, %v11923_v40, %v24432_v60 }
 0x910   :  { %16722 = vmatmul.mubr.bf16.gmra.mrb[28].mxu1 %v11775_v11  ;;  %v11907_v11 = vsel %vm290_vm0, %v11899_v30, %v24430_v55  ;;  %v18204_v30 = vld [vmem:[#allocation2 + $0x290] sm:$0xff]  ;;  %v12836_v55 = vld [vmem:[#allocation2 + $0x38] sm:$0xff] }
 0x911   :  { %16725 = vmatprep.mubr.bf16.mxu1 %v11787_v43  ;;  %v11578_v43 = vld [vmem:[#allocation2 + $0x318] sm:$0x80] }
 0x912   :  { %v11933_v38 = vshrl.u32 %v11578_v43, 16  ;;  %v12908_v43 = vshll.u32 %v12837_v23, 16 }
 0x918   :  { %16726 = vmatmul.mubr.bf16.gmra.mrb[32].mxu1 %v11799_v21  ;;  %v11945_v21 = vshrl.u32 %v11580_v47, 16  ;;  %v12838_v47 = vld [vmem:[#allocation2 + $0x50] sm:$0xff] }
 0x919   :  { %16729 = vmatprep.mubr.bf16.mxu1 %v11811_v63  ;;  %v11935_v63 = vrot.slane %v11933_v38, 7  ;;  %v12901_v38 = vshrl.u32 %v12836_v55, 16  ;;  %v12915_v60 = vshll.u32 %v12838_v47, 16 }
 0x91a   :  { %v11947_v28 = vrot.slane %v11945_v21, 7  ;;  %v12910_v21 = vrot.slane %v12908_v43, 1 }
 0x91b   :  { %v11943_v17 = vsel %vm290_vm0, %v11935_v63, %v24433_v32  ;;  %v12841_v63 = vld [vmem:[#allocation2 + $0x70] sm:$0x1] }
 0x91c   :  { %v11955_v56 = vsel %vm290_vm0, %v11947_v28, %v11954_v25  ;;  %v12917_v28 = vrot.slane %v12915_v60, 1  ;;  %v12920_v25 = vshll.u32 %v12839_v10, 16 }
 0x920   :  { %16730 = vmatmul.mubr.bf16.gmra.mrb[36].mxu1 %v11823_v52  ;;  %v11959_v52 = vrot.slane %v11957_v0, 7 }
 0x921   :  { %16733 = vmatprep.mubr.bf16.mxu1 %v11835_v29  ;;  %v18083_v29 = vld [vmem:[%s23641_s2 + $0x210] sm:$0xff]  }
 0x922   :  { %v11967_v1 = vsel %vm290_vm0, %v11959_v52, %v22248_v20  ;;  %v18084_v20 = vld [vmem:[%s23641_s2 + $0x218] sm:$0xff]   ;;  %v12913_v52 = vshrl.u32 %v12838_v47, 16 }
 0x928   :  { %16734 = vmatmul.mubr.bf16.gmra.mrb[40].mxu1 %v11847_v61  ;;  %v18088_v61 = vld [vmem:[%s23641_s2 + $0x238] sm:$0xff]  }
 0x929   :  { %16737 = vmatprep.mubr.bf16.mxu1 %v11859_v26  ;;  %v18191_v26 = vld [vmem:[#allocation2 + $0x110] sm:$0xff] }
 0x930   :  { %16738 = vmatmul.mubr.bf16.gmra.mrb[44].mxu1 %v11871_v54  ;;  %v18198_v54 = vld [vmem:[#allocation2 + $0x200] sm:$0xff] }
 0x931   :  { %16741 = vmatprep.mubr.bf16.mxu1 %v11883_v5  ;;  %v18201_v5 = vld [vmem:[#allocation2 + $0x248] sm:$0xff] }
 0x938   :  { %16742 = vmatmul.mubr.bf16.gmra.mrb[48].mxu1 %v11895_v62  ;;  %v18208_v62 = vld [vmem:[#allocation2 + $0x2f0] sm:$0xff] }
 0x939   :  { %16745 = vmatprep.mubr.bf16.mxu1 %v11907_v11  ;;  %v12903_v11 = vshll.u32 %v12836_v55, 16  ;;  %v12852_v55 = vld [vmem:[#allocation2 + $0xf8] sm:$0xff] }
 0x93b   :  { %v12905_v40 = vrot.slane %v12903_v11, 1 }
 0x940   :  { %16746 = vmatmul.mubr.bf16.gmra.mrb[52].mxu1 %v11919_v7  ;;  %v12840_v7 = vld [vmem:[#allocation2 + $0x68] sm:$0xff] }
 0x941   :  { %16749 = vmatprep.mubr.bf16.mxu1 %v11931_v31  ;;  %v12906_v31 = vor.u32 %v12905_v40, %v12901_v38  ;;  %v12927_v3 = vshll.u32 %v12840_v7, 16  ;;  %v12853_v38 = vld [vmem:[#allocation2 + $0x100] sm:$0x1] }
 0x943   :  { %v12911_v0 = vsel %vm1478_vm1, %v12906_v31, %v12910_v21  ;;  %v12929_v32 = vrot.slane %v12927_v3, 1 }
 0x948   :  { %16750 = vmatmul.mubr.bf16.gmra.mrb[56].mxu1 %v11943_v17  ;;  %v12932_v17 = vshll.u32 %v12841_v63, 16  ;;  %v13004_v63 = vshll.u32 %v12853_v38, 16  ;;  %v12868_v38 = vld [vmem:[#allocation2 + $0x1e8] sm:$0xff] }
 0x949   :  { %16753 = vmatprep.mubr.bf16.mxu1 %v11955_v56  ;;  %v12842_v56 = vld [vmem:[#allocation2 + $0x80] sm:$0xff] }
 0x950   :  { %16754 = vmatmul.mubr.bf16.gmra.mrb[60].mxu1 %v11967_v1  ;;  %v12844_v1 = vld [vmem:[#allocation2 + $0x98] sm:$0xff] }
 0x951   :  { %16773 = vmatprep.mubr.bf16.mxu1 %v18182_v24  ;;  %v12925_v24 = vshrl.u32 %v12840_v7, 16  ;;  %v12999_v7 = vshll.u32 %v12852_v55, 16 }
 0x953   :  { %v13001_v3 = vrot.slane %v12999_v7, 1 }
 0x958   :  { %16774 = vmatmul.mubr.bf16.vlgmr.msra.gmra.mrb[0].mxu1 %v18183_v16  ;;  %v12922_v16 = vrot.slane %v12920_v25, 1 }
 0x959   :  { %16777 = vmatprep.mubr.bf16.mxu1 %v18184_v41  ;;  %16838 = vmatpush3.bf16.msra.mxu1 %v22222_v22  ;;  %v18085_v22 = vld [vmem:[%s23641_s2 + $0x220] sm:$0xff]   ;;  %v12939_v41 = vshll.u32 %v12842_v56, 16 }
 0x95a   :  { %16839 = vmatprep.subr.bf16.mxu1 %v18082_v42 }
 0x95d   :  { %16840 = vmatpush3.bf16.msra.mxu1 %v18082_v42  ;;  %v12918_v42 = vor.u32 %v12917_v28, %v12913_v52  ;;  %v12854_v28 = vld [vmem:[#allocation2 + $0x110] sm:$0xff] }
 0x95e   :  { %16841 = vmatprep.subr.bf16.mxu1 %v18083_v29  ;;  %v13011_v52 = vshll.u32 %v12854_v28, 16 }
 0x960   :  { %16778 = vmatmul.mubr.bf16.gmra.mrb[4].mxu1 %v18185_v36  ;;  %v12843_v36 = vld [vmem:[#allocation2 + $0x88] sm:$0x1] }
 0x961   :  { %16781 = vmatprep.mubr.bf16.mxu1 %v18186_v57  ;;  %16842 = vmatpush3.bf16.msra.mxu1 %v18083_v29  ;;  %v12930_v29 = vor.u32 %v12929_v32, %v12925_v24  ;;  %v12951_v57 = vshll.u32 %v12844_v1, 16  ;;  %v12997_v32 = vshrl.u32 %v12852_v55, 16  ;;  %v13006_v24 = vrot.slane %v13004_v63, 1 }
 0x962   :  { %16843 = vmatprep.subr.bf16.mxu1 %v18084_v20  ;;  %v13085_v63 = vrot.slane %v11772_v58, 1 }
 0x965   :  { %16844 = vmatpush3.bf16.msra.mxu1 %v18084_v20  ;;  %v12934_v20 = vrot.slane %v12932_v17, 1 }
 0x966   :  { %16845 = vmatprep.subr.bf16.mxu1 %v18085_v22 }
 0x968   :  { %16782 = vmatmul.mubr.bf16.gmra.mrb[8].mxu1 %v18187_v49  ;;  %v12941_v49 = vrot.slane %v12939_v41, 1  ;;  %v12857_v41 = vld [vmem:[#allocation2 + $0x130] sm:$0x1] }
 0x969   :  { %16785 = vmatprep.mubr.bf16.mxu1 %v18188_v14  ;;  %16846 = vmatpush3.bf16.msra.mxu1 %v18085_v22  ;;  %v12845_v22 = vld [vmem:[#allocation2 + $0xa0] sm:$0x1]  ;;  %v12944_v14 = vshll.u32 %v12843_v36, 16 }
 0x96a   :  { %16847 = vmatprep.subr.bf16.mxu1 %v18086_v12 }
 0x96d   :  { %16848 = vmatpush3.bf16.msra.mxu1 %v18086_v12  ;;  %v12923_v12 = vsel %vm1478_vm1, %v12918_v42, %v12922_v16  ;;  %v12855_v42 = vld [vmem:[#allocation2 + $0x118] sm:$0x1] }
 0x96e   :  { %16849 = vmatprep.subr.bf16.mxu1 %v18087_v46  ;;  %v13016_v36 = vshll.u32 %v12855_v42, 16  ;;  %v12872_v42 = vld [vmem:[#allocation2 + $0x218] sm:$0xff] }
 0x970   :  { %16786 = vmatmul.mubr.bf16.gmra.mrb[12].mxu1 %v18189_v48  ;;  %v12956_v48 = vshll.u32 %v12845_v22, 16 }
 0x971   :  { %16789 = vmatprep.mubr.bf16.mxu1 %v18190_v44  ;;  %16850 = vmatpush3.bf16.msra.mxu1 %v18087_v46  ;;  %v12935_v46 = vsel %vm1478_vm1, %v12930_v29, %v12934_v20  ;;  %v12846_v44 = vld [vmem:[#allocation2 + $0xb0] sm:$0xff]  ;;  %v13013_v20 = vrot.slane %v13011_v52, 1  ;;  %v12870_v52 = vld [vmem:[#allocation2 + $0x200] sm:$0xff] }
 0x972   :  { %16851 = vmatprep.subr.bf16.mxu1 %v18088_v61  ;;  %v13107_v58 = vshll.u32 %v12870_v52, 16 }
 0x975   :  { %16852 = vmatpush3.bf16.msra.mxu1 %v18088_v61  ;;  %v12953_v61 = vrot.slane %v12951_v57, 1 }
 0x978   :  { %16790 = vmatmul.mubr.bf16.gmra.mrb[16].mxu1 %v18191_v26  ;;  %v12937_v26 = vshrl.u32 %v12842_v56, 16 }
 0x979   :  { %16793 = vmatprep.mubr.bf16.mxu1 %v18192_v45  ;;  %v12848_v45 = vld [vmem:[#allocation2 + $0xc8] sm:$0xff] }
 0x97a   :  { %v12973_v11 = vshrl.u32 %v12848_v45, 16 }
 0x980   :  { %16794 = vmatmul.mubr.bf16.gmra.mrb[20].mxu1 %v18193_v18  ;;  %v12949_v18 = vshrl.u32 %v12844_v1, 16  ;;  %v13002_v1 = vor.u32 %v13001_v3, %v12997_v32  ;;  %v13095_v3 = vshll.u32 %v12868_v38, 16 }
 0x981   :  { %16797 = vmatprep.mubr.bf16.mxu1 %v18194_v4  ;;  %v12942_v4 = vor.u32 %v12941_v49, %v12937_v26  ;;  %v12858_v49 = vld [vmem:[#allocation2 + $0x140] sm:$0xff] }
 0x982   :  { %v13007_v57 = vsel %vm1478_vm1, %v13002_v1, %v13006_v24  ;;  %v13035_v26 = vshll.u32 %v12858_v49, 16  ;;  %v22331_v1 = vor.u32 %v13085_v63, %v11769_v27 }
 0x988   :  { %16798 = vmatmul.mubr.bf16.gmra.mrb[24].mxu1 %v18195_v39  ;;  %v12946_v39 = vrot.slane %v12944_v14, 1  ;;  %v13009_v14 = vshrl.u32 %v12854_v28, 16 }
 0x989   :  { %16801 = vmatprep.mubr.bf16.mxu1 %v18196_v9  ;;  %v12963_v9 = vshll.u32 %v12846_v44, 16 }
 0x990   :  { %16802 = vmatmul.mubr.bf16.gmra.mrb[28].mxu1 %v22235_v8 }
 0x991   :  { %16805 = vmatprep.mubr.bf16.mxu1 %v18197_v34  ;;  %v12954_v34 = vor.u32 %v12953_v61, %v12949_v18 }
 0x998   :  { %16806 = vmatmul.mubr.bf16.gmra.mrb[32].mxu1 %v18198_v54  ;;  %v12958_v54 = vrot.slane %v12956_v48, 1  ;;  %v13014_v48 = vor.u32 %v13013_v20, %v13009_v14  ;;  %v12871_v20 = vld [vmem:[#allocation2 + $0x208] sm:$0x1]  ;;  %v12874_v14 = vld [vmem:[#allocation2 + $0x230] sm:$0xff] }
 0x999   :  { %16809 = vmatprep.mubr.bf16.mxu1 %v18199_v50  ;;  %v12847_v50 = vld [vmem:[#allocation2 + $0xb8] sm:$0x1] }
 0x9a0   :  { %16810 = vmatmul.mubr.bf16.gmra.mrb[36].mxu1 %v18200_v35  ;;  %v12975_v35 = vshll.u32 %v12848_v45, 16 }
 0x9a1   :  { %16813 = vmatprep.mubr.bf16.mxu1 %v18201_v5  ;;  %v12849_v5 = vld [vmem:[#allocation2 + $0xd0] sm:$0x1] }
 0x9a8   :  { %16814 = vmatmul.mubr.bf16.gmra.mrb[40].mxu1 %v18202_v6  ;;  %v12947_v6 = vsel %vm1478_vm1, %v12942_v4, %v12946_v39  ;;  %v12859_v4 = vld [vmem:[#allocation2 + $0x148] sm:$0x1] }
 0x9a9   :  { %16817 = vmatprep.mubr.bf16.mxu1 %v18203_v37  ;;  %v12965_v37 = vrot.slane %v12963_v9, 1  ;;  %v12861_v9 = vld [vmem:[#allocation2 + $0x160] sm:$0x1] }
 0x9b0   :  { %16818 = vmatmul.mubr.bf16.gmra.mrb[44].mxu1 %v18204_v30  ;;  %v12968_v30 = vshll.u32 %v12847_v50, 16  ;;  %v13040_v50 = vshll.u32 %v12859_v4, 16 }
 0x9b1   :  { %16821 = vmatprep.mubr.bf16.mxu1 %v18205_v53  ;;  %v12959_v53 = vsel %vm1478_vm1, %v12954_v34, %v12958_v54  ;;  %v13037_v54 = vrot.slane %v13035_v26, 1 }
 0x9b8   :  { %16822 = vmatmul.mubr.bf16.gmra.mrb[48].mxu1 %v18206_v59  ;;  %v12977_v59 = vrot.slane %v12975_v35, 1 }
 0x9b9   :  { %16825 = vmatprep.mubr.bf16.mxu1 %v18207_v51  ;;  %v12980_v51 = vshll.u32 %v12849_v5, 16 }
 0x9ba   :  { %v12978_v43 = vor.u32 %v12977_v59, %v12973_v11  ;;  %v12863_v11 = vld [vmem:[#allocation2 + $0x178] sm:$0x1] }
 0x9bb   :  { %v12982_v47 = vrot.slane %v12980_v51, 1  ;;  %v13042_v51 = vrot.slane %v13040_v50, 1 }
 0x9bd   :  { %v12983_v10 = vsel %vm1478_vm1, %v12978_v43, %v12982_v47  ;;  %v13064_v43 = vshll.u32 %v12863_v11, 16 }
 0x9c0   :  { %16826 = vmatmul.mubr.bf16.gmra.mrb[52].mxu1 %v18208_v62  ;;  %v12850_v62 = vld [vmem:[#allocation2 + $0xe0] sm:$0xff] }
 0x9c1   :  { %16829 = vmatprep.mubr.bf16.mxu1 %v18209_v15  ;;  %v12961_v15 = vshrl.u32 %v12846_v44, 16  ;;  %v12987_v40 = vshll.u32 %v12850_v62, 16  ;;  %v12985_v25 = vshrl.u32 %v12850_v62, 16  ;;  %v13018_v44 = vrot.slane %v13016_v36, 1 }
 0x9c2   :  { %v13119_v36 = vshll.u32 %v12872_v42, 16 }
 0x9c3   :  { %v12966_v23 = vor.u32 %v12965_v37, %v12961_v15  ;;  %v12989_v31 = vrot.slane %v12987_v40, 1  ;;  %v13019_v34 = vsel %vm1478_vm1, %v13014_v48, %v13018_v44  ;;  %v12862_v37 = vld [vmem:[#allocation2 + $0x170] sm:$0xff]  ;;  %v13117_v48 = vshrl.u32 %v12872_v42, 16 }
 0x9c4   :  { %v13059_v62 = vshll.u32 %v12862_v37, 16  ;;  %v13057_v7 = vshrl.u32 %v12862_v37, 16 }
 0x9c5   :  { %v12990_v17 = vor.u32 %v12989_v31, %v12985_v25  ;;  %v12869_v25 = vld [vmem:[#allocation2 + $0x1f0] sm:$0x1] }
 0x9c6   :  { %v13061_v40 = vrot.slane %v13059_v62, 1 }
 0x9c8   :  { %16830 = vmatmul.mubr.bf16.gmra.mrb[56].mxu1 %v18210_v2  ;;  %v12970_v2 = vrot.slane %v12968_v30, 1  ;;  %v13033_v30 = vshrl.u32 %v12858_v49, 16  ;;  %v13062_v31 = vor.u32 %v13061_v40, %v13057_v7 }
 0x9c9   :  { %16833 = vmatprep.mubr.bf16.mxu1 %v18211_v19  ;;  %v12851_v19 = vld [vmem:[#allocation2 + $0xe8] sm:$0x1] }
 0x9ca   :  { %v12971_v60 = vsel %vm1478_vm1, %v12966_v23, %v12970_v2  ;;  %v12992_v21 = vshll.u32 %v12851_v19, 16  ;;  %v13038_v59 = vor.u32 %v13037_v54, %v13033_v30  ;;  %v12865_v23 = vld [vmem:[#allocation2 + $0x190] sm:$0x1]  ;;  %v12878_v30 = vld [vmem:[#allocation2 + $0x260] sm:$0xff] }
 0x9cb   :  { %v13076_v19 = vshll.u32 %v12865_v23, 16 }
 0x9cc   :  { %v12994_v56 = vrot.slane %v12992_v21, 1  ;;  %v13043_v2 = vsel %vm1478_vm1, %v13038_v59, %v13042_v51  ;;  %v13066_v21 = vrot.slane %v13064_v43, 1  ;;  %v12880_v59 = vld [vmem:[#allocation2 + $0x278] sm:$0xff]  ;;  %v12881_v43 = vld [vmem:[#allocation2 + $0x280] sm:$0x1] }
 0x9cd   :  { %v13167_v40 = vshll.u32 %v12880_v59, 16  ;;  %v13165_v63 = vshrl.u32 %v12880_v59, 16 }
 0x9ce   :  { %v12995_v29 = vsel %vm1478_vm1, %v12990_v17, %v12994_v56  ;;  %v13097_v17 = vrot.slane %v13095_v3, 1  ;;  %v13100_v56 = vshll.u32 %v12869_v25, 16  ;;  %v12884_v3 = vld [vmem:[#allocation2 + $0x2a8] sm:$0xff] }
 0x9d0   :  { %16834 = vmatmul.mubr.bf16.gmra.mrb[60].mxu1 %v22235_v8  ;;  %v13121_v8 = vrot.slane %v13119_v36, 1  ;;  %v12886_v36 = vld [vmem:[#allocation2 + $0x2c0] sm:$0xff] }
 0x9d1   :  { %16853 = vmatprep.mubr.bf16.mxu1 %v12911_v0  ;;  %v12856_v0 = vld [vmem:[#allocation2 + $0x128] sm:$0xff] }
 0x9d2   :  { %v13023_v16 = vshll.u32 %v12856_v0, 16  ;;  %v13021_v61 = vshrl.u32 %v12856_v0, 16  ;;  %v13067_v0 = vsel %vm1478_vm1, %v13062_v31, %v13066_v21  ;;  %v13172_v31 = vshll.u32 %v12881_v43, 16  ;;  %v12882_v21 = vld [vmem:[#allocation2 + $0x290] sm:$0xff] }
 0x9d4   :  { %v13025_v22 = vrot.slane %v13023_v16, 1  ;;  %v13093_v16 = vshrl.u32 %v12868_v38, 16 }
 0x9d6   :  { %v13026_v45 = vor.u32 %v13025_v22, %v13021_v61  ;;  %v13109_v22 = vrot.slane %v13107_v58, 1  ;;  %v12876_v61 = vld [vmem:[#allocation2 + $0x248] sm:$0xff] }
 0x9d7   :  { %v13141_v51 = vshrl.u32 %v12876_v61, 16 }
 0x9d8   :  { %16854 = vmatmul.mubr.bf16.vlgmr.msra.gmra.mrb[0].mxu1 %v12923_v12  ;;  %v13028_v12 = vshll.u32 %v12857_v41, 16  ;;  %v13098_v41 = vor.u32 %v13097_v17, %v13093_v16  ;;  %v13174_v17 = vrot.slane %v13172_v31, 1 }
 0x9d9   :  { %16857 = vmatprep.mubr.bf16.mxu1 %v12935_v46  ;;  %v12860_v46 = vld [vmem:[#allocation2 + $0x158] sm:$0xff] }
 0x9da   :  { %v13030_v18 = vrot.slane %v13028_v12, 1  ;;  %v13047_v39 = vshll.u32 %v12860_v46, 16  ;;  %v13112_v12 = vshll.u32 %v12871_v20, 16 }
 0x9dc   :  { %v13031_v35 = vsel %vm1478_vm1, %v13026_v45, %v13030_v18  ;;  %v13049_v5 = vrot.slane %v13047_v39, 1  ;;  %v13114_v26 = vrot.slane %v13112_v12, 1  ;;  %v13131_v45 = vshll.u32 %v12874_v14, 16  ;;  %v12875_v39 = vld [vmem:[#allocation2 + $0x238] sm:$0x1] }
 0x9dd   :  { %v13122_v18 = vor.u32 %v13121_v8, %v13117_v48  ;;  %v13203_v8 = vshll.u32 %v12886_v36, 16  ;;  %v12889_v48 = vld [vmem:[#allocation2 + $0x2e0] sm:$0x1] }
 0x9de   :  { %v13133_v50 = vrot.slane %v13131_v45, 1 }
 0x9e0   :  { %16858 = vmatmul.mubr.bf16.gmra.mrb[4].mxu1 %v12947_v6  ;;  %v13052_v6 = vshll.u32 %v12861_v9, 16  ;;  %v13143_v9 = vshll.u32 %v12876_v61, 16 }
 0x9e1   :  { %16861 = vmatprep.mubr.bf16.mxu1 %v12959_v53  ;;  %v13045_v53 = vshrl.u32 %v12860_v46, 16  ;;  %v13105_v46 = vshrl.u32 %v12870_v52, 16  ;;  %v13191_v52 = vshll.u32 %v12884_v3, 16 }
 0x9e2   :  { %v13054_v55 = vrot.slane %v13052_v6, 1  ;;  %v13145_v6 = vrot.slane %v13143_v9, 1  ;;  %v12890_v9 = vld [vmem:[#allocation2 + $0x2f0] sm:$0xff] }
 0x9e3   :  { %v13050_v15 = vor.u32 %v13049_v5, %v13045_v53  ;;  %v13110_v44 = vor.u32 %v13109_v22, %v13105_v46  ;;  %v13129_v53 = vshrl.u32 %v12874_v14, 16  ;;  %v13189_v22 = vshrl.u32 %v12884_v3, 16  ;;  %v12887_v46 = vld [vmem:[#allocation2 + $0x2c8] sm:$0x1] }
 0x9e4   :  { %v13146_v11 = vor.u32 %v13145_v6, %v13141_v51  ;;  %v13208_v45 = vshll.u32 %v12887_v46, 16  ;;  %v13227_v6 = vshll.u32 %v12890_v9, 16  ;;  %v12893_v51 = vld [vmem:[#allocation2 + $0x310] sm:$0x1]  ;;  %v13225_v43 = vshrl.u32 %v12890_v9, 16 }
 0x9e5   :  { %v13055_v47 = vsel %vm1478_vm1, %v13050_v15, %v13054_v55  ;;  %v13115_v54 = vsel %vm1478_vm1, %v13110_v44, %v13114_v26  ;;  %v13134_v62 = vor.u32 %v13133_v50, %v13129_v53  ;;  %v13155_v55 = vshll.u32 %v12878_v30, 16  ;;  %v12891_v53 = vld [vmem:[#allocation2 + $0x2f8] sm:$0x1] }
 0x9e6   :  { %v13205_v26 = vrot.slane %v13203_v8, 1 }
 0x9e8   :  { %16862 = vmatmul.mubr.bf16.gmra.mrb[8].mxu1 %v12971_v60  ;;  %v12867_v60 = vld [vmem:[#allocation2 + $0x1a8] sm:$0x1] }
 0x9e9   :  { %16865 = vmatprep.mubr.bf16.mxu1 %v12983_v10  ;;  %v13078_v10 = vrot.slane %v13076_v19, 1  ;;  %v13088_v28 = vshll.u32 %v12867_v60, 16  ;;  %v13157_v19 = vrot.slane %v13155_v55, 1  ;;  %v13169_v60 = vrot.slane %v13167_v40, 1  ;;  %v12894_v40 = vld [vmem:[#allocation2 + $0x320] sm:$0xff] }
 0x9ea   :  { %v13232_v55 = vshll.u32 %v12891_v53, 16 }
 0x9eb   :  { %v13079_v32 = vsel %vm1478_vm1, %v21690_v33, %v13078_v10  ;;  %v13090_v24 = vrot.slane %v13088_v28, 1  ;;  %v12873_v33 = vld [vmem:[#allocation2 + $0x220] sm:$0x1]  ;;  %v13153_v10 = vshrl.u32 %v12878_v30, 16 }
 0x9ec   :  { %v13124_v27 = vshll.u32 %v12873_v33, 16  ;;  %v12888_v33 = vld [vmem:[#allocation2 + $0x2d8] sm:$0xff] }
 0x9ed   :  { %v13158_v28 = vor.u32 %v13157_v19, %v13153_v10  ;;  %v13215_v61 = vshll.u32 %v12888_v33, 16  ;;  %v13213_v50 = vshrl.u32 %v12888_v33, 16  ;;  %v12897_v10 = vld [vmem:[#allocation2 + $0x340] sm:$0x1] }
 0x9ee   :  { %v13126_v4 = vrot.slane %v13124_v27, 1 }
 0x9f0   :  { %16866 = vmatmul.mubr.bf16.gmra.mrb[12].mxu1 %v12995_v29  ;;  %v13102_v29 = vrot.slane %v13100_v56, 1  ;;  %v13127_v5 = vsel %vm1478_vm1, %v13122_v18, %v13126_v4  ;;  %v12883_v56 = vld [vmem:[#allocation2 + $0x298] sm:$0x1]  ;;  %v13217_v4 = vrot.slane %v13215_v61, 1 }
 0x9f1   :  { %16869 = vmatprep.mubr.bf16.mxu1 %v13007_v57  ;;  %v13091_v57 = vsel %vm1478_vm1, %v22331_v1, %v13090_v24  ;;  %v12885_v24 = vld [vmem:[#allocation2 + $0x2b0] sm:$0x1]  ;;  %v13184_v58 = vshll.u32 %v12883_v56, 16 }
 0x9f2   :  { %v13103_v49 = vsel %vm1478_vm1, %v13098_v41, %v13102_v29  ;;  %v13193_v29 = vrot.slane %v13191_v52, 1  ;;  %v13196_v20 = vshll.u32 %v12885_v24, 16 }
 0x9f4   :  { %v13194_v27 = vor.u32 %v13193_v29, %v13189_v22  ;;  %v13198_v14 = vrot.slane %v13196_v20, 1 }
 0x9f6   :  { %v13199_v18 = vsel %vm1478_vm1, %v13194_v27, %v13198_v14 }
 0x9f8   :  { %16870 = vmatmul.mubr.bf16.gmra.mrb[16].mxu1 %v13019_v34  ;;  %v12877_v34 = vld [vmem:[#allocation2 + $0x250] sm:$0x1] }
 0x9f9   :  { %16873 = vmatprep.mubr.bf16.mxu1 %v13031_v35  ;;  %v13136_v35 = vshll.u32 %v12875_v39, 16  ;;  %v13148_v37 = vshll.u32 %v12877_v34, 16  ;;  %v13220_v39 = vshll.u32 %v12889_v48, 16  ;;  %v13201_v34 = vshrl.u32 %v12886_v36, 16 }
 0x9fb   :  { %v13138_v15 = vrot.slane %v13136_v35, 1  ;;  %v13150_v23 = vrot.slane %v13148_v37, 1  ;;  %v13206_v35 = vor.u32 %v13205_v26, %v13201_v34  ;;  %v13218_v37 = vor.u32 %v13217_v4, %v13213_v50 }
 0x9fc   :  { %v13222_v30 = vrot.slane %v13220_v39, 1 }
 0x9fd   :  { %v13151_v38 = vsel %vm1478_vm1, %v13146_v11, %v13150_v23 }
 0x9fe   :  { %v13223_v11 = vsel %vm1478_vm1, %v13218_v37, %v13222_v30 }
 0xa00   :  { %16874 = vmatmul.mubr.bf16.gmra.mrb[20].mxu1 %v13043_v2  ;;  %v12879_v2 = vld [vmem:[#allocation2 + $0x268] sm:$0x1] }
 0xa01   :  { %16877 = vmatprep.mubr.bf16.mxu1 %v13055_v47  ;;  %v13139_v47 = vsel %vm1478_vm1, %v13134_v62, %v13138_v15  ;;  %v13160_v7 = vshll.u32 %v12879_v2, 16  ;;  %v13229_v15 = vrot.slane %v13227_v6, 1  ;;  %v13244_v2 = vshll.u32 %v12893_v51, 16 }
 0xa03   :  { %v13162_v25 = vrot.slane %v13160_v7, 1  ;;  %v13230_v19 = vor.u32 %v13229_v15, %v13225_v43  ;;  %v13234_v7 = vrot.slane %v13232_v55, 1  ;;  %v13246_v31 = vrot.slane %v13244_v2, 1 }
 0xa05   :  { %v13163_v42 = vsel %vm1478_vm1, %v13158_v28, %v13162_v25  ;;  %v13235_v3 = vsel %vm1478_vm1, %v13230_v19, %v13234_v7 }
 0xa08   :  { %16878 = vmatmul.mubr.bf16.gmra.mrb[24].mxu1 %v13067_v0  ;;  %v13179_v0 = vshll.u32 %v12882_v21, 16 }
 0xa09   :  { %16881 = vmatprep.mubr.bf16.mxu1 %v13079_v32  ;;  %v13170_v32 = vor.u32 %v13169_v60, %v13165_v63 }
 0xa0a   :  { %v13181_v16 = vrot.slane %v13179_v0, 1  ;;  %v13268_v0 = vshll.u32 %v12897_v10, 16 }
 0xa0b   :  { %v13175_v41 = vsel %vm1478_vm1, %v13170_v32, %v13174_v17  ;;  %v13249_v32 = vshrl.u32 %v12894_v40, 16  ;;  %v12899_v17 = vld [vmem:[#allocation2 + $0x358] sm:$0x1] }
 0xa0c   :  { %v13270_v24 = vrot.slane %v13268_v0, 1 }
 0xa10   :  { %16882 = vmatmul.mubr.bf16.gmra.mrb[28].mxu1 %v13091_v57  ;;  %v13177_v57 = vshrl.u32 %v12882_v21, 16  ;;  %v12895_v21 = vld [vmem:[#allocation2 + $0x328] sm:$0x1] }
 0xa11   :  { %16885 = vmatprep.mubr.bf16.mxu1 %v13103_v49  ;;  %v13186_v49 = vrot.slane %v13184_v58, 1  ;;  %v13256_v28 = vshll.u32 %v12895_v21, 16  ;;  %v13271_v58 = vsel %vm1478_vm1, %v21748_v13, %v13270_v24 }
 0xa12   :  { %v13182_v12 = vor.u32 %v13181_v16, %v13177_v57 }
 0xa13   :  { %v13258_v52 = vrot.slane %v13256_v28, 1 }
 0xa14   :  { %v13187_v44 = vsel %vm1478_vm1, %v13182_v12, %v13186_v49 }
 0xa18   :  { %16886 = vmatmul.mubr.bf16.gmra.mrb[32].mxu1 %v13115_v54  ;;  %v12892_v54 = vld [vmem:[#allocation2 + $0x308] sm:$0xff] }
 0xa19   :  { %16889 = vmatprep.mubr.bf16.mxu1 %v13127_v5  ;;  %v13210_v5 = vrot.slane %v13208_v45, 1  ;;  %v13239_v59 = vshll.u32 %v12892_v54, 16 }
 0xa1b   :  { %v13211_v62 = vsel %vm1478_vm1, %v13206_v35, %v13210_v5  ;;  %v13241_v23 = vrot.slane %v13239_v59, 1 }
 0xa20   :  { %16890 = vmatmul.mubr.bf16.gmra.mrb[36].mxu1 %v13139_v47  ;;  %v13237_v47 = vshrl.u32 %v12892_v54, 16 }
 0xa21   :  { %16893 = vmatprep.mubr.bf16.mxu1 %v13151_v38  ;;  %v13251_v38 = vshll.u32 %v12894_v40, 16 }
 0xa22   :  { %v13242_v60 = vor.u32 %v13241_v23, %v13237_v47 }
 0xa23   :  { %v13253_v63 = vrot.slane %v13251_v38, 1 }
 0xa24   :  { %v13247_v25 = vsel %vm1478_vm1, %v13242_v60, %v13246_v31 }
 0xa25   :  { %v13254_v56 = vor.u32 %v13253_v63, %v13249_v32 }
 0xa27   :  { %v13259_v16 = vsel %vm1478_vm1, %v13254_v56, %v13258_v52 }
 0xa28   :  { %16894 = vmatmul.mubr.bf16.gmra.mrb[40].mxu1 %v13163_v42  ;;  %v13280_v42 = vshll.u32 %v12899_v17, 16 }
 0xa29   :  { %16897 = vmatprep.mubr.bf16.mxu1 %v13175_v41 }
 0xa2a   :  { %v13282_v41 = vrot.slane %v13280_v42, 1 }
 0xa2c   :  { %v13283_v29 = vsel %vm1478_vm1, %v22331_v1, %v13282_v41 }
 0xa30   :  { %16898 = vmatmul.mubr.bf16.gmra.mrb[44].mxu1 %v13187_v44 }
 0xa31   :  { %16901 = vmatprep.mubr.bf16.mxu1 %v13199_v18 }
 0xa38   :  { %16902 = vmatmul.mubr.bf16.gmra.mrb[48].mxu1 %v13211_v62 }
 0xa39   :  { %16905 = vmatprep.mubr.bf16.mxu1 %v13223_v11 }
 0xa40   :  { %16906 = vmatmul.mubr.bf16.gmra.mrb[52].mxu1 %v13235_v3 }
 0xa41   :  { %16909 = vmatprep.mubr.bf16.mxu1 %v13247_v25 }
 0xa48   :  { %16910 = vmatmul.mubr.bf16.gmra.mrb[56].mxu1 %v13259_v16 }
 0xa49   :  { %16913 = vmatprep.mubr.bf16.mxu1 %v13271_v58 }
 0xa50   :  { %16914 = vmatmul.mubr.bf16.gmra.mrb[60].mxu1 %v13283_v29 }
 0xaab   :  { %v22353_v20 = vpop.f32.mrb[0].mxu1 }
 0xaac   :  { %v22355_v36 = vpop.f32.mrb[1].mxu1  ;;  %v13805_v1 = vmul.f32 %v22353_v20, %v22353_v20 }
 0xaad   :  { %v22357_v57 = vpop.f32.mrb[2].mxu1  ;;  %v13803_v22 = vmul.f32 %v22355_v36, %v22355_v36 }
 0xaae   :  { %v22359_v33 = vpop.f32.mrb[3].mxu1  ;;  %v13806_v27 = vmul.f32 %v22357_v57, %v22357_v57 }
 0xaaf   :  { %v13734_v13 = vadd.f32 %v22359_v33, %v22355_v36  ;;  %v13804_v12 = vmul.f32 %v22359_v33, %v22359_v33 }
 0xab1   :  { %v13735_v49 = vadd.f32 %v22353_v20, %v13734_v13  ;;  %v13867_v8 = vadd.f32 %v13804_v12, %v13803_v22 }
 0xab3   :  { %v13868_v14 = vadd.f32 %v13867_v8, %v13805_v1  ;;  %v22372_v46 = vpop.f32.mrb[4].mxu1  ;;  %v13736_v61 = vadd.f32 %v22357_v57, %v13735_v49 }
 0xab4   :  { %v22375_v48 = vpop.f32.mrb[5].mxu1  ;;  %v13809_v54 = vmul.f32 %v22372_v46, %v22372_v46 }
 0xab5   :  { %v13737_v44 = vadd.f32 %v13736_v61, %v22375_v48  ;;  %v13807_v26 = vmul.f32 %v22375_v48, %v22375_v48  ;;  %v13869_v45 = vadd.f32 %v13868_v14, %v13806_v27  ;;  %v22380_v18 = vpop.f32.mrb[6].mxu1 }
 0xab6   :  { %v22382_v4 = vpop.f32.mrb[7].mxu1  ;;  %v13810_v5 = vmul.f32 %v22380_v18, %v22380_v18 }
 0xab7   :  { %v13870_v39 = vadd.f32 %v13869_v45, %v13807_v26  ;;  %v13738_v9 = vadd.f32 %v13737_v44, %v22382_v4  ;;  %v13808_v34 = vmul.f32 %v22382_v4, %v22382_v4 }
 0xab9   :  { %v13739_v50 = vadd.f32 %v22372_v46, %v13738_v9  ;;  %v13871_v35 = vadd.f32 %v13870_v39, %v13808_v34 }
 0xabb   :  { %v13872_v6 = vadd.f32 %v13871_v35, %v13809_v54  ;;  %v22392_v37 = vpop.f32.mrb[8].mxu1  ;;  %v13740_v30 = vadd.f32 %v22380_v18, %v13739_v50 }
 0xabc   :  { %v22395_v53 = vpop.f32.mrb[9].mxu1  ;;  %v13813_v40 = vmul.f32 %v22392_v37, %v22392_v37 }
 0xabd   :  { %v13741_v59 = vadd.f32 %v13740_v30, %v22395_v53  ;;  %v13811_v51 = vmul.f32 %v22395_v53, %v22395_v53  ;;  %v13873_v62 = vadd.f32 %v13872_v6, %v13810_v5  ;;  %v22400_v15 = vpop.f32.mrb[10].mxu1 }
 0xabe   :  { %v22402_v55 = vpop.f32.mrb[11].mxu1  ;;  %v13814_v19 = vmul.f32 %v22400_v15, %v22400_v15 }
 0xabf   :  { %v13874_v11 = vadd.f32 %v13873_v62, %v13811_v51  ;;  %v13742_v23 = vadd.f32 %v13741_v59, %v22402_v55  ;;  %v13812_v2 = vmul.f32 %v22402_v55, %v22402_v55 }
 0xac1   :  { %v13743_v43 = vadd.f32 %v22392_v37, %v13742_v23  ;;  %v13875_v47 = vadd.f32 %v13874_v11, %v13812_v2 }
 0xac3   :  { %v13876_v7 = vadd.f32 %v13875_v47, %v13813_v40  ;;  %v22412_v38 = vpop.f32.mrb[12].mxu1  ;;  %v13744_v60 = vadd.f32 %v22400_v15, %v13743_v43 }
 0xac4   :  { %v22415_v31 = vpop.f32.mrb[13].mxu1  ;;  %v13817_v17 = vmul.f32 %v22412_v38, %v22412_v38 }
 0xac5   :  { %v13745_v21 = vadd.f32 %v13744_v60, %v22415_v31  ;;  %v13815_v10 = vmul.f32 %v22415_v31, %v22415_v31  ;;  %v13877_v3 = vadd.f32 %v13876_v7, %v13814_v19  ;;  %v22420_v63 = vpop.f32.mrb[14].mxu1 }
 0xac6   :  { %v22422_v28 = vpop.f32.mrb[15].mxu1  ;;  %v13818_v24 = vmul.f32 %v22420_v63, %v22420_v63 }
 0xac7   :  { %v13878_v25 = vadd.f32 %v13877_v3, %v13815_v10  ;;  %v13746_v0 = vadd.f32 %v13745_v21, %v22422_v28  ;;  %v13816_v32 = vmul.f32 %v22422_v28, %v22422_v28 }
 0xac9   :  { %v13747_v56 = vadd.f32 %v22412_v38, %v13746_v0  ;;  %v13879_v52 = vadd.f32 %v13878_v25, %v13816_v32 }
 0xacb   :  { %v13880_v42 = vadd.f32 %v13879_v52, %v13817_v17  ;;  %v22432_v16 = vpop.f32.mrb[16].mxu1  ;;  %v13748_v58 = vadd.f32 %v22420_v63, %v13747_v56 }
 0xacc   :  { %v22435_v41 = vpop.f32.mrb[17].mxu1  ;;  %v13821_v14 = vmul.f32 %v22432_v16, %v22432_v16 }
 0xacd   :  { %v13749_v29 = vadd.f32 %v13748_v58, %v22435_v41  ;;  %v13819_v22 = vmul.f32 %v22435_v41, %v22435_v41  ;;  %v13881_v13 = vadd.f32 %v13880_v42, %v13818_v24  ;;  %v22440_v12 = vpop.f32.mrb[18].mxu1 }
 0xace   :  { %v22442_v1 = vpop.f32.mrb[19].mxu1  ;;  %v13822_v26 = vmul.f32 %v22440_v12, %v22440_v12 }
 0xacf   :  { %v13882_v49 = vadd.f32 %v13881_v13, %v13819_v22  ;;  %v13750_v8 = vadd.f32 %v13749_v29, %v22442_v1  ;;  %v13820_v27 = vmul.f32 %v22442_v1, %v22442_v1 }
 0xad1   :  { %v13751_v61 = vadd.f32 %v22432_v16, %v13750_v8  ;;  %v13883_v44 = vadd.f32 %v13882_v49, %v13820_v27 }
 0xad3   :  { %v13884_v45 = vadd.f32 %v13883_v44, %v13821_v14  ;;  %v22452_v39 = vpop.f32.mrb[20].mxu1  ;;  %v13752_v9 = vadd.f32 %v22440_v12, %v13751_v61 }
 0xad4   :  { %v22455_v34 = vpop.f32.mrb[21].mxu1  ;;  %v13825_v62 = vmul.f32 %v22452_v39, %v22452_v39 }
 0xad5   :  { %v13753_v54 = vadd.f32 %v13752_v9, %v22455_v34  ;;  %v13823_v50 = vmul.f32 %v22455_v34, %v22455_v34  ;;  %v13885_v35 = vadd.f32 %v13884_v45, %v13822_v26  ;;  %v22460_v5 = vpop.f32.mrb[22].mxu1 }
 0xad6   :  { %v22462_v6 = vpop.f32.mrb[23].mxu1  ;;  %v13826_v2 = vmul.f32 %v22460_v5, %v22460_v5 }
 0xad7   :  { %v13886_v30 = vadd.f32 %v13885_v35, %v13823_v50  ;;  %v13754_v59 = vadd.f32 %v13753_v54, %v22462_v6  ;;  %v13824_v51 = vmul.f32 %v22462_v6, %v22462_v6 }
 0xad9   :  { %v13755_v11 = vadd.f32 %v22452_v39, %v13754_v59  ;;  %v13887_v23 = vadd.f32 %v13886_v30, %v13824_v51 }
 0xadb   :  { %v13888_v40 = vadd.f32 %v13887_v23, %v13825_v62  ;;  %v22472_v43 = vpop.f32.mrb[24].mxu1  ;;  %v13756_v47 = vadd.f32 %v22460_v5, %v13755_v11 }
 0xadc   :  { %v22475_v19 = vpop.f32.mrb[25].mxu1  ;;  %v13829_v17 = vmul.f32 %v22472_v43, %v22472_v43 }
 0xadd   :  { %v13757_v7 = vadd.f32 %v13756_v47, %v22475_v19  ;;  %v13827_v60 = vmul.f32 %v22475_v19, %v22475_v19  ;;  %v13889_v21 = vadd.f32 %v13888_v40, %v13826_v2  ;;  %v22480_v10 = vpop.f32.mrb[26].mxu1 }
 0xade   :  { %v22482_v3 = vpop.f32.mrb[27].mxu1  ;;  %v13830_v24 = vmul.f32 %v22480_v10, %v22480_v10 }
 0xadf   :  { %v13890_v25 = vadd.f32 %v13889_v21, %v13827_v60  ;;  %v13758_v0 = vadd.f32 %v13757_v7, %v22482_v3  ;;  %v13828_v32 = vmul.f32 %v22482_v3, %v22482_v3 }
 0xae1   :  { %v13759_v56 = vadd.f32 %v22472_v43, %v13758_v0  ;;  %v13891_v52 = vadd.f32 %v13890_v25, %v13828_v32 }
 0xae3   :  { %v13892_v42 = vadd.f32 %v13891_v52, %v13829_v17  ;;  %v22492_v58 = vpop.f32.mrb[28].mxu1  ;;  %v13760_v29 = vadd.f32 %v22480_v10, %v13759_v56 }
 0xae4   :  { %v22495_v22 = vpop.f32.mrb[29].mxu1  ;;  %v13833_v45 = vmul.f32 %v22492_v58, %v22492_v58 }
 0xae5   :  { %v13761_v13 = vadd.f32 %v13760_v29, %v22495_v22  ;;  %v13831_v49 = vmul.f32 %v22495_v22, %v22495_v22  ;;  %v13893_v8 = vadd.f32 %v13892_v42, %v13830_v24  ;;  %v22500_v27 = vpop.f32.mrb[30].mxu1 }
 0xae6   :  { %v22502_v14 = vpop.f32.mrb[31].mxu1  ;;  %v13834_v50 = vmul.f32 %v22500_v27, %v22500_v27 }
 0xae7   :  { %v13894_v61 = vadd.f32 %v13893_v8, %v13831_v49  ;;  %v13762_v44 = vadd.f32 %v13761_v13, %v22502_v14  ;;  %v13832_v26 = vmul.f32 %v22502_v14, %v22502_v14 }
 0xae9   :  { %v13763_v9 = vadd.f32 %v22492_v58, %v13762_v44  ;;  %v13895_v54 = vadd.f32 %v13894_v61, %v13832_v26 }
 0xaeb   :  { %v13896_v35 = vadd.f32 %v13895_v54, %v13833_v45  ;;  %v22512_v30 = vpop.f32.mrb[32].mxu1  ;;  %v13764_v59 = vadd.f32 %v22500_v27, %v13763_v9 }
 0xaec   :  { %v22515_v51 = vpop.f32.mrb[33].mxu1  ;;  %v13837_v21 = vmul.f32 %v22512_v30, %v22512_v30 }
 0xaed   :  { %v13765_v62 = vadd.f32 %v13764_v59, %v22515_v51  ;;  %v13835_v11 = vmul.f32 %v22515_v51, %v22515_v51  ;;  %v13897_v23 = vadd.f32 %v13896_v35, %v13834_v50  ;;  %v22520_v2 = vpop.f32.mrb[34].mxu1 }
 0xaee   :  { %v22522_v40 = vpop.f32.mrb[35].mxu1  ;;  %v13838_v32 = vmul.f32 %v22520_v2, %v22520_v2 }
 0xaef   :  { %v13898_v47 = vadd.f32 %v13897_v23, %v13835_v11  ;;  %v13766_v7 = vadd.f32 %v13765_v62, %v22522_v40  ;;  %v13836_v60 = vmul.f32 %v22522_v40, %v22522_v40 }
 0xaf1   :  { %v13767_v25 = vadd.f32 %v22512_v30, %v13766_v7  ;;  %v13899_v0 = vadd.f32 %v13898_v47, %v13836_v60 }
 0xaf3   :  { %v13900_v17 = vadd.f32 %v13899_v0, %v13837_v21  ;;  %v22532_v56 = vpop.f32.mrb[36].mxu1  ;;  %v13768_v52 = vadd.f32 %v22520_v2, %v13767_v25 }
 0xaf4   :  { %24434 = vst [vmem:[#allocation7_spill] sm:$0xff] %v22532_v56  ;;  %v22535_v24 = vpop.f32.mrb[37].mxu1  ;;  %v13841_v45 = vmul.f32 %v22532_v56, %v22532_v56 }
 0xaf5   :  { %v13769_v42 = vadd.f32 %v13768_v52, %v22535_v24  ;;  %v13839_v29 = vmul.f32 %v22535_v24, %v22535_v24  ;;  %v13901_v13 = vadd.f32 %v13900_v17, %v13838_v32  ;;  %v22540_v49 = vpop.f32.mrb[38].mxu1 }
 0xaf6   :  { %24435 = vst [vmem:[#allocation12_spill] sm:$0xff] %v22540_v49  ;;  %v22542_v8 = vpop.f32.mrb[39].mxu1  ;;  %v13842_v50 = vmul.f32 %v22540_v49, %v22540_v49 }
 0xaf7   :  { %v13902_v61 = vadd.f32 %v13901_v13, %v13839_v29  ;;  %v13770_v44 = vadd.f32 %v13769_v42, %v22542_v8  ;;  %v13840_v26 = vmul.f32 %v22542_v8, %v22542_v8 }
 0xaf9   :  { %v13771_v9 = vadd.f32 %v22532_v56, %v13770_v44  ;;  %v13903_v54 = vadd.f32 %v13902_v61, %v13840_v26 }
 0xafb   :  { %v13904_v35 = vadd.f32 %v13903_v54, %v13841_v45  ;;  %v22552_v59 = vpop.f32.mrb[40].mxu1  ;;  %v13772_v62 = vadd.f32 %v22540_v49, %v13771_v9 }
 0xafc   :  { %24436 = vst [vmem:[#allocation14_spill] sm:$0xff] %v22552_v59  ;;  %v22555_v11 = vpop.f32.mrb[41].mxu1  ;;  %v13845_v17 = vmul.f32 %v22552_v59, %v22552_v59 }
 0xafd   :  { %24437 = vst [vmem:[#allocation13_spill] sm:$0xff] %v22555_v11  ;;  %v13773_v23 = vadd.f32 %v13772_v62, %v22555_v11  ;;  %v13843_v47 = vmul.f32 %v22555_v11, %v22555_v11  ;;  %v13905_v7 = vadd.f32 %v13904_v35, %v13842_v50  ;;  %v22560_v60 = vpop.f32.mrb[42].mxu1 }
 0xafe   :  { %24438 = vst [vmem:[#allocation18_spill] sm:$0xff] %v22560_v60  ;;  %v22562_v21 = vpop.f32.mrb[43].mxu1  ;;  %v13846_v29 = vmul.f32 %v22560_v60, %v22560_v60 }
 0xaff   :  { %24439 = vst [vmem:[#allocation17_spill] sm:$0xff] %v22562_v21  ;;  %v13906_v25 = vadd.f32 %v13905_v7, %v13843_v47  ;;  %v13774_v0 = vadd.f32 %v13773_v23, %v22562_v21  ;;  %v13844_v32 = vmul.f32 %v22562_v21, %v22562_v21 }
 0xb01   :  { %v13775_v52 = vadd.f32 %v22552_v59, %v13774_v0  ;;  %v13907_v42 = vadd.f32 %v13906_v25, %v13844_v32 }
 0xb03   :  { %v13908_v13 = vadd.f32 %v13907_v42, %v13845_v17  ;;  %v22572_v61 = vpop.f32.mrb[44].mxu1  ;;  %v13776_v44 = vadd.f32 %v22560_v60, %v13775_v52 }
 0xb04   :  { %24440 = vst [vmem:[#allocation25_spill] sm:$0xff] %v22572_v61  ;;  %v22575_v26 = vpop.f32.mrb[45].mxu1  ;;  %v13849_v7 = vmul.f32 %v22572_v61, %v22572_v61 }
 0xb05   :  { %24441 = vst [vmem:[#allocation22_spill] sm:$0xff] %v22575_v26  ;;  %v13777_v45 = vadd.f32 %v13776_v44, %v22575_v26  ;;  %v13847_v9 = vmul.f32 %v22575_v26, %v22575_v26  ;;  %v13909_v54 = vadd.f32 %v13908_v13, %v13846_v29  ;;  %v22580_v50 = vpop.f32.mrb[46].mxu1 }
 0xb06   :  { %24442 = vst [vmem:[#allocation27_spill] sm:$0xff] %v22580_v50  ;;  %v22582_v35 = vpop.f32.mrb[47].mxu1  ;;  %v13850_v32 = vmul.f32 %v22580_v50, %v22580_v50 }
 0xb07   :  { %24443 = vst [vmem:[#allocation29_spill] sm:$0xff] %v22582_v35  ;;  %v13910_v62 = vadd.f32 %v13909_v54, %v13847_v9  ;;  %v13778_v23 = vadd.f32 %v13777_v45, %v22582_v35  ;;  %v13848_v47 = vmul.f32 %v22582_v35, %v22582_v35 }
 0xb09   :  { %v13779_v25 = vadd.f32 %v22572_v61, %v13778_v23  ;;  %v13911_v0 = vadd.f32 %v13910_v62, %v13848_v47 }
 0xb0b   :  { %v13912_v17 = vadd.f32 %v13911_v0, %v13849_v7  ;;  %v22592_v52 = vpop.f32.mrb[48].mxu1  ;;  %v13780_v42 = vadd.f32 %v22580_v50, %v13779_v25 }
 0xb0c   :  { %24444 = vst [vmem:[#allocation21_spill] sm:$0xff] %v22592_v52  ;;  %v22595_v29 = vpop.f32.mrb[49].mxu1  ;;  %v13853_v7 = vmul.f32 %v22592_v52, %v22592_v52 }
 0xb0d   :  { %24445 = vst [vmem:[#allocation28_spill] sm:$0xff] %v22595_v29  ;;  %v13781_v13 = vadd.f32 %v13780_v42, %v22595_v29  ;;  %v13851_v44 = vmul.f32 %v22595_v29, %v22595_v29  ;;  %v13913_v45 = vadd.f32 %v13912_v17, %v13850_v32  ;;  %v22600_v9 = vpop.f32.mrb[50].mxu1 }
 0xb0e   :  { %24446 = vst [vmem:[#allocation30_spill] sm:$0xff] %v22600_v9  ;;  %v22602_v54 = vpop.f32.mrb[51].mxu1  ;;  %v13854_v42 = vmul.f32 %v22600_v9, %v22600_v9 }
 0xb0f   :  { %24447 = vst [vmem:[#allocation33_spill] sm:$0xff] %v22602_v54  ;;  %v13914_v62 = vadd.f32 %v13913_v45, %v13851_v44  ;;  %v13782_v23 = vadd.f32 %v13781_v13, %v22602_v54  ;;  %v13852_v47 = vmul.f32 %v22602_v54, %v22602_v54 }
 0xb11   :  { %v13783_v25 = vadd.f32 %v22592_v52, %v13782_v23  ;;  %v13915_v0 = vadd.f32 %v13914_v62, %v13852_v47 }
 0xb13   :  { %v13916_v32 = vadd.f32 %v13915_v0, %v13853_v7  ;;  %v22612_v17 = vpop.f32.mrb[52].mxu1  ;;  %v13784_v29 = vadd.f32 %v22600_v9, %v13783_v25 }
 0xb14   :  { %24448 = vst [vmem:[#allocation34_spill] sm:$0xff] %v22612_v17  ;;  %v22615_v44 = vpop.f32.mrb[53].mxu1  ;;  %v13857_v25 = vmul.f32 %v22612_v17, %v22612_v17 }
 0xb15   :  { %24449 = vst [vmem:[#allocation8_spill] sm:$0xff] %v22615_v44  ;;  %v13785_v13 = vadd.f32 %v13784_v29, %v22615_v44  ;;  %v13855_v45 = vmul.f32 %v22615_v44, %v22615_v44  ;;  %v13917_v54 = vadd.f32 %v13916_v32, %v13854_v42  ;;  %v22620_v50 = vpop.f32.mrb[54].mxu1 }
 0xb16   :  { %24450 = vst [vmem:[#allocation6_spill] sm:$0xff] %v22620_v50  ;;  %v22622_v23 = vpop.f32.mrb[55].mxu1  ;;  %v13858_v44 = vmul.f32 %v22620_v50, %v22620_v50 }
 0xb17   :  { %24451 = vst [vmem:[#allocation10_spill] sm:$0xff] %v22622_v23  ;;  %v13918_v62 = vadd.f32 %v13917_v54, %v13855_v45  ;;  %v13786_v47 = vadd.f32 %v13785_v13, %v22622_v23  ;;  %v13856_v7 = vmul.f32 %v22622_v23, %v22622_v23 }
 0xb19   :  { %v13787_v0 = vadd.f32 %v22612_v17, %v13786_v47  ;;  %v13919_v29 = vadd.f32 %v13918_v62, %v13856_v7 }
 0xb1b   :  { %v13920_v42 = vadd.f32 %v13919_v29, %v13857_v25  ;;  %v22632_v32 = vpop.f32.mrb[56].mxu1  ;;  %v13788_v9 = vadd.f32 %v22620_v50, %v13787_v0 }
 0xb1c   :  { %24452 = vst [vmem:[#allocation9_spill] sm:$0xff] %v22632_v32  ;;  %v22635_v54 = vpop.f32.mrb[57].mxu1  ;;  %v13861_v0 = vmul.f32 %v22632_v32, %v22632_v32 }
 0xb1d   :  { %24453 = vst [vmem:[#allocation11_spill] sm:$0xff] %v22635_v54  ;;  %v13789_v13 = vadd.f32 %v13788_v9, %v22635_v54  ;;  %v13859_v45 = vmul.f32 %v22635_v54, %v22635_v54  ;;  %v13921_v23 = vadd.f32 %v13920_v42, %v13858_v44  ;;  %v22640_v52 = vpop.f32.mrb[58].mxu1 }
 0xb1e   :  { %24454 = vst [vmem:[#allocation16_spill] sm:$0xff] %v22640_v52  ;;  %v22642_v47 = vpop.f32.mrb[59].mxu1  ;;  %v13862_v54 = vmul.f32 %v22640_v52, %v22640_v52 }
 0xb1f   :  { %24455 = vst [vmem:[#allocation15_spill] sm:$0xff] %v22642_v47  ;;  %v13922_v62 = vadd.f32 %v13921_v23, %v13859_v45  ;;  %v13790_v7 = vadd.f32 %v13789_v13, %v22642_v47  ;;  %v13860_v25 = vmul.f32 %v22642_v47, %v22642_v47 }
 0xb21   :  { %v13791_v29 = vadd.f32 %v22632_v32, %v13790_v7  ;;  %v13923_v9 = vadd.f32 %v13922_v62, %v13860_v25 }
 0xb23   :  { %v13924_v44 = vadd.f32 %v13923_v9, %v13861_v0  ;;  %v22652_v42 = vpop.f32.mrb[60].mxu1  ;;  %v13792_v50 = vadd.f32 %v22640_v52, %v13791_v29 }
 0xb24   :  { %24456 = vst [vmem:[#allocation20_spill] sm:$0xff] %v22652_v42  ;;  %v22655_v23 = vpop.f32.mrb[61].mxu1  ;;  %v13865_v0 = vmul.f32 %v22652_v42, %v22652_v42 }
 0xb25   :  { %24457 = vst [vmem:[#allocation19_spill] sm:$0xff] %v22655_v23  ;;  %v13793_v13 = vadd.f32 %v13792_v50, %v22655_v23  ;;  %v13863_v45 = vmul.f32 %v22655_v23, %v22655_v23  ;;  %v13925_v47 = vadd.f32 %v13924_v44, %v13862_v54  ;;  %v22660_v17 = vpop.f32.mrb[62].mxu1 }
 0xb26   :  { %v13658_v7 = vpop.f32.mrb[63].mxu1  ;;  %v13866_v52 = vmul.f32 %v22660_v17, %v22660_v17 }
 0xb27   :  { %v13926_v62 = vadd.f32 %v13925_v47, %v13863_v45  ;;  %v13794_v25 = vadd.f32 %v13793_v13, %v13658_v7  ;;  %v13864_v32 = vmul.f32 %v13658_v7, %v13658_v7 }
 0xb29   :  { %v13795_v9 = vadd.f32 %v22652_v42, %v13794_v25  ;;  %v13927_v29 = vadd.f32 %v13926_v62, %v13864_v32 }
 0xb2b   :  { %v13796_v50 = vadd.f32 %v22660_v17, %v13795_v9  ;;  %v13928_v61 = vadd.f32 %v13927_v29, %v13865_v0  ;;  %v24458_v0 = vld [vmem:[#allocation31_spill] sm:$0xff] }
 0xb2d   :  { %v13797_v23 = vrot.slane %v13796_v50, 4  ;;  %v13929_v54 = vadd.f32 %v13928_v61, %v13866_v52  ;;  %v13951_v61 = vsub.s32 2, %v24458_v0 }
 0xb2f   :  { %v13798_v44 = vadd.f32 %v13797_v23, %v13796_v50  ;;  %v13930_v35 = vrot.slane %v13929_v54, 4 }
 0xb31   :  { %v13799_v26 = vrot.slane %v13798_v44, 2  ;;  %v13931_v47 = vadd.f32 %v13930_v35, %v13929_v54 }
 0xb33   :  { %v13800_v13 = vadd.f32 %v13799_v26, %v13798_v44  ;;  %v13932_v45 = vrot.slane %v13931_v47, 2  ;;  %v18212_v26 = vld [vmem:[%s23642_s3] sm:$0xf] }
 0xb35   :  { %v13801_v60 = vrot.slane %v13800_v13, 1  ;;  %v13933_v59 = vadd.f32 %v13932_v45, %v13931_v47 }
 0xb37   :  { %v13802_v21 = vadd.f32 %v13801_v60, %v13800_v13  ;;  %v13934_v11 = vrot.slane %v13933_v59, 1 }
 0xb39   :  { %v13935_v25 = vadd.f32 %v13934_v11, %v13933_v59  ;;  %v13936_v32 = vmul.f32 0.001953125, %v13802_v21  ;;  %v14019_v59 = vsub.s32 3, %v24458_v0 }
 0xb3b   :  { %v13937_v62 = vmul.f32 0.001953125, %v13935_v25  ;;  %v13938_v42 = vmul.f32 %v13936_v32, %v13936_v32 }
 0xb3d   :  { %v13939_v49 = vsub.f32 %v13937_v62, %v13938_v42  ;;  %v24461_v62 = vld [vmem:[#allocation13_spill] sm:$0xff] }
 0xb3f   :  { %v13940_v56 = vmax.f32 %v13939_v49, 0.0 }
 0xb41   :  { %v13941_v9 = vadd.f32 1e-05, %v13940_v56 }
 0xb43   :  { %18091 = vrsqrt.f32 %v13941_v9  ;;  %v24462_v9 = vld [vmem:[#allocation17_spill] sm:$0xff] }
 0xb4d   :  { %v18092_v52 = vpop.eup %18091 }
 0xb4e   :  { %v13943_v35 = vmul.f32 %v18212_v26, %v18092_v52 }
 0xb50   :  { %v13944_v23 = vmul.f32 %v13943_v35, %v13936_v32  ;;  %v22672_v29 = vrot.slane %v13943_v35, %v13951_v61  ;;  %v24460_v32 = vld [vmem:[#allocation12_spill] sm:$0xff]  ;;  %v24464_v61 = vld [vmem:[#allocation18_spill] sm:$0xff] }
 0xb52   :  { %v13946_v11 = vrot.slane %v13944_v23, 7  ;;  %v14014_v60 = vmul.f32 %v22672_v29, %v13658_v7  ;;  %v22678_v56 = vmul.f32 %v22672_v29, %v22355_v36  ;;  %v22682_v49 = vmul.f32 %v22672_v29, %v22359_v33  ;;  %v24466_v23 = vld [vmem:[#allocation29_spill] sm:$0xff] }
 0xb53   :  { %v22686_v21 = vmul.f32 %v22353_v20, %v22672_v29  ;;  %v22690_v42 = vmul.f32 %v22357_v57, %v22672_v29  ;;  %v22694_v50 = vmul.f32 %v22672_v29, %v22375_v48  ;;  %v22698_v36 = vmul.f32 %v22672_v29, %v22382_v4 }
 0xb54   :  { %v13948_v7 = vsub.f32 %v18212_v26, %v13946_v11  ;;  %v22702_v33 = vmul.f32 %v22372_v46, %v22672_v29  ;;  %v22706_v20 = vmul.f32 %v22380_v18, %v22672_v29  ;;  %v22710_v57 = vmul.f32 %v22672_v29, %v22395_v53  ;;  %v24465_v26 = vld [vmem:[#allocation22_spill] sm:$0xff]  ;;  %v24467_v11 = vld [vmem:[#allocation25_spill] sm:$0xff] }
 0xb55   :  { %v22714_v48 = vmul.f32 %v22672_v29, %v22402_v55  ;;  %v22718_v4 = vmul.f32 %v22392_v37, %v22672_v29  ;;  %v22722_v46 = vmul.f32 %v22400_v15, %v22672_v29  ;;  %v22726_v18 = vmul.f32 %v22672_v29, %v22415_v31  ;;  %v14146_v15 = vld [vmem:[%s23639_s0 + $0x1e8] sm:$0xff] }
 0xb56   :  { %v22728_v54 = vrot.slane %v13948_v7, %v14019_v59  ;;  %v22732_v53 = vmul.f32 %v22672_v29, %v22422_v28  ;;  %v22736_v55 = vmul.f32 %v22412_v38, %v22672_v29  ;;  %v22740_v37 = vmul.f32 %v22420_v63, %v22672_v29  ;;  %v24468_v7 = vld [vmem:[#allocation27_spill] sm:$0xff] }
 0xb57   :  { %v22747_v31 = vmul.f32 %v22672_v29, %v22435_v41  ;;  %v22751_v28 = vmul.f32 %v22672_v29, %v22442_v1  ;;  %v22755_v38 = vmul.f32 %v22432_v16, %v22672_v29  ;;  %v22759_v63 = vmul.f32 %v22440_v12, %v22672_v29 }
 0xb58   :  { %v14082_v44 = vadd.f32 %v22728_v54, %v14014_v60  ;;  %v22764_v47 = vmul.f32 %v22672_v29, %v22455_v34  ;;  %v22768_v41 = vmul.f32 %v22672_v29, %v22462_v6  ;;  %v22772_v1 = vmul.f32 %v22452_v39, %v22672_v29 }
 0xb59   :  { %v22776_v16 = vmul.f32 %v22460_v5, %v22672_v29  ;;  %v22780_v12 = vmul.f32 %v22672_v29, %v22475_v19  ;;  %v22784_v34 = vmul.f32 %v22672_v29, %v22482_v3  ;;  %v22788_v6 = vmul.f32 %v22472_v43, %v22672_v29 }
 0xb5a   :  { %v14210_v13 = vadd.f32 %v14146_v15, %v14082_v44  ;;  %v22792_v39 = vmul.f32 %v22480_v10, %v22672_v29  ;;  %v22796_v5 = vmul.f32 %v22672_v29, %v22495_v22  ;;  %v22800_v19 = vmul.f32 %v22672_v29, %v22502_v14  ;;  %v24469_v44 = vld [vmem:[#allocation28_spill] sm:$0xff] }
 0xb5b   :  { %v22804_v3 = vmul.f32 %v22492_v58, %v22672_v29  ;;  %v22808_v43 = vmul.f32 %v22500_v27, %v22672_v29  ;;  %v22812_v10 = vmul.f32 %v22672_v29, %v22515_v51  ;;  %v22816_v22 = vmul.f32 %v22672_v29, %v22522_v40  ;;  %v24459_v40 = vld [vmem:[#allocation7_spill] sm:$0xff] }
 0xb5c   :  { %v14274_v45 = vmax.f32 %v14210_v13, 0.0  ;;  %v22820_v14 = vmul.f32 %v22512_v30, %v22672_v29  ;;  %v22824_v58 = vmul.f32 %v22520_v2, %v22672_v29  ;;  %v22828_v27 = vmul.f32 %v22672_v29, %v22535_v24 }
 0xb5d   :  { %v22832_v51 = vmul.f32 %v22672_v29, %v22542_v8  ;;  %v22836_v25 = vmul.f32 %v24459_v40, %v22672_v29  ;;  %v22840_v30 = vmul.f32 %v24460_v32, %v22672_v29  ;;  %v22844_v2 = vmul.f32 %v22672_v29, %v24461_v62  ;;  %v24463_v8 = vld [vmem:[#allocation14_spill] sm:$0xff]  ;;  %v24471_v32 = vld [vmem:[#allocation21_spill] sm:$0xff] }
 0xb5e   :  { %14338 = vst [vmem:[#allocation3 + $0x1e8] sm:$0xff] %v14274_v45  ;;  %v22848_v24 = vmul.f32 %v22672_v29, %v24462_v9  ;;  %v22852_v0 = vmul.f32 %v24463_v8, %v22672_v29  ;;  %v22856_v52 = vmul.f32 %v24464_v61, %v22672_v29  ;;  %v22860_v35 = vmul.f32 %v22672_v29, %v24465_v26  ;;  %v24470_v45 = vld [vmem:[#allocation33_spill] sm:$0xff]  ;;  %v24473_v9 = vld [vmem:[#allocation30_spill] sm:$0xff]  ;;  %v24475_v61 = vld [vmem:[#allocation8_spill] sm:$0xff] }
 0xb5f   :  { %v22864_v59 = vmul.f32 %v22672_v29, %v24466_v23  ;;  %v22868_v60 = vmul.f32 %v24467_v11, %v22672_v29  ;;  %v22872_v15 = vmul.f32 %v24468_v7, %v22672_v29  ;;  %v22876_v13 = vmul.f32 %v22672_v29, %v24469_v44  ;;  %v24477_v23 = vld [vmem:[#allocation10_spill] sm:$0xff] }
 0xb60   :  { %v22880_v40 = vmul.f32 %v22672_v29, %v24470_v45  ;;  %v22884_v62 = vmul.f32 %v24471_v32, %v22672_v29  ;;  %v22888_v8 = vmul.f32 %v24473_v9, %v22672_v29  ;;  %v22892_v26 = vmul.f32 %v22672_v29, %v24475_v61  ;;  %v24479_v7 = vld [vmem:[#allocation34_spill] sm:$0xff] }
 0xb61   :  { %v22896_v11 = vmul.f32 %v22672_v29, %v24477_v23  ;;  %v22900_v44 = vmul.f32 %v24479_v7, %v22672_v29  ;;  %v24481_v45 = vld [vmem:[#allocation6_spill] sm:$0xff] }
 0xb62   :  { %24472 = vst [vmem:[#allocation23_spill] sm:$0xff] %v22884_v62  ;;  %24474 = vst [vmem:[#allocation24_spill] sm:$0xff] %v22888_v8  ;;  %v22904_v32 = vmul.f32 %v24481_v45, %v22672_v29  ;;  %v24483_v62 = vld [vmem:[#allocation11_spill] sm:$0xff] }
 0xb63   :  { %24476 = vst [vmem:[#allocation26_spill] sm:$0xff] %v22892_v26  ;;  %24478 = vst [vmem:[#allocation35_spill] sm:$0xff] %v22896_v11  ;;  %v22908_v9 = vmul.f32 %v22672_v29, %v24483_v62  ;;  %v24484_v8 = vld [vmem:[#allocation15_spill] sm:$0xff]  ;;  %v24485_v26 = vld [vmem:[#allocation9_spill] sm:$0xff] }
 0xb64   :  { %24480 = vst [vmem:[#allocation36_spill] sm:$0xff] %v22900_v44  ;;  %24482 = vst [vmem:[#allocation37_spill] sm:$0xff] %v22904_v32  ;;  %v22912_v61 = vmul.f32 %v22672_v29, %v24484_v8  ;;  %v22916_v23 = vmul.f32 %v24485_v26, %v22672_v29  ;;  %v24486_v11 = vld [vmem:[#allocation16_spill] sm:$0xff]  ;;  %v24487_v44 = vld [vmem:[#allocation19_spill] sm:$0xff]  ;;  %v22932_v8 = vmul.f32 %v22660_v17, %v22672_v29 }
 0xb65   :  { %v22920_v7 = vmul.f32 %v24486_v11, %v22672_v29  ;;  %v22924_v45 = vmul.f32 %v22672_v29, %v24487_v44  ;;  %v24488_v32 = vld [vmem:[#allocation20_spill] sm:$0xff]  ;;  %v22936_v26 = vadd.f32 %v22728_v54, %v22678_v56  ;;  %v22940_v11 = vadd.f32 %v22728_v54, %v22682_v49 }
 0xb66   :  { %v22928_v62 = vmul.f32 %v24488_v32, %v22672_v29  ;;  %v22944_v44 = vadd.f32 %v22728_v54, %v22686_v21  ;;  %v22948_v32 = vadd.f32 %v22728_v54, %v22690_v42  ;;  %v22952_v17 = vadd.f32 %v22728_v54, %v22694_v50 }
 0xb67   :  { %v22956_v29 = vadd.f32 %v22728_v54, %v22698_v36  ;;  %v22960_v56 = vadd.f32 %v22728_v54, %v22702_v33  ;;  %v22964_v49 = vadd.f32 %v22728_v54, %v22706_v20  ;;  %v22968_v21 = vadd.f32 %v22728_v54, %v22710_v57 }
 0xb68   :  { %v22972_v42 = vadd.f32 %v22728_v54, %v22714_v48  ;;  %v22976_v50 = vadd.f32 %v22728_v54, %v22718_v4  ;;  %v22980_v36 = vadd.f32 %v22728_v54, %v22722_v46  ;;  %v22984_v33 = vadd.f32 %v22728_v54, %v22726_v18 }
 0xb69   :  { %v22988_v20 = vadd.f32 %v22728_v54, %v22732_v53  ;;  %v22992_v57 = vadd.f32 %v22728_v54, %v22736_v55  ;;  %v22996_v48 = vadd.f32 %v22728_v54, %v22740_v37  ;;  %v23000_v4 = vadd.f32 %v22728_v54, %v22747_v31 }
 0xb6a   :  { %v23004_v46 = vadd.f32 %v22728_v54, %v22751_v28  ;;  %v23008_v18 = vadd.f32 %v22728_v54, %v22755_v38  ;;  %v23012_v53 = vadd.f32 %v22728_v54, %v22759_v63  ;;  %v23016_v55 = vadd.f32 %v22728_v54, %v22764_v47 }
 0xb6b   :  { %v23020_v37 = vadd.f32 %v22728_v54, %v22768_v41  ;;  %v23024_v31 = vadd.f32 %v22728_v54, %v22772_v1  ;;  %v23028_v28 = vadd.f32 %v22728_v54, %v22776_v16  ;;  %v23032_v38 = vadd.f32 %v22728_v54, %v22780_v12 }
 0xb6c   :  { %v23036_v63 = vadd.f32 %v22728_v54, %v22784_v34  ;;  %v23040_v47 = vadd.f32 %v22728_v54, %v22788_v6  ;;  %v23044_v41 = vadd.f32 %v22728_v54, %v22792_v39  ;;  %v23048_v1 = vadd.f32 %v22728_v54, %v22796_v5 }
 0xb6d   :  { %v23052_v16 = vadd.f32 %v22728_v54, %v22800_v19  ;;  %v23056_v12 = vadd.f32 %v22728_v54, %v22804_v3  ;;  %v23060_v34 = vadd.f32 %v22728_v54, %v22808_v43  ;;  %v23064_v6 = vadd.f32 %v22728_v54, %v22812_v10 }
 0xb6e   :  { %v23068_v39 = vadd.f32 %v22728_v54, %v22816_v22  ;;  %v23072_v5 = vadd.f32 %v22728_v54, %v22820_v14  ;;  %v23076_v19 = vadd.f32 %v22728_v54, %v22824_v58  ;;  %v23080_v3 = vadd.f32 %v22728_v54, %v22828_v27  ;;  %v14087_v27 = vld [vmem:[%s23639_s0 + $0x10] sm:$0xff] }
 0xb6f   :  { %v23084_v43 = vadd.f32 %v22728_v54, %v22832_v51  ;;  %v23088_v10 = vadd.f32 %v22728_v54, %v22836_v25  ;;  %v23092_v22 = vadd.f32 %v22728_v54, %v22840_v30  ;;  %v23096_v14 = vadd.f32 %v22728_v54, %v22844_v2  ;;  %v14085_v51 = vld [vmem:[%s23639_s0] sm:$0xff] }
 0xb70   :  { %24489 = vst [vmem:[#allocation38_spill] sm:$0xff] %v23072_v5  ;;  %24490 = vst [vmem:[#allocation39_spill] sm:$0xff] %v23076_v19  ;;  %v23100_v58 = vadd.f32 %v22728_v54, %v22848_v24  ;;  %v23110_v25 = vadd.f32 %v22728_v54, %v22852_v0  ;;  %v23114_v30 = vadd.f32 %v22728_v54, %v22856_v52  ;;  %v14086_v0 = vld [vmem:[%s23639_s0 + $0x8] sm:$0xff]  ;;  %v14091_v52 = vld [vmem:[%s23639_s0 + $0x30] sm:$0xff] }
 0xb71   :  { %24491 = vst [vmem:[#allocation40_spill] sm:$0xff] %v23080_v3  ;;  %24492 = vst [vmem:[#allocation41_spill] sm:$0xff] %v23084_v43  ;;  %v23118_v2 = vadd.f32 %v22728_v54, %v22860_v35  ;;  %v23122_v24 = vadd.f32 %v22728_v54, %v22864_v59  ;;  %v14089_v35 = vld [vmem:[%s23639_s0 + $0x20] sm:$0xff]  ;;  %v23138_v59 = vadd.f32 %v22728_v54, %v22868_v60  ;;  %v14090_v60 = vld [vmem:[%s23639_s0 + $0x28] sm:$0xff] }
 0xb72   :  { %24493 = vst [vmem:[#allocation42_spill] sm:$0xff] %v23088_v10  ;;  %24494 = vst [vmem:[#allocation43_spill] sm:$0xff] %v23092_v22  ;;  %v24511_v22 = vld [vmem:[#allocation35_spill] sm:$0xff]  ;;  %v14096_v43 = vld [vmem:[%s23639_s0 + $0x58] sm:$0xff]  ;;  %v23206_v3 = vadd.f32 %v22728_v54, %v22912_v61  ;;  %v23222_v61 = vadd.f32 %v22728_v54, %v22916_v23 }
 0xb73   :  { %24495 = vst [vmem:[#allocation44_spill] sm:$0xff] %v23096_v14  ;;  %24496 = vst [vmem:[#allocation32_spill] sm:$0xff] %v23100_v58  ;;  %v14088_v58 = vld [vmem:[%s23639_s0 + $0x18] sm:$0xff]  ;;  %v23178_v10 = vadd.f32 %v22728_v54, %v24511_v22  ;;  %v14102_v23 = vld [vmem:[%s23639_s0 + $0x88] sm:$0xff] }
 0xb74   :  { %24497 = vst [vmem:[#allocation45_spill] sm:$0xff] %v23110_v25  ;;  %24498 = vst [vmem:[#allocation46_spill] sm:$0xff] %v23114_v30  ;;  %v23150_v30 = vadd.f32 %v22728_v54, %v22880_v40  ;;  %v14092_v25 = vld [vmem:[%s23639_s0 + $0x38] sm:$0xff]  ;;  %v14106_v5 = vld [vmem:[%s23639_s0 + $0xa8] sm:$0xff] }
 0xb75   :  { %24499 = vst [vmem:[#allocation49_spill] sm:$0xff] %v23118_v2  ;;  %24500 = vst [vmem:[#allocation47_spill] sm:$0xff] %v23122_v24  ;;  %v23142_v24 = vadd.f32 %v22728_v54, %v22872_v15  ;;  %v23146_v2 = vadd.f32 %v22728_v54, %v22876_v13  ;;  %v14095_v15 = vld [vmem:[%s23639_s0 + $0x50] sm:$0xff]  ;;  %v14093_v13 = vld [vmem:[%s23639_s0 + $0x40] sm:$0xff] }
 0xb76   :  { %24501 = vst [vmem:[#allocation50_spill] sm:$0xff] %v23138_v59  ;;  %24504 = vst [vmem:[#allocation56_spill] sm:$0xff] %v23150_v30  ;;  %v24507_v30 = vld [vmem:[#allocation24_spill] sm:$0xff]  ;;  %v24509_v59 = vld [vmem:[#allocation26_spill] sm:$0xff] }
 0xb77   :  { %24502 = vst [vmem:[#allocation51_spill] sm:$0xff] %v23142_v24  ;;  %24503 = vst [vmem:[#allocation54_spill] sm:$0xff] %v23146_v2  ;;  %v24505_v2 = vld [vmem:[#allocation23_spill] sm:$0xff]  ;;  %v23170_v24 = vadd.f32 %v22728_v54, %v24507_v30  ;;  %v23174_v14 = vadd.f32 %v22728_v54, %v24509_v59  ;;  %v14099_v30 = vld [vmem:[%s23639_s0 + $0x70] sm:$0xff] }
 0xb78   :  { %v23166_v40 = vadd.f32 %v22728_v54, %v24505_v2  ;;  %24512 = vst [vmem:[#allocation63_spill] sm:$0xff] %v23178_v10  ;;  %v14094_v2 = vld [vmem:[%s23639_s0 + $0x48] sm:$0xff]  ;;  %v14097_v59 = vld [vmem:[%s23639_s0 + $0x60] sm:$0xff]  ;;  %v24515_v10 = vld [vmem:[#allocation37_spill] sm:$0xff] }
 0xb79   :  { %24508 = vst [vmem:[#allocation59_spill] sm:$0xff] %v23170_v24  ;;  %24510 = vst [vmem:[#allocation61_spill] sm:$0xff] %v23174_v14  ;;  %v24513_v14 = vld [vmem:[#allocation36_spill] sm:$0xff]  ;;  %v23198_v24 = vadd.f32 %v22728_v54, %v24515_v10  ;;  %v14100_v19 = vld [vmem:[%s23639_s0 + $0x78] sm:$0xff] }
 0xb7a   :  { %24506 = vst [vmem:[#allocation57_spill] sm:$0xff] %v23166_v40  ;;  %v23194_v22 = vadd.f32 %v22728_v54, %v24513_v14  ;;  %v23202_v40 = vadd.f32 %v22728_v54, %v22908_v9  ;;  %24518 = vst [vmem:[#allocation74_spill] sm:$0xff] %v23206_v3  ;;  %v14098_v14 = vld [vmem:[%s23639_s0 + $0x68] sm:$0xff]  ;;  %v14103_v10 = vld [vmem:[%s23639_s0 + $0x90] sm:$0xff]  ;;  %v23226_v3 = vadd.f32 %v22728_v54, %v22920_v7 }
 0xb7b   :  { %24516 = vst [vmem:[#allocation48_spill] sm:$0xff] %v23198_v24  ;;  %v14101_v9 = vld [vmem:[%s23639_s0 + $0x80] sm:$0xff]  ;;  %24519 = vst [vmem:[#allocation80_spill] sm:$0xff] %v23222_v61  ;;  %v23234_v24 = vadd.f32 %v22728_v54, %v22928_v62  ;;  %v14107_v7 = vld [vmem:[%s23639_s0 + $0xb0] sm:$0xff]  ;;  %v23250_v62 = vadd.f32 %v22728_v54, %v22932_v8 }
 0xb7c   :  { %24514 = vst [vmem:[#allocation65_spill] sm:$0xff] %v23194_v22  ;;  %24517 = vst [vmem:[#allocation71_spill] sm:$0xff] %v23202_v40  ;;  %v23230_v40 = vadd.f32 %v22728_v54, %v22924_v45  ;;  %v14104_v22 = vld [vmem:[%s23639_s0 + $0x98] sm:$0xff]  ;;  %v14105_v45 = vld [vmem:[%s23639_s0 + $0xa0] sm:$0xff] }
 0xb7d   :  { %24520 = vst [vmem:[#allocation83_spill] sm:$0xff] %v23226_v3  ;;  %24522 = vst [vmem:[#allocation53_spill] sm:$0xff] %v23234_v24  ;;  %v23253_v24 = vadd.f32 %v14085_v51, %v22936_v26  ;;  %v23259_v3 = vadd.f32 %v14087_v27, %v22944_v44  ;;  %v14108_v61 = vld [vmem:[%s23639_s0 + $0xb8] sm:$0xff]  ;;  %v14111_v54 = vld [vmem:[%s23639_s0 + $0xd0] sm:$0xff]  ;;  %v23274_v26 = vadd.f32 %v14088_v58, %v22948_v32 }
 0xb7e   :  { %24521 = vst [vmem:[#allocation52_spill] sm:$0xff] %v23230_v40  ;;  %v23256_v40 = vadd.f32 %v14086_v0, %v22940_v11  ;;  %v14109_v8 = vld [vmem:[%s23639_s0 + $0xc0] sm:$0xff]  ;;  %v23277_v11 = vadd.f32 %v14089_v35, %v22952_v17  ;;  %v23280_v44 = vadd.f32 %v14090_v60, %v22956_v29  ;;  %v23283_v27 = vadd.f32 %v14091_v52, %v22960_v56  ;;  %v14112_v51 = vld [vmem:[%s23639_s0 + $0xd8] sm:$0xff]  ;;  %v14110_v0 = vld [vmem:[%s23639_s0 + $0xc8] sm:$0xff] }
 0xb7f   :  { %v14115_v32 = vld [vmem:[%s23639_s0 + $0xf0] sm:$0xff]  ;;  %v14113_v17 = vld [vmem:[%s23639_s0 + $0xe0] sm:$0xff]  ;;  %v23298_v29 = vadd.f32 %v14092_v25, %v22964_v49  ;;  %v23301_v56 = vadd.f32 %v14093_v13, %v22968_v21  ;;  %v23304_v58 = vadd.f32 %v14094_v2, %v22972_v42  ;;  %v23307_v52 = vadd.f32 %v14095_v15, %v22976_v50  ;;  %v14116_v35 = vld [vmem:[%s23639_s0 + $0xf8] sm:$0xff] }
 0xb80   :  { %v14114_v60 = vld [vmem:[%s23639_s0 + $0xe8] sm:$0xff]  ;;  %v14119_v49 = vld [vmem:[%s23639_s0 + $0x110] sm:$0xff]  ;;  %v14117_v21 = vld [vmem:[%s23639_s0 + $0x100] sm:$0xff]  ;;  %v23322_v42 = vadd.f32 %v14096_v43, %v22980_v36  ;;  %v23325_v50 = vadd.f32 %v14097_v59, %v22984_v33  ;;  %v23328_v25 = vadd.f32 %v14098_v14, %v22988_v20  ;;  %v23331_v15 = vadd.f32 %v14099_v30, %v22992_v57 }
 0xb81   :  { %v14120_v13 = vld [vmem:[%s23639_s0 + $0x118] sm:$0xff]  ;;  %v14118_v2 = vld [vmem:[%s23639_s0 + $0x108] sm:$0xff]  ;;  %v14123_v36 = vld [vmem:[%s23639_s0 + $0x130] sm:$0xff]  ;;  %v23346_v20 = vadd.f32 %v14100_v19, %v22996_v48  ;;  %v23349_v57 = vadd.f32 %v14101_v9, %v23000_v4  ;;  %v23352_v43 = vadd.f32 %v14102_v23, %v23004_v46  ;;  %v23355_v30 = vadd.f32 %v14103_v10, %v23008_v18 }
 0xb82   :  { %v14121_v33 = vld [vmem:[%s23639_s0 + $0x120] sm:$0xff]  ;;  %v14124_v59 = vld [vmem:[%s23639_s0 + $0x138] sm:$0xff]  ;;  %v14122_v14 = vld [vmem:[%s23639_s0 + $0x128] sm:$0xff]  ;;  %v23370_v46 = vadd.f32 %v14104_v22, %v23012_v53  ;;  %v23373_v18 = vadd.f32 %v14105_v45, %v23016_v55  ;;  %v23376_v19 = vadd.f32 %v14106_v5, %v23020_v37  ;;  %v23379_v10 = vadd.f32 %v14107_v7, %v23024_v31 }
 0xb83   :  { %v14127_v48 = vld [vmem:[%s23639_s0 + $0x150] sm:$0xff]  ;;  %v14125_v4 = vld [vmem:[%s23639_s0 + $0x140] sm:$0xff]  ;;  %v14128_v9 = vld [vmem:[%s23639_s0 + $0x158] sm:$0xff]  ;;  %v23391_v55 = vadd.f32 %v14108_v61, %v23028_v28  ;;  %v23394_v37 = vadd.f32 %v14109_v8, %v23032_v38  ;;  %v23397_v31 = vadd.f32 %v14110_v0, %v23036_v63  ;;  %v23400_v5 = vadd.f32 %v14111_v54, %v23040_v47 }
 0xb84   :  { %v14126_v23 = vld [vmem:[%s23639_s0 + $0x148] sm:$0xff]  ;;  %v14131_v53 = vld [vmem:[%s23639_s0 + $0x170] sm:$0xff]  ;;  %v14129_v22 = vld [vmem:[%s23639_s0 + $0x160] sm:$0xff]  ;;  %v23412_v38 = vadd.f32 %v14112_v51, %v23044_v41  ;;  %v23415_v63 = vadd.f32 %v14113_v17, %v23048_v1  ;;  %v23418_v47 = vadd.f32 %v14114_v60, %v23052_v16  ;;  %v23421_v61 = vadd.f32 %v14115_v32, %v23056_v12 }
 0xb85   :  { %v14132_v7 = vld [vmem:[%s23639_s0 + $0x178] sm:$0xff]  ;;  %v14130_v28 = vld [vmem:[%s23639_s0 + $0x168] sm:$0xff]  ;;  %v14135_v45 = vld [vmem:[%s23639_s0 + $0x190] sm:$0xff]  ;;  %v23433_v1 = vadd.f32 %v14116_v35, %v23060_v34  ;;  %v23436_v16 = vadd.f32 %v14117_v21, %v23064_v6  ;;  %v23439_v12 = vadd.f32 %v14118_v2, %v23068_v39 }
 0xb86   :  { %v14133_v54 = vld [vmem:[%s23639_s0 + $0x180] sm:$0xff]  ;;  %v14136_v41 = vld [vmem:[%s23639_s0 + $0x198] sm:$0xff]  ;;  %v14134_v0 = vld [vmem:[%s23639_s0 + $0x188] sm:$0xff] }
 0xb87   :  { %24523 = vst [vmem:[#allocation55_spill] sm:$0xff] %v23439_v12  ;;  %v24524_v8 = vld [vmem:[#allocation38_spill] sm:$0xff]  ;;  %v14139_v32 = vld [vmem:[%s23639_s0 + $0x1b0] sm:$0xff]  ;;  %v24526_v6 = vld [vmem:[#allocation39_spill] sm:$0xff] }
 0xb88   :  { %v23442_v51 = vadd.f32 %v14119_v49, %v24524_v8  ;;  %v14137_v34 = vld [vmem:[%s23639_s0 + $0x1a0] sm:$0xff]  ;;  %v23454_v17 = vadd.f32 %v14120_v13, %v24526_v6  ;;  %v24528_v39 = vld [vmem:[#allocation40_spill] sm:$0xff]  ;;  %v24530_v60 = vld [vmem:[#allocation41_spill] sm:$0xff] }
 0xb89   :  { %v23457_v35 = vadd.f32 %v14121_v33, %v24528_v39  ;;  %v23460_v49 = vadd.f32 %v14122_v14, %v24530_v60  ;;  %v24532_v21 = vld [vmem:[#allocation42_spill] sm:$0xff]  ;;  %v14140_v8 = vld [vmem:[%s23639_s0 + $0x1b8] sm:$0xff]  ;;  %v14143_v13 = vld [vmem:[%s23639_s0 + $0x1d0] sm:$0xff] }
 0xb8a   :  { %24525 = vst [vmem:[#allocation58_spill] sm:$0xff] %v23442_v51  ;;  %24527 = vst [vmem:[#allocation60_spill] sm:$0xff] %v23454_v17  ;;  %v23463_v2 = vadd.f32 %v14123_v36, %v24532_v21  ;;  %v14138_v51 = vld [vmem:[%s23639_s0 + $0x1a8] sm:$0xff]  ;;  %v24536_v14 = vld [vmem:[#allocation44_spill] sm:$0xff] }
 0xb8b   :  { %24529 = vst [vmem:[#allocation62_spill] sm:$0xff] %v23457_v35  ;;  %24531 = vst [vmem:[#allocation64_spill] sm:$0xff] %v23460_v49  ;;  %v24534_v33 = vld [vmem:[#allocation43_spill] sm:$0xff]  ;;  %v23478_v39 = vadd.f32 %v14125_v4, %v24536_v14  ;;  %v24538_v36 = vld [vmem:[#allocation32_spill] sm:$0xff] }
 0xb8c   :  { %24533 = vst [vmem:[#allocation66_spill] sm:$0xff] %v23463_v2  ;;  %v23475_v6 = vadd.f32 %v14124_v59, %v24534_v33  ;;  %v23481_v60 = vadd.f32 %v14126_v23, %v24538_v36  ;;  %v24540_v21 = vld [vmem:[#allocation45_spill] sm:$0xff]  ;;  %v14141_v49 = vld [vmem:[%s23639_s0 + $0x1c0] sm:$0xff]  ;;  %v14142_v59 = vld [vmem:[%s23639_s0 + $0x1c8] sm:$0xff] }
 0xb8d   :  { %24537 = vst [vmem:[#allocation68_spill] sm:$0xff] %v23478_v39  ;;  %v23484_v2 = vadd.f32 %v14127_v48, %v24540_v21  ;;  %v14144_v35 = vld [vmem:[%s23639_s0 + $0x1d8] sm:$0xff]  ;;  %v24542_v4 = vld [vmem:[#allocation46_spill] sm:$0xff]  ;;  %v24546_v48 = vld [vmem:[#allocation47_spill] sm:$0xff] }
 0xb8e   :  { %24535 = vst [vmem:[#allocation67_spill] sm:$0xff] %v23475_v6  ;;  %24539 = vst [vmem:[#allocation69_spill] sm:$0xff] %v23481_v60  ;;  %v23496_v33 = vadd.f32 %v14128_v9, %v24542_v4  ;;  %v24544_v23 = vld [vmem:[#allocation49_spill] sm:$0xff]  ;;  %v23502_v36 = vadd.f32 %v14130_v28, %v24546_v48  ;;  %v24548_v21 = vld [vmem:[#allocation50_spill] sm:$0xff] }
 0xb8f   :  { %24541 = vst [vmem:[#allocation70_spill] sm:$0xff] %v23484_v2  ;;  %v23499_v14 = vadd.f32 %v14129_v22, %v24544_v23  ;;  %v23505_v2 = vadd.f32 %v14131_v53, %v24548_v21  ;;  %v14147_v60 = vld [vmem:[%s23639_s0 + $0x1f0] sm:$0xff]  ;;  %v14145_v39 = vld [vmem:[%s23639_s0 + $0x1e0] sm:$0xff]  ;;  %v14148_v9 = vld [vmem:[%s23639_s0 + $0x1f8] sm:$0xff]  ;;  %s18238_s0 = smov [#allocation3]  }
 0xb90   :  { %24543 = vst [vmem:[#allocation72_spill] sm:$0xff] %v23496_v33  ;;  %24547 = vst [vmem:[#allocation75_spill] sm:$0xff] %v23502_v36  ;;  %v24550_v22 = vld [vmem:[#allocation51_spill] sm:$0xff]  ;;  %v24551_v28 = vld [vmem:[#allocation54_spill] sm:$0xff]  ;;  %s14346_s23 = sshll.u32 %s18238_s0, 4  ;;  %s14347_s23 = int_to_ptr.vmem [resolvable:$true] %s14346_s23 }
 0xb91   :  { %24545 = vst [vmem:[#allocation73_spill] sm:$0xff] %v23499_v14  ;;  %24549 = vst [vmem:[#allocation76_spill] sm:$0xff] %v23505_v2  ;;  %v23517_v4 = vadd.f32 %v14132_v7, %v24550_v22  ;;  %v23520_v23 = vadd.f32 %v14133_v54, %v24551_v28  ;;  %v24552_v53 = vld [vmem:[#allocation56_spill] sm:$0xff]  ;;  %v24553_v21 = vld [vmem:[#allocation57_spill] sm:$0xff]  ;;  %s18213_s24 = scalar_lea.vmem %s14347_s23, 8192  ;;  %p18218_p1 = scmp.lt.s32.totalorder %s14347_s23, %s14347_s23 }
 0xb92   :  { %v23523_v48 = vadd.f32 %v14134_v0, %v24552_v53  ;;  %v23526_v2 = vadd.f32 %v14135_v45, %v24553_v21  ;;  %v24554_v36 = vld [vmem:[#allocation59_spill] sm:$0xff]  ;;  %v24555_v33 = vld [vmem:[#allocation61_spill] sm:$0xff]  ;;  %v24558_v54 = vld [vmem:[#allocation48_spill] sm:$0xff]  ;;  %p18214_p0 = scmp.ne.s32.totalorder %s14347_s23, %s18213_s24  ;;  %p18219_p2 = scmp.lt.s32.totalorder %s18213_s24, %s18213_s24 }
 0xb93   :  { %v23529_v14 = vadd.f32 %v14136_v41, %v24554_v36  ;;  %v23532_v6 = vadd.f32 %v14137_v34, %v24555_v33  ;;  %v24556_v17 = vld [vmem:[#allocation63_spill] sm:$0xff]  ;;  %v24557_v7 = vld [vmem:[#allocation65_spill] sm:$0xff]  ;;  %v23541_v28 = vadd.f32 %v14140_v8, %v24558_v54  ;;  %v24560_v45 = vld [vmem:[#allocation74_spill] sm:$0xff]  ;;  %v23562_v8 = vadd.f32 %v14148_v9, %v23250_v62 }
 0xb94   :  { %v23535_v12 = vadd.f32 %v14138_v51, %v24556_v17  ;;  %v23538_v22 = vadd.f32 %v14139_v32, %v24557_v7  ;;  %v24559_v0 = vld [vmem:[#allocation71_spill] sm:$0xff]  ;;  %v23547_v21 = vadd.f32 %v14142_v59, %v24560_v45  ;;  %v24561_v41 = vld [vmem:[#allocation80_spill] sm:$0xff]  ;;  %v24564_v32 = vld [vmem:[#allocation53_spill] sm:$0xff]  ;;  %v14214_v59 = vmax.f32 %v23256_v40, 0.0  ;;  %p18220_p3 = por %p18219_p2, %p18218_p1 }
 0xb95   :  { %v23544_v53 = vadd.f32 %v14141_v49, %v24559_v0  ;;  %v23550_v36 = vadd.f32 %v14143_v13, %v24561_v41  ;;  %v24562_v34 = vld [vmem:[#allocation83_spill] sm:$0xff]  ;;  %v24563_v51 = vld [vmem:[#allocation52_spill] sm:$0xff]  ;;  %v23559_v7 = vadd.f32 %v14147_v60, %v24564_v32  ;;  %v14213_v49 = vmax.f32 %v23253_v24, 0.0  ;;  %v24570_v41 = vld [vmem:[#allocation66_spill] sm:$0xff] }
 0xb96   :  { %v23553_v33 = vadd.f32 %v14144_v35, %v24562_v34  ;;  %v23556_v17 = vadd.f32 %v14145_v39, %v24563_v51  ;;  %v14215_v54 = vmax.f32 %v23259_v3, 0.0  ;;  %v14216_v13 = vmax.f32 %v23274_v26, 0.0  ;;  %14278 = vst [vmem:[#allocation3 + $0x8] sm:$0xff] %v14214_v59  ;;  %v24571_v51 = vld [vmem:[#allocation67_spill] sm:$0xff]  ;;  %v24573_v59 = vld [vmem:[#allocation69_spill] sm:$0xff]  ;;  %p18221_p4 = pnand %p18220_p3, %p18214_p0 }
 0xb97   :  { %v14217_v35 = vmax.f32 %v23277_v11, 0.0  ;;  %v14218_v0 = vmax.f32 %v23280_v44, 0.0  ;;  %v14219_v39 = vmax.f32 %v23283_v27, 0.0  ;;  %v14220_v60 = vmax.f32 %v23298_v29, 0.0  ;;  %14277 = vst [vmem:[#allocation3] sm:$0xff] %v14213_v49 }
 0xb98   :  { %v14221_v45 = vmax.f32 %v23301_v56, 0.0  ;;  %v14222_v62 = vmax.f32 %v23304_v58, 0.0  ;;  %v14223_v24 = vmax.f32 %v23307_v52, 0.0  ;;  %v14224_v40 = vmax.f32 %v23322_v42, 0.0  ;;  %14279 = vst [vmem:[#allocation3 + $0x10] sm:$0xff] %v14215_v54  ;;  %14280 = vst [vmem:[#allocation3 + $0x18] sm:$0xff] %v14216_v13 }
 0xb99   :  { %v14225_v3 = vmax.f32 %v23325_v50, 0.0  ;;  %v14226_v26 = vmax.f32 %v23328_v25, 0.0  ;;  %v14227_v11 = vmax.f32 %v23331_v15, 0.0  ;;  %v14228_v44 = vmax.f32 %v23346_v20, 0.0  ;;  %14281 = vst [vmem:[#allocation3 + $0x20] sm:$0xff] %v14217_v35  ;;  %14282 = vst [vmem:[#allocation3 + $0x28] sm:$0xff] %v14218_v0 }
 0xb9a   :  { %14283 = vst [vmem:[#allocation3 + $0x30] sm:$0xff] %v14219_v39  ;;  %14284 = vst [vmem:[#allocation3 + $0x38] sm:$0xff] %v14220_v60  ;;  %v14229_v27 = vmax.f32 %v23349_v57, 0.0  ;;  %v14230_v29 = vmax.f32 %v23352_v43, 0.0  ;;  %v14231_v56 = vmax.f32 %v23355_v30, 0.0  ;;  %v14232_v58 = vmax.f32 %v23370_v46, 0.0 }
 0xb9b   :  { %14285 = vst [vmem:[#allocation3 + $0x40] sm:$0xff] %v14221_v45  ;;  %14286 = vst [vmem:[#allocation3 + $0x48] sm:$0xff] %v14222_v62  ;;  %v14233_v52 = vmax.f32 %v23373_v18, 0.0  ;;  %v14234_v42 = vmax.f32 %v23376_v19, 0.0  ;;  %v14235_v50 = vmax.f32 %v23379_v10, 0.0  ;;  %v14236_v25 = vmax.f32 %v23391_v55, 0.0 }
 0xb9c   :  { %14287 = vst [vmem:[#allocation3 + $0x50] sm:$0xff] %v14223_v24  ;;  %14288 = vst [vmem:[#allocation3 + $0x58] sm:$0xff] %v14224_v40  ;;  %v14237_v15 = vmax.f32 %v23394_v37, 0.0  ;;  %v14238_v20 = vmax.f32 %v23397_v31, 0.0  ;;  %v14239_v57 = vmax.f32 %v23400_v5, 0.0  ;;  %v14240_v43 = vmax.f32 %v23412_v38, 0.0 }
 0xb9d   :  { %14289 = vst [vmem:[#allocation3 + $0x60] sm:$0xff] %v14225_v3  ;;  %14290 = vst [vmem:[#allocation3 + $0x68] sm:$0xff] %v14226_v26  ;;  %v14241_v30 = vmax.f32 %v23415_v63, 0.0  ;;  %v14242_v46 = vmax.f32 %v23418_v47, 0.0  ;;  %v14243_v18 = vmax.f32 %v23421_v61, 0.0  ;;  %v14244_v19 = vmax.f32 %v23433_v1, 0.0 }
 0xb9e   :  { %14291 = vst [vmem:[#allocation3 + $0x70] sm:$0xff] %v14227_v11  ;;  %14292 = vst [vmem:[#allocation3 + $0x78] sm:$0xff] %v14228_v44  ;;  %v14245_v10 = vmax.f32 %v23436_v16, 0.0  ;;  %v24565_v55 = vld [vmem:[#allocation55_spill] sm:$0xff]  ;;  %v24566_v31 = vld [vmem:[#allocation58_spill] sm:$0xff]  ;;  %v14251_v34 = vmax.f32 %v24570_v41, 0.0 }
 0xb9f   :  { %14293 = vst [vmem:[#allocation3 + $0x80] sm:$0xff] %v14229_v27  ;;  %14294 = vst [vmem:[#allocation3 + $0x88] sm:$0xff] %v14230_v29  ;;  %v14246_v37 = vmax.f32 %v24565_v55, 0.0  ;;  %v14247_v5 = vmax.f32 %v24566_v31, 0.0  ;;  %v24567_v38 = vld [vmem:[#allocation60_spill] sm:$0xff]  ;;  %v24568_v63 = vld [vmem:[#allocation62_spill] sm:$0xff] }
 0xba0   :  { %14295 = vst [vmem:[#allocation3 + $0x90] sm:$0xff] %v14231_v56  ;;  %14296 = vst [vmem:[#allocation3 + $0x98] sm:$0xff] %v14232_v58  ;;  %v14248_v9 = vmax.f32 %v24567_v38, 0.0  ;;  %v14249_v47 = vmax.f32 %v24568_v63, 0.0  ;;  %v24569_v61 = vld [vmem:[#allocation64_spill] sm:$0xff]  ;;  %v14252_v32 = vmax.f32 %v24571_v51, 0.0 }
 0xba1   :  { %14297 = vst [vmem:[#allocation3 + $0xa0] sm:$0xff] %v14233_v52  ;;  %14298 = vst [vmem:[#allocation3 + $0xa8] sm:$0xff] %v14234_v42  ;;  %v14250_v1 = vmax.f32 %v24569_v61, 0.0  ;;  %v24572_v16 = vld [vmem:[#allocation68_spill] sm:$0xff]  ;;  %v14254_v54 = vmax.f32 %v24573_v59, 0.0  ;;  %v24574_v13 = vld [vmem:[#allocation70_spill] sm:$0xff] }
 0xba2   :  { %14299 = vst [vmem:[#allocation3 + $0xb0] sm:$0xff] %v14235_v50  ;;  %14300 = vst [vmem:[#allocation3 + $0xb8] sm:$0xff] %v14236_v25  ;;  %v14253_v49 = vmax.f32 %v24572_v16, 0.0  ;;  %v14255_v35 = vmax.f32 %v24574_v13, 0.0  ;;  %v24575_v0 = vld [vmem:[#allocation72_spill] sm:$0xff]  ;;  %v24576_v60 = vld [vmem:[#allocation73_spill] sm:$0xff] }
 0xba3   :  { %14301 = vst [vmem:[#allocation3 + $0xc0] sm:$0xff] %v14237_v15  ;;  %14302 = vst [vmem:[#allocation3 + $0xc8] sm:$0xff] %v14238_v20  ;;  %v14256_v39 = vmax.f32 %v24575_v0, 0.0  ;;  %v14257_v45 = vmax.f32 %v24576_v60, 0.0  ;;  %v24577_v62 = vld [vmem:[#allocation75_spill] sm:$0xff]  ;;  %v24578_v40 = vld [vmem:[#allocation76_spill] sm:$0xff] }
 0xba4   :  { %14303 = vst [vmem:[#allocation3 + $0xd0] sm:$0xff] %v14239_v57  ;;  %14304 = vst [vmem:[#allocation3 + $0xd8] sm:$0xff] %v14240_v43  ;;  %v14258_v24 = vmax.f32 %v24577_v62, 0.0  ;;  %v14259_v3 = vmax.f32 %v24578_v40, 0.0  ;;  %v14260_v26 = vmax.f32 %v23517_v4, 0.0  ;;  %v14261_v11 = vmax.f32 %v23520_v23, 0.0 }
 0xba5   :  { %14305 = vst [vmem:[#allocation3 + $0xe0] sm:$0xff] %v14241_v30  ;;  %14306 = vst [vmem:[#allocation3 + $0xe8] sm:$0xff] %v14242_v46  ;;  %v14262_v44 = vmax.f32 %v23523_v48, 0.0  ;;  %v14263_v27 = vmax.f32 %v23526_v2, 0.0  ;;  %v14264_v29 = vmax.f32 %v23529_v14, 0.0  ;;  %v14265_v4 = vmax.f32 %v23532_v6, 0.0 }
 0xba6   :  { %14307 = vst [vmem:[#allocation3 + $0xf0] sm:$0xff] %v14243_v18  ;;  %14308 = vst [vmem:[#allocation3 + $0xf8] sm:$0xff] %v14244_v19  ;;  %v14266_v56 = vmax.f32 %v23535_v12, 0.0  ;;  %v14267_v58 = vmax.f32 %v23538_v22, 0.0  ;;  %v14268_v23 = vmax.f32 %v23541_v28, 0.0  ;;  %v14269_v2 = vmax.f32 %v23544_v53, 0.0 }
 0xba7   :  { %14309 = vst [vmem:[#allocation3 + $0x100] sm:$0xff] %v14245_v10  ;;  %14310 = vst [vmem:[#allocation3 + $0x108] sm:$0xff] %v14246_v37  ;;  %v14270_v14 = vmax.f32 %v23547_v21, 0.0  ;;  %v14271_v48 = vmax.f32 %v23550_v36, 0.0  ;;  %v14272_v52 = vmax.f32 %v23553_v33, 0.0  ;;  %v14273_v12 = vmax.f32 %v23556_v17, 0.0 }
 0xba8   :  { %14311 = vst [vmem:[#allocation3 + $0x110] sm:$0xff] %v14247_v5  ;;  %14312 = vst [vmem:[#allocation3 + $0x118] sm:$0xff] %v14248_v9  ;;  %v14275_v6 = vmax.f32 %v23559_v7, 0.0  ;;  %v14276_v22 = vmax.f32 %v23562_v8, 0.0 }
 0xba9   :  { %14313 = vst [vmem:[#allocation3 + $0x120] sm:$0xff] %v14249_v47  ;;  %14314 = vst [vmem:[#allocation3 + $0x128] sm:$0xff] %v14250_v1 }
 0xbaa   :  { %14315 = vst [vmem:[#allocation3 + $0x130] sm:$0xff] %v14251_v34  ;;  %14316 = vst [vmem:[#allocation3 + $0x138] sm:$0xff] %v14252_v32 }
 0xbab   :  { %14317 = vst [vmem:[#allocation3 + $0x140] sm:$0xff] %v14253_v49  ;;  %14318 = vst [vmem:[#allocation3 + $0x148] sm:$0xff] %v14254_v54 }
 0xbac   :  { %14319 = vst [vmem:[#allocation3 + $0x150] sm:$0xff] %v14255_v35  ;;  %14320 = vst [vmem:[#allocation3 + $0x158] sm:$0xff] %v14256_v39 }
 0xbad   :  { %14321 = vst [vmem:[#allocation3 + $0x160] sm:$0xff] %v14257_v45  ;;  %14322 = vst [vmem:[#allocation3 + $0x168] sm:$0xff] %v14258_v24 }
 0xbae   :  { %14323 = vst [vmem:[#allocation3 + $0x170] sm:$0xff] %v14259_v3  ;;  %14324 = vst [vmem:[#allocation3 + $0x178] sm:$0xff] %v14260_v26 }
 0xbaf   :  { %14325 = vst [vmem:[#allocation3 + $0x180] sm:$0xff] %v14261_v11  ;;  %14326 = vst [vmem:[#allocation3 + $0x188] sm:$0xff] %v14262_v44 }
 0xbb0   :  { %14327 = vst [vmem:[#allocation3 + $0x190] sm:$0xff] %v14263_v27  ;;  %14328 = vst [vmem:[#allocation3 + $0x198] sm:$0xff] %v14264_v29 }
 0xbb1   :  { %14329 = vst [vmem:[#allocation3 + $0x1a0] sm:$0xff] %v14265_v4  ;;  %14330 = vst [vmem:[#allocation3 + $0x1a8] sm:$0xff] %v14266_v56 }
 0xbb2   :  { %14331 = vst [vmem:[#allocation3 + $0x1b0] sm:$0xff] %v14267_v58  ;;  %14332 = vst [vmem:[#allocation3 + $0x1b8] sm:$0xff] %v14268_v23 }
 0xbb3   :  { %14333 = vst [vmem:[#allocation3 + $0x1c0] sm:$0xff] %v14269_v2  ;;  %14334 = vst [vmem:[#allocation3 + $0x1c8] sm:$0xff] %v14270_v14 }
 0xbb4   :  { %14335 = vst [vmem:[#allocation3 + $0x1d0] sm:$0xff] %v14271_v48  ;;  %14336 = vst [vmem:[#allocation3 + $0x1d8] sm:$0xff] %v14272_v52 }
 0xbb5   :  { %14337 = vst [vmem:[#allocation3 + $0x1e0] sm:$0xff] %v14273_v12  ;;  %14339 = vst [vmem:[#allocation3 + $0x1f0] sm:$0xff] %v14275_v6 }
 0xbb6   :  { %14340 = vst [vmem:[#allocation3 + $0x1f8] sm:$0xff] %v14276_v22 }
 0xbb7   :  { %18224 = shalt.err (!%p18221_p4)
}
 0xbb8   :  { %s18225_s1 = scalar_lea.hbm %s23643_s4, 8192 }
 0xbb9   :  { %p18226_p5 = scmp.ne.s32.totalorder %s23643_s4, %s18225_s1  ;;  %p18229_p6 = scmp.lt.u32.totalorder %s18225_s1, %s23643_s4 }
 0xbbb   :  { %p18231_p7 = pnand %p18229_p6, %p18226_p5 }
 0xbbd   :  { %18234 = shalt.err (!%p18231_p7)
}
 0xbbe   :  { %s18239_s5 = smov 128   ;;  %s18240_s6 = smov 8  }
 0xbbf   :  { %14352 = dma.vmem_to_hbm [thread:$0]  %s14347_s23, 8192, %s23643_s4, [#allocation4], %s18239_s5, %s18239_s5, %s18240_s6  }
 0xbc0   :  { %18235 = dma.done.wait [#allocation4], 8192  }
 0xbc1   :  { %18236 = vsyncadd [#allocation4], 4294959104 }
 0xbc2   :  { %14356 = vsyncpa [#allocation4], 1 }

</bundles_post_ra>
